<compile_context>
chip_gen: v7x
topology: tpu7x:2x2x1
jax: 0.10.0
libtpu: 0.0.40
codegen_flags: <defaults>
</compile_context>

<pallas_src>
import functools

import jax
import jax.numpy as jnp
from jax.experimental import pallas as pl
from jax.experimental.pallas import tpu as pltpu


_TILE_BUDGET = 4 << 20            # target bytes per *input* tile (review: 2-4 MiB)
_VMEM_LIMIT = 48 * 1024 * 1024    # scoped VMEM limit (safe on v5e/v6e/v7x)
_CHUNK_ELEMS = 32 * 1024          # max elements in any single interleave intermediate


def _sublane_align(dtype):
    """Dtype-aware sublane alignment: 8 (f32), 16 (bf16/f16), 32 (int8/fp8)."""
    itemsize = jnp.dtype(dtype).itemsize
    return max(8, 32 // itemsize)


def _largest_divisor_tile(full, align, cap):
    """Largest t <= cap with t % align == 0 and full % t == 0; fallback: full dim."""
    cap = min(int(cap), full)
    start = cap - (cap % align)
    for t in range(start, 0, -align):
        if full % t == 0:
            return t
    return full


# ----------------------------------------------------------------------------
# Fast-path kernel: lane (W) interleave only.  The row (s1) interleave is done
# by the grid / merged output view, not in the kernel.
#   x_ref: (1, s*Cp, th, tw)       o_ref: (1, Cp, th, tw*s)
#   o[c, h, w*s + s2] = x[s2*Cp + c, h, w]
# ----------------------------------------------------------------------------
def _expand_lane_kernel(x_ref, o_ref, *, s, c_out):
    Cp = c_out
    _, _, th, tw = x_ref.shape
    # Channel-chunk the interleave so the stacked (.., tw, s) intermediate stays
    # small (bounded VMEM relayout temporaries); ~<=32 unrolled chunks per tile.
    cc = max(1, min(Cp, _CHUNK_ELEMS // max(1, th * tw * s)))
    c0 = 0
    while c0 < Cp:
        cce = min(cc, Cp - c0)
        groups = [x_ref[0, k * Cp + c0:k * Cp + c0 + cce] for k in range(s)]
        inter = jnp.stack(groups, axis=-1).reshape(cce, th, tw * s)
        # Dense, lane-aligned store (tw*s is a multiple of 128 on this path).
        o_ref[0, c0:c0 + cce] = inter.astype(o_ref.dtype)
        c0 += cce


# ----------------------------------------------------------------------------
# Fallback kernel (tiny W): full (row + lane) interleave in-kernel.
#   x_ref: (1, C, th, tw)          o_ref: (1, Cp, th*s, tw*s)
#   o[c, h*s + s1, w*s + s2] = x[(s1*s + s2)*Cp + c, h, w]
# ----------------------------------------------------------------------------
def _expand_full_kernel(x_ref, o_ref, *, s, c_out):
    Cp = c_out
    _, _, th, tw = x_ref.shape
    cc = max(1, min(Cp, _CHUNK_ELEMS // max(1, th * tw * s * s)))
    c0 = 0
    while c0 < Cp:
        cce = min(cc, Cp - c0)
        cols = []
        for s2 in range(s):
            rows = [
                x_ref[0, (s1 * s + s2) * Cp + c0:(s1 * s + s2) * Cp + c0 + cce]
                for s1 in range(s)
            ]
            # (cce, th, s, tw) -> rows interleaved -> (cce, th*s, tw)
            cols.append(jnp.stack(rows, axis=2).reshape(cce, th * s, tw))
        # (cce, th*s, tw, s) -> columns interleaved -> (cce, th*s, tw*s)
        out = jnp.stack(cols, axis=-1).reshape(cce, th * s, tw * s)
        o_ref[0, c0:c0 + cce] = out.astype(o_ref.dtype)
        c0 += cce


def expand_pallas(x, gain=2):
    """Pallas equivalent of Expand(gain).forward(x).  x is NCHW."""
    N, C, H, W = x.shape
    s = int(gain)
    if s == 1:
        return x
    assert C % (s * s) == 0, "C must be divisible by gain**2"
    Cp = C // (s * s)
    itemsize = jnp.dtype(x.dtype).itemsize
    align = _sublane_align(x.dtype)

    total_bytes = int(N * C * H * W * itemsize)
    cost = pl.CostEstimate(flops=0, transcendentals=0, bytes_accessed=2 * total_bytes)

    # ------------------------- fast path -------------------------
    # Requires lane-dense, 128-aligned output blocks of the merged view:
    # tw*s % 128 == 0 (with tw == W, or tw a 128-multiple divisor of W).
    if (W * s) % 128 == 0:
        Cg = C // s                                # channels handled per grid step
        row_bytes = Cg * W * itemsize              # one H-row of the input block (tw=W)
        if align * row_bytes > _TILE_BUDGET and W % 128 == 0:
            # Very wide rows: thin H slab, split W on 128-lane boundaries.
            th = _largest_divisor_tile(H, align, align)
            tw = _largest_divisor_tile(
                W, 128, max(128, _TILE_BUDGET // max(1, Cg * th * itemsize)))
        else:
            # Keep W whole (maximum lane density); tile H.
            tw = W
            th = _largest_divisor_tile(
                H, align, max(align, _TILE_BUDGET // max(1, row_bytes)))
        nH, nW = H // th, W // tw
        grid = (N, s, nH, nW)                      # s axis => always >= 2 parallel iters

        kernel = functools.partial(_expand_lane_kernel, s=s, c_out=Cp)
        out_m = pl.pallas_call(
            kernel,
            out_shape=jax.ShapeDtypeStruct((N, Cp, H, s * s * W), x.dtype),
            grid_spec=pltpu.PrefetchScalarGridSpec(
                num_scalar_prefetch=0,
                grid=grid,
                in_specs=[
                    pl.BlockSpec((1, Cg, th, tw),
                                 lambda n, s1, i, j: (n, s1, i, j)),
                ],
                out_specs=pl.BlockSpec(
                    (1, Cp, th, tw * s),
                    lambda n, s1, i, j: (n, 0, i, s1 * nW + j)),
            ),
            compiler_params=pltpu.CompilerParams(
                dimension_semantics=("parallel", "parallel", "parallel", "parallel"),
                vmem_limit_bytes=_VMEM_LIMIT,
            ),
            cost_estimate=cost,
        )(x)
        # Contiguity-preserving reshape (free under jit):
        # (N, Cp, H, s*(W*s)) -> (N, Cp, H*s, W*s)
        return out_m.reshape(N, Cp, H * s, W * s)

    # ------------------- fallback (W*s not 128-aligned; tiny widths) -------------------
    row_bytes = C * W * itemsize
    tw = W
    th = _largest_divisor_tile(H, align, max(align, _TILE_BUDGET // max(1, row_bytes)))
    grid = (N, H // th, W // tw)

    kernel = functools.partial(_expand_full_kernel, s=s, c_out=Cp)
    return pl.pallas_call(
        kernel,
        out_shape=jax.ShapeDtypeStruct((N, Cp, H * s, W * s), x.dtype),
        grid_spec=pltpu.PrefetchScalarGridSpec(
            num_scalar_prefetch=0,
            grid=grid,
            in_specs=[pl.BlockSpec((1, C, th, tw), lambda n, i, j: (n, 0, i, j))],
            out_specs=pl.BlockSpec((1, Cp, th * s, tw * s),
                                   lambda n, i, j: (n, 0, i, j)),
        ),
        compiler_params=pltpu.CompilerParams(
            dimension_semantics=("parallel", "parallel", "parallel"),
            vmem_limit_bytes=_VMEM_LIMIT,
        ),
        cost_estimate=cost,
    )(x)


def expand_reference(x, gain=2):
    """Pure-JAX transcription of the PyTorch forward, for verification."""
    N, C, H, W = x.shape
    s = gain
    Cp = C // (s * s)
    y = x.reshape(N, s, s, Cp, H, W)
    y = jnp.transpose(y, (0, 3, 4, 1, 5, 2))
    return y.reshape(N, Cp, H * s, W * s)


if __name__ == "__main__":
    key = jax.random.PRNGKey(0)
    k1, k2, k3 = jax.random.split(key, 3)

    fn = jax.jit(expand_pallas, static_argnames="gain")

    # 1) Fast path (W*gain is a multiple of 128): lane-interleave-only kernel.
    x1 = jax.random.normal(k1, (2, 8, 16, 64), dtype=jnp.float32)
    o1 = jax.block_until_ready(fn(x1, gain=2))
    r1 = expand_reference(x1, gain=2)
    assert o1.shape == (2, 2, 32, 128), o1.shape
    assert bool(jnp.array_equal(o1, r1)), "fast-path (gain=2) mismatch vs reference"

    # 2) Fast path with gain=4.
    x2 = jax.random.normal(k2, (1, 16, 8, 32), dtype=jnp.float32)
    o2 = jax.block_until_ready(fn(x2, gain=4))
    r2 = expand_reference(x2, gain=4)
    assert o2.shape == (1, 1, 32, 128), o2.shape
    assert bool(jnp.array_equal(o2, r2)), "fast-path (gain=4) mismatch vs reference"

    # 3) Fallback path (tiny W: W*gain not a multiple of 128).
    x3 = jax.random.normal(k3, (2, 8, 16, 16), dtype=jnp.float32)
    o3 = jax.block_until_ready(fn(x3, gain=2))
    r3 = expand_reference(x3, gain=2)
    assert o3.shape == (2, 2, 32, 32), o3.shape
    assert bool(jnp.array_equal(o3, r3)), "fallback-path mismatch vs reference"

    print("KERNEL_OK")
</pallas_src>

<mosaic_0001>
module attributes {stable_mosaic.version = 11 : i64} {
  func.func @_expand_lane_kernel(%arg0: i32, %arg1: i32, %arg2: i32, %arg3: i32, %arg4: memref<1x4x16x64xf32, #tpu.memory_space<vmem>>, %arg5: memref<1x2x16x128xf32, #tpu.memory_space<vmem>>) attributes {dimension_semantics = [#tpu.dimension_semantics<parallel>, #tpu.dimension_semantics<parallel>, #tpu.dimension_semantics<parallel>, #tpu.dimension_semantics<parallel>], iteration_bounds = array<i64: 2, 2, 1, 1>, scalar_prefetch = 0 : i64, scratch_operands = 0 : i64, tpu.core_type = #tpu.core_type<tc>, window_params = [{transform_indices = @transform_0, window_bounds = array<i64: 1, 4, 16, 64>}, {transform_indices = @transform_1, window_bounds = array<i64: 1, 2, 16, 128>}]} {
    %c0 = arith.constant 0 : index
    %c0_0 = arith.constant 0 : index
    %c0_1 = arith.constant 0 : index
    %c0_2 = arith.constant 0 : index
    %0 = vector.load %arg4[%c0, %c0_0, %c0_1, %c0_2] : memref<1x4x16x64xf32, #tpu.memory_space<vmem>>, vector<1x2x16x64xf32>
    %1 = vector.shape_cast %0 : vector<1x2x16x64xf32> to vector<2x16x64xf32>
    %c0_3 = arith.constant 0 : index
    %c2 = arith.constant 2 : index
    %c0_4 = arith.constant 0 : index
    %c0_5 = arith.constant 0 : index
    %2 = vector.load %arg4[%c0_3, %c2, %c0_4, %c0_5] : memref<1x4x16x64xf32, #tpu.memory_space<vmem>>, vector<1x2x16x64xf32>
    %3 = vector.shape_cast %2 : vector<1x2x16x64xf32> to vector<2x16x64xf32>
    %4 = vector.shape_cast %1 : vector<2x16x64xf32> to vector<2x16x64x1xf32>
    %5 = vector.shape_cast %3 : vector<2x16x64xf32> to vector<2x16x64x1xf32>
    %6 = tpu.concatenate %4, %5 in 3 : vector<2x16x64x1xf32>, vector<2x16x64x1xf32> -> vector<2x16x64x2xf32>
    %7 = vector.shape_cast %6 : vector<2x16x64x2xf32> to vector<2x16x128xf32>
    %c0_6 = arith.constant 0 : index
    %c0_7 = arith.constant 0 : index
    %c0_8 = arith.constant 0 : index
    %c0_9 = arith.constant 0 : index
    %8 = vector.load %arg5[%c0_6, %c0_7, %c0_8, %c0_9] : memref<1x2x16x128xf32, #tpu.memory_space<vmem>>, vector<1x2x16x128xf32>
    %9 = vector.shape_cast %8 : vector<1x2x16x128xf32> to vector<2x16x128xf32>
    %10 = vector.shape_cast %7 : vector<2x16x128xf32> to vector<1x2x16x128xf32>
    tpu.vector_store %arg5[%c0_6, %c0_7, %c0_8, %c0_9], %10 {strides = array<i32>} : memref<1x2x16x128xf32, #tpu.memory_space<vmem>>, vector<1x2x16x128xf32>,
    return
  }
  func.func @transform_0(%arg0: i32, %arg1: i32, %arg2: i32, %arg3: i32) -> (i32, i32, i32, i32) {
    %c0_i32 = arith.constant 0 : i32
    return %arg0, %arg1, %arg2, %arg3 : i32, i32, i32, i32
  }
  func.func @transform_1(%arg0: i32, %arg1: i32, %arg2: i32, %arg3: i32) -> (i32, i32, i32, i32) {
    %c1_i32 = arith.constant 1 : i32
    %0 = arith.muli %arg1, %c1_i32 : i32
    %1 = arith.addi %0, %arg3 : i32
    %c0_i32 = arith.constant 0 : i32
    %c0_i32_0 = arith.constant 0 : i32
    return %arg0, %c0_i32, %arg2, %1 : i32, i32, i32, i32
  }
}

</mosaic_0001>

<bundles_post_ra>
// kernel: expand_pallas.1
= control target key start
LH: loop header
LB: loop body
LE: loop exit
PB: predicated region body
PF: predicated region fallthrough
CT: control target
= control target key end

     0   :  { %6 = vsyncpa [#allocation3], 0  ;;  %s14762_s0 = inlined_call_operand.hbm [shape: f32[2,8,16,64], index: 0, kind: input, shape index: {}]   ;;  %s14763_s1 = inlined_call_operand.vmem [shape: f32[2,2,16,256], index: 1, kind: output, shape index: {}]  }
   0x1   :  { %8 = vsyncpa [#allocation3 + $0x1], 0  ;;  %s8849_s6 = smov 0   ;;  %s8851_s7 = smov 0  }
   0x2   :  { %s8853_s8 = smov 0   ;;  %s8855_s9 = smov 0  }
   0x3   :  { %s8857_s10 = smov 0   ;;  %s8859_s11 = smov 0  }
   0x4   :  { %s8861_s12 = smov 0   ;;  %s8863_s13 = smov 0  }
   0x5 LB: > { %s8513_s14 = sadd.s32 4294967295, %s8769_s13   ;;  %s36_s15 = sadd.s32 1, %s8761_s11  ;;  %s8769_s13 = sphi %s8863_s13, %s14_s13   ;;  %s8765_s12 = sphi %s8861_s12, %s16113_s12   ;;  %s8761_s11 = sphi %s8859_s11, %s16112_s11   ;;  %s8757_s10 = sphi %s8857_s10, %s16111_s10   ;;  %s8753_s9 = sphi %s8855_s9, %s16110_s9   ;;  %s8749_s8 = sphi %s8853_s8, %s16109_s8   ;;  %s8745_s7 = sphi %s8851_s7, %s16108_s7   ;;  %s8741_s6 = sphi %s8849_s6, %s16107_s6  }
   0x6   : > { %p38_p0 = scmp.ge.s32.totalorder %s36_s15, 2  ;;  %s40_s16 = sadd.s32 1, %s8765_s12 }
   0x7   : > { %s53_s17 = sadd.s32 1, %s8749_s8  ;;  %p60_p1 = scmp.ne.s32.totalorder %s8749_s8, %s8745_s7 }
   0x8   : > { %s16115_s15 = smov (%p38_p0, %s36_s15), 0  ;;  %s16117_s16 = smov (!%p38_p0, %s40_s16), %s8765_s12 }
   0x9   : > { %s45_s18 = ssub.s32 %s8761_s11, %s16115_s15  ;;  %p61_p2 = scmp.eq.s32.totalorder %s8769_s13, 0 }
   0xa   : > { %p42_p3 = scmp.ge.s32.totalorder %s16117_s16, 2  ;;  %p66_p4 = scmp.ne.s32.totalorder %s8745_s7, %s8741_s6 }
   0xb   : > { %p8903_p5 = por %p61_p2, %p60_p1  ;;  %p67_p6 = scmp.eq.s32.totalorder %s8513_s14, 0 }
   0xc   : > { %s16119_s16 = smov (%p42_p3, %s16117_s16), 0  ;;  %p96_p8 = scmp.eq.s32.totalorder %s8513_s14, 3 }
   0xd   : > { %p8909_p7 = por %p67_p6, %p66_p4  ;;  %s44_s21 = ssub.s32 %s8765_s12, %s16119_s16 }
   0xe   : > { %s46_s22 = sor.u32 %s45_s18, %s44_s21  ;;  %p8918_p9 = por %p96_p8, %p60_p1 }
   0xf   : > { %p51_p10 = scmp.eq.s32.totalorder %s46_s22, 0  ;;  %p8541_p11 = scmp.lt.s32.totalorder %s8769_s13, 4 }
  0x10   : > { %s14849_s23 = scalar_select %p8918_p9, 1, 0 }
  0x11   : > { %s122_s24 = sand.u32 1, %s8749_s8   ;;  %s8534_s25 = sshll.u32 %s8761_s11, 3 }
  0x12   : > { %s8926_s26 = scalar_select %p51_p10, %s8749_s8, %s53_s17  }
  0x13   : > { %s8517_s27 = sshll.u32 %s122_s24, 6  ;;  %s8520_s28 = sshll.u32 %s8765_s12, 4 }
  0x14   : > { %s136_s29 = sadd.s32 %s8534_s25, %s8520_s28  ;;  %s126_s30 = scalar_lea.vmem [#allocation2], %s8517_s27 }
  0x15   : > { %s139_s2 = sshll.u32 %s126_s30, 4  ;;  %s8521_s3 = sshll.u32 %s136_s29, 7  ;;  %s8929_s2 = int_to_ptr.vmem [resolvable:$true] %s139_s2 }
  0x16   : > { %s8934_s6 = scalar_lea.hbm %s14762_s0, %s8521_s3  ;;  %p8938_p12 = pnand %p8541_p11, %p8903_p5 }
  0x17   : > { %s8943_s17 = scalar_lea.sflag [#allocation3], %s122_s24  ;;  %s8673_s18 = scalar_lea.hbm %s8934_s6, 1024 }
  0x18   : > { %p8674_p0 = scmp.ne.s32.totalorder %s8934_s6, %s8673_s18  ;;  %p8675_p1 = pneg %p8938_p12 }
  0x19   : > { %s8678_s22 = scalar_lea.hbm %s14762_s0, 4096  ;;  %p8679_p4 = scmp.lt.u32.totalorder %s8934_s6, %s14762_s0 }
  0x1a   : > { %p8676_p2 = pnand %p8675_p1, %p8674_p0  ;;  %p8680_p5 = scmp.lt.u32.totalorder %s8678_s22, %s8673_s18 }
  0x1b   : > { %p8682_p8 = scmp.lt.u32.totalorder %s8673_s18, %s8934_s6 }
  0x1c   : > { %p8677_p3 = pneg %p8676_p2  ;;  %p8681_p6 = por %p8680_p5, %p8679_p4 }
  0x1e   : > { %p8683_p10 = por %p8682_p8, %p8681_p6 }
  0x20   : > { %p8684_p11 = pnand %p8683_p10, %p8677_p3 }
  0x22   : > { %8687 = shalt.err (!%p8684_p11)
}
  0x23   : > { %s8688_s24 = scalar_lea.vmem %s8929_s2, 1024  ;;  %s8771_s28 = smov [#allocation2]  }
  0x24   : > { %p8689_p0 = scmp.ne.s32.totalorder %s8929_s2, %s8688_s24  ;;  %s8693_s29 = sshll.u32 %s8771_s28, 4  ;;  %s8694_s29 = int_to_ptr.vmem [resolvable:$false] %s8693_s29 }
  0x25   : > { %s8695_s30 = scalar_lea.vmem %s8694_s29, 2048  ;;  %p8696_p9 = scmp.lt.s32.totalorder %s8929_s2, %s8694_s29 }
  0x26   : > { %p8691_p2 = pnand %p8689_p0, %p8675_p1  ;;  %p8697_p4 = scmp.lt.s32.totalorder %s8695_s30, %s8688_s24 }
  0x28   : > { %p8692_p13 = pneg %p8691_p2  ;;  %p8698_p5 = por %p8697_p4, %p8696_p9 }
  0x2a   : > { %p8699_p6 = pnand %p8698_p5, %p8692_p13 }
  0x2c   : > { %8702 = shalt.err (!%p8699_p6)
}
  0x2d   : > { %s8772_s3 = smov 128   ;;  %s8773_s4 = smov 8  }
  0x2e   : > { %8540 = dma.hbm_to_vmem [thread:$0]  (!%p8938_p12), %s8934_s6, 1024, %s8929_s2, %s8943_s17, %s8772_s3, %s8772_s3, %s8773_s4  }
  0x2f   : > { %p147_p1 = scmp.lt.s32.totalorder %s8769_s13, 5  ;;  %p14851_p3 = scmp.ge.s32.totalorder %s8769_s13, 1 }
  0x31   : > { %p148_p8 = pnand %p14851_p3, %p147_p1 }
  0x33   : > { %151 = sbr.rel (%p148_p8) target bundleno = 1843 (0x733), region = 24 }
  0x3a   : > { %s8975_s5 = sand.u32 1, %s8745_s7  }
  0x3b   : > { %s8523_s18 = sshll.u32 %s8975_s5, 6  ;;  %s154_s19 = scalar_lea.sflag [#allocation3], %s8975_s5 }
  0x3c   : > { %s8979_s21 = scalar_lea.vmem [#allocation2], %s8523_s18 }
  0x3d   : > { %8736 = dma.done.wait (%p8909_p7), %s154_s19, 1024  }
  0x3e   : > { %8738 = vsyncadd (%p8909_p7), %s154_s19, 4294966272  ;;  %v188_v0 = vlaneseq  ;;  %v8991_v3 = vld [vmem:[%s8979_s21] sm:$0xff]  ;;  %v9039_v23 = vld [vmem:[%s8979_s21 + $0x8] sm:$0xff]  ;;  %vm2428_vm0 = vcmask 7168   ;;  %s8776_s20 = smov 2   ;;  %s8777_s2 = smov 4  }
  0x3f   : > { %s8778_s6 = smov 6   ;;  %s8779_s14 = smov 8   ;;  %vm8045_vm1 = vcmask 15360   ;;  %vm8050_vm2 = vcmask 31744   ;;  %vm8055_vm3 = vcmask 48128   ;;  %vm8060_vm4 = vcmask 64512  }
  0x40   : > { %v8985_v1 = vshrl.u32 %v188_v0, 7  ;;  %s8780_s17 = smov 10   ;;  %s8781_s22 = smov 12   ;;  %vm8065_vm5 = vcmask 80896   ;;  %vm8070_vm6 = vcmask 97280   ;;  %vm8075_vm7 = vcmask 113664  }
  0x41   : > { %s8782_s25 = smov 14   ;;  %s8783_s27 = smov 16   ;;  %vm8080_vm8 = vcmask 130048   ;;  %vm8085_vm9 = vcmask 146432   ;;  %vm14813_vm10 = vcmask 162816   ;;  %vm14814_vm11 = vcmask 179200  }
  0x42   : > { %v8988_v2 = vsub.s32 0, %v8985_v1  ;;  %v8996_v5 = vsub.s32 1, %v8985_v1  ;;  %v9001_v7 = vsub.s32 2, %v8985_v1  ;;  %v9006_v9 = vsub.s32 3, %v8985_v1  ;;  %s8784_s24 = smov 18   ;;  %s8785_s28 = smov 20  }
  0x43   : > { %v9011_v11 = vsub.s32 4, %v8985_v1  ;;  %v9016_v13 = vsub.s32 5, %v8985_v1  ;;  %v9021_v15 = vsub.s32 6, %v8985_v1  ;;  %v9026_v17 = vsub.s32 7, %v8985_v1  ;;  %s8786_s29 = smov 22   ;;  %s8787_s30 = smov 24  }
  0x44   : > { %v191_v4 = vrot.slane %v8991_v3, %v8988_v2  ;;  %v226_v6 = vrot.slane %v8991_v3, %v8996_v5  ;;  %v261_v8 = vrot.slane %v8991_v3, %v9001_v7  ;;  %v296_v10 = vrot.slane %v8991_v3, %v9006_v9  ;;  %s8788_s3 = smov 26   ;;  %s8789_s4 = smov 28  }
  0x45   : > { %v331_v12 = vrot.slane %v8991_v3, %v9011_v11  ;;  %v366_v14 = vrot.slane %v8991_v3, %v9016_v13  ;;  %v401_v16 = vrot.slane %v8991_v3, %v9021_v15  ;;  %v436_v18 = vrot.slane %v8991_v3, %v9026_v17  ;;  %s8790_s18 = smov 30   ;;  %s8791_s19 = smov 32  }
  0x46   : > { %201 = vbcast.lane.b32.xlu1 %v191_v4, 272  ;;  %193 = vbcast.lane.b32.xlu0 %v191_v4, 256  ;;  %v471_v26 = vrot.slane %v9039_v23, %v8988_v2  ;;  %v506_v35 = vrot.slane %v9039_v23, %v8996_v5  ;;  %v541_v44 = vrot.slane %v9039_v23, %v9001_v7  ;;  %vm14816_vm12 = vcmask 195584   ;;  %p16106_p7 = scmp.ne.s32.totalorder %s14849_s23, 0 }
  0x47   : > { %v576_v53 = vrot.slane %v9039_v23, %v9006_v9  ;;  %v611_v62 = vrot.slane %v9039_v23, %v9011_v11  ;;  %vm14815_vm13 = vcmask 211968   ;;  %vm14818_vm14 = vcmask 228352  }
  0x48   : > { %vm14817_vm15 = vcmask 244736  }
  0x4a   : > { %205 = vbcast.lane.b32.xlu1 %v191_v4, 280  ;;  %197 = vbcast.lane.b32.xlu0 %v191_v4, 264 }
  0x4e   : > { %213 = vbcast.lane.b32.xlu1 %v191_v4, 296  ;;  %209 = vbcast.lane.b32.xlu0 %v191_v4, 288 }
  0x52   : > { %221 = vbcast.lane.b32.xlu1 %v191_v4, 312  ;;  %217 = vbcast.lane.b32.xlu0 %v191_v4, 304 }
  0x56   : > { %232 = vbcast.lane.b32.xlu1 %v226_v6, 264  ;;  %228 = vbcast.lane.b32.xlu0 %v226_v6, 256 }
  0x5a   : > { %240 = vbcast.lane.b32.xlu1 %v226_v6, 280  ;;  %236 = vbcast.lane.b32.xlu0 %v226_v6, 272 }
  0x5e   : > { %248 = vbcast.lane.b32.xlu1 %v226_v6, 296  ;;  %244 = vbcast.lane.b32.xlu0 %v226_v6, 288 }
  0x62   : > { %256 = vbcast.lane.b32.xlu1 %v226_v6, 312  ;;  %252 = vbcast.lane.b32.xlu0 %v226_v6, 304 }
  0x66   : > { %267 = vbcast.lane.b32.xlu1 %v261_v8, 264  ;;  %263 = vbcast.lane.b32.xlu0 %v261_v8, 256 }
  0x6a   : > { %275 = vbcast.lane.b32.xlu1 %v261_v8, 280  ;;  %271 = vbcast.lane.b32.xlu0 %v261_v8, 272 }
  0x6e   : > { %283 = vbcast.lane.b32.xlu1 %v261_v8, 296  ;;  %279 = vbcast.lane.b32.xlu0 %v261_v8, 288 }
  0x72   : > { %291 = vbcast.lane.b32.xlu1 %v261_v8, 312  ;;  %287 = vbcast.lane.b32.xlu0 %v261_v8, 304 }
  0x76   : > { %302 = vbcast.lane.b32.xlu1 %v296_v10, 264  ;;  %298 = vbcast.lane.b32.xlu0 %v296_v10, 256 }
  0x7a   : > { %310 = vbcast.lane.b32.xlu1 %v296_v10, 280  ;;  %306 = vbcast.lane.b32.xlu0 %v296_v10, 272 }
  0x7e   : > { %318 = vbcast.lane.b32.xlu1 %v296_v10, 296  ;;  %314 = vbcast.lane.b32.xlu0 %v296_v10, 288 }
  0x82   : > { %326 = vbcast.lane.b32.xlu1 %v296_v10, 312  ;;  %322 = vbcast.lane.b32.xlu0 %v296_v10, 304 }
  0x86   : > { %337 = vbcast.lane.b32.xlu1 %v331_v12, 264  ;;  %333 = vbcast.lane.b32.xlu0 %v331_v12, 256 }
  0x8a   : > { %345 = vbcast.lane.b32.xlu1 %v331_v12, 280  ;;  %341 = vbcast.lane.b32.xlu0 %v331_v12, 272 }
  0x8e   : > { %353 = vbcast.lane.b32.xlu1 %v331_v12, 296  ;;  %349 = vbcast.lane.b32.xlu0 %v331_v12, 288 }
  0x92   : > { %361 = vbcast.lane.b32.xlu1 %v331_v12, 312  ;;  %357 = vbcast.lane.b32.xlu0 %v331_v12, 304 }
  0x96   : > { %372 = vbcast.lane.b32.xlu1 %v366_v14, 264  ;;  %368 = vbcast.lane.b32.xlu0 %v366_v14, 256 }
  0x9a   : > { %380 = vbcast.lane.b32.xlu1 %v366_v14, 280  ;;  %376 = vbcast.lane.b32.xlu0 %v366_v14, 272 }
  0x9e   : > { %388 = vbcast.lane.b32.xlu1 %v366_v14, 296  ;;  %384 = vbcast.lane.b32.xlu0 %v366_v14, 288 }
  0xa2   : > { %396 = vbcast.lane.b32.xlu1 %v366_v14, 312  ;;  %392 = vbcast.lane.b32.xlu0 %v366_v14, 304  ;;  %v646_v14 = vrot.slane %v9039_v23, %v9016_v13 }
  0xa6   : > { %407 = vbcast.lane.b32.xlu1 %v401_v16, 264  ;;  %403 = vbcast.lane.b32.xlu0 %v401_v16, 256 }
  0xaa   : > { %415 = vbcast.lane.b32.xlu1 %v401_v16, 280  ;;  %411 = vbcast.lane.b32.xlu0 %v401_v16, 272 }
  0xae   : > { %423 = vbcast.lane.b32.xlu1 %v401_v16, 296  ;;  %419 = vbcast.lane.b32.xlu0 %v401_v16, 288 }
  0xb2   : > { %431 = vbcast.lane.b32.xlu1 %v401_v16, 312  ;;  %427 = vbcast.lane.b32.xlu0 %v401_v16, 304 }
  0xb6   : > { %442 = vbcast.lane.b32.xlu1 %v436_v18, 264  ;;  %438 = vbcast.lane.b32.xlu0 %v436_v18, 256 }
  0xb8   : > { %v9030_v19 = vpop.permute.xlu1 %201  ;;  %v9032_v20 = vpop.permute.xlu0 %193 }
  0xb9   : > { %14852 = vst [vmem:[#allocation6_spill] sm:$0xff] %v9030_v19 }
  0xba   : > { %450 = vbcast.lane.b32.xlu1 %v436_v18, 280  ;;  %446 = vbcast.lane.b32.xlu0 %v436_v18, 272 }
  0xbc   : > { %v9034_v21 = vpop.permute.xlu1 %205  ;;  %v9036_v22 = vpop.permute.xlu0 %197 }
  0xbd   : > { %14853 = vst [vmem:[#allocation7_spill] sm:$0xff] %v9034_v21  ;;  %14854 = vst [vmem:[#allocation8_spill] sm:$0xff] %v9036_v22 }
  0xbe   : > { %458 = vbcast.lane.b32.xlu1 %v436_v18, 296  ;;  %454 = vbcast.lane.b32.xlu0 %v436_v18, 288 }
  0xc0   : > { %v9041_v24 = vpop.permute.xlu1 %213  ;;  %v9043_v25 = vpop.permute.xlu0 %209 }
  0xc1   : > { %14855 = vst [vmem:[#allocation9_spill] sm:$0xff] %v9041_v24  ;;  %14856 = vst [vmem:[#allocation10_spill] sm:$0xff] %v9043_v25 }
  0xc2   : > { %466 = vbcast.lane.b32.xlu1 %v436_v18, 312  ;;  %462 = vbcast.lane.b32.xlu0 %v436_v18, 304 }
  0xc4   : > { %v9047_v27 = vpop.permute.xlu1 %221  ;;  %v9049_v28 = vpop.permute.xlu0 %217 }
  0xc5   : > { %14857 = vst [vmem:[#allocation11_spill] sm:$0xff] %v9047_v27  ;;  %14858 = vst [vmem:[#allocation12_spill] sm:$0xff] %v9049_v28 }
  0xc6   : > { %477 = vbcast.lane.b32.xlu1 %v471_v26, 264  ;;  %473 = vbcast.lane.b32.xlu0 %v471_v26, 256 }
  0xc8   : > { %v9051_v29 = vpop.permute.xlu1 %232  ;;  %v9053_v30 = vpop.permute.xlu0 %228 }
  0xc9   : > { %14859 = vst [vmem:[#allocation13_spill] sm:$0xff] %v9051_v29 }
  0xca   : > { %485 = vbcast.lane.b32.xlu1 %v471_v26, 280  ;;  %481 = vbcast.lane.b32.xlu0 %v471_v26, 272 }
  0xcc   : > { %v9055_v31 = vpop.permute.xlu1 %240  ;;  %v9057_v32 = vpop.permute.xlu0 %236 }
  0xcd   : > { %14860 = vst [vmem:[#allocation14_spill] sm:$0xff] %v9055_v31  ;;  %14861 = vst [vmem:[#allocation15_spill] sm:$0xff] %v9057_v32 }
  0xce   : > { %493 = vbcast.lane.b32.xlu1 %v471_v26, 296  ;;  %489 = vbcast.lane.b32.xlu0 %v471_v26, 288 }
  0xd0   : > { %v9059_v33 = vpop.permute.xlu1 %248  ;;  %v9061_v34 = vpop.permute.xlu0 %244 }
  0xd1   : > { %14862 = vst [vmem:[#allocation16_spill] sm:$0xff] %v9059_v33  ;;  %14863 = vst [vmem:[#allocation17_spill] sm:$0xff] %v9061_v34 }
  0xd2   : > { %501 = vbcast.lane.b32.xlu1 %v471_v26, 312  ;;  %497 = vbcast.lane.b32.xlu0 %v471_v26, 304 }
  0xd4   : > { %v9065_v36 = vpop.permute.xlu1 %256  ;;  %v9067_v37 = vpop.permute.xlu0 %252 }
  0xd5   : > { %14864 = vst [vmem:[#allocation18_spill] sm:$0xff] %v9065_v36  ;;  %14865 = vst [vmem:[#allocation19_spill] sm:$0xff] %v9067_v37 }
  0xd6   : > { %512 = vbcast.lane.b32.xlu1 %v506_v35, 264  ;;  %508 = vbcast.lane.b32.xlu0 %v506_v35, 256 }
  0xd8   : > { %v9069_v38 = vpop.permute.xlu1 %267  ;;  %v9071_v39 = vpop.permute.xlu0 %263 }
  0xda   : > { %520 = vbcast.lane.b32.xlu1 %v506_v35, 280  ;;  %516 = vbcast.lane.b32.xlu0 %v506_v35, 272 }
  0xdc   : > { %v9073_v40 = vpop.permute.xlu1 %275  ;;  %v9075_v41 = vpop.permute.xlu0 %271 }
  0xdd   : > { %14866 = vst [vmem:[#allocation20_spill] sm:$0xff] %v9073_v40  ;;  %14867 = vst [vmem:[#allocation21_spill] sm:$0xff] %v9075_v41 }
  0xde   : > { %528 = vbcast.lane.b32.xlu1 %v506_v35, 296  ;;  %524 = vbcast.lane.b32.xlu0 %v506_v35, 288 }
  0xe0   : > { %v9077_v42 = vpop.permute.xlu1 %283  ;;  %v9079_v43 = vpop.permute.xlu0 %279 }
  0xe1   : > { %14868 = vst [vmem:[#allocation22_spill] sm:$0xff] %v9077_v42  ;;  %14869 = vst [vmem:[#allocation23_spill] sm:$0xff] %v9079_v43 }
  0xe2   : > { %536 = vbcast.lane.b32.xlu1 %v506_v35, 312  ;;  %532 = vbcast.lane.b32.xlu0 %v506_v35, 304 }
  0xe4   : > { %v9083_v45 = vpop.permute.xlu1 %291  ;;  %v9085_v46 = vpop.permute.xlu0 %287 }
  0xe5   : > { %14870 = vst [vmem:[#allocation24_spill] sm:$0xff] %v9083_v45  ;;  %14871 = vst [vmem:[#allocation25_spill] sm:$0xff] %v9085_v46 }
  0xe6   : > { %547 = vbcast.lane.b32.xlu1 %v541_v44, 264  ;;  %543 = vbcast.lane.b32.xlu0 %v541_v44, 256 }
  0xe8   : > { %v9087_v47 = vpop.permute.xlu1 %302  ;;  %v9089_v48 = vpop.permute.xlu0 %298 }
  0xea   : > { %555 = vbcast.lane.b32.xlu1 %v541_v44, 280  ;;  %551 = vbcast.lane.b32.xlu0 %v541_v44, 272 }
  0xec   : > { %v9091_v49 = vpop.permute.xlu1 %310  ;;  %v9093_v50 = vpop.permute.xlu0 %306 }
  0xed   : > { %14872 = vst [vmem:[#allocation26_spill] sm:$0xff] %v9091_v49  ;;  %14873 = vst [vmem:[#allocation27_spill] sm:$0xff] %v9093_v50 }
  0xee   : > { %563 = vbcast.lane.b32.xlu1 %v541_v44, 296  ;;  %559 = vbcast.lane.b32.xlu0 %v541_v44, 288 }
  0xf0   : > { %v9095_v51 = vpop.permute.xlu1 %318  ;;  %v9097_v52 = vpop.permute.xlu0 %314 }
  0xf1   : > { %14874 = vst [vmem:[#allocation28_spill] sm:$0xff] %v9095_v51  ;;  %14875 = vst [vmem:[#allocation29_spill] sm:$0xff] %v9097_v52 }
  0xf2   : > { %571 = vbcast.lane.b32.xlu1 %v541_v44, 312  ;;  %567 = vbcast.lane.b32.xlu0 %v541_v44, 304 }
  0xf4   : > { %v9101_v54 = vpop.permute.xlu1 %326  ;;  %v9103_v55 = vpop.permute.xlu0 %322 }
  0xf5   : > { %14876 = vst [vmem:[#allocation30_spill] sm:$0xff] %v9101_v54  ;;  %14877 = vst [vmem:[#allocation31_spill] sm:$0xff] %v9103_v55 }
  0xf6   : > { %582 = vbcast.lane.b32.xlu1 %v576_v53, 264  ;;  %578 = vbcast.lane.b32.xlu0 %v576_v53, 256 }
  0xf8   : > { %v9105_v56 = vpop.permute.xlu1 %337  ;;  %v9107_v57 = vpop.permute.xlu0 %333 }
  0xf9   : > { %14878 = vst [vmem:[#allocation32_spill] sm:$0xff] %v9105_v56 }
  0xfa   : > { %590 = vbcast.lane.b32.xlu1 %v576_v53, 280  ;;  %586 = vbcast.lane.b32.xlu0 %v576_v53, 272 }
  0xfc   : > { %v9109_v58 = vpop.permute.xlu1 %345  ;;  %v9111_v59 = vpop.permute.xlu0 %341 }
  0xfd   : > { %14879 = vst [vmem:[#allocation33_spill] sm:$0xff] %v9109_v58  ;;  %14880 = vst [vmem:[#allocation34_spill] sm:$0xff] %v9111_v59 }
  0xfe   : > { %598 = vbcast.lane.b32.xlu1 %v576_v53, 296  ;;  %594 = vbcast.lane.b32.xlu0 %v576_v53, 288 }
 0x100   : > { %v9113_v60 = vpop.permute.xlu1 %353  ;;  %v9115_v61 = vpop.permute.xlu0 %349 }
 0x101   : > { %14881 = vst [vmem:[#allocation35_spill] sm:$0xff] %v9113_v60  ;;  %14882 = vst [vmem:[#allocation36_spill] sm:$0xff] %v9115_v61 }
 0x102   : > { %606 = vbcast.lane.b32.xlu1 %v576_v53, 312  ;;  %602 = vbcast.lane.b32.xlu0 %v576_v53, 304 }
 0x104   : > { %v9119_v63 = vpop.permute.xlu1 %361  ;;  %v9121_v0 = vpop.permute.xlu0 %357 }
 0x105   : > { %14883 = vst [vmem:[#allocation37_spill] sm:$0xff] %v9119_v63  ;;  %14884 = vst [vmem:[#allocation38_spill] sm:$0xff] %v9121_v0 }
 0x106   : > { %617 = vbcast.lane.b32.xlu1 %v611_v62, 264  ;;  %613 = vbcast.lane.b32.xlu0 %v611_v62, 256 }
 0x108   : > { %v9123_v3 = vpop.permute.xlu1 %372  ;;  %v9125_v4 = vpop.permute.xlu0 %368 }
 0x10a   : > { %625 = vbcast.lane.b32.xlu1 %v611_v62, 280  ;;  %621 = vbcast.lane.b32.xlu0 %v611_v62, 272 }
 0x10c   : > { %v9127_v6 = vpop.permute.xlu1 %380  ;;  %v9129_v8 = vpop.permute.xlu0 %376 }
 0x10d   : > { %14885 = vst [vmem:[#allocation39_spill] sm:$0xff] %v9127_v6  ;;  %14886 = vst [vmem:[#allocation40_spill] sm:$0xff] %v9129_v8 }
 0x10e   : > { %633 = vbcast.lane.b32.xlu1 %v611_v62, 296  ;;  %629 = vbcast.lane.b32.xlu0 %v611_v62, 288 }
 0x110   : > { %v9131_v10 = vpop.permute.xlu1 %388  ;;  %v9133_v12 = vpop.permute.xlu0 %384 }
 0x111   : > { %14887 = vst [vmem:[#allocation41_spill] sm:$0xff] %v9131_v10  ;;  %14888 = vst [vmem:[#allocation42_spill] sm:$0xff] %v9133_v12 }
 0x112   : > { %641 = vbcast.lane.b32.xlu1 %v611_v62, 312  ;;  %637 = vbcast.lane.b32.xlu0 %v611_v62, 304 }
 0x114   : > { %v9137_v16 = vpop.permute.xlu1 %396  ;;  %v9139_v18 = vpop.permute.xlu0 %392 }
 0x115   : > { %14889 = vst [vmem:[#allocation43_spill] sm:$0xff] %v9137_v16  ;;  %14890 = vst [vmem:[#allocation44_spill] sm:$0xff] %v9139_v18  ;;  %v681_v18 = vrot.slane %v9039_v23, %v9021_v15 }
 0x116   : > { %652 = vbcast.lane.b32.xlu1 %v646_v14, 264  ;;  %648 = vbcast.lane.b32.xlu0 %v646_v14, 256 }
 0x118   : > { %v9141_v26 = vpop.permute.xlu1 %407  ;;  %v9143_v35 = vpop.permute.xlu0 %403 }
 0x11a   : > { %660 = vbcast.lane.b32.xlu1 %v646_v14, 280  ;;  %656 = vbcast.lane.b32.xlu0 %v646_v14, 272 }
 0x11c   : > { %v9145_v44 = vpop.permute.xlu1 %415  ;;  %v9147_v53 = vpop.permute.xlu0 %411 }
 0x11d   : > { %14891 = vst [vmem:[#allocation45_spill] sm:$0xff] %v9145_v44  ;;  %14892 = vst [vmem:[#allocation46_spill] sm:$0xff] %v9147_v53 }
 0x11e   : > { %668 = vbcast.lane.b32.xlu1 %v646_v14, 296  ;;  %664 = vbcast.lane.b32.xlu0 %v646_v14, 288 }
 0x120   : > { %v9149_v62 = vpop.permute.xlu1 %423  ;;  %v9151_v0 = vpop.permute.xlu0 %419 }
 0x121   : > { %14893 = vst [vmem:[#allocation47_spill] sm:$0xff] %v9149_v62  ;;  %14894 = vst [vmem:[#allocation48_spill] sm:$0xff] %v9151_v0 }
 0x122   : > { %676 = vbcast.lane.b32.xlu1 %v646_v14, 312  ;;  %672 = vbcast.lane.b32.xlu0 %v646_v14, 304 }
 0x124   : > { %v9155_v16 = vpop.permute.xlu1 %431  ;;  %v9157_v63 = vpop.permute.xlu0 %427 }
 0x125   : > { %14895 = vst [vmem:[#allocation49_spill] sm:$0xff] %v9155_v16  ;;  %14896 = vst [vmem:[#allocation50_spill] sm:$0xff] %v9157_v63  ;;  %v716_v63 = vrot.slane %v9039_v23, %v9026_v17 }
 0x126   : > { %687 = vbcast.lane.b32.xlu1 %v681_v18, 264  ;;  %683 = vbcast.lane.b32.xlu0 %v681_v18, 256 }
 0x128   : > { %v9159_v54 = vpop.permute.xlu1 %442  ;;  %v9161_v55 = vpop.permute.xlu0 %438 }
 0x12a   : > { %695 = vbcast.lane.b32.xlu1 %v681_v18, 280  ;;  %691 = vbcast.lane.b32.xlu0 %v681_v18, 272 }
 0x12c   : > { %v9163_v37 = vpop.permute.xlu1 %450  ;;  %v9165_v36 = vpop.permute.xlu0 %446 }
 0x12d   : > { %14897 = vst [vmem:[#allocation51_spill] sm:$0xff] %v9163_v37  ;;  %14898 = vst [vmem:[#allocation52_spill] sm:$0xff] %v9165_v36 }
 0x12e   : > { %703 = vbcast.lane.b32.xlu1 %v681_v18, 296  ;;  %699 = vbcast.lane.b32.xlu0 %v681_v18, 288 }
 0x130   : > { %v9167_v14 = vpop.permute.xlu1 %458  ;;  %v9169_v45 = vpop.permute.xlu0 %454 }
 0x131   : > { %14899 = vst [vmem:[#allocation53_spill] sm:$0xff] %v9167_v14  ;;  %14900 = vst [vmem:[#allocation54_spill] sm:$0xff] %v9169_v45 }
 0x132   : > { %711 = vbcast.lane.b32.xlu1 %v681_v18, 312  ;;  %707 = vbcast.lane.b32.xlu0 %v681_v18, 304  ;;  %v9186_v18 = vld [vmem:[%s8979_s21 + $0x10] sm:$0xff] }
 0x134   : > { %v9173_v16 = vpop.permute.xlu1 %466  ;;  %v9175_v28 = vpop.permute.xlu0 %462 }
 0x135   : > { %14901 = vst [vmem:[#allocation55_spill] sm:$0xff] %v9173_v16  ;;  %14902 = vst [vmem:[#allocation56_spill] sm:$0xff] %v9175_v28  ;;  %v751_v28 = vrot.slane %v9186_v18, %v8988_v2 }
 0x136   : > { %722 = vbcast.lane.b32.xlu1 %v716_v63, 264  ;;  %718 = vbcast.lane.b32.xlu0 %v716_v63, 256 }
 0x138   : > { %v9177_v27 = vpop.permute.xlu1 %477  ;;  %v9179_v46 = vpop.permute.xlu0 %473 }
 0x139   : > { %14903 = vst [vmem:[#allocation57_spill] sm:$0xff] %v9177_v27 }
 0x13a   : > { %730 = vbcast.lane.b32.xlu1 %v716_v63, 280  ;;  %726 = vbcast.lane.b32.xlu0 %v716_v63, 272 }
 0x13c   : > { %v9181_v24 = vpop.permute.xlu1 %485  ;;  %v9183_v60 = vpop.permute.xlu0 %481 }
 0x13d   : > { %14904 = vst [vmem:[#allocation58_spill] sm:$0xff] %v9181_v24  ;;  %14905 = vst [vmem:[#allocation59_spill] sm:$0xff] %v9183_v60 }
 0x13e   : > { %738 = vbcast.lane.b32.xlu1 %v716_v63, 296  ;;  %734 = vbcast.lane.b32.xlu0 %v716_v63, 288 }
 0x140   : > { %v9188_v23 = vpop.permute.xlu1 %493  ;;  %v9190_v16 = vpop.permute.xlu0 %489 }
 0x141   : > { %14906 = vst [vmem:[#allocation60_spill] sm:$0xff] %v9188_v23  ;;  %14907 = vst [vmem:[#allocation61_spill] sm:$0xff] %v9190_v16 }
 0x142   : > { %746 = vbcast.lane.b32.xlu1 %v716_v63, 312  ;;  %742 = vbcast.lane.b32.xlu0 %v716_v63, 304 }
 0x144   : > { %v9194_v42 = vpop.permute.xlu1 %501  ;;  %v9196_v62 = vpop.permute.xlu0 %497 }
 0x145   : > { %14908 = vst [vmem:[#allocation62_spill] sm:$0xff] %v9194_v42  ;;  %14909 = vst [vmem:[#allocation63_spill] sm:$0xff] %v9196_v62  ;;  %v786_v42 = vrot.slane %v9186_v18, %v8996_v5 }
 0x146   : > { %757 = vbcast.lane.b32.xlu1 %v751_v28, 264  ;;  %753 = vbcast.lane.b32.xlu0 %v751_v28, 256 }
 0x148   : > { %v9198_v10 = vpop.permute.xlu1 %512  ;;  %v9200_v14 = vpop.permute.xlu0 %508 }
 0x149   : > { %14910 = vst [vmem:[#allocation64_spill] sm:$0xff] %v9198_v10 }
 0x14a   : > { %765 = vbcast.lane.b32.xlu1 %v751_v28, 280  ;;  %761 = vbcast.lane.b32.xlu0 %v751_v28, 272 }
 0x14c   : > { %v9202_v23 = vpop.permute.xlu1 %520  ;;  %v9204_v16 = vpop.permute.xlu0 %516 }
 0x14d   : > { %14911 = vst [vmem:[#allocation65_spill] sm:$0xff] %v9202_v23  ;;  %14912 = vst [vmem:[#allocation66_spill] sm:$0xff] %v9204_v16 }
 0x14e   : > { %773 = vbcast.lane.b32.xlu1 %v751_v28, 296  ;;  %769 = vbcast.lane.b32.xlu0 %v751_v28, 288 }
 0x150   : > { %v9206_v63 = vpop.permute.xlu1 %528  ;;  %v9208_v51 = vpop.permute.xlu0 %524 }
 0x151   : > { %14913 = vst [vmem:[#allocation67_spill] sm:$0xff] %v9206_v63  ;;  %14914 = vst [vmem:[#allocation68_spill] sm:$0xff] %v9208_v51 }
 0x152   : > { %781 = vbcast.lane.b32.xlu1 %v751_v28, 312  ;;  %777 = vbcast.lane.b32.xlu0 %v751_v28, 304 }
 0x154   : > { %v9212_v62 = vpop.permute.xlu1 %536  ;;  %v9214_v33 = vpop.permute.xlu0 %532 }
 0x155   : > { %14915 = vst [vmem:[#allocation69_spill] sm:$0xff] %v9212_v62  ;;  %14916 = vst [vmem:[#allocation70_spill] sm:$0xff] %v9214_v33  ;;  %v821_v62 = vrot.slane %v9186_v18, %v9001_v7 }
 0x156   : > { %792 = vbcast.lane.b32.xlu1 %v786_v42, 264  ;;  %788 = vbcast.lane.b32.xlu0 %v786_v42, 256 }
 0x158   : > { %v9216_v24 = vpop.permute.xlu1 %547  ;;  %v9218_v23 = vpop.permute.xlu0 %543 }
 0x159   : > { %14917 = vst [vmem:[#allocation71_spill] sm:$0xff] %v9216_v24 }
 0x15a   : > { %800 = vbcast.lane.b32.xlu1 %v786_v42, 280  ;;  %796 = vbcast.lane.b32.xlu0 %v786_v42, 272 }
 0x15c   : > { %v9220_v63 = vpop.permute.xlu1 %555  ;;  %v9222_v51 = vpop.permute.xlu0 %551 }
 0x15d   : > { %14918 = vst [vmem:[#allocation72_spill] sm:$0xff] %v9220_v63  ;;  %14919 = vst [vmem:[#allocation73_spill] sm:$0xff] %v9222_v51 }
 0x15e   : > { %808 = vbcast.lane.b32.xlu1 %v786_v42, 296  ;;  %804 = vbcast.lane.b32.xlu0 %v786_v42, 288 }
 0x160   : > { %v9224_v28 = vpop.permute.xlu1 %563  ;;  %v9226_v25 = vpop.permute.xlu0 %559 }
 0x161   : > { %14920 = vst [vmem:[#allocation74_spill] sm:$0xff] %v9224_v28  ;;  %14921 = vst [vmem:[#allocation75_spill] sm:$0xff] %v9226_v25 }
 0x162   : > { %816 = vbcast.lane.b32.xlu1 %v786_v42, 312  ;;  %812 = vbcast.lane.b32.xlu0 %v786_v42, 304 }
 0x164   : > { %v9230_v33 = vpop.permute.xlu1 %571  ;;  %v9232_v61 = vpop.permute.xlu0 %567 }
 0x165   : > { %14922 = vst [vmem:[#allocation76_spill] sm:$0xff] %v9230_v33  ;;  %14923 = vst [vmem:[#allocation77_spill] sm:$0xff] %v9232_v61  ;;  %v856_v33 = vrot.slane %v9186_v18, %v9006_v9 }
 0x166   : > { %827 = vbcast.lane.b32.xlu1 %v821_v62, 264  ;;  %823 = vbcast.lane.b32.xlu0 %v821_v62, 256 }
 0x168   : > { %v9234_v63 = vpop.permute.xlu1 %582  ;;  %v9236_v43 = vpop.permute.xlu0 %578 }
 0x169   : > { %14924 = vst [vmem:[#allocation78_spill] sm:$0xff] %v9234_v63 }
 0x16a   : > { %835 = vbcast.lane.b32.xlu1 %v821_v62, 280  ;;  %831 = vbcast.lane.b32.xlu0 %v821_v62, 272 }
 0x16c   : > { %v9238_v28 = vpop.permute.xlu1 %590  ;;  %v9240_v25 = vpop.permute.xlu0 %586 }
 0x16d   : > { %14925 = vst [vmem:[#allocation79_spill] sm:$0xff] %v9238_v28  ;;  %14926 = vst [vmem:[#allocation80_spill] sm:$0xff] %v9240_v25 }
 0x16e   : > { %843 = vbcast.lane.b32.xlu1 %v821_v62, 296  ;;  %839 = vbcast.lane.b32.xlu0 %v821_v62, 288 }
 0x170   : > { %v9242_v42 = vpop.permute.xlu1 %598  ;;  %v9244_v0 = vpop.permute.xlu0 %594 }
 0x171   : > { %14927 = vst [vmem:[#allocation81_spill] sm:$0xff] %v9242_v42  ;;  %14928 = vst [vmem:[#allocation82_spill] sm:$0xff] %v9244_v0 }
 0x172   : > { %851 = vbcast.lane.b32.xlu1 %v821_v62, 312  ;;  %847 = vbcast.lane.b32.xlu0 %v821_v62, 304 }
 0x174   : > { %v9248_v61 = vpop.permute.xlu1 %606  ;;  %v9250_v12 = vpop.permute.xlu0 %602 }
 0x175   : > { %14929 = vst [vmem:[#allocation83_spill] sm:$0xff] %v9248_v61  ;;  %14930 = vst [vmem:[#allocation84_spill] sm:$0xff] %v9250_v12  ;;  %v891_v61 = vrot.slane %v9186_v18, %v9011_v11 }
 0x176   : > { %862 = vbcast.lane.b32.xlu1 %v856_v33, 264  ;;  %858 = vbcast.lane.b32.xlu0 %v856_v33, 256 }
 0x178   : > { %v9252_v28 = vpop.permute.xlu1 %617  ;;  %v9254_v45 = vpop.permute.xlu0 %613 }
 0x179   : > { %14931 = vst [vmem:[#allocation85_spill] sm:$0xff] %v9252_v28 }
 0x17a   : > { %870 = vbcast.lane.b32.xlu1 %v856_v33, 280  ;;  %866 = vbcast.lane.b32.xlu0 %v856_v33, 272 }
 0x17c   : > { %v9256_v42 = vpop.permute.xlu1 %625  ;;  %v9258_v0 = vpop.permute.xlu0 %621 }
 0x17d   : > { %14932 = vst [vmem:[#allocation86_spill] sm:$0xff] %v9256_v42  ;;  %14933 = vst [vmem:[#allocation87_spill] sm:$0xff] %v9258_v0 }
 0x17e   : > { %878 = vbcast.lane.b32.xlu1 %v856_v33, 296  ;;  %874 = vbcast.lane.b32.xlu0 %v856_v33, 288 }
 0x180   : > { %v9260_v62 = vpop.permute.xlu1 %633  ;;  %v9262_v52 = vpop.permute.xlu0 %629 }
 0x181   : > { %14934 = vst [vmem:[#allocation88_spill] sm:$0xff] %v9260_v62  ;;  %14935 = vst [vmem:[#allocation89_spill] sm:$0xff] %v9262_v52 }
 0x182   : > { %886 = vbcast.lane.b32.xlu1 %v856_v33, 312  ;;  %882 = vbcast.lane.b32.xlu0 %v856_v33, 304 }
 0x184   : > { %v9266_v12 = vpop.permute.xlu1 %641  ;;  %v9268_v34 = vpop.permute.xlu0 %637 }
 0x185   : > { %14936 = vst [vmem:[#allocation90_spill] sm:$0xff] %v9266_v12  ;;  %14937 = vst [vmem:[#allocation91_spill] sm:$0xff] %v9268_v34  ;;  %v926_v12 = vrot.slane %v9186_v18, %v9016_v13 }
 0x186   : > { %897 = vbcast.lane.b32.xlu1 %v891_v61, 264  ;;  %893 = vbcast.lane.b32.xlu0 %v891_v61, 256 }
 0x188   : > { %v9270_v42 = vpop.permute.xlu1 %652  ;;  %v9272_v60 = vpop.permute.xlu0 %648 }
 0x189   : > { %14938 = vst [vmem:[#allocation92_spill] sm:$0xff] %v9270_v42 }
 0x18a   : > { %905 = vbcast.lane.b32.xlu1 %v891_v61, 280  ;;  %901 = vbcast.lane.b32.xlu0 %v891_v61, 272 }
 0x18c   : > { %v9274_v62 = vpop.permute.xlu1 %660  ;;  %v9276_v52 = vpop.permute.xlu0 %656 }
 0x18d   : > { %14939 = vst [vmem:[#allocation93_spill] sm:$0xff] %v9274_v62  ;;  %14940 = vst [vmem:[#allocation94_spill] sm:$0xff] %v9276_v52 }
 0x18e   : > { %913 = vbcast.lane.b32.xlu1 %v891_v61, 296  ;;  %909 = vbcast.lane.b32.xlu0 %v891_v61, 288 }
 0x190   : > { %v9278_v33 = vpop.permute.xlu1 %668  ;;  %v9280_v0 = vpop.permute.xlu0 %664 }
 0x191   : > { %14941 = vst [vmem:[#allocation95_spill] sm:$0xff] %v9278_v33  ;;  %14942 = vst [vmem:[#allocation96_spill] sm:$0xff] %v9280_v0 }
 0x192   : > { %921 = vbcast.lane.b32.xlu1 %v891_v61, 312  ;;  %917 = vbcast.lane.b32.xlu0 %v891_v61, 304 }
 0x194   : > { %v9284_v34 = vpop.permute.xlu1 %676  ;;  %v9286_v51 = vpop.permute.xlu0 %672 }
 0x195   : > { %14943 = vst [vmem:[#allocation97_spill] sm:$0xff] %v9284_v34  ;;  %14944 = vst [vmem:[#allocation98_spill] sm:$0xff] %v9286_v51  ;;  %v961_v34 = vrot.slane %v9186_v18, %v9021_v15 }
 0x196   : > { %932 = vbcast.lane.b32.xlu1 %v926_v12, 264  ;;  %928 = vbcast.lane.b32.xlu0 %v926_v12, 256 }
 0x198   : > { %v9288_v62 = vpop.permute.xlu1 %687  ;;  %v9290_v52 = vpop.permute.xlu0 %683 }
 0x199   : > { %14945 = vst [vmem:[#allocation99_spill] sm:$0xff] %v9288_v62 }
 0x19a   : > { %940 = vbcast.lane.b32.xlu1 %v926_v12, 280  ;;  %936 = vbcast.lane.b32.xlu0 %v926_v12, 272 }
 0x19c   : > { %v9292_v33 = vpop.permute.xlu1 %695  ;;  %v9294_v0 = vpop.permute.xlu0 %691 }
 0x19d   : > { %14946 = vst [vmem:[#allocation100_spill] sm:$0xff] %v9292_v33  ;;  %14947 = vst [vmem:[#allocation101_spill] sm:$0xff] %v9294_v0 }
 0x19e   : > { %948 = vbcast.lane.b32.xlu1 %v926_v12, 296  ;;  %944 = vbcast.lane.b32.xlu0 %v926_v12, 288 }
 0x1a0   : > { %v9296_v61 = vpop.permute.xlu1 %703  ;;  %v9298_v16 = vpop.permute.xlu0 %699 }
 0x1a1   : > { %14948 = vst [vmem:[#allocation102_spill] sm:$0xff] %v9296_v61  ;;  %14949 = vst [vmem:[#allocation103_spill] sm:$0xff] %v9298_v16 }
 0x1a2   : > { %956 = vbcast.lane.b32.xlu1 %v926_v12, 312  ;;  %952 = vbcast.lane.b32.xlu0 %v926_v12, 304 }
 0x1a4   : > { %v9302_v51 = vpop.permute.xlu1 %711  ;;  %v9304_v25 = vpop.permute.xlu0 %707 }
 0x1a5   : > { %14950 = vst [vmem:[#allocation104_spill] sm:$0xff] %v9302_v51  ;;  %14951 = vst [vmem:[#allocation105_spill] sm:$0xff] %v9304_v25  ;;  %v996_v51 = vrot.slane %v9186_v18, %v9026_v17 }
 0x1a6   : > { %967 = vbcast.lane.b32.xlu1 %v961_v34, 264  ;;  %963 = vbcast.lane.b32.xlu0 %v961_v34, 256 }
 0x1a8   : > { %v9306_v33 = vpop.permute.xlu1 %722  ;;  %v9308_v0 = vpop.permute.xlu0 %718 }
 0x1a9   : > { %14952 = vst [vmem:[#allocation106_spill] sm:$0xff] %v9306_v33 }
 0x1aa   : > { %975 = vbcast.lane.b32.xlu1 %v961_v34, 280  ;;  %971 = vbcast.lane.b32.xlu0 %v961_v34, 272 }
 0x1ac   : > { %v9310_v61 = vpop.permute.xlu1 %730  ;;  %v9312_v16 = vpop.permute.xlu0 %726 }
 0x1ad   : > { %14953 = vst [vmem:[#allocation107_spill] sm:$0xff] %v9310_v61  ;;  %14954 = vst [vmem:[#allocation108_spill] sm:$0xff] %v9312_v16 }
 0x1ae   : > { %983 = vbcast.lane.b32.xlu1 %v961_v34, 296  ;;  %979 = vbcast.lane.b32.xlu0 %v961_v34, 288 }
 0x1b0   : > { %v9314_v12 = vpop.permute.xlu1 %738  ;;  %v9316_v21 = vpop.permute.xlu0 %734 }
 0x1b1   : > { %14955 = vst [vmem:[#allocation109_spill] sm:$0xff] %v9314_v12  ;;  %14956 = vst [vmem:[#allocation110_spill] sm:$0xff] %v9316_v21 }
 0x1b2   : > { %991 = vbcast.lane.b32.xlu1 %v961_v34, 312  ;;  %987 = vbcast.lane.b32.xlu0 %v961_v34, 304  ;;  %v9333_v34 = vld [vmem:[%s8979_s21 + $0x18] sm:$0xff] }
 0x1b4   : > { %v9320_v25 = vpop.permute.xlu1 %746  ;;  %v9322_v58 = vpop.permute.xlu0 %742 }
 0x1b5   : > { %14957 = vst [vmem:[#allocation111_spill] sm:$0xff] %v9320_v25  ;;  %14958 = vst [vmem:[#allocation112_spill] sm:$0xff] %v9322_v58  ;;  %v1031_v58 = vrot.slane %v9333_v34, %v8988_v2 }
 0x1b6   : > { %1002 = vbcast.lane.b32.xlu1 %v996_v51, 264  ;;  %998 = vbcast.lane.b32.xlu0 %v996_v51, 256 }
 0x1b8   : > { %v9324_v61 = vpop.permute.xlu1 %757  ;;  %v9326_v16 = vpop.permute.xlu0 %753 }
 0x1b9   : > { %14959 = vst [vmem:[#allocation113_spill] sm:$0xff] %v9324_v61 }
 0x1ba   : > { %1010 = vbcast.lane.b32.xlu1 %v996_v51, 280  ;;  %1006 = vbcast.lane.b32.xlu0 %v996_v51, 272 }
 0x1bc   : > { %v9328_v12 = vpop.permute.xlu1 %765  ;;  %v9330_v21 = vpop.permute.xlu0 %761 }
 0x1bd   : > { %14960 = vst [vmem:[#allocation114_spill] sm:$0xff] %v9328_v12  ;;  %14961 = vst [vmem:[#allocation115_spill] sm:$0xff] %v9330_v21 }
 0x1be   : > { %1018 = vbcast.lane.b32.xlu1 %v996_v51, 296  ;;  %1014 = vbcast.lane.b32.xlu0 %v996_v51, 288 }
 0x1c0   : > { %v9335_v18 = vpop.permute.xlu1 %773  ;;  %v9337_v25 = vpop.permute.xlu0 %769 }
 0x1c1   : > { %14962 = vst [vmem:[#allocation116_spill] sm:$0xff] %v9335_v18  ;;  %14963 = vst [vmem:[#allocation117_spill] sm:$0xff] %v9337_v25 }
 0x1c2   : > { %1026 = vbcast.lane.b32.xlu1 %v996_v51, 312  ;;  %1022 = vbcast.lane.b32.xlu0 %v996_v51, 304 }
 0x1c4   : > { %v9341_v40 = vpop.permute.xlu1 %781  ;;  %v9343_v44 = vpop.permute.xlu0 %777 }
 0x1c5   : > { %14964 = vst [vmem:[#allocation118_spill] sm:$0xff] %v9341_v40  ;;  %14965 = vst [vmem:[#allocation119_spill] sm:$0xff] %v9343_v44  ;;  %v1066_v40 = vrot.slane %v9333_v34, %v8996_v5 }
 0x1c6   : > { %1037 = vbcast.lane.b32.xlu1 %v1031_v58, 264  ;;  %1033 = vbcast.lane.b32.xlu0 %v1031_v58, 256 }
 0x1c8   : > { %v9345_v12 = vpop.permute.xlu1 %792  ;;  %v9347_v6 = vpop.permute.xlu0 %788 }
 0x1c9   : > { %14966 = vst [vmem:[#allocation120_spill] sm:$0xff] %v9345_v12 }
 0x1ca   : > { %1045 = vbcast.lane.b32.xlu1 %v1031_v58, 280  ;;  %1041 = vbcast.lane.b32.xlu0 %v1031_v58, 272 }
 0x1cc   : > { %v9349_v18 = vpop.permute.xlu1 %800  ;;  %v9351_v25 = vpop.permute.xlu0 %796 }
 0x1cd   : > { %14967 = vst [vmem:[#allocation121_spill] sm:$0xff] %v9349_v18  ;;  %14968 = vst [vmem:[#allocation122_spill] sm:$0xff] %v9351_v25 }
 0x1ce   : > { %1053 = vbcast.lane.b32.xlu1 %v1031_v58, 296  ;;  %1049 = vbcast.lane.b32.xlu0 %v1031_v58, 288 }
 0x1d0   : > { %v9353_v51 = vpop.permute.xlu1 %808  ;;  %v9355_v37 = vpop.permute.xlu0 %804 }
 0x1d1   : > { %14969 = vst [vmem:[#allocation123_spill] sm:$0xff] %v9353_v51  ;;  %14970 = vst [vmem:[#allocation124_spill] sm:$0xff] %v9355_v37 }
 0x1d2   : > { %1061 = vbcast.lane.b32.xlu1 %v1031_v58, 312  ;;  %1057 = vbcast.lane.b32.xlu0 %v1031_v58, 304 }
 0x1d4   : > { %v9359_v44 = vpop.permute.xlu1 %816  ;;  %v9361_v49 = vpop.permute.xlu0 %812 }
 0x1d5   : > { %14971 = vst [vmem:[#allocation125_spill] sm:$0xff] %v9359_v44  ;;  %14972 = vst [vmem:[#allocation126_spill] sm:$0xff] %v9361_v49  ;;  %v1101_v44 = vrot.slane %v9333_v34, %v9001_v7 }
 0x1d6   : > { %1072 = vbcast.lane.b32.xlu1 %v1066_v40, 264  ;;  %1068 = vbcast.lane.b32.xlu0 %v1066_v40, 256 }
 0x1d8   : > { %v9363_v18 = vpop.permute.xlu1 %827  ;;  %v9365_v31 = vpop.permute.xlu0 %823 }
 0x1d9   : > { %14973 = vst [vmem:[#allocation127_spill] sm:$0xff] %v9363_v18 }
 0x1da   : > { %1080 = vbcast.lane.b32.xlu1 %v1066_v40, 280  ;;  %1076 = vbcast.lane.b32.xlu0 %v1066_v40, 272 }
 0x1dc   : > { %v9367_v51 = vpop.permute.xlu1 %835  ;;  %v9369_v37 = vpop.permute.xlu0 %831 }
 0x1dd   : > { %14974 = vst [vmem:[#allocation128_spill] sm:$0xff] %v9367_v51  ;;  %14975 = vst [vmem:[#allocation129_spill] sm:$0xff] %v9369_v37 }
 0x1de   : > { %1088 = vbcast.lane.b32.xlu1 %v1066_v40, 296  ;;  %1084 = vbcast.lane.b32.xlu0 %v1066_v40, 288 }
 0x1e0   : > { %v9371_v58 = vpop.permute.xlu1 %843  ;;  %v9373_v27 = vpop.permute.xlu0 %839 }
 0x1e1   : > { %14976 = vst [vmem:[#allocation130_spill] sm:$0xff] %v9371_v58  ;;  %14977 = vst [vmem:[#allocation131_spill] sm:$0xff] %v9373_v27 }
 0x1e2   : > { %1096 = vbcast.lane.b32.xlu1 %v1066_v40, 312  ;;  %1092 = vbcast.lane.b32.xlu0 %v1066_v40, 304 }
 0x1e4   : > { %v9377_v49 = vpop.permute.xlu1 %851  ;;  %v9379_v28 = vpop.permute.xlu0 %847 }
 0x1e5   : > { %14978 = vst [vmem:[#allocation132_spill] sm:$0xff] %v9377_v49  ;;  %14979 = vst [vmem:[#allocation133_spill] sm:$0xff] %v9379_v28  ;;  %v1136_v49 = vrot.slane %v9333_v34, %v9006_v9 }
 0x1e6   : > { %1107 = vbcast.lane.b32.xlu1 %v1101_v44, 264  ;;  %1103 = vbcast.lane.b32.xlu0 %v1101_v44, 256 }
 0x1e8   : > { %v9381_v51 = vpop.permute.xlu1 %862  ;;  %v9383_v24 = vpop.permute.xlu0 %858 }
 0x1e9   : > { %14980 = vst [vmem:[#allocation134_spill] sm:$0xff] %v9381_v51 }
 0x1ea   : > { %1115 = vbcast.lane.b32.xlu1 %v1101_v44, 280  ;;  %1111 = vbcast.lane.b32.xlu0 %v1101_v44, 272 }
 0x1ec   : > { %v9385_v58 = vpop.permute.xlu1 %870  ;;  %v9387_v27 = vpop.permute.xlu0 %866 }
 0x1ed   : > { %14981 = vst [vmem:[#allocation135_spill] sm:$0xff] %v9385_v58  ;;  %14982 = vst [vmem:[#allocation136_spill] sm:$0xff] %v9387_v27 }
 0x1ee   : > { %1123 = vbcast.lane.b32.xlu1 %v1101_v44, 296  ;;  %1119 = vbcast.lane.b32.xlu0 %v1101_v44, 288 }
 0x1f0   : > { %v9389_v40 = vpop.permute.xlu1 %878  ;;  %v9391_v10 = vpop.permute.xlu0 %874 }
 0x1f1   : > { %14983 = vst [vmem:[#allocation137_spill] sm:$0xff] %v9389_v40  ;;  %14984 = vst [vmem:[#allocation138_spill] sm:$0xff] %v9391_v10 }
 0x1f2   : > { %1131 = vbcast.lane.b32.xlu1 %v1101_v44, 312  ;;  %1127 = vbcast.lane.b32.xlu0 %v1101_v44, 304 }
 0x1f4   : > { %v9395_v28 = vpop.permute.xlu1 %886  ;;  %v9397_v62 = vpop.permute.xlu0 %882 }
 0x1f5   : > { %14985 = vst [vmem:[#allocation139_spill] sm:$0xff] %v9395_v28  ;;  %14986 = vst [vmem:[#allocation140_spill] sm:$0xff] %v9397_v62  ;;  %v1171_v28 = vrot.slane %v9333_v34, %v9011_v11 }
 0x1f6   : > { %1142 = vbcast.lane.b32.xlu1 %v1136_v49, 264  ;;  %1138 = vbcast.lane.b32.xlu0 %v1136_v49, 256 }
 0x1f8   : > { %v9399_v58 = vpop.permute.xlu1 %897  ;;  %v9401_v42 = vpop.permute.xlu0 %893 }
 0x1f9   : > { %14987 = vst [vmem:[#allocation141_spill] sm:$0xff] %v9399_v58 }
 0x1fa   : > { %1150 = vbcast.lane.b32.xlu1 %v1136_v49, 280  ;;  %1146 = vbcast.lane.b32.xlu0 %v1136_v49, 272 }
 0x1fc   : > { %v9403_v40 = vpop.permute.xlu1 %905  ;;  %v9405_v10 = vpop.permute.xlu0 %901 }
 0x1fd   : > { %14988 = vst [vmem:[#allocation142_spill] sm:$0xff] %v9403_v40  ;;  %14989 = vst [vmem:[#allocation143_spill] sm:$0xff] %v9405_v10 }
 0x1fe   : > { %1158 = vbcast.lane.b32.xlu1 %v1136_v49, 296  ;;  %1154 = vbcast.lane.b32.xlu0 %v1136_v49, 288 }
 0x200   : > { %v9407_v44 = vpop.permute.xlu1 %913  ;;  %v9409_v63 = vpop.permute.xlu0 %909 }
 0x201   : > { %14990 = vst [vmem:[#allocation144_spill] sm:$0xff] %v9407_v44  ;;  %14991 = vst [vmem:[#allocation145_spill] sm:$0xff] %v9409_v63 }
 0x202   : > { %1166 = vbcast.lane.b32.xlu1 %v1136_v49, 312  ;;  %1162 = vbcast.lane.b32.xlu0 %v1136_v49, 304 }
 0x204   : > { %v9413_v62 = vpop.permute.xlu1 %921  ;;  %v9415_v33 = vpop.permute.xlu0 %917 }
 0x205   : > { %14992 = vst [vmem:[#allocation146_spill] sm:$0xff] %v9413_v62  ;;  %14993 = vst [vmem:[#allocation147_spill] sm:$0xff] %v9415_v33  ;;  %v1206_v62 = vrot.slane %v9333_v34, %v9016_v13 }
 0x206   : > { %1177 = vbcast.lane.b32.xlu1 %v1171_v28, 264  ;;  %1173 = vbcast.lane.b32.xlu0 %v1171_v28, 256 }
 0x208   : > { %v9417_v40 = vpop.permute.xlu1 %932  ;;  %v9419_v21 = vpop.permute.xlu0 %928 }
 0x209   : > { %14994 = vst [vmem:[#allocation148_spill] sm:$0xff] %v9417_v40 }
 0x20a   : > { %1185 = vbcast.lane.b32.xlu1 %v1171_v28, 280  ;;  %1181 = vbcast.lane.b32.xlu0 %v1171_v28, 272 }
 0x20c   : > { %v9421_v44 = vpop.permute.xlu1 %940  ;;  %v9423_v63 = vpop.permute.xlu0 %936 }
 0x20d   : > { %14995 = vst [vmem:[#allocation149_spill] sm:$0xff] %v9421_v44  ;;  %14996 = vst [vmem:[#allocation150_spill] sm:$0xff] %v9423_v63 }
 0x20e   : > { %1193 = vbcast.lane.b32.xlu1 %v1171_v28, 296  ;;  %1189 = vbcast.lane.b32.xlu0 %v1171_v28, 288 }
 0x210   : > { %v9425_v49 = vpop.permute.xlu1 %948  ;;  %v9427_v10 = vpop.permute.xlu0 %944 }
 0x211   : > { %14997 = vst [vmem:[#allocation151_spill] sm:$0xff] %v9425_v49  ;;  %14998 = vst [vmem:[#allocation152_spill] sm:$0xff] %v9427_v10 }
 0x212   : > { %1201 = vbcast.lane.b32.xlu1 %v1171_v28, 312  ;;  %1197 = vbcast.lane.b32.xlu0 %v1171_v28, 304 }
 0x214   : > { %v9431_v33 = vpop.permute.xlu1 %956  ;;  %v9433_v37 = vpop.permute.xlu0 %952 }
 0x215   : > { %14999 = vst [vmem:[#allocation153_spill] sm:$0xff] %v9431_v33  ;;  %15000 = vst [vmem:[#allocation154_spill] sm:$0xff] %v9433_v37  ;;  %v1241_v33 = vrot.slane %v9333_v34, %v9021_v15 }
 0x216   : > { %1212 = vbcast.lane.b32.xlu1 %v1206_v62, 264  ;;  %1208 = vbcast.lane.b32.xlu0 %v1206_v62, 256 }
 0x218   : > { %v9435_v44 = vpop.permute.xlu1 %967  ;;  %v9437_v25 = vpop.permute.xlu0 %963 }
 0x219   : > { %15001 = vst [vmem:[#allocation155_spill] sm:$0xff] %v9435_v44 }
 0x21a   : > { %1220 = vbcast.lane.b32.xlu1 %v1206_v62, 280  ;;  %1216 = vbcast.lane.b32.xlu0 %v1206_v62, 272 }
 0x21c   : > { %v9439_v49 = vpop.permute.xlu1 %975  ;;  %v9441_v10 = vpop.permute.xlu0 %971 }
 0x21d   : > { %15002 = vst [vmem:[#allocation156_spill] sm:$0xff] %v9439_v49  ;;  %15003 = vst [vmem:[#allocation157_spill] sm:$0xff] %v9441_v10 }
 0x21e   : > { %1228 = vbcast.lane.b32.xlu1 %v1206_v62, 296  ;;  %1224 = vbcast.lane.b32.xlu0 %v1206_v62, 288 }
 0x220   : > { %v9443_v28 = vpop.permute.xlu1 %983  ;;  %v9445_v63 = vpop.permute.xlu0 %979 }
 0x221   : > { %15004 = vst [vmem:[#allocation158_spill] sm:$0xff] %v9443_v28  ;;  %15005 = vst [vmem:[#allocation159_spill] sm:$0xff] %v9445_v63 }
 0x222   : > { %1236 = vbcast.lane.b32.xlu1 %v1206_v62, 312  ;;  %1232 = vbcast.lane.b32.xlu0 %v1206_v62, 304 }
 0x224   : > { %v9449_v37 = vpop.permute.xlu1 %991  ;;  %v9451_v27 = vpop.permute.xlu0 %987 }
 0x225   : > { %15006 = vst [vmem:[#allocation160_spill] sm:$0xff] %v9449_v37  ;;  %15007 = vst [vmem:[#allocation161_spill] sm:$0xff] %v9451_v27  ;;  %v1276_v37 = vrot.slane %v9333_v34, %v9026_v17 }
 0x226   : > { %1247 = vbcast.lane.b32.xlu1 %v1241_v33, 264  ;;  %1243 = vbcast.lane.b32.xlu0 %v1241_v33, 256 }
 0x228   : > { %v9453_v49 = vpop.permute.xlu1 %1002  ;;  %v9455_v10 = vpop.permute.xlu0 %998 }
 0x229   : > { %15008 = vst [vmem:[#allocation162_spill] sm:$0xff] %v9453_v49 }
 0x22a   : > { %1255 = vbcast.lane.b32.xlu1 %v1241_v33, 280  ;;  %1251 = vbcast.lane.b32.xlu0 %v1241_v33, 272 }
 0x22c   : > { %v9457_v28 = vpop.permute.xlu1 %1010  ;;  %v9459_v63 = vpop.permute.xlu0 %1006 }
 0x22d   : > { %15009 = vst [vmem:[#allocation163_spill] sm:$0xff] %v9457_v28  ;;  %15010 = vst [vmem:[#allocation164_spill] sm:$0xff] %v9459_v63 }
 0x22e   : > { %1263 = vbcast.lane.b32.xlu1 %v1241_v33, 296  ;;  %1259 = vbcast.lane.b32.xlu0 %v1241_v33, 288 }
 0x230   : > { %v9461_v62 = vpop.permute.xlu1 %1018  ;;  %v9463_v59 = vpop.permute.xlu0 %1014 }
 0x231   : > { %15011 = vst [vmem:[#allocation165_spill] sm:$0xff] %v9461_v62  ;;  %15012 = vst [vmem:[#allocation166_spill] sm:$0xff] %v9463_v59 }
 0x232   : > { %1271 = vbcast.lane.b32.xlu1 %v1241_v33, 312  ;;  %1267 = vbcast.lane.b32.xlu0 %v1241_v33, 304  ;;  %v9480_v33 = vld [vmem:[%s8979_s21 + $0x20] sm:$0xff] }
 0x234   : > { %v9467_v27 = vpop.permute.xlu1 %1026  ;;  %v9469_v19 = vpop.permute.xlu0 %1022 }
 0x235   : > { %15013 = vst [vmem:[#allocation167_spill] sm:$0xff] %v9467_v27  ;;  %15014 = vst [vmem:[#allocation168_spill] sm:$0xff] %v9469_v19  ;;  %v1311_v19 = vrot.slane %v9480_v33, %v8988_v2 }
 0x236   : > { %1282 = vbcast.lane.b32.xlu1 %v1276_v37, 264  ;;  %1278 = vbcast.lane.b32.xlu0 %v1276_v37, 256 }
 0x238   : > { %v9471_v28 = vpop.permute.xlu1 %1037  ;;  %v9473_v63 = vpop.permute.xlu0 %1033 }
 0x239   : > { %15015 = vst [vmem:[#allocation169_spill] sm:$0xff] %v9471_v28  ;;  %15016 = vst [vmem:[#allocation170_spill] sm:$0xff] %v9473_v63 }
 0x23a   : > { %1290 = vbcast.lane.b32.xlu1 %v1276_v37, 280  ;;  %1286 = vbcast.lane.b32.xlu0 %v1276_v37, 272 }
 0x23c   : > { %v9475_v62 = vpop.permute.xlu1 %1045  ;;  %v9477_v59 = vpop.permute.xlu0 %1041 }
 0x23d   : > { %15017 = vst [vmem:[#allocation171_spill] sm:$0xff] %v9475_v62  ;;  %15018 = vst [vmem:[#allocation172_spill] sm:$0xff] %v9477_v59 }
 0x23e   : > { %1298 = vbcast.lane.b32.xlu1 %v1276_v37, 296  ;;  %1294 = vbcast.lane.b32.xlu0 %v1276_v37, 288 }
 0x240   : > { %v9482_v34 = vpop.permute.xlu1 %1053  ;;  %v9484_v27 = vpop.permute.xlu0 %1049 }
 0x241   : > { %15019 = vst [vmem:[#allocation173_spill] sm:$0xff] %v9482_v34  ;;  %15020 = vst [vmem:[#allocation174_spill] sm:$0xff] %v9484_v27 }
 0x242   : > { %1306 = vbcast.lane.b32.xlu1 %v1276_v37, 312  ;;  %1302 = vbcast.lane.b32.xlu0 %v1276_v37, 304 }
 0x244   : > { %v9488_v28 = vpop.permute.xlu1 %1061  ;;  %v9490_v53 = vpop.permute.xlu0 %1057 }
 0x245   : > { %15021 = vst [vmem:[#allocation175_spill] sm:$0xff] %v9488_v28  ;;  %15022 = vst [vmem:[#allocation176_spill] sm:$0xff] %v9490_v53  ;;  %v1346_v28 = vrot.slane %v9480_v33, %v8996_v5 }
 0x246   : > { %1317 = vbcast.lane.b32.xlu1 %v1311_v19, 264  ;;  %1313 = vbcast.lane.b32.xlu0 %v1311_v19, 256 }
 0x248   : > { %v9492_v62 = vpop.permute.xlu1 %1072  ;;  %v9494_v59 = vpop.permute.xlu0 %1068 }
 0x249   : > { %15023 = vst [vmem:[#allocation177_spill] sm:$0xff] %v9492_v62  ;;  %15024 = vst [vmem:[#allocation178_spill] sm:$0xff] %v9494_v59 }
 0x24a   : > { %1325 = vbcast.lane.b32.xlu1 %v1311_v19, 280  ;;  %1321 = vbcast.lane.b32.xlu0 %v1311_v19, 272 }
 0x24c   : > { %v9496_v34 = vpop.permute.xlu1 %1080  ;;  %v9498_v27 = vpop.permute.xlu0 %1076 }
 0x24d   : > { %15025 = vst [vmem:[#allocation179_spill] sm:$0xff] %v9496_v34  ;;  %15026 = vst [vmem:[#allocation180_spill] sm:$0xff] %v9498_v27 }
 0x24e   : > { %1333 = vbcast.lane.b32.xlu1 %v1311_v19, 296  ;;  %1329 = vbcast.lane.b32.xlu0 %v1311_v19, 288 }
 0x250   : > { %v9500_v37 = vpop.permute.xlu1 %1088  ;;  %v9502_v41 = vpop.permute.xlu0 %1084 }
 0x251   : > { %15027 = vst [vmem:[#allocation181_spill] sm:$0xff] %v9500_v37  ;;  %15028 = vst [vmem:[#allocation182_spill] sm:$0xff] %v9502_v41 }
 0x252   : > { %1341 = vbcast.lane.b32.xlu1 %v1311_v19, 312  ;;  %1337 = vbcast.lane.b32.xlu0 %v1311_v19, 304 }
 0x254   : > { %v9506_v53 = vpop.permute.xlu1 %1096  ;;  %v9508_v62 = vpop.permute.xlu0 %1092 }
 0x255   : > { %15029 = vst [vmem:[#allocation183_spill] sm:$0xff] %v9506_v53  ;;  %15030 = vst [vmem:[#allocation184_spill] sm:$0xff] %v9508_v62  ;;  %v1381_v53 = vrot.slane %v9480_v33, %v9001_v7 }
 0x256   : > { %1352 = vbcast.lane.b32.xlu1 %v1346_v28, 264  ;;  %1348 = vbcast.lane.b32.xlu0 %v1346_v28, 256 }
 0x258   : > { %v9510_v34 = vpop.permute.xlu1 %1107  ;;  %v9512_v27 = vpop.permute.xlu0 %1103 }
 0x259   : > { %15031 = vst [vmem:[#allocation185_spill] sm:$0xff] %v9510_v34  ;;  %15032 = vst [vmem:[#allocation186_spill] sm:$0xff] %v9512_v27 }
 0x25a   : > { %1360 = vbcast.lane.b32.xlu1 %v1346_v28, 280  ;;  %1356 = vbcast.lane.b32.xlu0 %v1346_v28, 272 }
 0x25c   : > { %v9514_v37 = vpop.permute.xlu1 %1115  ;;  %v9516_v41 = vpop.permute.xlu0 %1111 }
 0x25d   : > { %15033 = vst [vmem:[#allocation187_spill] sm:$0xff] %v9514_v37  ;;  %15034 = vst [vmem:[#allocation188_spill] sm:$0xff] %v9516_v41 }
 0x25e   : > { %1368 = vbcast.lane.b32.xlu1 %v1346_v28, 296  ;;  %1364 = vbcast.lane.b32.xlu0 %v1346_v28, 288 }
 0x260   : > { %v9518_v19 = vpop.permute.xlu1 %1123  ;;  %v9520_v8 = vpop.permute.xlu0 %1119 }
 0x261   : > { %15035 = vst [vmem:[#allocation189_spill] sm:$0xff] %v9518_v19  ;;  %15036 = vst [vmem:[#allocation190_spill] sm:$0xff] %v9520_v8 }
 0x262   : > { %1376 = vbcast.lane.b32.xlu1 %v1346_v28, 312  ;;  %1372 = vbcast.lane.b32.xlu0 %v1346_v28, 304 }
 0x264   : > { %v9524_v62 = vpop.permute.xlu1 %1131  ;;  %v9526_v34 = vpop.permute.xlu0 %1127 }
 0x265   : > { %15037 = vst [vmem:[#allocation191_spill] sm:$0xff] %v9524_v62  ;;  %15038 = vst [vmem:[#allocation192_spill] sm:$0xff] %v9526_v34  ;;  %v1416_v62 = vrot.slane %v9480_v33, %v9006_v9 }
 0x266   : > { %1387 = vbcast.lane.b32.xlu1 %v1381_v53, 264  ;;  %1383 = vbcast.lane.b32.xlu0 %v1381_v53, 256 }
 0x268   : > { %v9528_v37 = vpop.permute.xlu1 %1142  ;;  %v9530_v41 = vpop.permute.xlu0 %1138 }
 0x269   : > { %15039 = vst [vmem:[#allocation193_spill] sm:$0xff] %v9528_v37  ;;  %15040 = vst [vmem:[#allocation194_spill] sm:$0xff] %v9530_v41 }
 0x26a   : > { %1395 = vbcast.lane.b32.xlu1 %v1381_v53, 280  ;;  %1391 = vbcast.lane.b32.xlu0 %v1381_v53, 272 }
 0x26c   : > { %v9532_v19 = vpop.permute.xlu1 %1150  ;;  %v9534_v8 = vpop.permute.xlu0 %1146 }
 0x26d   : > { %15041 = vst [vmem:[#allocation195_spill] sm:$0xff] %v9532_v19  ;;  %15042 = vst [vmem:[#allocation196_spill] sm:$0xff] %v9534_v8 }
 0x26e   : > { %1403 = vbcast.lane.b32.xlu1 %v1381_v53, 296  ;;  %1399 = vbcast.lane.b32.xlu0 %v1381_v53, 288 }
 0x270   : > { %v9536_v28 = vpop.permute.xlu1 %1158  ;;  %v9538_v50 = vpop.permute.xlu0 %1154 }
 0x271   : > { %15043 = vst [vmem:[#allocation197_spill] sm:$0xff] %v9536_v28  ;;  %15044 = vst [vmem:[#allocation198_spill] sm:$0xff] %v9538_v50 }
 0x272   : > { %1411 = vbcast.lane.b32.xlu1 %v1381_v53, 312  ;;  %1407 = vbcast.lane.b32.xlu0 %v1381_v53, 304 }
 0x274   : > { %v9542_v34 = vpop.permute.xlu1 %1166  ;;  %v9544_v37 = vpop.permute.xlu0 %1162 }
 0x275   : > { %15045 = vst [vmem:[#allocation199_spill] sm:$0xff] %v9542_v34  ;;  %15046 = vst [vmem:[#allocation200_spill] sm:$0xff] %v9544_v37  ;;  %v1451_v34 = vrot.slane %v9480_v33, %v9011_v11 }
 0x276   : > { %1422 = vbcast.lane.b32.xlu1 %v1416_v62, 264  ;;  %1418 = vbcast.lane.b32.xlu0 %v1416_v62, 256 }
 0x278   : > { %v9546_v19 = vpop.permute.xlu1 %1177  ;;  %v9548_v8 = vpop.permute.xlu0 %1173 }
 0x279   : > { %15047 = vst [vmem:[#allocation201_spill] sm:$0xff] %v9546_v19  ;;  %15048 = vst [vmem:[#allocation202_spill] sm:$0xff] %v9548_v8 }
 0x27a   : > { %1430 = vbcast.lane.b32.xlu1 %v1416_v62, 280  ;;  %1426 = vbcast.lane.b32.xlu0 %v1416_v62, 272 }
 0x27c   : > { %v9550_v28 = vpop.permute.xlu1 %1185  ;;  %v9552_v50 = vpop.permute.xlu0 %1181 }
 0x27d   : > { %15049 = vst [vmem:[#allocation203_spill] sm:$0xff] %v9550_v28  ;;  %15050 = vst [vmem:[#allocation204_spill] sm:$0xff] %v9552_v50 }
 0x27e   : > { %1438 = vbcast.lane.b32.xlu1 %v1416_v62, 296  ;;  %1434 = vbcast.lane.b32.xlu0 %v1416_v62, 288 }
 0x280   : > { %v9554_v53 = vpop.permute.xlu1 %1193  ;;  %v9556_v36 = vpop.permute.xlu0 %1189 }
 0x281   : > { %15051 = vst [vmem:[#allocation205_spill] sm:$0xff] %v9554_v53  ;;  %15052 = vst [vmem:[#allocation206_spill] sm:$0xff] %v9556_v36 }
 0x282   : > { %1446 = vbcast.lane.b32.xlu1 %v1416_v62, 312  ;;  %1442 = vbcast.lane.b32.xlu0 %v1416_v62, 304 }
 0x284   : > { %v9560_v37 = vpop.permute.xlu1 %1201  ;;  %v9562_v19 = vpop.permute.xlu0 %1197 }
 0x285   : > { %15053 = vst [vmem:[#allocation207_spill] sm:$0xff] %v9560_v37  ;;  %15054 = vst [vmem:[#allocation208_spill] sm:$0xff] %v9562_v19  ;;  %v1486_v37 = vrot.slane %v9480_v33, %v9016_v13 }
 0x286   : > { %1457 = vbcast.lane.b32.xlu1 %v1451_v34, 264  ;;  %1453 = vbcast.lane.b32.xlu0 %v1451_v34, 256 }
 0x288   : > { %v9564_v28 = vpop.permute.xlu1 %1212  ;;  %v9566_v50 = vpop.permute.xlu0 %1208 }
 0x289   : > { %15055 = vst [vmem:[#allocation209_spill] sm:$0xff] %v9564_v28  ;;  %15056 = vst [vmem:[#allocation210_spill] sm:$0xff] %v9566_v50 }
 0x28a   : > { %1465 = vbcast.lane.b32.xlu1 %v1451_v34, 280  ;;  %1461 = vbcast.lane.b32.xlu0 %v1451_v34, 272 }
 0x28c   : > { %v9568_v53 = vpop.permute.xlu1 %1220  ;;  %v9570_v36 = vpop.permute.xlu0 %1216 }
 0x28d   : > { %15057 = vst [vmem:[#allocation211_spill] sm:$0xff] %v9568_v53  ;;  %15058 = vst [vmem:[#allocation212_spill] sm:$0xff] %v9570_v36 }
 0x28e   : > { %1473 = vbcast.lane.b32.xlu1 %v1451_v34, 296  ;;  %1469 = vbcast.lane.b32.xlu0 %v1451_v34, 288 }
 0x290   : > { %v9572_v62 = vpop.permute.xlu1 %1228  ;;  %v9574_v8 = vpop.permute.xlu0 %1224 }
 0x291   : > { %15059 = vst [vmem:[#allocation213_spill] sm:$0xff] %v9572_v62  ;;  %15060 = vst [vmem:[#allocation214_spill] sm:$0xff] %v9574_v8 }
 0x292   : > { %1481 = vbcast.lane.b32.xlu1 %v1451_v34, 312  ;;  %1477 = vbcast.lane.b32.xlu0 %v1451_v34, 304 }
 0x294   : > { %v9578_v19 = vpop.permute.xlu1 %1236  ;;  %v9580_v28 = vpop.permute.xlu0 %1232 }
 0x295   : > { %15061 = vst [vmem:[#allocation215_spill] sm:$0xff] %v9578_v19  ;;  %15062 = vst [vmem:[#allocation216_spill] sm:$0xff] %v9580_v28  ;;  %v1521_v19 = vrot.slane %v9480_v33, %v9021_v15 }
 0x296   : > { %1492 = vbcast.lane.b32.xlu1 %v1486_v37, 264  ;;  %1488 = vbcast.lane.b32.xlu0 %v1486_v37, 256 }
 0x298   : > { %v9582_v53 = vpop.permute.xlu1 %1247  ;;  %v9584_v36 = vpop.permute.xlu0 %1243 }
 0x299   : > { %15063 = vst [vmem:[#allocation217_spill] sm:$0xff] %v9582_v53  ;;  %15064 = vst [vmem:[#allocation218_spill] sm:$0xff] %v9584_v36 }
 0x29a   : > { %1500 = vbcast.lane.b32.xlu1 %v1486_v37, 280  ;;  %1496 = vbcast.lane.b32.xlu0 %v1486_v37, 272 }
 0x29c   : > { %v9586_v62 = vpop.permute.xlu1 %1255  ;;  %v9588_v8 = vpop.permute.xlu0 %1251 }
 0x29d   : > { %15065 = vst [vmem:[#allocation219_spill] sm:$0xff] %v9586_v62  ;;  %15066 = vst [vmem:[#allocation220_spill] sm:$0xff] %v9588_v8 }
 0x29e   : > { %1508 = vbcast.lane.b32.xlu1 %v1486_v37, 296  ;;  %1504 = vbcast.lane.b32.xlu0 %v1486_v37, 288 }
 0x2a0   : > { %v9590_v34 = vpop.permute.xlu1 %1263  ;;  %v9592_v50 = vpop.permute.xlu0 %1259 }
 0x2a1   : > { %15067 = vst [vmem:[#allocation221_spill] sm:$0xff] %v9590_v34  ;;  %15068 = vst [vmem:[#allocation222_spill] sm:$0xff] %v9592_v50 }
 0x2a2   : > { %1516 = vbcast.lane.b32.xlu1 %v1486_v37, 312  ;;  %1512 = vbcast.lane.b32.xlu0 %v1486_v37, 304 }
 0x2a4   : > { %v9596_v28 = vpop.permute.xlu1 %1271  ;;  %v9598_v53 = vpop.permute.xlu0 %1267 }
 0x2a5   : > { %15069 = vst [vmem:[#allocation223_spill] sm:$0xff] %v9596_v28  ;;  %15070 = vst [vmem:[#allocation224_spill] sm:$0xff] %v9598_v53  ;;  %v1556_v28 = vrot.slane %v9480_v33, %v9026_v17 }
 0x2a6   : > { %1527 = vbcast.lane.b32.xlu1 %v1521_v19, 264  ;;  %1523 = vbcast.lane.b32.xlu0 %v1521_v19, 256 }
 0x2a8   : > { %v9600_v62 = vpop.permute.xlu1 %1282  ;;  %v9602_v8 = vpop.permute.xlu0 %1278 }
 0x2a9   : > { %15071 = vst [vmem:[#allocation225_spill] sm:$0xff] %v9600_v62  ;;  %15072 = vst [vmem:[#allocation226_spill] sm:$0xff] %v9602_v8 }
 0x2aa   : > { %1535 = vbcast.lane.b32.xlu1 %v1521_v19, 280  ;;  %1531 = vbcast.lane.b32.xlu0 %v1521_v19, 272 }
 0x2ac   : > { %v9604_v34 = vpop.permute.xlu1 %1290  ;;  %v9606_v50 = vpop.permute.xlu0 %1286 }
 0x2ad   : > { %15073 = vst [vmem:[#allocation227_spill] sm:$0xff] %v9604_v34  ;;  %15074 = vst [vmem:[#allocation228_spill] sm:$0xff] %v9606_v50 }
 0x2ae   : > { %1543 = vbcast.lane.b32.xlu1 %v1521_v19, 296  ;;  %1539 = vbcast.lane.b32.xlu0 %v1521_v19, 288 }
 0x2b0   : > { %v9608_v37 = vpop.permute.xlu1 %1298  ;;  %v9610_v32 = vpop.permute.xlu0 %1294 }
 0x2b1   : > { %15075 = vst [vmem:[#allocation229_spill] sm:$0xff] %v9608_v37  ;;  %15076 = vst [vmem:[#allocation230_spill] sm:$0xff] %v9610_v32 }
 0x2b2   : > { %1551 = vbcast.lane.b32.xlu1 %v1521_v19, 312  ;;  %1547 = vbcast.lane.b32.xlu0 %v1521_v19, 304  ;;  %v9627_v19 = vld [vmem:[%s8979_s21 + $0x28] sm:$0xff] }
 0x2b4   : > { %v9614_v53 = vpop.permute.xlu1 %1306  ;;  %v9616_v62 = vpop.permute.xlu0 %1302 }
 0x2b5   : > { %15077 = vst [vmem:[#allocation231_spill] sm:$0xff] %v9614_v53  ;;  %15078 = vst [vmem:[#allocation232_spill] sm:$0xff] %v9616_v62  ;;  %v1591_v62 = vrot.slane %v9627_v19, %v8988_v2 }
 0x2b6   : > { %1562 = vbcast.lane.b32.xlu1 %v1556_v28, 264  ;;  %1558 = vbcast.lane.b32.xlu0 %v1556_v28, 256 }
 0x2b8   : > { %v9618_v34 = vpop.permute.xlu1 %1317  ;;  %v9620_v50 = vpop.permute.xlu0 %1313 }
 0x2b9   : > { %15079 = vst [vmem:[#allocation233_spill] sm:$0xff] %v9618_v34 }
 0x2ba   : > { %1570 = vbcast.lane.b32.xlu1 %v1556_v28, 280  ;;  %1566 = vbcast.lane.b32.xlu0 %v1556_v28, 272 }
 0x2bc   : > { %v9622_v37 = vpop.permute.xlu1 %1325  ;;  %v9624_v32 = vpop.permute.xlu0 %1321 }
 0x2bd   : > { %15080 = vst [vmem:[#allocation234_spill] sm:$0xff] %v9622_v37  ;;  %15081 = vst [vmem:[#allocation235_spill] sm:$0xff] %v9624_v32 }
 0x2be   : > { %1578 = vbcast.lane.b32.xlu1 %v1556_v28, 296  ;;  %1574 = vbcast.lane.b32.xlu0 %v1556_v28, 288 }
 0x2c0   : > { %v9629_v33 = vpop.permute.xlu1 %1333  ;;  %v9631_v53 = vpop.permute.xlu0 %1329 }
 0x2c1   : > { %15082 = vst [vmem:[#allocation236_spill] sm:$0xff] %v9629_v33  ;;  %15083 = vst [vmem:[#allocation237_spill] sm:$0xff] %v9631_v53 }
 0x2c2   : > { %1586 = vbcast.lane.b32.xlu1 %v1556_v28, 312  ;;  %1582 = vbcast.lane.b32.xlu0 %v1556_v28, 304 }
 0x2c4   : > { %v9635_v8 = vpop.permute.xlu1 %1341  ;;  %v9637_v36 = vpop.permute.xlu0 %1337 }
 0x2c5   : > { %15084 = vst [vmem:[#allocation238_spill] sm:$0xff] %v9635_v8  ;;  %15085 = vst [vmem:[#allocation239_spill] sm:$0xff] %v9637_v36  ;;  %v1626_v36 = vrot.slane %v9627_v19, %v8996_v5 }
 0x2c6   : > { %1597 = vbcast.lane.b32.xlu1 %v1591_v62, 264  ;;  %1593 = vbcast.lane.b32.xlu0 %v1591_v62, 256 }
 0x2c8   : > { %v9639_v37 = vpop.permute.xlu1 %1352  ;;  %v9641_v32 = vpop.permute.xlu0 %1348 }
 0x2c9   : > { %15086 = vst [vmem:[#allocation240_spill] sm:$0xff] %v9639_v37 }
 0x2ca   : > { %1605 = vbcast.lane.b32.xlu1 %v1591_v62, 280  ;;  %1601 = vbcast.lane.b32.xlu0 %v1591_v62, 272 }
 0x2cc   : > { %v9643_v33 = vpop.permute.xlu1 %1360  ;;  %v9645_v53 = vpop.permute.xlu0 %1356 }
 0x2cd   : > { %15087 = vst [vmem:[#allocation241_spill] sm:$0xff] %v9643_v33  ;;  %15088 = vst [vmem:[#allocation242_spill] sm:$0xff] %v9645_v53 }
 0x2ce   : > { %1613 = vbcast.lane.b32.xlu1 %v1591_v62, 296  ;;  %1609 = vbcast.lane.b32.xlu0 %v1591_v62, 288 }
 0x2d0   : > { %v9647_v28 = vpop.permute.xlu1 %1368  ;;  %v9649_v63 = vpop.permute.xlu0 %1364 }
 0x2d1   : > { %15089 = vst [vmem:[#allocation243_spill] sm:$0xff] %v9647_v28  ;;  %15090 = vst [vmem:[#allocation244_spill] sm:$0xff] %v9649_v63 }
 0x2d2   : > { %1621 = vbcast.lane.b32.xlu1 %v1591_v62, 312  ;;  %1617 = vbcast.lane.b32.xlu0 %v1591_v62, 304 }
 0x2d4   : > { %v9653_v8 = vpop.permute.xlu1 %1376  ;;  %v9655_v27 = vpop.permute.xlu0 %1372 }
 0x2d5   : > { %15091 = vst [vmem:[#allocation245_spill] sm:$0xff] %v9653_v8  ;;  %15092 = vst [vmem:[#allocation246_spill] sm:$0xff] %v9655_v27  ;;  %v1661_v27 = vrot.slane %v9627_v19, %v9001_v7 }
 0x2d6   : > { %1632 = vbcast.lane.b32.xlu1 %v1626_v36, 264  ;;  %1628 = vbcast.lane.b32.xlu0 %v1626_v36, 256 }
 0x2d8   : > { %v9657_v33 = vpop.permute.xlu1 %1387  ;;  %v9659_v53 = vpop.permute.xlu0 %1383 }
 0x2da   : > { %1640 = vbcast.lane.b32.xlu1 %v1626_v36, 280  ;;  %1636 = vbcast.lane.b32.xlu0 %v1626_v36, 272 }
 0x2dc   : > { %v9661_v28 = vpop.permute.xlu1 %1395  ;;  %v9663_v63 = vpop.permute.xlu0 %1391 }
 0x2dd   : > { %15093 = vst [vmem:[#allocation247_spill] sm:$0xff] %v9661_v28  ;;  %15094 = vst [vmem:[#allocation248_spill] sm:$0xff] %v9663_v63 }
 0x2de   : > { %1648 = vbcast.lane.b32.xlu1 %v1626_v36, 296  ;;  %1644 = vbcast.lane.b32.xlu0 %v1626_v36, 288 }
 0x2e0   : > { %v9665_v62 = vpop.permute.xlu1 %1403  ;;  %v9667_v59 = vpop.permute.xlu0 %1399 }
 0x2e1   : > { %15095 = vst [vmem:[#allocation249_spill] sm:$0xff] %v9665_v62  ;;  %15096 = vst [vmem:[#allocation250_spill] sm:$0xff] %v9667_v59 }
 0x2e2   : > { %1656 = vbcast.lane.b32.xlu1 %v1626_v36, 312  ;;  %1652 = vbcast.lane.b32.xlu0 %v1626_v36, 304 }
 0x2e4   : > { %v9671_v8 = vpop.permute.xlu1 %1411  ;;  %v9673_v41 = vpop.permute.xlu0 %1407 }
 0x2e5   : > { %15097 = vst [vmem:[#allocation251_spill] sm:$0xff] %v9671_v8  ;;  %15098 = vst [vmem:[#allocation252_spill] sm:$0xff] %v9673_v41  ;;  %v1696_v8 = vrot.slane %v9627_v19, %v9006_v9 }
 0x2e6   : > { %1667 = vbcast.lane.b32.xlu1 %v1661_v27, 264  ;;  %1663 = vbcast.lane.b32.xlu0 %v1661_v27, 256 }
 0x2e8   : > { %v9675_v28 = vpop.permute.xlu1 %1422  ;;  %v9677_v63 = vpop.permute.xlu0 %1418 }
 0x2ea   : > { %1675 = vbcast.lane.b32.xlu1 %v1661_v27, 280  ;;  %1671 = vbcast.lane.b32.xlu0 %v1661_v27, 272 }
 0x2ec   : > { %v9679_v62 = vpop.permute.xlu1 %1430  ;;  %v9681_v59 = vpop.permute.xlu0 %1426 }
 0x2ed   : > { %15099 = vst [vmem:[#allocation253_spill] sm:$0xff] %v9679_v62  ;;  %15100 = vst [vmem:[#allocation254_spill] sm:$0xff] %v9681_v59 }
 0x2ee   : > { %1683 = vbcast.lane.b32.xlu1 %v1661_v27, 296  ;;  %1679 = vbcast.lane.b32.xlu0 %v1661_v27, 288 }
 0x2f0   : > { %v9683_v61 = vpop.permute.xlu1 %1438  ;;  %v9685_v36 = vpop.permute.xlu0 %1434 }
 0x2f1   : > { %15101 = vst [vmem:[#allocation255_spill] sm:$0xff] %v9683_v61  ;;  %15102 = vst [vmem:[#allocation256_spill] sm:$0xff] %v9685_v36 }
 0x2f2   : > { %1691 = vbcast.lane.b32.xlu1 %v1661_v27, 312  ;;  %1687 = vbcast.lane.b32.xlu0 %v1661_v27, 304 }
 0x2f4   : > { %v9689_v41 = vpop.permute.xlu1 %1446  ;;  %v9691_v58 = vpop.permute.xlu0 %1442 }
 0x2f5   : > { %15103 = vst [vmem:[#allocation257_spill] sm:$0xff] %v9689_v41  ;;  %15104 = vst [vmem:[#allocation258_spill] sm:$0xff] %v9691_v58  ;;  %v1731_v41 = vrot.slane %v9627_v19, %v9011_v11 }
 0x2f6   : > { %1702 = vbcast.lane.b32.xlu1 %v1696_v8, 264  ;;  %1698 = vbcast.lane.b32.xlu0 %v1696_v8, 256 }
 0x2f8   : > { %v9693_v62 = vpop.permute.xlu1 %1457  ;;  %v9695_v59 = vpop.permute.xlu0 %1453 }
 0x2f9   : > { %15105 = vst [vmem:[#allocation259_spill] sm:$0xff] %v9693_v62 }
 0x2fa   : > { %1710 = vbcast.lane.b32.xlu1 %v1696_v8, 280  ;;  %1706 = vbcast.lane.b32.xlu0 %v1696_v8, 272 }
 0x2fc   : > { %v9697_v61 = vpop.permute.xlu1 %1465  ;;  %v9699_v36 = vpop.permute.xlu0 %1461 }
 0x2fd   : > { %15106 = vst [vmem:[#allocation260_spill] sm:$0xff] %v9697_v61  ;;  %15107 = vst [vmem:[#allocation261_spill] sm:$0xff] %v9699_v36 }
 0x2fe   : > { %1718 = vbcast.lane.b32.xlu1 %v1696_v8, 296  ;;  %1714 = vbcast.lane.b32.xlu0 %v1696_v8, 288 }
 0x300   : > { %v9701_v18 = vpop.permute.xlu1 %1473  ;;  %v9703_v27 = vpop.permute.xlu0 %1469 }
 0x301   : > { %15108 = vst [vmem:[#allocation262_spill] sm:$0xff] %v9701_v18  ;;  %15109 = vst [vmem:[#allocation263_spill] sm:$0xff] %v9703_v27 }
 0x302   : > { %1726 = vbcast.lane.b32.xlu1 %v1696_v8, 312  ;;  %1722 = vbcast.lane.b32.xlu0 %v1696_v8, 304 }
 0x304   : > { %v9707_v58 = vpop.permute.xlu1 %1481  ;;  %v9709_v12 = vpop.permute.xlu0 %1477 }
 0x305   : > { %15110 = vst [vmem:[#allocation264_spill] sm:$0xff] %v9707_v58  ;;  %15111 = vst [vmem:[#allocation265_spill] sm:$0xff] %v9709_v12  ;;  %v1766_v12 = vrot.slane %v9627_v19, %v9016_v13 }
 0x306   : > { %1737 = vbcast.lane.b32.xlu1 %v1731_v41, 264  ;;  %1733 = vbcast.lane.b32.xlu0 %v1731_v41, 256 }
 0x308   : > { %v9711_v61 = vpop.permute.xlu1 %1492  ;;  %v1489_v36 = vpop.permute.xlu0 %1488 }
 0x30a   : > { %1745 = vbcast.lane.b32.xlu1 %v1731_v41, 280  ;;  %1741 = vbcast.lane.b32.xlu0 %v1731_v41, 272 }
 0x30c   : > { %v9713_v44 = vpop.permute.xlu1 %1500  ;;  %v9715_v18 = vpop.permute.xlu0 %1496 }
 0x30d   : > { %15112 = vst [vmem:[#allocation266_spill] sm:$0xff] %v9713_v44  ;;  %15113 = vst [vmem:[#allocation267_spill] sm:$0xff] %v9715_v18 }
 0x30e   : > { %1753 = vbcast.lane.b32.xlu1 %v1731_v41, 296  ;;  %1749 = vbcast.lane.b32.xlu0 %v1731_v41, 288 }
 0x310   : > { %v9717_v27 = vpop.permute.xlu1 %1508  ;;  %v9719_v8 = vpop.permute.xlu0 %1504 }
 0x311   : > { %15114 = vst [vmem:[#allocation268_spill] sm:$0xff] %v9717_v27  ;;  %15115 = vst [vmem:[#allocation269_spill] sm:$0xff] %v9719_v8  ;;  %v8774_v8 = vmov 1983009808  }
 0x312   : > { %1761 = vbcast.lane.b32.xlu1 %v1731_v41, 312  ;;  %1757 = vbcast.lane.b32.xlu0 %v1731_v41, 304  ;;  %v2688_v22 = vunpack.c.l.s4 %v8774_v8  ;;  %v9747_v8 = vsel %vm2428_vm0, %v9053_v30, %v9641_v32 }
 0x314   : > { %v9723_v58 = vpop.permute.xlu1 %1516  ;;  %v9725_v40 = vpop.permute.xlu0 %1512  ;;  %v2689_v34 = vunpack.c.0.s8 %v2688_v22 }
 0x315   : > { %15116 = vst [vmem:[#allocation270_spill] sm:$0xff] %v9723_v58  ;;  %15117 = vst [vmem:[#allocation271_spill] sm:$0xff] %v9725_v40  ;;  %v9740_v40 = vsel %vm2428_vm0, %v9089_v48, %v9677_v63 }
 0x316   : > { %1772 = vbcast.lane.b32.xlu1 %v1766_v12, 264  ;;  %1768 = vbcast.lane.b32.xlu0 %v1766_v12, 256  ;;  %v2701_v22 = vcombine.low %v9747_v8, %v9740_v40  ;;  %v9770_v32 = vsub.s32 %v2689_v34, %v8985_v1 }
 0x318   : > { %v9727_v44 = vpop.permute.xlu1 %1527  ;;  %v1524_v18 = vpop.permute.xlu0 %1523 }
 0x319   : > { %v9767_v30 = vsel %vm2428_vm0, %v9143_v35, %v1524_v18  ;;  %v9782_v35 = vrot.slane %v2701_v22, %v9770_v32  ;;  %v9786_v18 = vsel %vm2428_vm0, %v9125_v4, %v1489_v36 }
 0x31a   : > { %1780 = vbcast.lane.b32.xlu1 %v1766_v12, 280  ;;  %1776 = vbcast.lane.b32.xlu0 %v1766_v12, 272 }
 0x31c   : > { %v9729_v51 = vpop.permute.xlu1 %1535  ;;  %v9731_v27 = vpop.permute.xlu0 %1531 }
 0x31d   : > { %15118 = vst [vmem:[#allocation272_spill] sm:$0xff] %v9729_v51  ;;  %15119 = vst [vmem:[#allocation273_spill] sm:$0xff] %v9731_v27  ;;  %v1801_v51 = vrot.slane %v9627_v19, %v9021_v15  ;;  %v8775_v27 = vmov 1934713408  }
 0x31e   : > { %1788 = vbcast.lane.b32.xlu1 %v1766_v12, 296  ;;  %1784 = vbcast.lane.b32.xlu0 %v1766_v12, 288  ;;  %v2752_v49 = vunpack.c.l.s4 %v8775_v27  ;;  %v9777_v27 = vsel %vm2428_vm0, %v9107_v57, %v9695_v59 }
 0x31f   : > { %v2717_v34 = vcombine.low %v9777_v27, %v9767_v30 }
 0x320   : > { %v9733_v41 = vpop.permute.xlu1 %1543  ;;  %v9735_v58 = vpop.permute.xlu0 %1539 }
 0x321   : > { %15120 = vst [vmem:[#allocation274_spill] sm:$0xff] %v9733_v41  ;;  %15121 = vst [vmem:[#allocation275_spill] sm:$0xff] %v9735_v58  ;;  %v9752_v41 = vsel %vm2428_vm0, %v9071_v39, %v9659_v53  ;;  %v2753_v53 = vunpack.c.0.s8 %v2752_v49 }
 0x322   : > { %1796 = vbcast.lane.b32.xlu1 %v1766_v12, 312  ;;  %1792 = vbcast.lane.b32.xlu0 %v1766_v12, 304  ;;  %v9763_v12 = vsel %vm2428_vm0, %v9032_v20, %v9620_v50 }
 0x323   : > { %v2685_v39 = vcombine.low %v9763_v12, %v9752_v41 }
 0x324   : > { %v9754_v48 = vpop.permute.xlu1 %1551  ;;  %v9756_v63 = vpop.permute.xlu0 %1547 }
 0x325   : > { %15122 = vst [vmem:[#allocation276_spill] sm:$0xff] %v9754_v48  ;;  %15123 = vst [vmem:[#allocation277_spill] sm:$0xff] %v9756_v63  ;;  %v9797_v59 = vrot.slane %v2685_v39, %v9770_v32  ;;  %v9807_v63 = vsub.s32 %v2753_v53, %v8985_v1  ;;  %v1836_v53 = vrot.slane %v9627_v19, %v9026_v17  ;;  %v9841_v19 = vld [vmem:[%s8979_s21 + $0x30] sm:$0xff] }
 0x326   : > { %1807 = vbcast.lane.b32.xlu1 %v1801_v51, 264  ;;  %1803 = vbcast.lane.b32.xlu0 %v1801_v51, 256 }
 0x328   : > { %v9779_v20 = vpop.permute.xlu1 %1562  ;;  %v1559_v50 = vpop.permute.xlu0 %1558 }
 0x329   : > { %v9792_v49 = vsel %vm2428_vm0, %v9161_v55, %v1559_v50  ;;  %v2749_v55 = vcombine.low %v9797_v59, %v9782_v35  ;;  %v9812_v50 = vrot.slane %v2717_v34, %v9770_v32 }
 0x32a   : > { %v2733_v57 = vcombine.low %v9786_v18, %v9792_v49  ;;  %1815 = vbcast.lane.b32.xlu1 %v1801_v51, 280  ;;  %1811 = vbcast.lane.b32.xlu0 %v1801_v51, 272 }
 0x32b   : > { %v9821_v58 = vrot.slane %v2749_v55, %v9807_v63 }
 0x32c   : > { %v9800_v22 = vrot.slane %v2733_v57, %v9770_v32  ;;  %v9802_v4 = vpop.permute.xlu1 %1570  ;;  %v9804_v36 = vpop.permute.xlu0 %1566 }
 0x32d   : > { %15124 = vst [vmem:[#allocation278_spill] sm:$0xff] %v9802_v4  ;;  %15125 = vst [vmem:[#allocation279_spill] sm:$0xff] %v9804_v36 }
 0x32e   : > { %1823 = vbcast.lane.b32.xlu1 %v1801_v51, 296  ;;  %v2781_v39 = vcombine.low %v9812_v50, %v9800_v22  ;;  %1819 = vbcast.lane.b32.xlu0 %v1801_v51, 288  ;;  %15128 = vst [vmem:[#allocation282_spill] sm:$0xff] %v9821_v58 }
 0x330   : > { %v9816_v57 = vpop.permute.xlu1 %1578  ;;  %v9818_v48 = vpop.permute.xlu0 %1574  ;;  %v9824_v1 = vrot.slane %v2781_v39, %v9807_v63 }
 0x331   : > { %15126 = vst [vmem:[#allocation280_spill] sm:$0xff] %v9816_v57  ;;  %15127 = vst [vmem:[#allocation281_spill] sm:$0xff] %v9818_v48 }
 0x332   : > { %15129 = vst [vmem:[#allocation283_spill] sm:$0xff] %v9824_v1  ;;  %1831 = vbcast.lane.b32.xlu1 %v1801_v51, 312  ;;  %1827 = vbcast.lane.b32.xlu0 %v1801_v51, 304 }
 0x334   : > { %v9830_v4 = vpop.permute.xlu1 %1586  ;;  %v9832_v57 = vpop.permute.xlu0 %1582 }
 0x335   : > { %15130 = vst [vmem:[#allocation284_spill] sm:$0xff] %v9830_v4  ;;  %15131 = vst [vmem:[#allocation285_spill] sm:$0xff] %v9832_v57  ;;  %v1871_v4 = vrot.slane %v9841_v19, %v8988_v2 }
 0x336   : > { %1842 = vbcast.lane.b32.xlu1 %v1836_v53, 264  ;;  %1838 = vbcast.lane.b32.xlu0 %v1836_v53, 256 }
 0x338   : > { %v9834_v55 = vpop.permute.xlu1 %1597  ;;  %v1594_v48 = vpop.permute.xlu0 %1593 }
 0x339   : > { %15132 = vst [vmem:[#allocation286_spill] sm:$0xff] %v9834_v55  ;;  %v2493_v62 = vsel %vm2428_vm0, %v9179_v46, %v1594_v48  ;;  %v1941_v46 = vrot.slane %v9841_v19, %v9001_v7 }
 0x33a   : > { %1850 = vbcast.lane.b32.xlu1 %v1836_v53, 280  ;;  %1846 = vbcast.lane.b32.xlu0 %v1836_v53, 272 }
 0x33c   : > { %v9836_v39 = vpop.permute.xlu1 %1605  ;;  %v9838_v36 = vpop.permute.xlu0 %1601 }
 0x33d   : > { %15133 = vst [vmem:[#allocation287_spill] sm:$0xff] %v9836_v39  ;;  %15134 = vst [vmem:[#allocation288_spill] sm:$0xff] %v9838_v36 }
 0x33e   : > { %1858 = vbcast.lane.b32.xlu1 %v1836_v53, 296  ;;  %1854 = vbcast.lane.b32.xlu0 %v1836_v53, 288 }
 0x340   : > { %v9843_v51 = vpop.permute.xlu1 %1613  ;;  %v9845_v34 = vpop.permute.xlu0 %1609 }
 0x341   : > { %15135 = vst [vmem:[#allocation289_spill] sm:$0xff] %v9843_v51  ;;  %15136 = vst [vmem:[#allocation290_spill] sm:$0xff] %v9845_v34 }
 0x342   : > { %1866 = vbcast.lane.b32.xlu1 %v1836_v53, 312  ;;  %1862 = vbcast.lane.b32.xlu0 %v1836_v53, 304 }
 0x344   : > { %v9849_v57 = vpop.permute.xlu1 %1621  ;;  %v9851_v55 = vpop.permute.xlu0 %1617 }
 0x345   : > { %15137 = vst [vmem:[#allocation291_spill] sm:$0xff] %v9849_v57  ;;  %15138 = vst [vmem:[#allocation292_spill] sm:$0xff] %v9851_v55  ;;  %v1906_v57 = vrot.slane %v9841_v19, %v8996_v5 }
 0x346   : > { %1877 = vbcast.lane.b32.xlu1 %v1871_v4, 264  ;;  %1873 = vbcast.lane.b32.xlu0 %v1871_v4, 256 }
 0x348   : > { %v9853_v39 = vpop.permute.xlu1 %1632  ;;  %v1629_v36 = vpop.permute.xlu0 %1628 }
 0x349   : > { %15139 = vst [vmem:[#allocation293_spill] sm:$0xff] %v9853_v39 }
 0x34a   : > { %1885 = vbcast.lane.b32.xlu1 %v1871_v4, 280  ;;  %1881 = vbcast.lane.b32.xlu0 %v1871_v4, 272 }
 0x34c   : > { %v9855_v56 = vpop.permute.xlu1 %1640  ;;  %v9857_v51 = vpop.permute.xlu0 %1636 }
 0x34d   : > { %15140 = vst [vmem:[#allocation294_spill] sm:$0xff] %v9855_v56  ;;  %15141 = vst [vmem:[#allocation295_spill] sm:$0xff] %v9857_v51 }
 0x34e   : > { %1893 = vbcast.lane.b32.xlu1 %v1871_v4, 296  ;;  %1889 = vbcast.lane.b32.xlu0 %v1871_v4, 288 }
 0x350   : > { %v9859_v34 = vpop.permute.xlu1 %1648  ;;  %v9861_v53 = vpop.permute.xlu0 %1644 }
 0x351   : > { %15142 = vst [vmem:[#allocation296_spill] sm:$0xff] %v9859_v34  ;;  %15143 = vst [vmem:[#allocation297_spill] sm:$0xff] %v9861_v53 }
 0x352   : > { %1901 = vbcast.lane.b32.xlu1 %v1871_v4, 312  ;;  %1897 = vbcast.lane.b32.xlu0 %v1871_v4, 304 }
 0x354   : > { %v9865_v55 = vpop.permute.xlu1 %1656  ;;  %v9867_v39 = vpop.permute.xlu0 %1652 }
 0x355   : > { %15144 = vst [vmem:[#allocation298_spill] sm:$0xff] %v9865_v55  ;;  %15145 = vst [vmem:[#allocation299_spill] sm:$0xff] %v9867_v39 }
 0x356   : > { %1912 = vbcast.lane.b32.xlu1 %v1906_v57, 264  ;;  %1908 = vbcast.lane.b32.xlu0 %v1906_v57, 256 }
 0x358   : > { %v9869_v56 = vpop.permute.xlu1 %1667  ;;  %v1664_v51 = vpop.permute.xlu0 %1663 }
 0x359   : > { %15146 = vst [vmem:[#allocation300_spill] sm:$0xff] %v9869_v56  ;;  %v2509_v34 = vsel %vm2428_vm0, %v9218_v23, %v1664_v51 }
 0x35a   : > { %1920 = vbcast.lane.b32.xlu1 %v1906_v57, 280  ;;  %v2822_v53 = vcombine.high %v2493_v62, %v2509_v34  ;;  %1916 = vbcast.lane.b32.xlu0 %v1906_v57, 272 }
 0x35c   : > { %v9875_v29 = vpop.permute.xlu1 %1675  ;;  %v9877_v4 = vpop.permute.xlu0 %1671 }
 0x35d   : > { %15147 = vst [vmem:[#allocation301_spill] sm:$0xff] %v9875_v29  ;;  %15148 = vst [vmem:[#allocation302_spill] sm:$0xff] %v9877_v4  ;;  %v2821_v29 = vcombine.low %v2493_v62, %v2509_v34 }
 0x35e   : > { %1928 = vbcast.lane.b32.xlu1 %v1906_v57, 296  ;;  %1924 = vbcast.lane.b32.xlu0 %v1906_v57, 288 }
 0x360   : > { %v9879_v55 = vpop.permute.xlu1 %1683  ;;  %v9881_v39 = vpop.permute.xlu0 %1679 }
 0x361   : > { %15149 = vst [vmem:[#allocation303_spill] sm:$0xff] %v9879_v55  ;;  %15150 = vst [vmem:[#allocation304_spill] sm:$0xff] %v9881_v39  ;;  %v2501_v55 = vsel %vm2428_vm0, %v9200_v14, %v1629_v36 }
 0x362   : > { %1936 = vbcast.lane.b32.xlu1 %v1906_v57, 312  ;;  %1932 = vbcast.lane.b32.xlu0 %v1906_v57, 304 }
 0x364   : > { %v9885_v48 = vpop.permute.xlu1 %1691  ;;  %v9887_v23 = vpop.permute.xlu0 %1687 }
 0x365   : > { %15151 = vst [vmem:[#allocation305_spill] sm:$0xff] %v9885_v48  ;;  %15152 = vst [vmem:[#allocation306_spill] sm:$0xff] %v9887_v23  ;;  %v9898_v48 = vrot.slane %v2821_v29, %v9770_v32  ;;  %v9901_v23 = vrot.slane %v2822_v53, %v9770_v32 }
 0x366   : > { %1947 = vbcast.lane.b32.xlu1 %v1941_v46, 264  ;;  %1943 = vbcast.lane.b32.xlu0 %v1941_v46, 256 }
 0x368   : > { %v9889_v51 = vpop.permute.xlu1 %1702  ;;  %v1699_v4 = vpop.permute.xlu0 %1698 }
 0x369   : > { %15153 = vst [vmem:[#allocation307_spill] sm:$0xff] %v9889_v51  ;;  %v2517_v39 = vsel %vm2428_vm0, %v9236_v43, %v1699_v4 }
 0x36a   : > { %1955 = vbcast.lane.b32.xlu1 %v1941_v46, 280  ;;  %v2837_v56 = vcombine.low %v2501_v55, %v2517_v39  ;;  %v2838_v37 = vcombine.high %v2501_v55, %v2517_v39  ;;  %1951 = vbcast.lane.b32.xlu0 %v1941_v46, 272 }
 0x36c   : > { %v9895_v57 = vpop.permute.xlu1 %1710  ;;  %v9904_v62 = vrot.slane %v2837_v56, %v9770_v32  ;;  %v9907_v14 = vrot.slane %v2838_v37, %v9770_v32  ;;  %v9909_v36 = vpop.permute.xlu0 %1706  ;;  %v1976_v37 = vrot.slane %v9841_v19, %v9006_v9 }
 0x36d   : > { %15154 = vst [vmem:[#allocation308_spill] sm:$0xff] %v9895_v57  ;;  %15155 = vst [vmem:[#allocation309_spill] sm:$0xff] %v9909_v36 }
 0x36e   : > { %1963 = vbcast.lane.b32.xlu1 %v1941_v46, 296  ;;  %1959 = vbcast.lane.b32.xlu0 %v1941_v46, 288 }
 0x370   : > { %v9917_v55 = vpop.permute.xlu1 %1718  ;;  %v9919_v56 = vpop.permute.xlu0 %1714 }
 0x371   : > { %15156 = vst [vmem:[#allocation310_spill] sm:$0xff] %v9917_v55  ;;  %15157 = vst [vmem:[#allocation311_spill] sm:$0xff] %v9919_v56 }
 0x372   : > { %1971 = vbcast.lane.b32.xlu1 %v1941_v46, 312  ;;  %1967 = vbcast.lane.b32.xlu0 %v1941_v46, 304 }
 0x374   : > { %v9923_v39 = vpop.permute.xlu1 %1726  ;;  %v9925_v53 = vpop.permute.xlu0 %1722 }
 0x375   : > { %15158 = vst [vmem:[#allocation312_spill] sm:$0xff] %v9923_v39  ;;  %15159 = vst [vmem:[#allocation313_spill] sm:$0xff] %v9925_v53  ;;  %v2011_v39 = vrot.slane %v9841_v19, %v9011_v11 }
 0x376   : > { %1982 = vbcast.lane.b32.xlu1 %v1976_v37, 264  ;;  %1978 = vbcast.lane.b32.xlu0 %v1976_v37, 256 }
 0x378   : > { %v9927_v4 = vpop.permute.xlu1 %1737  ;;  %v1734_v34 = vpop.permute.xlu0 %1733 }
 0x379   : > { %15160 = vst [vmem:[#allocation314_spill] sm:$0xff] %v9927_v4  ;;  %v2525_v4 = vsel %vm2428_vm0, %v9254_v45, %v1734_v34  ;;  %v2081_v45 = vrot.slane %v9841_v19, %v9021_v15 }
 0x37a   : > { %1990 = vbcast.lane.b32.xlu1 %v1976_v37, 280  ;;  %1986 = vbcast.lane.b32.xlu0 %v1976_v37, 272 }
 0x37c   : > { %v9929_v29 = vpop.permute.xlu1 %1745  ;;  %v9931_v43 = vpop.permute.xlu0 %1741 }
 0x37d   : > { %15161 = vst [vmem:[#allocation315_spill] sm:$0xff] %v9929_v29  ;;  %15162 = vst [vmem:[#allocation316_spill] sm:$0xff] %v9931_v43 }
 0x37e   : > { %1998 = vbcast.lane.b32.xlu1 %v1976_v37, 296  ;;  %1994 = vbcast.lane.b32.xlu0 %v1976_v37, 288 }
 0x380   : > { %v9933_v55 = vpop.permute.xlu1 %1753  ;;  %v9935_v46 = vpop.permute.xlu0 %1749 }
 0x381   : > { %15163 = vst [vmem:[#allocation317_spill] sm:$0xff] %v9933_v55  ;;  %15164 = vst [vmem:[#allocation318_spill] sm:$0xff] %v9935_v46 }
 0x382   : > { %2006 = vbcast.lane.b32.xlu1 %v1976_v37, 312  ;;  %2002 = vbcast.lane.b32.xlu0 %v1976_v37, 304 }
 0x384   : > { %v9939_v53 = vpop.permute.xlu1 %1761  ;;  %v9941_v56 = vpop.permute.xlu0 %1757 }
 0x385   : > { %15165 = vst [vmem:[#allocation319_spill] sm:$0xff] %v9939_v53  ;;  %15166 = vst [vmem:[#allocation320_spill] sm:$0xff] %v9941_v56  ;;  %v2046_v53 = vrot.slane %v9841_v19, %v9016_v13 }
 0x386   : > { %2017 = vbcast.lane.b32.xlu1 %v2011_v39, 264  ;;  %2013 = vbcast.lane.b32.xlu0 %v2011_v39, 256 }
 0x388   : > { %v9943_v29 = vpop.permute.xlu1 %1772  ;;  %v1769_v57 = vpop.permute.xlu0 %1768 }
 0x389   : > { %15167 = vst [vmem:[#allocation321_spill] sm:$0xff] %v9943_v29 }
 0x38a   : > { %2025 = vbcast.lane.b32.xlu1 %v2011_v39, 280  ;;  %2021 = vbcast.lane.b32.xlu0 %v2011_v39, 272 }
 0x38c   : > { %v9945_v43 = vpop.permute.xlu1 %1780  ;;  %v9947_v55 = vpop.permute.xlu0 %1776 }
 0x38d   : > { %15168 = vst [vmem:[#allocation322_spill] sm:$0xff] %v9945_v43  ;;  %15169 = vst [vmem:[#allocation323_spill] sm:$0xff] %v9947_v55 }
 0x38e   : > { %2033 = vbcast.lane.b32.xlu1 %v2011_v39, 296  ;;  %2029 = vbcast.lane.b32.xlu0 %v2011_v39, 288 }
 0x390   : > { %v9949_v46 = vpop.permute.xlu1 %1788  ;;  %v9951_v37 = vpop.permute.xlu0 %1784 }
 0x391   : > { %15170 = vst [vmem:[#allocation324_spill] sm:$0xff] %v9949_v46  ;;  %15171 = vst [vmem:[#allocation325_spill] sm:$0xff] %v9951_v37 }
 0x392   : > { %2041 = vbcast.lane.b32.xlu1 %v2011_v39, 312  ;;  %2037 = vbcast.lane.b32.xlu0 %v2011_v39, 304 }
 0x394   : > { %v9955_v56 = vpop.permute.xlu1 %1796  ;;  %v9957_v36 = vpop.permute.xlu0 %1792 }
 0x395   : > { %15172 = vst [vmem:[#allocation326_spill] sm:$0xff] %v9955_v56  ;;  %15173 = vst [vmem:[#allocation327_spill] sm:$0xff] %v9957_v36 }
 0x396   : > { %2052 = vbcast.lane.b32.xlu1 %v2046_v53, 264  ;;  %2048 = vbcast.lane.b32.xlu0 %v2046_v53, 256 }
 0x398   : > { %v9959_v43 = vpop.permute.xlu1 %1807  ;;  %v1804_v55 = vpop.permute.xlu0 %1803 }
 0x399   : > { %15174 = vst [vmem:[#allocation328_spill] sm:$0xff] %v9959_v43  ;;  %v2541_v46 = vsel %vm2428_vm0, %v9290_v52, %v1804_v55 }
 0x39a   : > { %2060 = vbcast.lane.b32.xlu1 %v2046_v53, 280  ;;  %v2854_v37 = vcombine.high %v2525_v4, %v2541_v46  ;;  %2056 = vbcast.lane.b32.xlu0 %v2046_v53, 272 }
 0x39c   : > { %v9965_v29 = vpop.permute.xlu1 %1815  ;;  %v9967_v39 = vpop.permute.xlu0 %1811 }
 0x39d   : > { %15175 = vst [vmem:[#allocation329_spill] sm:$0xff] %v9965_v29  ;;  %15176 = vst [vmem:[#allocation330_spill] sm:$0xff] %v9967_v39  ;;  %v2853_v29 = vcombine.low %v2525_v4, %v2541_v46  ;;  %v2868_v4 = vrot.slane %v2854_v37, %v9770_v32 }
 0x39e   : > { %2068 = vbcast.lane.b32.xlu1 %v2046_v53, 296  ;;  %2064 = vbcast.lane.b32.xlu0 %v2046_v53, 288 }
 0x3a0   : > { %v9969_v56 = vpop.permute.xlu1 %1823  ;;  %v9971_v36 = vpop.permute.xlu0 %1819 }
 0x3a1   : > { %15177 = vst [vmem:[#allocation331_spill] sm:$0xff] %v9969_v56  ;;  %15178 = vst [vmem:[#allocation332_spill] sm:$0xff] %v9971_v36  ;;  %v2533_v56 = vsel %vm2428_vm0, %v9272_v60, %v1769_v57 }
 0x3a2   : > { %2076 = vbcast.lane.b32.xlu1 %v2046_v53, 312  ;;  %2072 = vbcast.lane.b32.xlu0 %v2046_v53, 304  ;;  %v2885_v53 = vcombine.low %v9898_v48, %v9904_v62 }
 0x3a4   : > { %v9975_v34 = vpop.permute.xlu1 %1831  ;;  %v9977_v52 = vpop.permute.xlu0 %1827 }
 0x3a5   : > { %15179 = vst [vmem:[#allocation333_spill] sm:$0xff] %v9975_v34  ;;  %15180 = vst [vmem:[#allocation334_spill] sm:$0xff] %v9977_v52  ;;  %v2861_v52 = vrot.slane %v2853_v29, %v9770_v32 }
 0x3a6   : > { %2087 = vbcast.lane.b32.xlu1 %v2081_v45, 264  ;;  %2083 = vbcast.lane.b32.xlu0 %v2081_v45, 256 }
 0x3a8   : > { %v9979_v55 = vpop.permute.xlu1 %1842  ;;  %v1839_v39 = vpop.permute.xlu0 %1838 }
 0x3a9   : > { %15181 = vst [vmem:[#allocation335_spill] sm:$0xff] %v9979_v55  ;;  %v2549_v36 = vsel %vm2428_vm0, %v9308_v0, %v1839_v39 }
 0x3aa   : > { %2095 = vbcast.lane.b32.xlu1 %v2081_v45, 280  ;;  %v2869_v43 = vcombine.low %v2533_v56, %v2549_v36  ;;  %v2870_v51 = vcombine.high %v2533_v56, %v2549_v36  ;;  %2091 = vbcast.lane.b32.xlu0 %v2081_v45, 272 }
 0x3ac   : > { %v9987_v34 = vpop.permute.xlu1 %1850  ;;  %v2877_v46 = vrot.slane %v2869_v43, %v9770_v32  ;;  %v2884_v60 = vrot.slane %v2870_v51, %v9770_v32  ;;  %v9993_v57 = vpop.permute.xlu0 %1846  ;;  %v2116_v51 = vrot.slane %v9841_v19, %v9026_v17  ;;  %v10022_v19 = vld [vmem:[%s8979_s21 + $0x38] sm:$0xff]  ;;  %s8792_s21 = smov 34  }
 0x3ad   : > { %15182 = vst [vmem:[#allocation336_spill] sm:$0xff] %v9987_v34  ;;  %15183 = vst [vmem:[#allocation337_spill] sm:$0xff] %v9993_v57  ;;  %v9998_v34 = vrot.slane %v2885_v53, %v9807_v63 }
 0x3ae   : > { %2103 = vbcast.lane.b32.xlu1 %v2081_v45, 296  ;;  %v2917_v0 = vcombine.low %v2861_v52, %v2877_v46  ;;  %v2918_v39 = vcombine.high %v2861_v52, %v2877_v46  ;;  %v2933_v36 = vcombine.low %v2868_v4, %v2884_v60  ;;  %v2934_v56 = vcombine.high %v2868_v4, %v2884_v60 }
 0x3af   : > { %2099 = vbcast.lane.b32.xlu0 %v2081_v45, 288  ;;  %15185 = vst [vmem:[#allocation339_spill] sm:$0xff] %v9998_v34 }
 0x3b0   : > { %v9995_v55 = vpop.permute.xlu1 %1858  ;;  %v10001_v29 = vrot.slane %v2917_v0, %v9807_v63  ;;  %v10003_v37 = vpop.permute.xlu0 %1854  ;;  %v10039_v57 = vrot.slane %v2934_v56, %v9807_v63 }
 0x3b1   : > { %15184 = vst [vmem:[#allocation338_spill] sm:$0xff] %v9995_v55  ;;  %15187 = vst [vmem:[#allocation341_spill] sm:$0xff] %v10003_v37  ;;  %v10034_v55 = vrot.slane %v2933_v36, %v9807_v63  ;;  %v15203_v36 = vcombine.high %v9901_v23, %v9907_v14 }
 0x3b2   : > { %15186 = vst [vmem:[#allocation340_spill] sm:$0xff] %v10001_v29  ;;  %2111 = vbcast.lane.b32.xlu1 %v2081_v45, 312  ;;  %15197 = vst [vmem:[#allocation351_spill] sm:$0xff] %v10039_v57 }
 0x3b3   : > { %2107 = vbcast.lane.b32.xlu0 %v2081_v45, 304  ;;  %15195 = vst [vmem:[#allocation349_spill] sm:$0xff] %v10034_v55  ;;  %v10059_v56 = vrot.slane %v15203_v36, %v9807_v63 }
 0x3b4   : > { %v10009_v52 = vpop.permute.xlu1 %1866  ;;  %v10011_v4 = vpop.permute.xlu0 %1862 }
 0x3b5   : > { %15188 = vst [vmem:[#allocation342_spill] sm:$0xff] %v10009_v52  ;;  %15189 = vst [vmem:[#allocation343_spill] sm:$0xff] %v10011_v4  ;;  %v2151_v52 = vrot.slane %v10022_v19, %v8988_v2  ;;  %v10031_v4 = vrot.slane %v2918_v39, %v9807_v63  ;;  %v15201_v2 = vcombine.low %v9901_v23, %v9907_v14 }
 0x3b6   : > { %2122 = vbcast.lane.b32.xlu1 %v2116_v51, 264  ;;  %15204 = vst [vmem:[#allocation355_spill] sm:$0xff] %v10059_v56 }
 0x3b7   : > { %2118 = vbcast.lane.b32.xlu0 %v2116_v51, 256  ;;  %15194 = vst [vmem:[#allocation348_spill] sm:$0xff] %v10031_v4  ;;  %v10053_v39 = vrot.slane %v15201_v2, %v9807_v63  ;;  %v2186_v2 = vrot.slane %v10022_v19, %v8996_v5 }
 0x3b8   : > { %v10013_v53 = vpop.permute.xlu1 %1877  ;;  %v10015_v46 = vpop.permute.xlu0 %1873 }
 0x3b9   : > { %15202 = vst [vmem:[#allocation354_spill] sm:$0xff] %v10053_v39 }
 0x3ba   : > { %2130 = vbcast.lane.b32.xlu1 %v2116_v51, 280 }
 0x3bb   : > { %2126 = vbcast.lane.b32.xlu0 %v2116_v51, 272 }
 0x3bc   : > { %v10017_v60 = vpop.permute.xlu1 %1885  ;;  %v10019_v0 = vpop.permute.xlu0 %1881 }
 0x3bd   : > { %15190 = vst [vmem:[#allocation344_spill] sm:$0xff] %v10017_v60  ;;  %15191 = vst [vmem:[#allocation345_spill] sm:$0xff] %v10019_v0 }
 0x3be   : > { %2138 = vbcast.lane.b32.xlu1 %v2116_v51, 296 }
 0x3bf   : > { %2134 = vbcast.lane.b32.xlu0 %v2116_v51, 288 }
 0x3c0   : > { %v10024_v45 = vpop.permute.xlu1 %1893  ;;  %v10026_v43 = vpop.permute.xlu0 %1889 }
 0x3c1   : > { %15192 = vst [vmem:[#allocation346_spill] sm:$0xff] %v10024_v45  ;;  %15193 = vst [vmem:[#allocation347_spill] sm:$0xff] %v10026_v43  ;;  %v15199_v45 = vcombine.high %v9898_v48, %v9904_v62 }
 0x3c2   : > { %2146 = vbcast.lane.b32.xlu1 %v2116_v51, 312 }
 0x3c3   : > { %2142 = vbcast.lane.b32.xlu0 %v2116_v51, 304  ;;  %v10047_v43 = vrot.slane %v15199_v45, %v9807_v63 }
 0x3c4   : > { %v10036_v37 = vpop.permute.xlu1 %1901  ;;  %v10041_v60 = vpop.permute.xlu0 %1897 }
 0x3c5   : > { %15196 = vst [vmem:[#allocation350_spill] sm:$0xff] %v10036_v37  ;;  %15198 = vst [vmem:[#allocation352_spill] sm:$0xff] %v10041_v60 }
 0x3c6   : > { %15200 = vst [vmem:[#allocation353_spill] sm:$0xff] %v10047_v43  ;;  %2157 = vbcast.lane.b32.xlu1 %v2151_v52, 264 }
 0x3c7   : > { %2153 = vbcast.lane.b32.xlu0 %v2151_v52, 256 }
 0x3c8   : > { %v10061_v51 = vpop.permute.xlu1 %1912  ;;  %v10071_v37 = vpop.permute.xlu0 %1908 }
 0x3ca   : > { %2165 = vbcast.lane.b32.xlu1 %v2151_v52, 280 }
 0x3cb   : > { %2161 = vbcast.lane.b32.xlu0 %v2151_v52, 272 }
 0x3cc   : > { %v10077_v36 = vpop.permute.xlu1 %1920  ;;  %v10079_v48 = vpop.permute.xlu0 %1916 }
 0x3cd   : > { %15205 = vst [vmem:[#allocation356_spill] sm:$0xff] %v10077_v36  ;;  %15206 = vst [vmem:[#allocation357_spill] sm:$0xff] %v10079_v48 }
 0x3ce   : > { %2173 = vbcast.lane.b32.xlu1 %v2151_v52, 296 }
 0x3cf   : > { %2169 = vbcast.lane.b32.xlu0 %v2151_v52, 288 }
 0x3d0   : > { %v10081_v45 = vpop.permute.xlu1 %1928  ;;  %v10083_v62 = vpop.permute.xlu0 %1924 }
 0x3d1   : > { %15207 = vst [vmem:[#allocation358_spill] sm:$0xff] %v10081_v45  ;;  %15208 = vst [vmem:[#allocation359_spill] sm:$0xff] %v10083_v62 }
 0x3d2   : > { %2181 = vbcast.lane.b32.xlu1 %v2151_v52, 312 }
 0x3d3   : > { %2177 = vbcast.lane.b32.xlu0 %v2151_v52, 304 }
 0x3d4   : > { %v10087_v23 = vpop.permute.xlu1 %1936  ;;  %v10089_v14 = vpop.permute.xlu0 %1932 }
 0x3d5   : > { %15209 = vst [vmem:[#allocation360_spill] sm:$0xff] %v10087_v23  ;;  %15210 = vst [vmem:[#allocation361_spill] sm:$0xff] %v10089_v14  ;;  %v2221_v23 = vrot.slane %v10022_v19, %v9001_v7 }
 0x3d6   : > { %2192 = vbcast.lane.b32.xlu1 %v2186_v2, 264 }
 0x3d7   : > { %2188 = vbcast.lane.b32.xlu0 %v2186_v2, 256 }
 0x3d8   : > { %v10091_v60 = vpop.permute.xlu1 %1947  ;;  %v10093_v36 = vpop.permute.xlu0 %1943 }
 0x3da   : > { %2200 = vbcast.lane.b32.xlu1 %v2186_v2, 280 }
 0x3db   : > { %2196 = vbcast.lane.b32.xlu0 %v2186_v2, 272 }
 0x3dc   : > { %v10095_v45 = vpop.permute.xlu1 %1955  ;;  %v10097_v62 = vpop.permute.xlu0 %1951 }
 0x3dd   : > { %15211 = vst [vmem:[#allocation362_spill] sm:$0xff] %v10095_v45  ;;  %15212 = vst [vmem:[#allocation363_spill] sm:$0xff] %v10097_v62 }
 0x3de   : > { %2208 = vbcast.lane.b32.xlu1 %v2186_v2, 296 }
 0x3df   : > { %2204 = vbcast.lane.b32.xlu0 %v2186_v2, 288 }
 0x3e0   : > { %v10099_v5 = vpop.permute.xlu1 %1963  ;;  %v10101_v52 = vpop.permute.xlu0 %1959 }
 0x3e1   : > { %15213 = vst [vmem:[#allocation364_spill] sm:$0xff] %v10099_v5  ;;  %15214 = vst [vmem:[#allocation365_spill] sm:$0xff] %v10101_v52 }
 0x3e2   : > { %2216 = vbcast.lane.b32.xlu1 %v2186_v2, 312 }
 0x3e3   : > { %2212 = vbcast.lane.b32.xlu0 %v2186_v2, 304  ;;  %v2256_v2 = vrot.slane %v10022_v19, %v9006_v9 }
 0x3e4   : > { %v10105_v14 = vpop.permute.xlu1 %1971  ;;  %v10107_v57 = vpop.permute.xlu0 %1967 }
 0x3e5   : > { %15215 = vst [vmem:[#allocation366_spill] sm:$0xff] %v10105_v14  ;;  %15216 = vst [vmem:[#allocation367_spill] sm:$0xff] %v10107_v57 }
 0x3e6   : > { %2227 = vbcast.lane.b32.xlu1 %v2221_v23, 264 }
 0x3e7   : > { %2223 = vbcast.lane.b32.xlu0 %v2221_v23, 256 }
 0x3e8   : > { %v10109_v45 = vpop.permute.xlu1 %1982  ;;  %v1979_v56 = vpop.permute.xlu0 %1978 }
 0x3ea   : > { %2235 = vbcast.lane.b32.xlu1 %v2221_v23, 280 }
 0x3eb   : > { %2231 = vbcast.lane.b32.xlu0 %v2221_v23, 272 }
 0x3ec   : > { %v10111_v55 = vpop.permute.xlu1 %1990  ;;  %v10113_v5 = vpop.permute.xlu0 %1986 }
 0x3ed   : > { %15217 = vst [vmem:[#allocation368_spill] sm:$0xff] %v10111_v55 }
 0x3ee   : > { %2243 = vbcast.lane.b32.xlu1 %v2221_v23, 296 }
 0x3ef   : > { %2239 = vbcast.lane.b32.xlu0 %v2221_v23, 288 }
 0x3f0   : > { %v10115_v52 = vpop.permute.xlu1 %1998  ;;  %v10117_v7 = vpop.permute.xlu0 %1994 }
 0x3f1   : > { %15218 = vst [vmem:[#allocation369_spill] sm:$0xff] %v10115_v52  ;;  %15219 = vst [vmem:[#allocation370_spill] sm:$0xff] %v10117_v7 }
 0x3f2   : > { %2251 = vbcast.lane.b32.xlu1 %v2221_v23, 312 }
 0x3f3   : > { %2247 = vbcast.lane.b32.xlu0 %v2221_v23, 304  ;;  %v2291_v23 = vrot.slane %v10022_v19, %v9011_v11 }
 0x3f4   : > { %v10121_v14 = vpop.permute.xlu1 %2006  ;;  %v10123_v57 = vpop.permute.xlu0 %2002 }
 0x3f5   : > { %15220 = vst [vmem:[#allocation371_spill] sm:$0xff] %v10121_v14  ;;  %15221 = vst [vmem:[#allocation372_spill] sm:$0xff] %v10123_v57 }
 0x3f6   : > { %2262 = vbcast.lane.b32.xlu1 %v2256_v2, 264 }
 0x3f7   : > { %2258 = vbcast.lane.b32.xlu0 %v2256_v2, 256 }
 0x3f8   : > { %v10125_v55 = vpop.permute.xlu1 %2017  ;;  %v2014_v39 = vpop.permute.xlu0 %2013 }
 0x3fa   : > { %2270 = vbcast.lane.b32.xlu1 %v2256_v2, 280 }
 0x3fb   : > { %2266 = vbcast.lane.b32.xlu0 %v2256_v2, 272 }
 0x3fc   : > { %v10127_v4 = vpop.permute.xlu1 %2025  ;;  %v10129_v52 = vpop.permute.xlu0 %2021 }
 0x3fd   : > { %15222 = vst [vmem:[#allocation373_spill] sm:$0xff] %v10127_v4  ;;  %15223 = vst [vmem:[#allocation374_spill] sm:$0xff] %v10129_v52 }
 0x3fe   : > { %2278 = vbcast.lane.b32.xlu1 %v2256_v2, 296 }
 0x3ff   : > { %2274 = vbcast.lane.b32.xlu0 %v2256_v2, 288 }
 0x400   : > { %v10131_v7 = vpop.permute.xlu1 %2033  ;;  %v10133_v9 = vpop.permute.xlu0 %2029 }
 0x401   : > { %15224 = vst [vmem:[#allocation375_spill] sm:$0xff] %v10131_v7  ;;  %15225 = vst [vmem:[#allocation376_spill] sm:$0xff] %v10133_v9 }
 0x402   : > { %2286 = vbcast.lane.b32.xlu1 %v2256_v2, 312 }
 0x403   : > { %2282 = vbcast.lane.b32.xlu0 %v2256_v2, 304  ;;  %v2326_v2 = vrot.slane %v10022_v19, %v9016_v13 }
 0x404   : > { %v10137_v14 = vpop.permute.xlu1 %2041  ;;  %v10139_v57 = vpop.permute.xlu0 %2037 }
 0x405   : > { %15226 = vst [vmem:[#allocation377_spill] sm:$0xff] %v10137_v14  ;;  %15227 = vst [vmem:[#allocation378_spill] sm:$0xff] %v10139_v57 }
 0x406   : > { %2297 = vbcast.lane.b32.xlu1 %v2291_v23, 264 }
 0x407   : > { %2293 = vbcast.lane.b32.xlu0 %v2291_v23, 256 }
 0x408   : > { %v10141_v4 = vpop.permute.xlu1 %2052  ;;  %v2049_v43 = vpop.permute.xlu0 %2048 }
 0x40a   : > { %2305 = vbcast.lane.b32.xlu1 %v2291_v23, 280 }
 0x40b   : > { %2301 = vbcast.lane.b32.xlu0 %v2291_v23, 272 }
 0x40c   : > { %v10143_v0 = vpop.permute.xlu1 %2060  ;;  %v10145_v7 = vpop.permute.xlu0 %2056 }
 0x40d   : > { %15228 = vst [vmem:[#allocation379_spill] sm:$0xff] %v10143_v0 }
 0x40e   : > { %2313 = vbcast.lane.b32.xlu1 %v2291_v23, 296 }
 0x40f   : > { %2309 = vbcast.lane.b32.xlu0 %v2291_v23, 288 }
 0x410   : > { %v10147_v9 = vpop.permute.xlu1 %2068  ;;  %v10149_v11 = vpop.permute.xlu0 %2064 }
 0x411   : > { %15229 = vst [vmem:[#allocation380_spill] sm:$0xff] %v10147_v9  ;;  %15230 = vst [vmem:[#allocation381_spill] sm:$0xff] %v10149_v11 }
 0x412   : > { %2321 = vbcast.lane.b32.xlu1 %v2291_v23, 312 }
 0x413   : > { %2317 = vbcast.lane.b32.xlu0 %v2291_v23, 304  ;;  %v10169_v23 = vsel %vm2428_vm0, %v9383_v24, %v1979_v56 }
 0x414   : > { %v10153_v14 = vpop.permute.xlu1 %2076  ;;  %v10155_v57 = vpop.permute.xlu0 %2072 }
 0x415   : > { %15231 = vst [vmem:[#allocation382_spill] sm:$0xff] %v10153_v14  ;;  %15232 = vst [vmem:[#allocation383_spill] sm:$0xff] %v10155_v57  ;;  %v2361_v14 = vrot.slane %v10022_v19, %v9021_v15  ;;  %v10176_v57 = vsel %vm2428_vm0, %v9347_v6, %v10071_v37  ;;  %v10192_v15 = vsel %vm2428_vm0, %v9326_v16, %v10015_v46 }
 0x416   : > { %2332 = vbcast.lane.b32.xlu1 %v2326_v2, 264  ;;  %v4877_v24 = vcombine.low %v10176_v57, %v10169_v23  ;;  %v10202_v37 = vsel %vm2428_vm0, %v9401_v42, %v2014_v39 }
 0x417   : > { %2328 = vbcast.lane.b32.xlu0 %v2326_v2, 256 }
 0x418   : > { %v10157_v0 = vpop.permute.xlu1 %2087  ;;  %v2084_v52 = vpop.permute.xlu0 %2083 }
 0x419   : > { %v10196_v6 = vsel %vm2428_vm0, %v9437_v25, %v2084_v52  ;;  %v10213_v25 = vsel %vm2428_vm0, %v9419_v21, %v2049_v43 }
 0x41a   : > { %2340 = vbcast.lane.b32.xlu1 %v2326_v2, 280  ;;  %v4893_v16 = vcombine.low %v10202_v37, %v10196_v6 }
 0x41b   : > { %2336 = vbcast.lane.b32.xlu0 %v2326_v2, 272 }
 0x41c   : > { %v10159_v62 = vpop.permute.xlu1 %2095  ;;  %v10161_v9 = vpop.permute.xlu0 %2091 }
 0x41d   : > { %15233 = vst [vmem:[#allocation384_spill] sm:$0xff] %v10159_v62  ;;  %15234 = vst [vmem:[#allocation385_spill] sm:$0xff] %v10161_v9 }
 0x41e   : > { %2348 = vbcast.lane.b32.xlu1 %v2326_v2, 296 }
 0x41f   : > { %2344 = vbcast.lane.b32.xlu0 %v2326_v2, 288 }
 0x420   : > { %v10163_v11 = vpop.permute.xlu1 %2103 }
 0x421   : > { %15235 = vst [vmem:[#allocation386_spill] sm:$0xff] %v10163_v11  ;;  %v10165_v13 = vpop.permute.xlu0 %2099  ;;  %v10181_v11 = vsel %vm2428_vm0, %v9365_v31, %v10093_v36 }
 0x422   : > { %15236 = vst [vmem:[#allocation387_spill] sm:$0xff] %v10165_v13  ;;  %2356 = vbcast.lane.b32.xlu1 %v2326_v2, 312  ;;  %v4861_v31 = vcombine.low %v10192_v15, %v10181_v11 }
 0x423   : > { %2352 = vbcast.lane.b32.xlu0 %v2326_v2, 304  ;;  %v10207_v2 = vrot.slane %v4877_v24, %v9770_v32 }
 0x424   : > { %v10183_v13 = vpop.permute.xlu1 %2111  ;;  %v4869_v42 = vrot.slane %v4861_v31, %v9770_v32 }
 0x425   : > { %15237 = vst [vmem:[#allocation388_spill] sm:$0xff] %v10183_v13  ;;  %v10187_v56 = vpop.permute.xlu0 %2107 }
 0x426   : > { %15238 = vst [vmem:[#allocation389_spill] sm:$0xff] %v10187_v56  ;;  %2367 = vbcast.lane.b32.xlu1 %v2361_v14, 264  ;;  %v4925_v13 = vcombine.low %v4869_v42, %v10207_v2  ;;  %v4901_v56 = vrot.slane %v4893_v16, %v9770_v32  ;;  %v2396_v16 = vrot.slane %v10022_v19, %v9026_v17 }
 0x427   : > { %2363 = vbcast.lane.b32.xlu0 %v2361_v14, 256 }
 0x428   : > { %v10204_v36 = vpop.permute.xlu1 %2122  ;;  %v10232_v31 = vrot.slane %v4925_v13, %v9807_v63 }
 0x429   : > { %v2119_v46 = vpop.permute.xlu0 %2118 }
 0x42a   : > { %v10217_v52 = vsel %vm2428_vm0, %v9455_v10, %v2119_v46  ;;  %2375 = vbcast.lane.b32.xlu1 %v2361_v14, 280  ;;  %15241 = vst [vmem:[#allocation392_spill] sm:$0xff] %v10232_v31 }
 0x42b   : > { %v4909_v39 = vcombine.low %v10213_v25, %v10217_v52  ;;  %2371 = vbcast.lane.b32.xlu0 %v2361_v14, 272 }
 0x42c   : > { %v10222_v24 = vpop.permute.xlu1 %2130 }
 0x42d   : > { %15239 = vst [vmem:[#allocation390_spill] sm:$0xff] %v10222_v24  ;;  %v4917_v21 = vrot.slane %v4909_v39, %v9770_v32  ;;  %v10227_v43 = vpop.permute.xlu0 %2126  ;;  %v2782_v39 = vcombine.high %v9812_v50, %v9800_v22 }
 0x42e   : > { %2383 = vbcast.lane.b32.xlu1 %v2361_v14, 296 }
 0x42f   : > { %v4957_v10 = vcombine.low %v4901_v56, %v4917_v21  ;;  %2379 = vbcast.lane.b32.xlu0 %v2361_v14, 288 }
 0x430   : > { %v10229_v46 = vpop.permute.xlu1 %2138 }
 0x431   : > { %15240 = vst [vmem:[#allocation391_spill] sm:$0xff] %v10229_v46  ;;  %v10235_v62 = vrot.slane %v4957_v10, %v9807_v63  ;;  %v10237_v24 = vpop.permute.xlu0 %2134 }
 0x432   : > { %15243 = vst [vmem:[#allocation394_spill] sm:$0xff] %v10237_v24  ;;  %2391 = vbcast.lane.b32.xlu1 %v2361_v14, 312 }
 0x433   : > { %15242 = vst [vmem:[#allocation393_spill] sm:$0xff] %v10235_v62  ;;  %2387 = vbcast.lane.b32.xlu0 %v2361_v14, 304  ;;  %v2950_v14 = vcombine.high %v9998_v34, %v10001_v29  ;;  %v4958_v29 = vcombine.high %v4901_v56, %v4917_v21  ;;  %v4990_v22 = vcombine.high %v10232_v31, %v10235_v62 }
 0x434   : > { %v10243_v48 = vpop.permute.xlu1 %2146  ;;  %v2702_v21 = vcombine.high %v9747_v8, %v9740_v40 }
 0x435   : > { %15244 = vst [vmem:[#allocation395_spill] sm:$0xff] %v10243_v48  ;;  %v10245_v9 = vpop.permute.xlu0 %2142 }
 0x436   : > { %15245 = vst [vmem:[#allocation396_spill] sm:$0xff] %v10245_v9  ;;  %2402 = vbcast.lane.b32.xlu1 %v2396_v16, 264  ;;  %v2814_v9 = vcombine.high %v9821_v58, %v9824_v1  ;;  %v2716_v40 = vrot.slane %v2702_v21, %v9770_v32 }
 0x437   : > { %2398 = vbcast.lane.b32.xlu0 %v2396_v16, 256 }
 0x438   : > { %v10247_v13 = vpop.permute.xlu1 %2157 }
 0x439   : > { %v10249_v10 = vpop.permute.xlu0 %2153 }
 0x43a   : > { %2410 = vbcast.lane.b32.xlu1 %v2396_v16, 280 }
 0x43b   : > { %2406 = vbcast.lane.b32.xlu0 %v2396_v16, 272 }
 0x43c   : > { %v10251_v46 = vpop.permute.xlu1 %2165 }
 0x43d   : > { %15246 = vst [vmem:[#allocation397_spill] sm:$0xff] %v10251_v46  ;;  %v10253_v24 = vpop.permute.xlu0 %2161  ;;  %v15330_v46 = vld [vmem:[#allocation122_spill] sm:$0xff] }
 0x43e   : > { %15247 = vst [vmem:[#allocation398_spill] sm:$0xff] %v10253_v24  ;;  %2418 = vbcast.lane.b32.xlu1 %v2396_v16, 296 }
 0x43f   : > { %2414 = vbcast.lane.b32.xlu0 %v2396_v16, 288 }
 0x440   : > { %v10255_v17 = vpop.permute.xlu1 %2173 }
 0x441   : > { %15248 = vst [vmem:[#allocation399_spill] sm:$0xff] %v10255_v17  ;;  %v10257_v19 = vpop.permute.xlu0 %2169  ;;  %v2750_v17 = vcombine.high %v9797_v59, %v9782_v35  ;;  %v2734_v35 = vcombine.high %v9786_v18, %v9792_v49  ;;  %v4972_v59 = vrot.slane %v4958_v29, %v9807_v63  ;;  %v2686_v18 = vcombine.high %v9763_v12, %v9752_v41 }
 0x442   : > { %15249 = vst [vmem:[#allocation400_spill] sm:$0xff] %v10257_v19  ;;  %2426 = vbcast.lane.b32.xlu1 %v2396_v16, 312  ;;  %v4910_v29 = vcombine.high %v10213_v25, %v10217_v52  ;;  %v4862_v25 = vcombine.high %v10192_v15, %v10181_v11 }
 0x443   : > { %2422 = vbcast.lane.b32.xlu0 %v2396_v16, 304  ;;  %v2796_v16 = vrot.slane %v2782_v39, %v9807_v63  ;;  %v2764_v50 = vrot.slane %v2750_v17, %v9807_v63  ;;  %v2718_v17 = vcombine.high %v9777_v27, %v9767_v30  ;;  %v2748_v49 = vrot.slane %v2734_v35, %v9770_v32 }
 0x444   : > { %v10270_v19 = vpop.permute.xlu1 %2181  ;;  %v4878_v30 = vcombine.high %v10176_v57, %v10169_v23  ;;  %v4894_v27 = vcombine.high %v10202_v37, %v10196_v6  ;;  %v2700_v41 = vrot.slane %v2686_v18, %v9770_v32  ;;  %v4924_v52 = vrot.slane %v4910_v29, %v9770_v32 }
 0x445   : > { %v10263_v48 = vpop.permute.xlu0 %2177  ;;  %15251 = vst [vmem:[#allocation402_spill] sm:$0xff] %v10270_v19  ;;  %v2815_v56 = vcombine.low %v2764_v50, %v2796_v16  ;;  %v2732_v8 = vrot.slane %v2718_v17, %v9770_v32  ;;  %v2816_v35 = vcombine.high %v2764_v50, %v2796_v16  ;;  %v4876_v37 = vrot.slane %v4862_v25, %v9770_v32 }
 0x446   : > { %15250 = vst [vmem:[#allocation401_spill] sm:$0xff] %v10263_v48  ;;  %7043 = vrot.lane.b32.xlu1 %v2950_v14, %s8776_s20  ;;  %v4926_v48 = vcombine.high %v4869_v42, %v10207_v2  ;;  %v4892_v57 = vrot.slane %v4878_v30, %v9770_v32  ;;  %v4908_v23 = vrot.slane %v4894_v27, %v9770_v32 }
 0x447   : > { %7041 = vrot.lane.b32.xlu0 %v2814_v9, %s8776_s20  ;;  %v2797_v12 = vcombine.low %v2732_v8, %v2748_v49 }
 0x448   : > { %v10284_v9 = vpop.permute.xlu1 %2192  ;;  %v4940_v2 = vrot.slane %v4926_v48, %v9807_v63  ;;  %v4973_v21 = vcombine.low %v4908_v23, %v4924_v52  ;;  %v4941_v50 = vcombine.low %v4876_v37, %v4892_v57 }
 0x449   : > { %v10274_v34 = vpop.permute.xlu0 %2188  ;;  %v2805_v6 = vrot.slane %v2797_v12, %v9807_v63 }
 0x44a   : > { %v4991_v14 = vcombine.low %v4940_v2, %v4972_v59  ;;  %v4992_v15 = vcombine.high %v4940_v2, %v4972_v59  ;;  %v4981_v18 = vrot.slane %v4973_v21, %v9807_v63  ;;  %v4949_v30 = vrot.slane %v4941_v50, %v9807_v63 }
 0x44b   : > { %7045 = vrot.lane.b32.xlu0 %v4990_v22, %s8776_s20  ;;  %v2798_v2 = vcombine.high %v2732_v8, %v2748_v49  ;;  %v2766_v21 = vcombine.high %v2700_v41, %v2716_v40  ;;  %v4974_v50 = vcombine.high %v4908_v23, %v4924_v52  ;;  %v4942_v8 = vcombine.high %v4876_v37, %v4892_v57  ;;  %v15268_v37 = vld [vmem:[#allocation233_spill] sm:$0xff] }
 0x44c   : > { %v10307_v48 = vpop.permute.xlu1 %2200  ;;  %v4993_v59 = vcombine.low %v4949_v30, %v4981_v18 }
 0x44d   : > { %v10286_v39 = vpop.permute.xlu0 %2196  ;;  %15254 = vst [vmem:[#allocation405_spill] sm:$0xff] %v10307_v48  ;;  %v2780_v49 = vrot.slane %v2766_v21, %v9807_v63  ;;  %v15270_v21 = vld [vmem:[#allocation134_spill] sm:$0xff]  ;;  %v15334_v48 = vld [vmem:[#allocation143_spill] sm:$0xff] }
 0x44e   : > { %15252 = vst [vmem:[#allocation403_spill] sm:$0xff] %v10286_v39 }
 0x44f   : > { %7057 = vrot.lane.b32.xlu0 %v2815_v56, %s8777_s2  ;;  %v2765_v56 = vcombine.low %v2700_v41, %v2716_v40  ;;  %v10357_v40 = vsel %vm2428_vm0, %v9087_v47, %v9675_v28  ;;  %v10362_v41 = vsel %vm2428_vm0, %v9123_v3, %v9711_v61  ;;  %v4988_v47 = vrot.slane %v4974_v50, %v9807_v63  ;;  %v15263_v3 = vld [vmem:[#allocation240_spill] sm:$0xff]  ;;  %v15264_v61 = vld [vmem:[#allocation13_spill] sm:$0xff] }
 0x450   : > { %v10321_v17 = vpop.permute.xlu1 %2208  ;;  %v10382_v23 = vsel %vm2428_vm0, %v15264_v61, %v15263_v3  ;;  %v10410_v50 = vsel %vm2428_vm0, %v15270_v21, %v10109_v45  ;;  %v15272_v61 = vld [vmem:[#allocation155_spill] sm:$0xff] }
 0x451   : > { %v10299_v42 = vpop.permute.xlu0 %2204  ;;  %15256 = vst [vmem:[#allocation407_spill] sm:$0xff] %v10321_v17  ;;  %v2773_v16 = vrot.slane %v2765_v56, %v9807_v63 }
 0x452   : > { %15253 = vst [vmem:[#allocation404_spill] sm:$0xff] %v10299_v42 }
 0x453   : > { %7061 = vrot.lane.b32.xlu0 %v4991_v14, %s8777_s2  ;;  %v2817_v14 = vcombine.low %v2773_v16, %v2805_v6  ;;  %v2818_v56 = vcombine.high %v2773_v16, %v2805_v6  ;;  %v15269_v16 = vld [vmem:[#allocation8_spill] sm:$0xff] }
 0x454   : > { %v10331_v27 = vpop.permute.xlu1 %2216 }
 0x455   : > { %v10314_v22 = vpop.permute.xlu0 %2212  ;;  %15258 = vst [vmem:[#allocation409_spill] sm:$0xff] %v10331_v27 }
 0x456   : > { %15255 = vst [vmem:[#allocation406_spill] sm:$0xff] %v10314_v22 }
 0x457   : > { %7073 = vrot.lane.b32.xlu0 %v2816_v35, %s8778_s6 }
 0x458   : > { %v10337_v25 = vpop.permute.xlu1 %2227 }
 0x459   : > { %v10323_v11 = vpop.permute.xlu0 %2223 }
 0x45b   : > { %7077 = vrot.lane.b32.xlu0 %v4992_v15, %s8778_s6  ;;  %v2812_v15 = vrot.slane %v2798_v2, %v9807_v63 }
 0x45c   : > { %v10351_v27 = vpop.permute.xlu1 %2235 }
 0x45d   : > { %v10328_v29 = vpop.permute.xlu0 %2231  ;;  %15261 = vst [vmem:[#allocation412_spill] sm:$0xff] %v10351_v27  ;;  %v2819_v57 = vcombine.low %v2780_v49, %v2812_v15  ;;  %v2820_v22 = vcombine.high %v2780_v49, %v2812_v15 }
 0x45e   : > { %15257 = vst [vmem:[#allocation408_spill] sm:$0xff] %v10328_v29 }
 0x45f   : > { %7089 = vrot.lane.b32.xlu0 %v2817_v14, %s8779_s14  ;;  %v4994_v14 = vcombine.high %v4949_v30, %v4981_v18  ;;  %v10397_v18 = vsel %vm2428_vm0, %v15269_v16, %v15268_v37  ;;  %v2973_v30 = vcombine.low %v10382_v23, %v10357_v40  ;;  %v15275_v37 = vld [vmem:[#allocation120_spill] sm:$0xff]  ;;  %v15276_v16 = vld [vmem:[#allocation127_spill] sm:$0xff] }
 0x461   : > { %v10334_v12 = vpop.permute.xlu0 %2239 }
 0x462   : > { %15259 = vst [vmem:[#allocation410_spill] sm:$0xff] %v10334_v12 }
 0x463   : > { %7093 = vrot.lane.b32.xlu0 %v4993_v59, %s8779_s14  ;;  %v10348_v59 = vsel %vm2428_vm0, %v9159_v54, %v9779_v20  ;;  %v10367_v54 = vsel %vm2428_vm0, %v9141_v26, %v9727_v44  ;;  %v10372_v20 = vsel %vm2428_vm0, %v9069_v38, %v9657_v33  ;;  %v15265_v26 = vld [vmem:[#allocation259_spill] sm:$0xff]  ;;  %v15266_v44 = vld [vmem:[#allocation32_spill] sm:$0xff]  ;;  %v15267_v38 = vld [vmem:[#allocation162_spill] sm:$0xff] }
 0x464   : > { %v3005_v52 = vcombine.low %v10362_v41, %v10348_v59  ;;  %v10387_v6 = vsel %vm2428_vm0, %v15266_v44, %v15265_v26  ;;  %v10392_v33 = vsel %vm2428_vm0, %v15267_v38, %v10204_v36  ;;  %v2957_v36 = vcombine.low %v10397_v18, %v10372_v20  ;;  %v10425_v44 = vpop.permute.xlu1 %2243 }
 0x465   : > { %v10339_v35 = vpop.permute.xlu0 %2247  ;;  %v2989_v2 = vcombine.low %v10387_v6, %v10367_v54  ;;  %15273 = vst [vmem:[#allocation240_spill] sm:$0xff] %v10425_v44 }
 0x466   : > { %15260 = vst [vmem:[#allocation411_spill] sm:$0xff] %v10339_v35 }
 0x467   : > { %7105 = vrot.lane.b32.xlu0 %v2818_v56, %s8780_s17  ;;  %v4956_v56 = vrot.slane %v4942_v8, %v9807_v63  ;;  %v10420_v8 = vsel %vm2428_vm0, %v15272_v61, %v10157_v0  ;;  %v10437_v0 = vsel %vm2428_vm0, %v15276_v16, %v10091_v60  ;;  %v2997_v61 = vrot.slane %v2989_v2, %v9770_v32 }
 0x468   : > { %v2965_v60 = vrot.slane %v2957_v36, %v9770_v32  ;;  %v10464_v36 = vpop.permute.xlu1 %2251 }
 0x469   : > { %v10343_v19 = vpop.permute.xlu0 %2258  ;;  %v4995_v45 = vcombine.low %v4956_v56, %v4988_v47  ;;  %15280 = vst [vmem:[#allocation32_spill] sm:$0xff] %v10464_v36 }
 0x46b   : > { %7109 = vrot.lane.b32.xlu0 %v4994_v14, %s8780_s17  ;;  %v15271_v14 = vld [vmem:[#allocation148_spill] sm:$0xff] }
 0x46c   : > { %v10415_v3 = vsel %vm2428_vm0, %v15271_v14, %v10141_v4  ;;  %v10432_v4 = vsel %vm2428_vm0, %v15275_v37, %v10061_v51  ;;  %v2981_v14 = vrot.slane %v2973_v30, %v9770_v32  ;;  %v15278_v37 = vld [vmem:[#allocation113_spill] sm:$0xff] }
 0x46d   : > { %v10377_v28 = vpop.permute.xlu0 %2266  ;;  %v5181_v26 = vcombine.low %v10415_v3, %v10392_v33  ;;  %v5149_v35 = vcombine.low %v10432_v4, %v10410_v50  ;;  %v10455_v16 = vsel %vm2428_vm0, %v15278_v37, %v10013_v53 }
 0x46e   : > { %15262 = vst [vmem:[#allocation413_spill] sm:$0xff] %v10377_v28  ;;  %v5133_v30 = vcombine.low %v10455_v16, %v10437_v0  ;;  %v3021_v44 = vcombine.low %v2965_v60, %v2981_v14  ;;  %v15425_v28 = vld [vmem:[#allocation373_spill] sm:$0xff] }
 0x46f   : > { %7121 = vrot.lane.b32.xlu0 %v2819_v57, %s8781_s22  ;;  %v3013_v57 = vrot.slane %v3005_v52, %v9770_v32  ;;  %v15277_v52 = vld [vmem:[#allocation141_spill] sm:$0xff]  ;;  %v5189_v2 = vrot.slane %v5181_v26, %v9770_v32  ;;  %v5157_v17 = vrot.slane %v5149_v35, %v9770_v32  ;;  %v4996_v26 = vcombine.high %v4956_v56, %v4988_v47 }
 0x470   : > { %v10442_v21 = vsel %vm2428_vm0, %v15277_v52, %v10125_v55  ;;  %v5141_v37 = vrot.slane %v5133_v30, %v9770_v32  ;;  %v3029_v15 = vrot.slane %v3021_v44, %v9807_v63 }
 0x471   : > { %v10427_v38 = vpop.permute.xlu0 %2274  ;;  %v5165_v51 = vcombine.low %v10442_v21, %v10420_v8  ;;  %v3053_v55 = vcombine.low %v2997_v61, %v3013_v57  ;;  %v3054_v44 = vcombine.high %v2997_v61, %v3013_v57  ;;  %v3006_v57 = vcombine.high %v10362_v41, %v10348_v59 }
 0x472   : > { %15274 = vst [vmem:[#allocation13_spill] sm:$0xff] %v10427_v38  ;;  %v5197_v49 = vcombine.low %v5141_v37, %v5157_v17  ;;  %v5198_v42 = vcombine.high %v5141_v37, %v5157_v17  ;;  %v2958_v17 = vcombine.high %v10397_v18, %v10372_v20  ;;  %v5182_v59 = vcombine.high %v10415_v3, %v10392_v33 }
 0x473   : > { %7125 = vrot.lane.b32.xlu0 %v4995_v45, %s8781_s22  ;;  %v5173_v45 = vrot.slane %v5165_v51, %v9770_v32  ;;  %v3061_v53 = vrot.slane %v3053_v55, %v9807_v63  ;;  %v10474_v51 = vpop.permute.xlu1 %2262  ;;  %v5134_v33 = vcombine.high %v10455_v16, %v10437_v0 }
 0x474   : > { %v5205_v55 = vrot.slane %v5197_v49, %v9807_v63  ;;  %v3068_v49 = vrot.slane %v3054_v44, %v9807_v63  ;;  %v2972_v20 = vrot.slane %v2958_v17, %v9770_v32  ;;  %v10526_v3 = vrot.slane %v5182_v59, %v9770_v32 }
 0x475   : > { %v10460_v52 = vpop.permute.xlu0 %2282  ;;  %v5229_v1 = vcombine.low %v5173_v45, %v5189_v2  ;;  %v5230_v62 = vcombine.high %v5173_v45, %v5189_v2  ;;  %v2974_v2 = vcombine.high %v10382_v23, %v10357_v40  ;;  %v2990_v45 = vcombine.high %v10387_v6, %v10367_v54 }
 0x476   : > { %15279 = vst [vmem:[#allocation259_spill] sm:$0xff] %v10460_v52  ;;  %v3022_v52 = vcombine.high %v2965_v60, %v2981_v14  ;;  %v5150_v23 = vcombine.high %v10432_v4, %v10410_v50  ;;  %v5166_v6 = vcombine.high %v10442_v21, %v10420_v8  ;;  %v10539_v0 = vrot.slane %v5134_v33, %v9770_v32 }
 0x477   : > { %7137 = vrot.lane.b32.xlu0 %v2820_v22, %s8782_s25  ;;  %v5237_v35 = vrot.slane %v5229_v1, %v9807_v63  ;;  %v3085_v22 = vcombine.low %v3029_v15, %v3061_v53  ;;  %v10482_v56 = vpop.permute.xlu1 %2270  ;;  %v3086_v1 = vcombine.high %v3029_v15, %v3061_v53  ;;  %v5244_v14 = vrot.slane %v5230_v62, %v9807_v63 }
 0x478   : > { %15283 = vst [vmem:[#allocation8_spill] sm:$0xff] %v10482_v56  ;;  %v3036_v12 = vrot.slane %v3022_v52, %v9807_v63  ;;  %v5212_v53 = vrot.slane %v5198_v42, %v9807_v63  ;;  %v3020_v62 = vrot.slane %v3006_v57, %v9770_v32  ;;  %v2988_v54 = vrot.slane %v2974_v2, %v9770_v32 }
 0x479   : > { %v10469_v58 = vpop.permute.xlu0 %2293  ;;  %v5261_v47 = vcombine.low %v5205_v55, %v5237_v35  ;;  %v3004_v42 = vrot.slane %v2990_v45, %v9770_v32  ;;  %v10533_v4 = vrot.slane %v5150_v23, %v9770_v32  ;;  %v5180_v8 = vrot.slane %v5166_v6, %v9770_v32  ;;  %v15296_v6 = vld [vmem:[#allocation186_spill] sm:$0xff] }
 0x47a   : > { %v3087_v60 = vcombine.low %v3036_v12, %v3068_v49  ;;  %v5263_v40 = vcombine.low %v5212_v53, %v5244_v14  ;;  %v3037_v50 = vcombine.low %v2972_v20, %v2988_v54 }
 0x47b   : > { %7141 = vrot.lane.b32.xlu0 %v4996_v26, %s8782_s25  ;;  %v10489_v31 = vpop.permute.xlu1 %2278  ;;  %v3069_v18 = vcombine.low %v3004_v42, %v3020_v62  ;;  %v5245_v16 = vcombine.low %v5180_v8, %v10526_v3  ;;  %v3070_v59 = vcombine.high %v3004_v42, %v3020_v62  ;;  %v15299_v42 = vld [vmem:[#allocation218_spill] sm:$0xff] }
 0x47c   : > { %15285 = vst [vmem:[#allocation148_spill] sm:$0xff] %v10489_v31 }
 0x47d   : > { %v10476_v36 = vpop.permute.xlu0 %2301  ;;  %v3077_v21 = vrot.slane %v3069_v18, %v9807_v63  ;;  %v10571_v18 = vsel %vm2428_vm0, %v15296_v6, %v10323_v11 }
 0x47e   : > { %15281 = vst [vmem:[#allocation162_spill] sm:$0xff] %v10476_v36 }
 0x47f   : > { %7153 = vrot.lane.b32.xlu0 %v3085_v22, %s8783_s27  ;;  %v10505_v52 = vpop.permute.xlu1 %2286 }
 0x480   : > { %15287 = vst [vmem:[#allocation120_spill] sm:$0xff] %v10505_v52  ;;  %v15319_v52 = vld [vmem:[#allocation261_spill] sm:$0xff] }
 0x481   : > { %v10480_v30 = vpop.permute.xlu0 %2309 }
 0x482   : > { %15282 = vst [vmem:[#allocation233_spill] sm:$0xff] %v10480_v30  ;;  %v5262_v30 = vcombine.high %v5205_v55, %v5237_v35  ;;  %v3088_v35 = vcombine.high %v3036_v12, %v3068_v49  ;;  %v3045_v12 = vrot.slane %v3037_v50, %v9807_v63  ;;  %v3038_v50 = vcombine.high %v2972_v20, %v2988_v54  ;;  %v15303_v20 = vld [vmem:[#allocation279_spill] sm:$0xff] }
 0x483   : > { %7157 = vrot.lane.b32.xlu0 %v5261_v47, %s8783_s27  ;;  %v10528_v37 = vpop.permute.xlu1 %2297  ;;  %v5213_v47 = vcombine.low %v10539_v0, %v10533_v4 }
 0x484   : > { %v3089_v57 = vcombine.low %v3045_v12, %v3077_v21 }
 0x485   : > { %v10485_v26 = vpop.permute.xlu0 %2317 }
 0x486   : > { %15284 = vst [vmem:[#allocation134_spill] sm:$0xff] %v10485_v26  ;;  %v15320_v26 = vld [vmem:[#allocation34_spill] sm:$0xff] }
 0x487   : > { %7169 = vrot.lane.b32.xlu0 %v3086_v1, %s8784_s24  ;;  %v10545_v44 = vpop.permute.xlu1 %2305  ;;  %v5253_v1 = vrot.slane %v5245_v16, %v9807_v63  ;;  %v15298_v16 = vld [vmem:[#allocation170_spill] sm:$0xff] }
 0x488   : > { %15290 = vst [vmem:[#allocation113_spill] sm:$0xff] %v10545_v44  ;;  %v10580_v62 = vsel %vm2428_vm0, %v15298_v16, %v10249_v10  ;;  %v10597_v10 = vrot.slane %v3070_v59, %v9807_v63  ;;  %v3052_v16 = vrot.slane %v3038_v50, %v9807_v63  ;;  %v15332_v44 = vld [vmem:[#allocation129_spill] sm:$0xff] }
 0x489   : > { %v10491_v22 = vpop.permute.xlu0 %2328  ;;  %v4997_v11 = vcombine.low %v10580_v62, %v10571_v18 }
 0x48b   : > { %7173 = vrot.lane.b32.xlu0 %v5262_v30, %s8784_s24  ;;  %v5264_v30 = vcombine.high %v5212_v53, %v5244_v14  ;;  %v10553_v14 = vpop.permute.xlu1 %2313  ;;  %v15294_v53 = vld [vmem:[#allocation194_spill] sm:$0xff]  ;;  %v10638_v50 = vrot.slane %v4997_v11, %v9770_v32 }
 0x48c   : > { %15292 = vst [vmem:[#allocation415_spill] sm:$0xff] %v10553_v14  ;;  %v10560_v17 = vsel %vm2428_vm0, %v15294_v53, %v10343_v19  ;;  %v3090_v19 = vcombine.high %v3045_v12, %v3077_v21  ;;  %v15302_v21 = vld [vmem:[#allocation15_spill] sm:$0xff]  ;;  %v15304_v12 = vld [vmem:[#allocation52_spill] sm:$0xff]  ;;  %v5246_v53 = vcombine.high %v5180_v8, %v10526_v3  ;;  %v15309_v3 = vld [vmem:[#allocation226_spill] sm:$0xff] }
 0x48d   : > { %v10498_v61 = vpop.permute.xlu0 %2336 }
 0x48e   : > { %15286 = vst [vmem:[#allocation155_spill] sm:$0xff] %v10498_v61  ;;  %v5260_v11 = vrot.slane %v5246_v53, %v9807_v63 }
 0x48f   : > { %7185 = vrot.lane.b32.xlu0 %v3087_v60, %s8785_s28  ;;  %v5221_v60 = vrot.slane %v5213_v47, %v9807_v63  ;;  %v15301_v47 = vld [vmem:[#allocation242_spill] sm:$0xff] }
 0x490   : > { %v10594_v54 = vsel %vm2428_vm0, %v15302_v21, %v15301_v47  ;;  %v15307_v47 = vld [vmem:[#allocation27_spill] sm:$0xff] }
 0x491   : > { %v10513_v41 = vpop.permute.xlu0 %2344  ;;  %v5265_v45 = vcombine.low %v5221_v60, %v5253_v1 }
 0x492   : > { %15288 = vst [vmem:[#allocation127_spill] sm:$0xff] %v10513_v41 }
 0x493   : > { %7189 = vrot.lane.b32.xlu0 %v5263_v40, %s8785_s28  ;;  %v15295_v40 = vld [vmem:[#allocation178_spill] sm:$0xff] }
 0x494   : > { %v10566_v23 = vsel %vm2428_vm0, %v15295_v40, %v10274_v34 }
 0x495   : > { %v10530_v15 = vpop.permute.xlu0 %2352  ;;  %v5013_v33 = vcombine.low %v10566_v23, %v10560_v17 }
 0x496   : > { %15289 = vst [vmem:[#allocation141_spill] sm:$0xff] %v10530_v15 }
 0x497   : > { %7201 = vrot.lane.b32.xlu0 %v3088_v35, %s8786_s29  ;;  %v10611_v40 = vrot.slane %v5013_v33, %v9770_v32  ;;  %v15310_v33 = vld [vmem:[#allocation267_spill] sm:$0xff] }
 0x499   : > { %v2364_v55 = vpop.permute.xlu0 %2363 }
 0x49a   : > { %v10584_v34 = vsel %vm2428_vm0, %v15299_v42, %v2364_v55  ;;  %v10602_v55 = vsel %vm2428_vm0, %v15304_v12, %v15303_v20  ;;  %v15306_v42 = vld [vmem:[#allocation254_spill] sm:$0xff]  ;;  %v15311_v12 = vld [vmem:[#allocation40_spill] sm:$0xff] }
 0x49b   : > { %7205 = vrot.lane.b32.xlu0 %v5264_v30, %s8786_s29  ;;  %v10588_v30 = vpop.permute.xlu1 %2321  ;;  %v10619_v21 = vsel %vm2428_vm0, %v15307_v47, %v15306_v42  ;;  %v15313_v42 = vld [vmem:[#allocation21_spill] sm:$0xff] }
 0x49c   : > { %15300 = vst [vmem:[#allocation178_spill] sm:$0xff] %v10588_v30  ;;  %v15314_v47 = vld [vmem:[#allocation273_spill] sm:$0xff]  ;;  %v3245_v53 = vcombine.low %v10594_v54, %v10619_v21 }
 0x49d   : > { %v10549_v49 = vpop.permute.xlu0 %2371 }
 0x49e   : > { %15291 = vst [vmem:[#allocation414_spill] sm:$0xff] %v10549_v49  ;;  %v15421_v49 = vld [vmem:[#allocation121_spill] sm:$0xff] }
 0x49f   : > { %7217 = vrot.lane.b32.xlu0 %v3089_v57, %s8787_s30  ;;  %v15305_v57 = vld [vmem:[#allocation202_spill] sm:$0xff] }
 0x4a1   : > { %v10555_v2 = vpop.permute.xlu0 %2379 }
 0x4a2   : > { %15293 = vst [vmem:[#allocation416_spill] sm:$0xff] %v10555_v2  ;;  %v15324_v2 = vld [vmem:[#allocation385_spill] sm:$0xff] }
 0x4a3   : > { %7221 = vrot.lane.b32.xlu0 %v5265_v45, %s8787_s30  ;;  %v10607_v45 = vsel %vm2428_vm0, %v15305_v57, %v10469_v58  ;;  %v15308_v58 = vld [vmem:[#allocation210_spill] sm:$0xff] }
 0x4a4   : > { %v5029_v6 = vcombine.low %v10607_v45, %v10584_v34  ;;  %v10624_v20 = vsel %vm2428_vm0, %v15308_v58, %v10491_v22  ;;  %v15312_v22 = vld [vmem:[#allocation248_spill] sm:$0xff]  ;;  %v15315_v58 = vld [vmem:[#allocation46_spill] sm:$0xff] }
 0x4a5   : > { %v10575_v35 = vpop.permute.xlu0 %2387 }
 0x4a6   : > { %15297 = vst [vmem:[#allocation194_spill] sm:$0xff] %v10575_v35  ;;  %v10677_v35 = vsel %vm2428_vm0, %v15320_v26, %v15319_v52  ;;  %v15322_v52 = vld [vmem:[#allocation136_spill] sm:$0xff] }
 0x4a7   : > { %7233 = vrot.lane.b32.xlu0 %v3090_v19, %s8788_s3  ;;  %v5266_v19 = vcombine.high %v5221_v60, %v5253_v1  ;;  %v10633_v1 = vsel %vm2428_vm0, %v15311_v12, %v15310_v33  ;;  %v5214_v60 = vcombine.high %v10539_v0, %v10533_v4  ;;  %v3091_v0 = vcombine.low %v3052_v16, %v10597_v10  ;;  %v10659_v33 = vpop.permute.xlu1 %2332 }
 0x4a8   : > { %v3277_v4 = vcombine.low %v10633_v1, %v10602_v55  ;;  %v10662_v12 = vrot.slane %v5029_v6, %v9770_v32  ;;  %v15321_v6 = vld [vmem:[#allocation164_spill] sm:$0xff] }
 0x4a9   : > { %v2399_v59 = vpop.permute.xlu0 %2398  ;;  %v10682_v15 = vsel %vm2428_vm0, %v15321_v6, %v10227_v43  ;;  %v10697_v43 = vsel %vm2428_vm0, %v15322_v52, %v10113_v5  ;;  %v15323_v6 = vld [vmem:[#allocation150_spill] sm:$0xff] }
 0x4aa   : > { %v10628_v8 = vsel %vm2428_vm0, %v15309_v3, %v2399_v59  ;;  %v10646_v59 = vsel %vm2428_vm0, %v15313_v42, %v15312_v22  ;;  %v10651_v3 = vsel %vm2428_vm0, %v15315_v58, %v15314_v47  ;;  %v15317_v47 = vld [vmem:[#allocation235_spill] sm:$0xff]  ;;  %v15318_v58 = vld [vmem:[#allocation6_spill] sm:$0xff]  ;;  %v10692_v26 = vrot.slane %v3277_v4, %v9770_v32 }
 0x4ab   : > { %v5045_v57 = vcombine.low %v10624_v20, %v10628_v8  ;;  %7237 = vrot.lane.b32.xlu0 %v5266_v19, %s8788_s3  ;;  %v5061_v19 = vcombine.low %v10638_v50, %v10611_v40  ;;  %v10670_v30 = vsel %vm2428_vm0, %v15318_v58, %v15317_v47  ;;  %v3261_v47 = vcombine.low %v10677_v35, %v10651_v3 }
 0x4ac   : > { %v5228_v58 = vrot.slane %v5214_v60, %v9807_v63  ;;  %v10702_v31 = vsel %vm2428_vm0, %v15323_v6, %v10145_v7  ;;  %v15325_v60 = vld [vmem:[#allocation157_spill] sm:$0xff]  ;;  %v10720_v7 = vrot.slane %v3245_v53, %v9770_v32 }
 0x4ad   : > { %v5053_v22 = vrot.slane %v5045_v57, %v9770_v32  ;;  %v10665_v42 = vpop.permute.xlu0 %2406  ;;  %v3229_v57 = vcombine.low %v10670_v30, %v10646_v59  ;;  %v10707_v41 = vsel %vm2428_vm0, %v15325_v60, %v15324_v2  ;;  %v10712_v4 = vrot.slane %v5061_v19, %v9807_v63  ;;  %v15329_v6 = vld [vmem:[#allocation357_spill] sm:$0xff]  ;;  %v15331_v60 = vld [vmem:[#allocation363_spill] sm:$0xff]  ;;  %v15333_v19 = vld [vmem:[#allocation374_spill] sm:$0xff] }
 0x4ae   : > { %15316 = vst [vmem:[#allocation186_spill] sm:$0xff] %v10665_v42  ;;  %v5267_v52 = vcombine.low %v5228_v58, %v5260_v11  ;;  %v10725_v2 = vsel %vm2428_vm0, %v15330_v46, %v15329_v6  ;;  %v10730_v27 = vsel %vm2428_vm0, %v15332_v44, %v15331_v60  ;;  %v10742_v46 = vpop.permute.xlu1 %2340  ;;  %v15336_v60 = vld [vmem:[#allocation345_spill] sm:$0xff]  ;;  %v3092_v6 = vcombine.high %v3052_v16, %v10597_v10 }
 0x4af   : > { %v5093_v14 = vcombine.low %v10662_v12, %v5053_v22  ;;  %7249 = vrot.lane.b32.xlu0 %v3091_v0, %s8789_s4  ;;  %v5453_v0 = vcombine.low %v10702_v31, %v10682_v15  ;;  %15326 = vst [vmem:[#allocation170_spill] sm:$0xff] %v10712_v4  ;;  %v5421_v53 = vcombine.low %v10725_v2, %v10697_v43  ;;  %15335 = vst [vmem:[#allocation15_spill] sm:$0xff] %v10742_v46 }
 0x4b0   : > { %v3237_v44 = vrot.slane %v3229_v57, %v9770_v32  ;;  %v5268_v10 = vcombine.high %v5228_v58, %v5260_v11 }
 0x4b1   : > { %v10715_v38 = vrot.slane %v5093_v14, %v9807_v63  ;;  %v10717_v5 = vpop.permute.xlu0 %2414  ;;  %v10735_v14 = vsel %vm2428_vm0, %v15334_v48, %v15333_v19  ;;  %v15337_v48 = vld [vmem:[#allocation115_spill] sm:$0xff]  ;;  %v10757_v36 = vrot.slane %v5453_v0, %v9770_v32  ;;  %v10764_v57 = vrot.slane %v5421_v53, %v9770_v32 }
 0x4b2   : > { %15328 = vst [vmem:[#allocation242_spill] sm:$0xff] %v10717_v5  ;;  %v3269_v5 = vrot.slane %v3261_v47, %v9770_v32  ;;  %v5437_v56 = vcombine.low %v10735_v14, %v10707_v41  ;;  %v10751_v19 = vsel %vm2428_vm0, %v15337_v48, %v15336_v60  ;;  %v10771_v39 = vpop.permute.xlu1 %2348 }
 0x4b3   : > { %15327 = vst [vmem:[#allocation218_spill] sm:$0xff] %v10715_v38  ;;  %7253 = vrot.lane.b32.xlu0 %v5267_v52, %s8789_s4  ;;  %v5405_v24 = vcombine.low %v10751_v19, %v10730_v27  ;;  %v3293_v52 = vcombine.low %v3237_v44, %v10720_v7  ;;  %15339 = vst [vmem:[#allocation52_spill] sm:$0xff] %v10771_v39 }
 0x4b4   : > { %v3325_v47 = vcombine.low %v3269_v5, %v10692_v26  ;;  %v5445_v60 = vrot.slane %v5437_v56, %v9770_v32  ;;  %v5094_v56 = vcombine.high %v10662_v12, %v5053_v22 }
 0x4b5   : > { %v10759_v46 = vpop.permute.xlu0 %2422  ;;  %v5413_v29 = vrot.slane %v5405_v24, %v9770_v32  ;;  %v3301_v16 = vrot.slane %v3293_v52, %v9807_v63 }
 0x4b6   : > { %15338 = vst [vmem:[#allocation279_spill] sm:$0xff] %v10759_v46  ;;  %v3333_v48 = vrot.slane %v3325_v47, %v9807_v63  ;;  %v5501_v0 = vcombine.low %v5445_v60, %v10757_v36  ;;  %v5062_v47 = vcombine.high %v10638_v50, %v10611_v40  ;;  %v10788_v52 = vpop.permute.xlu1 %2356  ;;  %v5108_v12 = vrot.slane %v5094_v56, %v9807_v63 }
 0x4b7   : > { %7265 = vrot.lane.b32.xlu0 %v3092_v6, %s8790_s18  ;;  %v5469_v53 = vcombine.low %v5413_v29, %v10764_v57  ;;  %v5126_v6 = vcombine.high %v10712_v4, %v10715_v38  ;;  %15342 = vst [vmem:[#allocation27_spill] sm:$0xff] %v10788_v52  ;;  %v3326_v56 = vcombine.high %v3269_v5, %v10692_v26 }
 0x4b8   : > { %v5509_v24 = vrot.slane %v5501_v0, %v9807_v63  ;;  %v3357_v11 = vcombine.low %v3301_v16, %v3333_v48  ;;  %v5076_v22 = vrot.slane %v5062_v47, %v9807_v63  ;;  %v15343_v0 = vld [vmem:[#allocation353_spill] sm:$0xff]  ;;  %v5030_v52 = vcombine.high %v10607_v45, %v10584_v34 }
 0x4b9   : > { %v10773_v46 = vpop.permute.xlu0 %7041  ;;  %7047 = vrot.lane.b32.xlu1 %v5126_v6, %s8776_s20  ;;  %v5477_v58 = vrot.slane %v5469_v53, %v9807_v63  ;;  %v5046_v53 = vcombine.high %v10624_v20, %v10628_v8  ;;  %v3358_v4 = vcombine.high %v3301_v16, %v3333_v48  ;;  %v3294_v20 = vcombine.high %v3237_v44, %v10720_v7  ;;  %s8793_s20 = smov 36  }
 0x4ba   : > { %15340 = vst [vmem:[#allocation202_spill] sm:$0xff] %v10773_v46  ;;  %v5127_v38 = vcombine.low %v5076_v22, %v5108_v12  ;;  %v10805_v47 = vpop.permute.xlu1 %2367  ;;  %v4998_v8 = vcombine.high %v10580_v62, %v10571_v18  ;;  %v10825_v34 = vrot.slane %v5030_v52, %v9770_v32  ;;  %v5470_v5 = vcombine.high %v5413_v29, %v10764_v57  ;;  %v15413_v46 = vld [vmem:[#allocation135_spill] sm:$0xff] }
 0x4bb   : > { %7269 = vrot.lane.b32.xlu0 %v5268_v10, %s8790_s18  ;;  %v15344_v10 = vld [vmem:[#allocation348_spill] sm:$0xff]  ;;  %v5533_v6 = vcombine.low %v5477_v58, %v5509_v24  ;;  %v10816_v26 = vrot.slane %v5046_v53, %v9770_v32  ;;  %v5534_v45 = vcombine.high %v5477_v58, %v5509_v24  ;;  %v3278_v48 = vcombine.high %v10633_v1, %v10602_v55 }
 0x4bc   : > { %v15345_v40 = vcombine.low %v15343_v0, %v15344_v10  ;;  %v15348_v18 = vcombine.high %v15343_v0, %v15344_v10  ;;  %v3246_v58 = vcombine.high %v10594_v54, %v10619_v21  ;;  %v3262_v52 = vcombine.high %v10677_v35, %v10651_v3  ;;  %v15353_v35 = vld [vmem:[#allocation354_spill] sm:$0xff]  ;;  %v15354_v3 = vld [vmem:[#allocation349_spill] sm:$0xff] }
 0x4bd   : > { %v10785_v39 = vpop.permute.xlu0 %7045  ;;  %v5109_v44 = vcombine.low %v10825_v34, %v10816_v26  ;;  %v3230_v1 = vcombine.high %v10670_v30, %v10646_v59  ;;  %v5454_v0 = vcombine.high %v10702_v31, %v10682_v15  ;;  %v15355_v10 = vcombine.low %v15353_v35, %v15354_v3 }
 0x4be   : > { %15341 = vst [vmem:[#allocation254_spill] sm:$0xff] %v10785_v39  ;;  %7059 = vrot.lane.b32.xlu1 %v15345_v40, %s8777_s2  ;;  %v10838_v7 = vpop.permute.xlu1 %2375  ;;  %v10875_v30 = vrot.slane %v3246_v58, %v9770_v32  ;;  %v10878_v59 = vrot.slane %v3262_v52, %v9770_v32  ;;  %v5422_v31 = vcombine.high %v10725_v2, %v10697_v43  ;;  %v15417_v39 = vld [vmem:[#allocation156_spill] sm:$0xff] }
 0x4bf   : > { %7281 = vrot.lane.b32.xlu0 %v3357_v11, %s8791_s19  ;;  %v5014_v11 = vcombine.high %v10566_v23, %v10560_v17  ;;  %v3340_v17 = vrot.slane %v3326_v56, %v9807_v63  ;;  %v5502_v23 = vcombine.high %v5445_v60, %v10757_v36  ;;  %v10836_v36 = vrot.slane %v4998_v8, %v9770_v32 }
 0x4c0   : > { %15350 = vst [vmem:[#allocation40_spill] sm:$0xff] %v10838_v7  ;;  %v5128_v60 = vcombine.high %v5076_v22, %v5108_v12  ;;  %v5484_v12 = vrot.slane %v5470_v5, %v9807_v63  ;;  %v5117_v55 = vrot.slane %v5109_v44, %v9807_v63  ;;  %v10861_v22 = vrot.slane %v3278_v48, %v9770_v32  ;;  %v15361_v48 = vld [vmem:[#allocation335_spill] sm:$0xff] }
 0x4c1   : > { %v10797_v50 = vpop.permute.xlu0 %7057  ;;  %v5516_v16 = vrot.slane %v5502_v23, %v9807_v63  ;;  %v5438_v15 = vcombine.high %v10735_v14, %v10707_v41  ;;  %v5406_v8 = vcombine.high %v10751_v19, %v10730_v27  ;;  %v10893_v23 = vrot.slane %v5454_v0, %v9770_v32  ;;  %v15363_v0 = vld [vmem:[#allocation307_spill] sm:$0xff] }
 0x4c2   : > { %15346 = vst [vmem:[#allocation210_spill] sm:$0xff] %v10797_v50  ;;  %7063 = vrot.lane.b32.xlu1 %v5127_v38, %s8777_s2  ;;  %v10822_v38 = vrot.slane %v5014_v11, %v9770_v32  ;;  %v10866_v21 = vpop.permute.xlu1 %2383  ;;  %v10886_v11 = vrot.slane %v3230_v1, %v9770_v32  ;;  %v10901_v14 = vrot.slane %v5422_v31, %v9770_v32  ;;  %s8794_s2 = smov 38   ;;  %v15367_v31 = vld [vmem:[#allocation328_spill] sm:$0xff] }
 0x4c3   : > { %7285 = vrot.lane.b32.xlu0 %v5533_v6, %s8791_s19  ;;  %15352 = vst [vmem:[#allocation21_spill] sm:$0xff] %v10866_v21  ;;  %v5535_v53 = vcombine.low %v5484_v12, %v5516_v16  ;;  %v10913_v19 = vrot.slane %v5406_v8, %v9770_v32  ;;  %v5536_v44 = vcombine.high %v5484_v12, %v5516_v16  ;;  %v15371_v8 = vld [vmem:[#allocation64_spill] sm:$0xff] }
 0x4c4   : > { %v5077_v24 = vcombine.low %v10836_v36, %v10822_v38  ;;  %v3309_v2 = vcombine.low %v10886_v11, %v10875_v30  ;;  %v5110_v52 = vcombine.high %v10825_v34, %v10816_v26  ;;  %v5078_v34 = vcombine.high %v10836_v36, %v10822_v38  ;;  %v15374_v36 = vld [vmem:[#allocation314_spill] sm:$0xff] }
 0x4c5   : > { %v10810_v40 = vpop.permute.xlu0 %7061  ;;  %v5485_v58 = vcombine.low %v10913_v19, %v10901_v14 }
 0x4c6   : > { %15347 = vst [vmem:[#allocation226_spill] sm:$0xff] %v10810_v40  ;;  %7075 = vrot.lane.b32.xlu1 %v15348_v18, %s8778_s6  ;;  %v5085_v54 = vrot.slane %v5077_v24, %v9807_v63  ;;  %v10904_v18 = vrot.slane %v5438_v15, %v9770_v32  ;;  %v15362_v24 = vld [vmem:[#allocation106_spill] sm:$0xff]  ;;  %v15368_v15 = vld [vmem:[#allocation99_spill] sm:$0xff] }
 0x4c7   : > { %7297 = vrot.lane.b32.xlu0 %v3358_v4, %s8792_s21  ;;  %v3308_v4 = vrot.slane %v3294_v20, %v9807_v63  ;;  %v3341_v20 = vcombine.low %v10878_v59, %v10861_v22 }
 0x4c8   : > { %v5129_v56 = vcombine.low %v5085_v54, %v5117_v55  ;;  %v5130_v1 = vcombine.high %v5085_v54, %v5117_v55 }
 0x4c9   : > { %v10831_v62 = vpop.permute.xlu0 %7073  ;;  %v3359_v57 = vcombine.low %v3308_v4, %v3340_v17  ;;  %v3360_v41 = vcombine.high %v3308_v4, %v3340_v17  ;;  %v10910_v27 = vrot.slane %v3341_v20, %v9807_v63  ;;  %v5517_v17 = vcombine.low %v10904_v18, %v10893_v23  ;;  %v15370_v20 = vld [vmem:[#allocation293_spill] sm:$0xff] }
 0x4ca   : > { %15349 = vst [vmem:[#allocation267_spill] sm:$0xff] %v10831_v62  ;;  %7079 = vrot.lane.b32.xlu1 %v5128_v60, %s8778_s6  ;;  %v15359_v4 = vcombine.high %v15353_v35, %v15354_v3  ;;  %v3317_v60 = vrot.slane %v3309_v2, %v9807_v63  ;;  %v15364_v35 = vld [vmem:[#allocation78_spill] sm:$0xff]  ;;  %v15365_v3 = vld [vmem:[#allocation321_spill] sm:$0xff]  ;;  %v15372_v2 = vld [vmem:[#allocation300_spill] sm:$0xff]  ;;  %s8795_s6 = smov 40  }
 0x4cb   : > { %7301 = vrot.lane.b32.xlu0 %v5534_v45, %s8792_s21  ;;  %v10906_v45 = vpop.permute.xlu1 %2391  ;;  %v10937_v16 = vsel %vm2428_vm0, %v15364_v35, %v15363_v0  ;;  %v10951_v26 = vrot.slane %v5517_v17, %v9807_v63  ;;  %v10979_v0 = vrot.slane %v5110_v52, %v9807_v63  ;;  %v15376_v35 = vld [vmem:[#allocation286_spill] sm:$0xff]  ;;  %v5092_v52 = vrot.slane %v5078_v34, %v9807_v63  ;;  %v15400_v62 = vld [vmem:[#allocation39_spill] sm:$0xff] }
 0x4cc   : > { %15358 = vst [vmem:[#allocation235_spill] sm:$0xff] %v10906_v45  ;;  %v3361_v12 = vcombine.low %v3317_v60, %v10910_v27  ;;  %v3342_v45 = vcombine.high %v10878_v59, %v10861_v22  ;;  %v15387_v22 = vld [vmem:[#allocation185_spill] sm:$0xff] }
 0x4cd   : > { %v10849_v29 = vpop.permute.xlu0 %7077  ;;  %v11041_v59 = vsel %vm2428_vm0, %v15387_v22, %v10337_v25  ;;  %v3310_v25 = vcombine.high %v10886_v11, %v10875_v30  ;;  %v15393_v11 = vld [vmem:[#allocation253_spill] sm:$0xff] }
 0x4ce   : > { %15351 = vst [vmem:[#allocation248_spill] sm:$0xff] %v10849_v29  ;;  %7091 = vrot.lane.b32.xlu1 %v15355_v10, %s8779_s14  ;;  %v15366_v10 = vld [vmem:[#allocation92_spill] sm:$0xff] }
 0x4cf   : > { %7313 = vrot.lane.b32.xlu0 %v3359_v57, %s8793_s20  ;;  %v10927_v57 = vsel %vm2428_vm0, %v15362_v24, %v15361_v48  ;;  %v2403_v55 = vpop.permute.xlu1 %2402  ;;  %v15375_v48 = vld [vmem:[#allocation85_spill] sm:$0xff] }
 0x4d0   : > { %v10975_v24 = vsel %vm2428_vm0, %v15375_v48, %v15374_v36 }
 0x4d1   : > { %v10872_v6 = vpop.permute.xlu0 %7089 }
 0x4d2   : > { %15356 = vst [vmem:[#allocation273_spill] sm:$0xff] %v10872_v6  ;;  %7095 = vrot.lane.b32.xlu1 %v5129_v56, %s8779_s14  ;;  %v10948_v56 = vsel %vm2428_vm0, %v15368_v15, %v15367_v31  ;;  %v15378_v15 = vld [vmem:[#allocation225_spill] sm:$0xff]  ;;  %s8796_s14 = smov 42  }
 0x4d3   : > { %7317 = vrot.lane.b32.xlu0 %v5535_v53, %s8793_s20  ;;  %v10943_v53 = vsel %vm2428_vm0, %v15366_v10, %v15365_v3  ;;  %v15377_v3 = vld [vmem:[#allocation57_spill] sm:$0xff]  ;;  %v3125_v31 = vcombine.low %v10975_v24, %v10948_v56 }
 0x4d4   : > { %v3141_v17 = vcombine.low %v10943_v53, %v10927_v57  ;;  %v10985_v10 = vsel %vm2428_vm0, %v15377_v3, %v15376_v35  ;;  %v15384_v3 = vld [vmem:[#allocation209_spill] sm:$0xff] }
 0x4d5   : > { %v10896_v43 = vpop.permute.xlu0 %7093  ;;  %v11014_v34 = vsel %vm2428_vm0, %v15384_v3, %v10659_v33  ;;  %v11031_v33 = vrot.slane %v3125_v31, %v9770_v32  ;;  %v15386_v3 = vld [vmem:[#allocation177_spill] sm:$0xff] }
 0x4d6   : > { %15357 = vst [vmem:[#allocation46_spill] sm:$0xff] %v10896_v43  ;;  %7107 = vrot.lane.b32.xlu1 %v15359_v4, %s8780_s17  ;;  %v15373_v4 = vld [vmem:[#allocation71_spill] sm:$0xff]  ;;  %v11004_v48 = vrot.slane %v3141_v17, %v9770_v32 }
 0x4d7   : > { %7329 = vrot.lane.b32.xlu0 %v3360_v41, %s8794_s2  ;;  %v10961_v41 = vsel %vm2428_vm0, %v15371_v8, %v15370_v20  ;;  %v10991_v20 = vsel %vm2428_vm0, %v15378_v15, %v2403_v55  ;;  %v15379_v8 = vld [vmem:[#allocation355_spill] sm:$0xff]  ;;  %v15383_v55 = vld [vmem:[#allocation193_spill] sm:$0xff] }
 0x4d8   : > { %v3109_v38 = vcombine.low %v10961_v41, %v10937_v16  ;;  %v11009_v35 = vsel %vm2428_vm0, %v15383_v55, %v10474_v51  ;;  %v15385_v15 = vld [vmem:[#allocation217_spill] sm:$0xff]  ;;  %v5317_v51 = vcombine.low %v11014_v34, %v10991_v20  ;;  %v5131_v55 = vcombine.low %v5092_v52, %v10979_v0 }
 0x4d9   : > { %v10921_v5 = vpop.permute.xlu0 %7105 }
 0x4da   : > { %15360 = vst [vmem:[#allocation6_spill] sm:$0xff] %v10921_v5  ;;  %7111 = vrot.lane.b32.xlu1 %v5130_v1, %s8780_s17  ;;  %v5493_v1 = vrot.slane %v5485_v58, %v9807_v63  ;;  %v11024_v17 = vrot.slane %v3109_v38, %v9770_v32  ;;  %v15388_v38 = vld [vmem:[#allocation201_spill] sm:$0xff]  ;;  %v11076_v30 = vrot.slane %v5317_v51, %v9770_v32  ;;  %s8797_s17 = smov 44  }
 0x4db   : > { %7333 = vrot.lane.b32.xlu0 %v5536_v44, %s8794_s2  ;;  %v10966_v44 = vsel %vm2428_vm0, %v15373_v4, %v15372_v2 }
 0x4dc   : > { %v3093_v58 = vcombine.low %v10985_v10, %v10966_v44  ;;  %v5537_v36 = vcombine.low %v5493_v1, %v10951_v26 }
 0x4dd   : > { %v10956_v54 = vpop.permute.xlu0 %7109 }
 0x4de   : > { %15369 = vst [vmem:[#allocation261_spill] sm:$0xff] %v10956_v54  ;;  %v11059_v22 = vrot.slane %v3093_v58, %v9770_v32 }
 0x4df   : > { %7345 = vrot.lane.b32.xlu0 %v3361_v12, %s8795_s6  ;;  %v15380_v12 = vld [vmem:[#allocation351_spill] sm:$0xff] }
 0x4e0   : > { %v15381_v2 = vcombine.low %v15379_v8, %v15380_v12  ;;  %v3157_v51 = vcombine.low %v11059_v22, %v11024_v17 }
 0x4e1   : > { %v11000_v4 = vpop.permute.xlu0 %7121 }
 0x4e2   : > { %7123 = vrot.lane.b32.xlu1 %v15381_v2, %s8781_s22  ;;  %15382 = vst [vmem:[#allocation34_spill] sm:$0xff] %v11000_v4  ;;  %v11019_v2 = vsel %vm2428_vm0, %v15385_v15, %v10805_v47  ;;  %v11036_v47 = vsel %vm2428_vm0, %v15386_v3, %v10284_v9  ;;  %v11046_v15 = vsel %vm2428_vm0, %v15388_v38, %v10528_v37  ;;  %v15390_v38 = vld [vmem:[#allocation169_spill] sm:$0xff] }
 0x4e3   : > { %7349 = vrot.lane.b32.xlu0 %v5537_v36, %s8795_s6  ;;  %v5285_v36 = vcombine.low %v11036_v47, %v11009_v35  ;;  %v5301_v31 = vcombine.low %v11046_v15, %v11019_v2  ;;  %v3362_v3 = vcombine.high %v3317_v60, %v10910_v27  ;;  %v3189_v37 = vcombine.low %v11031_v33, %v11004_v48  ;;  %v15391_v4 = vld [vmem:[#allocation241_spill] sm:$0xff]  ;;  %v15394_v60 = vld [vmem:[#allocation26_spill] sm:$0xff] }
 0x4e4   : > { %v11066_v21 = vsel %vm2428_vm0, %v15390_v38, %v10247_v13  ;;  %v11082_v58 = vsel %vm2428_vm0, %v15394_v60, %v15393_v11  ;;  %v15395_v13 = vld [vmem:[#allocation278_spill] sm:$0xff]  ;;  %v15396_v38 = vld [vmem:[#allocation51_spill] sm:$0xff]  ;;  %v15397_v60 = vcombine.high %v15379_v8, %v15380_v12  ;;  %v5486_v8 = vcombine.high %v10913_v19, %v10901_v14  ;;  %v15406_v14 = vld [vmem:[#allocation33_spill] sm:$0xff] }
 0x4e5   : > { %v11053_v9 = vpop.permute.xlu0 %7125  ;;  %v5269_v27 = vcombine.low %v11066_v21, %v11041_v59  ;;  %v11087_v6 = vsel %vm2428_vm0, %v15396_v38, %v15395_v13  ;;  %v11100_v11 = vrot.slane %v5301_v31, %v9770_v32  ;;  %v3324_v38 = vrot.slane %v3310_v25, %v9807_v63 }
 0x4e6   : > { %7127 = vrot.lane.b32.xlu1 %v5131_v55, %s8781_s22  ;;  %15389 = vst [vmem:[#allocation164_spill] sm:$0xff] %v11053_v9  ;;  %v15392_v55 = vld [vmem:[#allocation14_spill] sm:$0xff]  ;;  %v3197_v54 = vrot.slane %v3189_v37, %v9807_v63  ;;  %s8798_s22 = smov 46  }
 0x4e7   : > { %v11071_v5 = vsel %vm2428_vm0, %v15392_v55, %v15391_v4  ;;  %7361 = vrot.lane.b32.xlu0 %v3362_v3, %s8796_s14  ;;  %v11090_v4 = vrot.slane %v3342_v45, %v9807_v63  ;;  %v5518_v55 = vcombine.high %v10904_v18, %v10893_v23  ;;  %v11097_v3 = vrot.slane %v5285_v36, %v9770_v32  ;;  %v15399_v9 = vld [vmem:[#allocation266_spill] sm:$0xff]  ;;  %v15401_v18 = vld [vmem:[#allocation272_spill] sm:$0xff]  ;;  %v15402_v36 = vld [vmem:[#allocation45_spill] sm:$0xff] }
 0x4e8   : > { %v5538_v45 = vcombine.high %v5493_v1, %v10951_v26  ;;  %v11113_v23 = vsel %vm2428_vm0, %v15400_v62, %v15399_v9  ;;  %v11118_v31 = vsel %vm2428_vm0, %v15402_v36, %v15401_v18  ;;  %v11124_v12 = vrot.slane %v5269_v27, %v9770_v32  ;;  %v15403_v62 = vld [vmem:[#allocation247_spill] sm:$0xff]  ;;  %v15404_v9 = vld [vmem:[#allocation20_spill] sm:$0xff] }
 0x4e9   : > { %v11106_v13 = vpop.permute.xlu0 %7137  ;;  %v5365_v26 = vcombine.low %v11100_v11, %v11076_v30  ;;  %v5132_v1 = vcombine.high %v5092_v52, %v10979_v0  ;;  %v11133_v25 = vsel %vm2428_vm0, %v15404_v9, %v15403_v62  ;;  %v3517_v37 = vcombine.low %v11071_v5, %v11082_v58  ;;  %v15408_v62 = vld [vmem:[#allocation234_spill] sm:$0xff]  ;;  %v15409_v9 = vld [vmem:[#allocation7_spill] sm:$0xff] }
 0x4ea   : > { %7139 = vrot.lane.b32.xlu1 %v15397_v60, %s8782_s25  ;;  %15398 = vst [vmem:[#allocation136_spill] sm:$0xff] %v11106_v13  ;;  %v15405_v60 = vld [vmem:[#allocation260_spill] sm:$0xff]  ;;  %v3549_v27 = vcombine.low %v11113_v23, %v11087_v6  ;;  %v3165_v0 = vrot.slane %v3157_v51, %v9807_v63  ;;  %v5532_v52 = vrot.slane %v5518_v55, %v9807_v63  ;;  %v15410_v51 = vld [vmem:[#allocation390_spill] sm:$0xff]  ;;  %v15411_v13 = vld [vmem:[#allocation163_spill] sm:$0xff] }
 0x4eb   : > { %7365 = vrot.lane.b32.xlu0 %v5538_v45, %s8796_s14  ;;  %v11140_v19 = vsel %vm2428_vm0, %v15406_v14, %v15405_v60  ;;  %v5333_v45 = vcombine.low %v11124_v12, %v11097_v3  ;;  %v3363_v36 = vcombine.low %v3324_v38, %v11090_v4  ;;  %v11155_v60 = vsel %vm2428_vm0, %v15409_v9, %v15408_v62  ;;  %v15412_v9 = vld [vmem:[#allocation368_spill] sm:$0xff] }
 0x4ec   : > { %v3533_v14 = vcombine.low %v11140_v19, %v11118_v31  ;;  %v11162_v55 = vsel %vm2428_vm0, %v15411_v13, %v15410_v51  ;;  %v5373_v50 = vrot.slane %v5365_v26, %v9807_v63  ;;  %v3221_v43 = vcombine.low %v3165_v0, %v3197_v54  ;;  %v15414_v13 = vld [vmem:[#allocation379_spill] sm:$0xff]  ;;  %v15415_v51 = vld [vmem:[#allocation149_spill] sm:$0xff] }
 0x4ed   : > { %v11149_v18 = vpop.permute.xlu0 %7141  ;;  %v11170_v62 = vrot.slane %v3549_v27, %v9770_v32  ;;  %v11175_v29 = vsel %vm2428_vm0, %v15413_v46, %v15412_v9  ;;  %v11180_v40 = vsel %vm2428_vm0, %v15415_v51, %v15414_v13  ;;  %v5341_v7 = vrot.slane %v5333_v45, %v9807_v63  ;;  %v15420_v51 = vld [vmem:[#allocation356_spill] sm:$0xff]  ;;  %v15426_v45 = vld [vmem:[#allocation142_spill] sm:$0xff] }
 0x4ee   : > { %7143 = vrot.lane.b32.xlu1 %v5132_v1, %s8782_s25  ;;  %15407 = vst [vmem:[#allocation150_spill] sm:$0xff] %v11149_v18  ;;  %v3501_v1 = vcombine.low %v11155_v60, %v11133_v25  ;;  %v5500_v18 = vrot.slane %v5486_v8, %v9807_v63  ;;  %v15416_v8 = vld [vmem:[#allocation384_spill] sm:$0xff]  ;;  %v5725_v27 = vcombine.low %v11180_v40, %v11162_v55  ;;  %s8799_s25 = smov 48  }
 0x4ef   : > { %7377 = vrot.lane.b32.xlu0 %v3363_v36, %s8797_s17  ;;  %v11185_v26 = vsel %vm2428_vm0, %v15417_v39, %v15416_v8  ;;  %v11188_v36 = vrot.slane %v3517_v37, %v9770_v32  ;;  %v11197_v13 = vrot.slane %v3533_v14, %v9770_v32  ;;  %v11202_v39 = vsel %vm2428_vm0, %v15421_v49, %v15420_v51  ;;  %v15423_v37 = vld [vmem:[#allocation362_spill] sm:$0xff]  ;;  %v15424_v8 = vld [vmem:[#allocation128_spill] sm:$0xff] }
 0x4f0   : > { %15418 = vst [vmem:[#allocation385_spill] sm:$0xff] %v11185_v26  ;;  %v5539_v9 = vcombine.low %v5500_v18, %v5532_v52  ;;  %15422 = vst [vmem:[#allocation357_spill] sm:$0xff] %v11202_v39  ;;  %v11207_v61 = vsel %vm2428_vm0, %v15424_v8, %v15423_v37  ;;  %v5397_v42 = vcombine.low %v5341_v7, %v5373_v50  ;;  %v15428_v37 = vld [vmem:[#allocation344_spill] sm:$0xff]  ;;  %v15429_v8 = vld [vmem:[#allocation114_spill] sm:$0xff] }
 0x4f1   : > { %v11194_v46 = vpop.permute.xlu0 %7153  ;;  %v11220_v49 = vrot.slane %v3501_v1, %v9770_v32  ;;  %v3597_v51 = vcombine.low %v11197_v13, %v11170_v62  ;;  %v3364_v1 = vcombine.high %v3324_v38, %v11090_v4  ;;  %v3158_v4 = vcombine.high %v11059_v22, %v11024_v17 }
 0x4f2   : > { %7155 = vrot.lane.b32.xlu1 %v3221_v43, %s8783_s27  ;;  %15419 = vst [vmem:[#allocation157_spill] sm:$0xff] %v11194_v46  ;;  %v11212_v43 = vsel %vm2428_vm0, %v15426_v45, %v15425_v28  ;;  %v5693_v46 = vcombine.low %v11202_v39, %v11175_v29  ;;  %v11227_v28 = vsel %vm2428_vm0, %v15429_v8, %v15428_v37 }
 0x4f3   : > { %15427 = vst [vmem:[#allocation122_spill] sm:$0xff] %v11212_v43  ;;  %v5709_v14 = vcombine.low %v11212_v43, %v11185_v26  ;;  %7381 = vrot.lane.b32.xlu0 %v5539_v9, %s8797_s17  ;;  %v5677_v45 = vcombine.low %v11227_v28, %v11207_v61  ;;  %v11232_v39 = vrot.slane %v5725_v27, %v9770_v32 }
 0x4f4   : > { %v3565_v43 = vcombine.low %v11220_v49, %v11188_v36  ;;  %v3190_v26 = vcombine.high %v11031_v33, %v11004_v48  ;;  %v11243_v37 = vrot.slane %v5693_v46, %v9770_v32  ;;  %v3222_v27 = vcombine.high %v3165_v0, %v3197_v54 }
 0x4f5   : > { %v11235_v9 = vpop.permute.xlu0 %7157  ;;  %v11246_v8 = vrot.slane %v5709_v14, %v9770_v32  ;;  %v11253_v38 = vrot.slane %v5677_v45, %v9770_v32  ;;  %v5540_v46 = vcombine.high %v5500_v18, %v5532_v52  ;;  %v5366_v17 = vcombine.high %v11100_v11, %v11076_v30 }
 0x4f6   : > { %7159 = vrot.lane.b32.xlu1 %v5397_v42, %s8783_s27  ;;  %15430 = vst [vmem:[#allocation363_spill] sm:$0xff] %v11235_v9  ;;  %v3605_v42 = vrot.slane %v3597_v51, %v9807_v63  ;;  %v3573_v54 = vrot.slane %v3565_v43, %v9807_v63  ;;  %v3204_v0 = vrot.slane %v3190_v26, %v9807_v63  ;;  %s8800_s27 = smov 50   ;;  %v15516_v9 = vld [vmem:[#allocation145_spill] sm:$0xff] }
 0x4f7   : > { %7393 = vrot.lane.b32.xlu0 %v3364_v1, %s8798_s22  ;;  %v5773_v48 = vcombine.low %v11246_v8, %v11232_v39  ;;  %v5741_v14 = vcombine.low %v11253_v38, %v11243_v37  ;;  %v5398_v22 = vcombine.high %v5341_v7, %v5373_v50  ;;  %v3172_v51 = vrot.slane %v3158_v4, %v9807_v63 }
 0x4f8   : > { %v5334_v52 = vcombine.high %v11124_v12, %v11097_v3  ;;  %v3629_v26 = vcombine.low %v3573_v54, %v3605_v42  ;;  %v3142_v43 = vcombine.high %v10943_v53, %v10927_v57  ;;  %v5380_v50 = vrot.slane %v5366_v17, %v9807_v63 }
 0x4f9   : > { %v11258_v33 = vpop.permute.xlu0 %7169  ;;  %v5781_v45 = vrot.slane %v5773_v48, %v9807_v63  ;;  %v5749_v30 = vrot.slane %v5741_v14, %v9807_v63  ;;  %v3223_v7 = vcombine.low %v3172_v51, %v3204_v0  ;;  %v3110_v11 = vcombine.high %v10961_v41, %v10937_v16 }
 0x4fa   : > { %7171 = vrot.lane.b32.xlu1 %v3222_v27, %s8784_s24  ;;  %15431 = vst [vmem:[#allocation129_spill] sm:$0xff] %v11258_v33  ;;  %v3126_v3 = vcombine.high %v10975_v24, %v10948_v56  ;;  %v5348_v12 = vrot.slane %v5334_v52, %v9807_v63  ;;  %v3094_v53 = vcombine.high %v10985_v10, %v10966_v44 }
 0x4fb   : > { %7397 = vrot.lane.b32.xlu0 %v5540_v46, %s8798_s22  ;;  %v5805_v57 = vcombine.low %v5749_v30, %v5781_v45  ;;  %v11290_v27 = vrot.slane %v3142_v43, %v9770_v32  ;;  %v5318_v4 = vcombine.high %v11014_v34, %v10991_v20  ;;  %v3598_v56 = vcombine.high %v11197_v13, %v11170_v62 }
 0x4fc   : > { %v5399_v16 = vcombine.low %v5348_v12, %v5380_v50  ;;  %v11298_v41 = vrot.slane %v3110_v11, %v9770_v32  ;;  %v11301_v24 = vrot.slane %v3126_v3, %v9770_v32  ;;  %v5286_v44 = vcombine.high %v11036_v47, %v11009_v35 }
 0x4fd   : > { %v11272_v18 = vpop.permute.xlu0 %7173  ;;  %v5302_v10 = vcombine.high %v11046_v15, %v11019_v2  ;;  %v3630_v34 = vcombine.high %v3573_v54, %v3605_v42  ;;  %v3566_v62 = vcombine.high %v11220_v49, %v11188_v36  ;;  %v11313_v13 = vrot.slane %v3094_v53, %v9770_v32 }
 0x4fe   : > { %7175 = vrot.lane.b32.xlu1 %v5398_v22, %s8784_s24  ;;  %15432 = vst [vmem:[#allocation374_spill] sm:$0xff] %v11272_v18  ;;  %v3205_v48 = vcombine.low %v11301_v24, %v11290_v27  ;;  %v5270_v35 = vcombine.high %v11066_v21, %v11041_v59  ;;  %v11320_v47 = vrot.slane %v5318_v4, %v9770_v32  ;;  %s8801_s24 = smov 52  }
 0x4ff   : > { %7409 = vrot.lane.b32.xlu0 %v3629_v26, %s8799_s25  ;;  %v3224_v2 = vcombine.high %v3172_v51, %v3204_v0  ;;  %v3612_v15 = vrot.slane %v3598_v56, %v9807_v63  ;;  %v3173_v36 = vcombine.low %v11313_v13, %v11298_v41  ;;  %v5774_v49 = vcombine.high %v11246_v8, %v11232_v39 }
 0x500   : > { %v11329_v42 = vrot.slane %v5286_v44, %v9770_v32  ;;  %v11332_v21 = vrot.slane %v5302_v10, %v9770_v32  ;;  %v5806_v46 = vcombine.high %v5749_v30, %v5781_v45  ;;  %v3580_v54 = vrot.slane %v3566_v62, %v9807_v63 }
 0x501   : > { %v11285_v1 = vpop.permute.xlu0 %7185  ;;  %v3213_v0 = vrot.slane %v3205_v48, %v9807_v63  ;;  %v5742_v14 = vcombine.high %v11253_v38, %v11243_v37  ;;  %v11342_v39 = vrot.slane %v5270_v35, %v9770_v32  ;;  %v5400_v17 = vcombine.high %v5348_v12, %v5380_v50  ;;  %v15439_v12 = vld [vmem:[#allocation385_spill] sm:$0xff] }
 0x502   : > { %7187 = vrot.lane.b32.xlu1 %v3223_v7, %s8785_s28  ;;  %15433 = vst [vmem:[#allocation143_spill] sm:$0xff] %v11285_v1  ;;  %v5381_v8 = vcombine.low %v11332_v21, %v11320_v47  ;;  %v3550_v22 = vcombine.high %v11113_v23, %v11087_v6  ;;  %v3181_v51 = vrot.slane %v3173_v36, %v9807_v63  ;;  %v15505_v1 = vld [vmem:[#allocation381_spill] sm:$0xff] }
 0x503   : > { %7413 = vrot.lane.b32.xlu0 %v5805_v57, %s8799_s25  ;;  %v5788_v45 = vrot.slane %v5774_v49, %v9807_v63  ;;  %v5349_v52 = vcombine.low %v11342_v39, %v11329_v42  ;;  %v3631_v38 = vcombine.low %v3580_v54, %v3612_v15  ;;  %v3518_v26 = vcombine.high %v11071_v5, %v11082_v58  ;;  %v15440_v57 = vld [vmem:[#allocation122_spill] sm:$0xff] }
 0x504   : > { %v3534_v43 = vcombine.high %v11140_v19, %v11118_v31  ;;  %v5756_v6 = vrot.slane %v5742_v14, %v9807_v63  ;;  %v5389_v23 = vrot.slane %v5381_v8, %v9807_v63  ;;  %v3225_v30 = vcombine.low %v3181_v51, %v3213_v0  ;;  %v15447_v14 = vld [vmem:[#allocation108_spill] sm:$0xff] }
 0x505   : > { %v11308_v20 = vpop.permute.xlu0 %7189  ;;  %v3502_v50 = vcombine.high %v11155_v60, %v11133_v25  ;;  %v11366_v7 = vrot.slane %v3550_v22, %v9770_v32  ;;  %v5726_v5 = vcombine.high %v11180_v40, %v11162_v55  ;;  %v5357_v58 = vrot.slane %v5349_v52, %v9807_v63  ;;  %v15438_v25 = vld [vmem:[#allocation357_spill] sm:$0xff]  ;;  %v15449_v52 = vld [vmem:[#allocation66_spill] sm:$0xff] }
 0x506   : > { %7191 = vrot.lane.b32.xlu1 %v5399_v16, %s8785_s28  ;;  %15434 = vst [vmem:[#allocation345_spill] sm:$0xff] %v11308_v20  ;;  %v5807_v19 = vcombine.low %v5756_v6, %v5788_v45  ;;  %v11375_v11 = vrot.slane %v3518_v26, %v9770_v32  ;;  %v11378_v3 = vrot.slane %v3534_v43, %v9770_v32  ;;  %s8802_s28 = smov 54   ;;  %v15514_v20 = vld [vmem:[#allocation131_spill] sm:$0xff] }
 0x507   : > { %7425 = vrot.lane.b32.xlu0 %v3630_v34, %s8800_s27  ;;  %v5694_v60 = vcombine.high %v15438_v25, %v11175_v29  ;;  %v5710_v53 = vcombine.high %v15440_v57, %v15439_v12  ;;  %v5401_v40 = vcombine.low %v5357_v58, %v5389_v23  ;;  %v11386_v55 = vrot.slane %v3502_v50, %v9770_v32  ;;  %v15455_v25 = vld [vmem:[#allocation302_spill] sm:$0xff] }
 0x508   : > { %v3613_v4 = vcombine.low %v11378_v3, %v11366_v7  ;;  %v5678_v16 = vcombine.high %v11227_v28, %v11207_v61  ;;  %v11393_v56 = vrot.slane %v5726_v5, %v9770_v32  ;;  %v3632_v44 = vcombine.high %v3580_v54, %v3612_v15  ;;  %v15445_v54 = vld [vmem:[#allocation80_spill] sm:$0xff]  ;;  %v15452_v5 = vld [vmem:[#allocation330_spill] sm:$0xff] }
 0x509   : > { %v11335_v59 = vpop.permute.xlu0 %7201  ;;  %v3581_v10 = vcombine.low %v11386_v55, %v11375_v11  ;;  %v3206_v34 = vcombine.high %v11301_v24, %v11290_v27  ;;  %v11403_v62 = vrot.slane %v5694_v60, %v9770_v32  ;;  %v11406_v48 = vrot.slane %v5710_v53, %v9770_v32  ;;  %v11419_v24 = vpop.permute.xlu1 %2410  ;;  %v15456_v60 = vld [vmem:[#allocation73_spill] sm:$0xff] }
 0x50a   : > { %7203 = vrot.lane.b32.xlu1 %v3224_v2, %s8786_s29  ;;  %15435 = vst [vmem:[#allocation115_spill] sm:$0xff] %v11335_v59  ;;  %v3226_v61 = vcombine.high %v3181_v51, %v3213_v0  ;;  %v11410_v28 = vrot.slane %v3613_v4, %v9807_v63  ;;  %v3174_v35 = vcombine.high %v11313_v13, %v11298_v41  ;;  %15442 = vst [vmem:[#allocation349_spill] sm:$0xff] %v11419_v24  ;;  %v15446_v0 = vld [vmem:[#allocation337_spill] sm:$0xff]  ;;  %v15458_v4 = vld [vmem:[#allocation87_spill] sm:$0xff] }
 0x50b   : > { %7429 = vrot.lane.b32.xlu0 %v5806_v46, %s8800_s27  ;;  %v11415_v2 = vrot.slane %v5678_v16, %v9770_v32  ;;  %v5789_v27 = vcombine.low %v11406_v48, %v11393_v56  ;;  %v5808_v36 = vcombine.high %v5756_v6, %v5788_v45  ;;  %v11425_v49 = vrot.slane %v3581_v10, %v9807_v63  ;;  %v15444_v46 = vld [vmem:[#allocation309_spill] sm:$0xff]  ;;  %v15448_v45 = vld [vmem:[#allocation295_spill] sm:$0xff] }
 0x50c   : > { %v11430_v41 = vsel %vm2428_vm0, %v15445_v54, %v15444_v46  ;;  %v11433_v13 = vrot.slane %v3206_v34, %v9807_v63  ;;  %v11438_v8 = vsel %vm2428_vm0, %v15447_v14, %v15446_v0  ;;  %v5382_v22 = vcombine.high %v11332_v21, %v11320_v47  ;;  %v15450_v6 = vld [vmem:[#allocation323_spill] sm:$0xff]  ;;  %v15453_v47 = vld [vmem:[#allocation101_spill] sm:$0xff]  ;;  %v15460_v34 = vld [vmem:[#allocation288_spill] sm:$0xff] }
 0x50d   : > { %v11354_v37 = vpop.permute.xlu0 %7205  ;;  %v5402_v51 = vcombine.high %v5357_v58, %v5389_v23  ;;  %v3188_v26 = vrot.slane %v3174_v35, %v9807_v63  ;;  %v3633_v43 = vcombine.low %v11425_v49, %v11410_v28  ;;  %v11461_v21 = vsel %vm2428_vm0, %v15453_v47, %v15452_v5  ;;  %v15463_v46 = vld [vmem:[#allocation228_spill] sm:$0xff]  ;;  %v15469_v47 = vld [vmem:[#allocation414_spill] sm:$0xff] }
 0x50e   : > { %7207 = vrot.lane.b32.xlu1 %v5400_v17, %s8786_s29  ;;  %15436 = vst [vmem:[#allocation353_spill] sm:$0xff] %v11354_v37  ;;  %v5757_v17 = vcombine.low %v11415_v2, %v11403_v62  ;;  %v11464_v23 = vrot.slane %v5789_v27, %v9807_v63  ;;  %v5350_v58 = vcombine.high %v11342_v39, %v11329_v42  ;;  %s8803_s29 = smov 56  }
 0x50f   : > { %7441 = vrot.lane.b32.xlu0 %v3631_v38, %s8801_s24  ;;  %v11448_v38 = vsel %vm2428_vm0, %v15449_v52, %v15448_v45  ;;  %v11474_v12 = vsel %vm2428_vm0, %v15456_v60, %v15455_v25  ;;  %v11487_v39 = vrot.slane %v5382_v22, %v9807_v63  ;;  %v3227_v10 = vcombine.low %v3188_v26, %v11433_v13  ;;  %v15465_v45 = vld [vmem:[#allocation413_spill] sm:$0xff]  ;;  %v15466_v52 = vld [vmem:[#allocation196_spill] sm:$0xff] }
 0x510   : > { %v3381_v57 = vcombine.low %v11448_v38, %v11430_v41  ;;  %v5765_v42 = vrot.slane %v5757_v17, %v9807_v63  ;;  %v5364_v14 = vrot.slane %v5350_v58, %v9807_v63  ;;  %v15470_v58 = vld [vmem:[#allocation220_spill] sm:$0xff]  ;;  %v3614_v60 = vcombine.high %v11378_v3, %v11366_v7 }
 0x511   : > { %v11372_v31 = vpop.permute.xlu0 %7217  ;;  %v11528_v25 = vsel %vm2428_vm0, %v15470_v58, %v15469_v47  ;;  %v15474_v7 = vld [vmem:[#allocation188_spill] sm:$0xff]  ;;  %v3634_v47 = vcombine.high %v11425_v49, %v11410_v28  ;;  %v3582_v58 = vcombine.high %v11386_v55, %v11375_v11  ;;  %v3228_v55 = vcombine.high %v3188_v26, %v11433_v13 }
 0x512   : > { %7219 = vrot.lane.b32.xlu1 %v3225_v30, %s8787_s30  ;;  %15437 = vst [vmem:[#allocation348_spill] sm:$0xff] %v11372_v31  ;;  %v15451_v30 = vld [vmem:[#allocation94_spill] sm:$0xff]  ;;  %v5809_v22 = vcombine.low %v5765_v42, %v11464_v23  ;;  %v15483_v49 = vld [vmem:[#allocation256_spill] sm:$0xff]  ;;  %v5790_v13 = vcombine.high %v11406_v48, %v11393_v56  ;;  %v15490_v56 = vld [vmem:[#allocation275_spill] sm:$0xff] }
 0x513   : > { %7445 = vrot.lane.b32.xlu0 %v5807_v19, %s8801_s24  ;;  %v11456_v50 = vsel %vm2428_vm0, %v15451_v30, %v15450_v6  ;;  %v15467_v6 = vld [vmem:[#allocation155_spill] sm:$0xff]  ;;  %v15468_v30 = vld [vmem:[#allocation212_spill] sm:$0xff] }
 0x514   : > { %v3413_v53 = vcombine.low %v11456_v50, %v11438_v8  ;;  %v11523_v5 = vsel %vm2428_vm0, %v15468_v30, %v15467_v6  ;;  %v15491_v48 = vld [vmem:[#allocation48_spill] sm:$0xff] }
 0x515   : > { %v11396_v29 = vpop.permute.xlu0 %7221 }
 0x516   : > { %7223 = vrot.lane.b32.xlu1 %v5401_v40, %s8787_s30  ;;  %15441 = vst [vmem:[#allocation354_spill] sm:$0xff] %v11396_v29  ;;  %v15457_v40 = vld [vmem:[#allocation316_spill] sm:$0xff]  ;;  %s8804_s30 = smov 58  }
 0x517   : > { %7457 = vrot.lane.b32.xlu0 %v3632_v44, %s8802_s28  ;;  %v11483_v16 = vsel %vm2428_vm0, %v15458_v4, %v15457_v40  ;;  %v11489_v44 = vpop.permute.xlu1 %2418  ;;  %v5403_v4 = vcombine.low %v5364_v14, %v11487_v39  ;;  %v15506_v29 = vld [vmem:[#allocation152_spill] sm:$0xff] }
 0x518   : > { %15459 = vst [vmem:[#allocation307_spill] sm:$0xff] %v11489_v44  ;;  %v3397_v27 = vcombine.low %v11483_v16, %v11461_v21 }
 0x519   : > { %v11422_v15 = vpop.permute.xlu0 %7233 }
 0x51a   : > { %7235 = vrot.lane.b32.xlu1 %v3226_v61, %s8788_s3  ;;  %15443 = vst [vmem:[#allocation335_spill] sm:$0xff] %v11422_v15  ;;  %v15461_v61 = vld [vmem:[#allocation59_spill] sm:$0xff]  ;;  %v15501_v15 = vld [vmem:[#allocation166_spill] sm:$0xff] }
 0x51b   : > { %7461 = vrot.lane.b32.xlu0 %v5808_v36, %s8802_s28  ;;  %v11496_v35 = vsel %vm2428_vm0, %v15461_v61, %v15460_v34  ;;  %v15462_v36 = vld [vmem:[#allocation186_spill] sm:$0xff]  ;;  %v15471_v34 = vld [vmem:[#allocation403_spill] sm:$0xff]  ;;  %v15472_v61 = vld [vmem:[#allocation180_spill] sm:$0xff]  ;;  %v11561_v6 = vpop.permute.xlu1 %2426 }
 0x51c   : > { %v11503_v54 = vsel %vm2428_vm0, %v15463_v46, %v15462_v36  ;;  %v3365_v0 = vcombine.low %v11496_v35, %v11474_v12  ;;  %v11545_v36 = vsel %vm2428_vm0, %v15472_v61, %v15471_v34  ;;  %v15473_v46 = vld [vmem:[#allocation408_spill] sm:$0xff]  ;;  %15477 = vst [vmem:[#allocation321_spill] sm:$0xff] %v11561_v6 }
 0x51d   : > { %v11469_v19 = vpop.permute.xlu0 %7237  ;;  %v5589_v40 = vcombine.low %v11523_v5, %v11503_v54  ;;  %v11550_v3 = vsel %vm2428_vm0, %v15474_v7, %v15473_v46  ;;  %v15479_v46 = vld [vmem:[#allocation398_spill] sm:$0xff]  ;;  %v15480_v7 = vld [vmem:[#allocation172_spill] sm:$0xff] }
 0x51e   : > { %7239 = vrot.lane.b32.xlu1 %v5402_v51, %s8788_s3  ;;  %15454 = vst [vmem:[#allocation106_spill] sm:$0xff] %v11469_v19  ;;  %v11513_v51 = vrot.slane %v3413_v53, %v9770_v32  ;;  %v11533_v53 = vrot.slane %v3381_v57, %v9770_v32  ;;  %v15475_v57 = vld [vmem:[#allocation162_spill] sm:$0xff]  ;;  %v11571_v34 = vrot.slane %v3365_v0, %v9770_v32  ;;  %v15484_v0 = vld [vmem:[#allocation29_spill] sm:$0xff]  ;;  %s8805_s3 = smov 60  }
 0x51f   : > { %7473 = vrot.lane.b32.xlu0 %v3633_v43, %s8803_s29  ;;  %v11518_v43 = vsel %vm2428_vm0, %v15466_v52, %v15465_v45  ;;  %v15476_v45 = vld [vmem:[#allocation204_spill] sm:$0xff]  ;;  %v11588_v11 = vrot.slane %v5589_v40, %v9770_v32  ;;  %v15503_v19 = vld [vmem:[#allocation370_spill] sm:$0xff] }
 0x520   : > { %v11555_v52 = vsel %vm2428_vm0, %v15476_v45, %v15475_v57  ;;  %v11578_v57 = vsel %vm2428_vm0, %v15480_v7, %v15479_v46  ;;  %v15482_v45 = vld [vmem:[#allocation17_spill] sm:$0xff]  ;;  %v11595_v46 = vsel %vm2428_vm0, %v15484_v0, %v15483_v49  ;;  %v11598_v7 = vrot.slane %v3614_v60, %v9807_v63 }
 0x521   : > { %v11509_v17 = vpop.permute.xlu0 %7249  ;;  %v5541_v28 = vcombine.low %v11578_v57, %v11550_v3  ;;  %v3429_v40 = vcombine.low %v11571_v34, %v11533_v53  ;;  %v5810_v49 = vcombine.high %v5765_v42, %v11464_v23  ;;  %v11620_v0 = vrot.slane %v3582_v58, %v9807_v63  ;;  %v11642_v58 = vpop.permute.xlu1 %7043 }
 0x522   : > { %7251 = vrot.lane.b32.xlu1 %v3227_v10, %s8789_s4  ;;  %15464 = vst [vmem:[#allocation78_spill] sm:$0xff] %v11509_v17  ;;  %v11540_v10 = vrot.slane %v3397_v27, %v9770_v32  ;;  %v5573_v27 = vcombine.low %v11555_v52, %v11528_v25  ;;  %15492 = vst [vmem:[#allocation99_spill] sm:$0xff] %v11642_v58 }
 0x523   : > { %7477 = vrot.lane.b32.xlu0 %v5809_v22, %s8803_s29  ;;  %v5557_v22 = vcombine.low %v11545_v36, %v11518_v43  ;;  %v11638_v23 = vrot.slane %v5541_v28, %v9770_v32  ;;  %v15496_v28 = vld [vmem:[#allocation36_spill] sm:$0xff] }
 0x524   : > { %v3461_v61 = vcombine.low %v11540_v10, %v11513_v51 }
 0x525   : > { %v11564_v30 = vpop.permute.xlu0 %7253  ;;  %v11610_v26 = vrot.slane %v5557_v22, %v9770_v32  ;;  %v11630_v22 = vsel %vm2428_vm0, %v15491_v48, %v15490_v56  ;;  %v15494_v56 = vld [vmem:[#allocation23_spill] sm:$0xff] }
 0x526   : > { %7255 = vrot.lane.b32.xlu1 %v5403_v4, %s8789_s4  ;;  %15478 = vst [vmem:[#allocation92_spill] sm:$0xff] %v11564_v30  ;;  %v15481_v4 = vld [vmem:[#allocation244_spill] sm:$0xff]  ;;  %s8806_s4 = smov 62  }
 0x527   : > { %v11583_v6 = vsel %vm2428_vm0, %v15482_v45, %v15481_v4  ;;  %7489 = vrot.lane.b32.xlu0 %v3634_v47, %s8804_s30  ;;  %v15485_v4 = vld [vmem:[#allocation281_spill] sm:$0xff]  ;;  %v15486_v45 = vld [vmem:[#allocation54_spill] sm:$0xff]  ;;  %v11613_v47 = vrot.slane %v5573_v27, %v9770_v32  ;;  %v11633_v27 = vrot.slane %v3461_v61, %v9807_v63 }
 0x528   : > { %v11603_v44 = vsel %vm2428_vm0, %v15486_v45, %v15485_v4  ;;  %v15488_v4 = vld [vmem:[#allocation269_spill] sm:$0xff]  ;;  %v15489_v45 = vld [vmem:[#allocation42_spill] sm:$0xff] }
 0x529   : > { %v11616_v60 = vpop.permute.xlu0 %7265  ;;  %v11625_v17 = vsel %vm2428_vm0, %v15489_v45, %v15488_v4  ;;  %v5637_v42 = vcombine.low %v11613_v47, %v11588_v11  ;;  %v5404_v4 = vcombine.high %v5364_v14, %v11487_v39  ;;  %v15493_v45 = vld [vmem:[#allocation250_spill] sm:$0xff]  ;;  %v3437_v39 = vrot.slane %v3429_v40, %v9807_v63 }
 0x52a   : > { %7267 = vrot.lane.b32.xlu1 %v3228_v55, %s8790_s18  ;;  %15487 = vst [vmem:[#allocation328_spill] sm:$0xff] %v11616_v60  ;;  %v5758_v55 = vcombine.high %v11415_v2, %v11403_v62  ;;  %v11649_v61 = vsel %vm2428_vm0, %v15494_v56, %v15493_v45  ;;  %v3789_v62 = vcombine.low %v11583_v6, %v11595_v46  ;;  %v15495_v2 = vld [vmem:[#allocation263_spill] sm:$0xff] }
 0x52b   : > { %7493 = vrot.lane.b32.xlu0 %v5810_v49, %s8804_s30  ;;  %v11656_v48 = vsel %vm2428_vm0, %v15496_v28, %v15495_v2  ;;  %v3821_v58 = vcombine.low %v11625_v17, %v11603_v44  ;;  %v11662_v14 = vrot.slane %v5790_v13, %v9807_v63  ;;  %v5605_v49 = vcombine.low %v11638_v23, %v11610_v26  ;;  %v15498_v2 = vld [vmem:[#allocation237_spill] sm:$0xff]  ;;  %v15499_v28 = vld [vmem:[#allocation10_spill] sm:$0xff]  ;;  %v11687_v59 = vpop.permute.xlu1 %7047 }
 0x52c   : > { %v3635_v56 = vcombine.low %v11620_v0, %v11598_v7  ;;  %v11674_v60 = vsel %vm2428_vm0, %v15499_v28, %v15498_v2  ;;  %v3805_v40 = vcombine.low %v11656_v48, %v11630_v22  ;;  %v15500_v13 = vld [vmem:[#allocation394_spill] sm:$0xff]  ;;  %v5645_v30 = vrot.slane %v5637_v42, %v9807_v63  ;;  %15502 = vst [vmem:[#allocation64_spill] sm:$0xff] %v11687_v59  ;;  %v15507_v42 = vld [vmem:[#allocation387_spill] sm:$0xff] }
 0x52d   : > { %v11667_v45 = vpop.permute.xlu0 %7269  ;;  %v11681_v31 = vsel %vm2428_vm0, %v15501_v15, %v15500_v13  ;;  %v3493_v2 = vcombine.low %v3437_v39, %v11633_v27  ;;  %v11692_v28 = vrot.slane %v3821_v58, %v9770_v32  ;;  %v15504_v15 = vld [vmem:[#allocation138_spill] sm:$0xff]  ;;  %v15508_v59 = vld [vmem:[#allocation159_spill] sm:$0xff]  ;;  %v5613_v37 = vrot.slane %v5605_v49, %v9807_v63  ;;  %v15515_v49 = vld [vmem:[#allocation376_spill] sm:$0xff] }
 0x52e   : > { %7271 = vrot.lane.b32.xlu1 %v5404_v4, %s8790_s18  ;;  %15497 = vst [vmem:[#allocation293_spill] sm:$0xff] %v11667_v45  ;;  %v3773_v4 = vcombine.low %v11674_v60, %v11649_v61  ;;  %v5772_v45 = vrot.slane %v5758_v55, %v9807_v63  ;;  %v11697_v13 = vsel %vm2428_vm0, %v15504_v15, %v15503_v19  ;;  %v15510_v15 = vld [vmem:[#allocation359_spill] sm:$0xff]  ;;  %s8807_s18 = smov 64  }
 0x52f   : > { %7505 = vrot.lane.b32.xlu0 %v3635_v56, %s8805_s3  ;;  %v11702_v55 = vsel %vm2428_vm0, %v15506_v29, %v15505_v1  ;;  %v11707_v33 = vsel %vm2428_vm0, %v15508_v59, %v15507_v42  ;;  %v11710_v56 = vrot.slane %v3789_v62, %v9770_v32  ;;  %v11720_v29 = vrot.slane %v3805_v40, %v9770_v32  ;;  %v15511_v59 = vld [vmem:[#allocation124_spill] sm:$0xff]  ;;  %v15513_v62 = vld [vmem:[#allocation365_spill] sm:$0xff] }
 0x530   : > { %v5997_v58 = vcombine.low %v11702_v55, %v11681_v31  ;;  %v5811_v1 = vcombine.low %v5772_v45, %v11662_v14  ;;  %v11725_v42 = vsel %vm2428_vm0, %v15511_v59, %v15510_v15  ;;  %v11730_v18 = vsel %vm2428_vm0, %v15514_v20, %v15513_v62  ;;  %v11741_v24 = vpop.permute.xlu1 %7059  ;;  %v15519_v62 = vld [vmem:[#allocation347_spill] sm:$0xff] }
 0x531   : > { %v11716_v19 = vpop.permute.xlu0 %7281  ;;  %15512 = vst [vmem:[#allocation71_spill] sm:$0xff] %v11725_v42  ;;  %15518 = vst [vmem:[#allocation85_spill] sm:$0xff] %v11741_v24  ;;  %v5669_v15 = vcombine.low %v5613_v37, %v5645_v30  ;;  %v11745_v59 = vrot.slane %v3773_v4, %v9770_v32  ;;  %v3869_v20 = vcombine.low %v11720_v29, %v11692_v28 }
 0x532   : > { %7283 = vrot.lane.b32.xlu1 %v3493_v2, %s8791_s19  ;;  %15509 = vst [vmem:[#allocation300_spill] sm:$0xff] %v11716_v19  ;;  %v11735_v2 = vsel %vm2428_vm0, %v15516_v9, %v15515_v49  ;;  %v5965_v19 = vcombine.low %v11725_v42, %v11697_v13  ;;  %v15520_v9 = vld [vmem:[#allocation117_spill] sm:$0xff]  ;;  %v3636_v4 = vcombine.high %v11620_v0, %v11598_v7 }
 0x533   : > { %15517 = vst [vmem:[#allocation314_spill] sm:$0xff] %v11735_v2  ;;  %v5981_v40 = vcombine.low %v11735_v2, %v11707_v33  ;;  %7509 = vrot.lane.b32.xlu0 %v5811_v1, %s8805_s3  ;;  %v11752_v49 = vsel %vm2428_vm0, %v15520_v9, %v15519_v62  ;;  %v11757_v2 = vrot.slane %v5997_v58, %v9770_v32 }
 0x534   : > { %15521 = vst [vmem:[#allocation286_spill] sm:$0xff] %v11752_v49  ;;  %v5949_v42 = vcombine.low %v11752_v49, %v11730_v18  ;;  %v3837_v24 = vcombine.low %v11745_v59, %v11710_v56  ;;  %v3462_v62 = vcombine.high %v11540_v10, %v11513_v51  ;;  %v11769_v9 = vrot.slane %v5965_v19, %v9770_v32  ;;  %v11774_v58 = vpop.permute.xlu1 %7063 }
 0x535   : > { %v11760_v1 = vpop.permute.xlu0 %7285  ;;  %v11772_v49 = vrot.slane %v5981_v40, %v9770_v32  ;;  %15523 = vst [vmem:[#allocation225_spill] sm:$0xff] %v11774_v58  ;;  %v3877_v7 = vrot.slane %v3869_v20, %v9807_v63  ;;  %v3430_v0 = vcombine.high %v11571_v34, %v11533_v53  ;;  %v5638_v53 = vcombine.high %v11613_v47, %v11588_v11 }
 0x536   : > { %7287 = vrot.lane.b32.xlu1 %v5669_v15, %s8791_s19  ;;  %15522 = vst [vmem:[#allocation57_spill] sm:$0xff] %v11760_v1  ;;  %v3494_v15 = vcombine.high %v3437_v39, %v11633_v27  ;;  %v11782_v51 = vrot.slane %v5949_v42, %v9770_v32  ;;  %v5812_v27 = vcombine.high %v5772_v45, %v11662_v14  ;;  %s8808_s19 = smov 66  }
 0x537   : > { %7521 = vrot.lane.b32.xlu0 %v3636_v4, %s8806_s4  ;;  %v6045_v10 = vcombine.low %v11772_v49, %v11757_v2  ;;  %v3845_v39 = vrot.slane %v3837_v24, %v9807_v63  ;;  %v3476_v40 = vrot.slane %v3462_v62, %v9807_v63  ;;  %v5670_v42 = vcombine.high %v5613_v37, %v5645_v30 }
 0x538   : > { %v6013_v20 = vcombine.low %v11782_v51, %v11769_v9  ;;  %v11796_v34 = vpop.permute.xlu1 %7075  ;;  %v3444_v4 = vrot.slane %v3430_v0, %v9807_v63  ;;  %v5606_v24 = vcombine.high %v11638_v23, %v11610_v26  ;;  %v3414_v11 = vcombine.high %v11456_v50, %v11438_v8 }
 0x539   : > { %v11787_v19 = vpop.permute.xlu0 %7297  ;;  %15525 = vst [vmem:[#allocation351_spill] sm:$0xff] %v11796_v34  ;;  %v3901_v45 = vcombine.low %v3845_v39, %v3877_v7  ;;  %v5652_v37 = vrot.slane %v5638_v53, %v9807_v63  ;;  %v3382_v26 = vcombine.high %v11448_v38, %v11430_v41  ;;  %v3398_v23 = vcombine.high %v11483_v16, %v11461_v21 }
 0x53a   : > { %7299 = vrot.lane.b32.xlu1 %v3494_v15, %s8792_s21  ;;  %15524 = vst [vmem:[#allocation355_spill] sm:$0xff] %v11787_v19  ;;  %v6053_v15 = vrot.slane %v6045_v10, %v9807_v63  ;;  %v6021_v47 = vrot.slane %v6013_v20, %v9807_v63  ;;  %v3495_v62 = vcombine.low %v3444_v4, %v3476_v40 }
 0x53b   : > { %7525 = vrot.lane.b32.xlu0 %v5812_v27, %s8806_s4  ;;  %v5620_v0 = vrot.slane %v5606_v24, %v9807_v63  ;;  %v3366_v10 = vcombine.high %v11496_v35, %v11474_v12  ;;  %v11824_v27 = vrot.slane %v3414_v11, %v9770_v32  ;;  %v5590_v20 = vcombine.high %v11523_v5, %v11503_v54 }
 0x53c   : > { %v11810_v30 = vpop.permute.xlu1 %7079  ;;  %v6077_v50 = vcombine.low %v6021_v47, %v6053_v15  ;;  %v3870_v21 = vcombine.high %v11720_v29, %v11692_v28  ;;  %v11834_v16 = vrot.slane %v3382_v26, %v9770_v32  ;;  %v11837_v53 = vrot.slane %v3398_v23, %v9770_v32 }
 0x53d   : > { %v11804_v14 = vpop.permute.xlu0 %7301  ;;  %15527 = vst [vmem:[#allocation209_spill] sm:$0xff] %v11810_v30  ;;  %v5671_v38 = vcombine.low %v5620_v0, %v5652_v37  ;;  %v5558_v12 = vcombine.high %v11545_v36, %v11518_v43  ;;  %v5574_v35 = vcombine.high %v11555_v52, %v11528_v25  ;;  %v3902_v5 = vcombine.high %v3845_v39, %v3877_v7 }
 0x53e   : > { %7303 = vrot.lane.b32.xlu1 %v5670_v42, %s8792_s21  ;;  %15526 = vst [vmem:[#allocation193_spill] sm:$0xff] %v11804_v14  ;;  %v3838_v28 = vcombine.high %v11745_v59, %v11710_v56  ;;  %v11849_v29 = vrot.slane %v3366_v10, %v9770_v32  ;;  %v3477_v42 = vcombine.low %v11837_v53, %v11824_v27  ;;  %s8809_s21 = smov 68   ;;  %v15619_v14 = vld [vmem:[#allocation144_spill] sm:$0xff] }
 0x53f   : > { %7537 = vrot.lane.b32.xlu0 %v3901_v45, %s8807_s18  ;;  %v5542_v43 = vcombine.high %v11578_v57, %v11550_v3  ;;  %v11856_v36 = vrot.slane %v5590_v20, %v9770_v32  ;;  %v3496_v52 = vcombine.high %v3444_v4, %v3476_v40  ;;  %v3884_v56 = vrot.slane %v3870_v21, %v9807_v63 }
 0x540   : > { %v11828_v41 = vpop.permute.xlu1 %7091  ;;  %v3445_v59 = vcombine.low %v11849_v29, %v11834_v16  ;;  %v6046_v7 = vcombine.high %v11772_v49, %v11757_v2  ;;  %v11867_v39 = vrot.slane %v5558_v12, %v9770_v32  ;;  %v11870_v3 = vrot.slane %v5574_v35, %v9770_v32  ;;  %v15538_v35 = vld [vmem:[#allocation314_spill] sm:$0xff] }
 0x541   : > { %v11819_v8 = vpop.permute.xlu0 %7313  ;;  %15529 = vst [vmem:[#allocation177_spill] sm:$0xff] %v11828_v41  ;;  %v6078_v40 = vcombine.high %v6021_v47, %v6053_v15  ;;  %v3852_v4 = vrot.slane %v3838_v28, %v9807_v63  ;;  %v3485_v24 = vrot.slane %v3477_v42, %v9807_v63  ;;  %v6014_v45 = vcombine.high %v11782_v51, %v11769_v9  ;;  %v15578_v41 = vld [vmem:[#allocation203_spill] sm:$0xff] }
 0x542   : > { %7315 = vrot.lane.b32.xlu1 %v3495_v62, %s8793_s20  ;;  %15528 = vst [vmem:[#allocation217_spill] sm:$0xff] %v11819_v8  ;;  %v11880_v2 = vrot.slane %v5542_v43, %v9770_v32  ;;  %v5653_v49 = vcombine.low %v11870_v3, %v11856_v36  ;;  %v5672_v62 = vcombine.high %v5620_v0, %v5652_v37  ;;  %v15540_v43 = vld [vmem:[#allocation286_spill] sm:$0xff] }
 0x543   : > { %7541 = vrot.lane.b32.xlu0 %v6077_v50, %s8807_s18  ;;  %v3822_v15 = vcombine.high %v11625_v17, %v11603_v44  ;;  %v3453_v47 = vrot.slane %v3445_v59, %v9807_v63  ;;  %v6060_v26 = vrot.slane %v6046_v7, %v9807_v63  ;;  %v3903_v23 = vcombine.low %v3852_v4, %v3884_v56  ;;  %v15609_v8 = vld [vmem:[#allocation386_spill] sm:$0xff] }
 0x544   : > { %v11858_v25 = vpop.permute.xlu1 %7095  ;;  %v5621_v9 = vcombine.low %v11880_v2, %v11867_v39  ;;  %v3790_v37 = vcombine.high %v11583_v6, %v11595_v46  ;;  %v3806_v0 = vcombine.high %v11656_v48, %v11630_v22  ;;  %v6028_v44 = vrot.slane %v6014_v45, %v9807_v63 }
 0x545   : > { %v11844_v54 = vpop.permute.xlu0 %7317  ;;  %15531 = vst [vmem:[#allocation201_spill] sm:$0xff] %v11858_v25  ;;  %v5661_v17 = vrot.slane %v5653_v49, %v9807_v63  ;;  %v3497_v10 = vcombine.low %v3453_v47, %v3485_v24  ;;  %v3774_v20 = vcombine.high %v11674_v60, %v11649_v61  ;;  %v5998_v6 = vcombine.high %v11702_v55, %v11681_v31  ;;  %v15537_v60 = vld [vmem:[#allocation71_spill] sm:$0xff] }
 0x546   : > { %7319 = vrot.lane.b32.xlu1 %v5671_v38, %s8793_s20  ;;  %15530 = vst [vmem:[#allocation185_spill] sm:$0xff] %v11844_v54  ;;  %v11908_v38 = vrot.slane %v3822_v15, %v9770_v32  ;;  %v5629_v46 = vrot.slane %v5621_v9, %v9807_v63  ;;  %v6079_v48 = vcombine.low %v6028_v44, %v6060_v26  ;;  %s8810_s20 = smov 70   ;;  %v15544_v9 = vld [vmem:[#allocation308_spill] sm:$0xff] }
 0x547   : > { %7553 = vrot.lane.b32.xlu0 %v3902_v5, %s8808_s19  ;;  %v11917_v21 = vrot.slane %v3790_v37, %v9770_v32  ;;  %v11920_v12 = vrot.slane %v3806_v0, %v9770_v32  ;;  %v5966_v61 = vcombine.high %v15537_v60, %v11697_v13  ;;  %v5982_v5 = vcombine.high %v15538_v35, %v11707_v33  ;;  %v15550_v60 = vld [vmem:[#allocation65_spill] sm:$0xff] }
 0x548   : > { %v11884_v11 = vpop.permute.xlu1 %7107  ;;  %v5673_v55 = vcombine.low %v5629_v46, %v5661_v17  ;;  %v11930_v28 = vrot.slane %v3774_v20, %v9770_v32  ;;  %v11937_v59 = vrot.slane %v5998_v6, %v9770_v32  ;;  %v3904_v13 = vcombine.high %v3852_v4, %v3884_v56 }
 0x549   : > { %v11873_v57 = vpop.permute.xlu0 %7329  ;;  %15533 = vst [vmem:[#allocation241_spill] sm:$0xff] %v11884_v11  ;;  %v3885_v42 = vcombine.low %v11920_v12, %v11908_v38  ;;  %v11947_v45 = vrot.slane %v5966_v61, %v9770_v32  ;;  %v11950_v49 = vrot.slane %v5982_v5, %v9770_v32  ;;  %v3446_v4 = vcombine.high %v11849_v29, %v11834_v16  ;;  %v15546_v16 = vld [vmem:[#allocation336_spill] sm:$0xff]  ;;  %v15547_v29 = vld [vmem:[#allocation107_spill] sm:$0xff] }
 0x54a   : > { %7331 = vrot.lane.b32.xlu1 %v3496_v52, %s8794_s2  ;;  %15532 = vst [vmem:[#allocation169_spill] sm:$0xff] %v11873_v57  ;;  %v5950_v52 = vcombine.high %v15540_v43, %v11730_v18  ;;  %v3853_v7 = vcombine.low %v11930_v28, %v11917_v21  ;;  %v11979_v0 = vsel %vm2428_vm0, %v15547_v29, %v15546_v16 }
 0x54b   : > { %7557 = vrot.lane.b32.xlu0 %v6078_v40, %s8808_s19  ;;  %v3478_v40 = vcombine.high %v11837_v53, %v11824_v27  ;;  %v11956_v56 = vrot.slane %v3885_v42, %v9807_v63  ;;  %v6061_v53 = vcombine.low %v11950_v49, %v11937_v59  ;;  %v5674_v6 = vcombine.high %v5629_v46, %v5661_v17  ;;  %v15552_v42 = vld [vmem:[#allocation93_spill] sm:$0xff]  ;;  %v15554_v17 = vld [vmem:[#allocation100_spill] sm:$0xff] }
 0x54c   : > { %v11902_v50 = vpop.permute.xlu1 %7111  ;;  %v11961_v27 = vrot.slane %v5950_v52, %v9770_v32  ;;  %v11997_v35 = vrot.slane %v3446_v4, %v9807_v63  ;;  %v5622_v52 = vcombine.high %v11880_v2, %v11867_v39 }
 0x54d   : > { %v11894_v51 = vpop.permute.xlu0 %7333  ;;  %15535 = vst [vmem:[#allocation253_spill] sm:$0xff] %v11902_v50  ;;  %v12012_v43 = vrot.slane %v6061_v53, %v9807_v63  ;;  %v15558_v53 = vld [vmem:[#allocation315_spill] sm:$0xff]  ;;  %v15583_v50 = vld [vmem:[#allocation16_spill] sm:$0xff] }
 0x54e   : > { %7335 = vrot.lane.b32.xlu1 %v5672_v62, %s8794_s2  ;;  %15534 = vst [vmem:[#allocation14_spill] sm:$0xff] %v11894_v51  ;;  %v3498_v62 = vcombine.high %v3453_v47, %v3485_v24  ;;  %v6080_v24 = vcombine.high %v6028_v44, %v6060_v26  ;;  %v11969_v47 = vrot.slane %v3853_v7, %v9807_v63  ;;  %v15556_v7 = vld [vmem:[#allocation301_spill] sm:$0xff]  ;;  %s8811_s2 = smov 72   ;;  %v15616_v51 = vld [vmem:[#allocation130_spill] sm:$0xff] }
 0x54f   : > { %7569 = vrot.lane.b32.xlu0 %v3903_v23, %s8809_s21  ;;  %v15545_v23 = vld [vmem:[#allocation79_spill] sm:$0xff]  ;;  %v6029_v20 = vcombine.low %v11961_v27, %v11947_v45  ;;  %v5654_v26 = vcombine.high %v11870_v3, %v11856_v36  ;;  %v15553_v3 = vld [vmem:[#allocation329_spill] sm:$0xff]  ;;  %v6030_v58 = vcombine.high %v11961_v27, %v11947_v45  ;;  %v15597_v27 = vld [vmem:[#allocation262_spill] sm:$0xff] }
 0x550   : > { %v11974_v37 = vsel %vm2428_vm0, %v15545_v23, %v15544_v9  ;;  %v3905_v5 = vcombine.low %v11969_v47, %v11956_v56  ;;  %v12009_v46 = vsel %vm2428_vm0, %v15554_v17, %v15553_v3  ;;  %v15559_v9 = vld [vmem:[#allocation86_spill] sm:$0xff]  ;;  %v5636_v17 = vrot.slane %v5622_v52, %v9807_v63  ;;  %v15570_v52 = vld [vmem:[#allocation40_spill] sm:$0xff] }
 0x551   : > { %v11914_v22 = vpop.permute.xlu0 %7345  ;;  %v12031_v23 = vsel %vm2428_vm0, %v15559_v9, %v15558_v53  ;;  %v12034_v39 = vrot.slane %v6029_v20, %v9807_v63  ;;  %v12037_v2 = vrot.slane %v5654_v26, %v9807_v63  ;;  %v15566_v53 = vld [vmem:[#allocation8_spill] sm:$0xff]  ;;  %v15567_v9 = vld [vmem:[#allocation195_spill] sm:$0xff] }
 0x552   : > { %7347 = vrot.lane.b32.xlu1 %v3497_v10, %s8795_s6  ;;  %15536 = vst [vmem:[#allocation26_spill] sm:$0xff] %v11914_v22  ;;  %v11982_v10 = vrot.slane %v3478_v40, %v9807_v63  ;;  %v15557_v40 = vld [vmem:[#allocation72_spill] sm:$0xff]  ;;  %v3669_v20 = vcombine.low %v12031_v23, %v12009_v46 }
 0x553   : > { %7573 = vrot.lane.b32.xlu0 %v6079_v48, %s8809_s21  ;;  %v15549_v48 = vld [vmem:[#allocation294_spill] sm:$0xff]  ;;  %v5675_v11 = vcombine.low %v5636_v17, %v12037_v2 }
 0x554   : > { %v11926_v31 = vpop.permute.xlu1 %7123  ;;  %v11994_v61 = vsel %vm2428_vm0, %v15550_v60, %v15549_v48  ;;  %v3499_v29 = vcombine.low %v11997_v35, %v11982_v10  ;;  %v15562_v48 = vld [vmem:[#allocation58_spill] sm:$0xff] }
 0x555   : > { %15539 = vst [vmem:[#allocation278_spill] sm:$0xff] %v11926_v31  ;;  %v11940_v33 = vpop.permute.xlu0 %7349  ;;  %v3653_v4 = vcombine.low %v11994_v61, %v11974_v37  ;;  %v3886_v31 = vcombine.high %v11920_v12, %v11908_v38  ;;  %v15575_v38 = vld [vmem:[#allocation412_spill] sm:$0xff]  ;;  %v15576_v12 = vld [vmem:[#allocation187_spill] sm:$0xff] }
 0x556   : > { %7351 = vrot.lane.b32.xlu1 %v5673_v55, %s8795_s6  ;;  %15541 = vst [vmem:[#allocation51_spill] sm:$0xff] %v11940_v33  ;;  %v15551_v55 = vld [vmem:[#allocation322_spill] sm:$0xff]  ;;  %s8812_s6 = smov 74  }
 0x557   : > { %7585 = vrot.lane.b32.xlu0 %v3904_v13, %s8810_s20  ;;  %v12004_v36 = vsel %vm2428_vm0, %v15552_v42, %v15551_v55  ;;  %v15563_v55 = vld [vmem:[#allocation349_spill] sm:$0xff]  ;;  %v15564_v42 = vld [vmem:[#allocation227_spill] sm:$0xff] }
 0x558   : > { %v11952_v18 = vpop.permute.xlu1 %7127  ;;  %v12054_v26 = vsel %vm2428_vm0, %v15564_v42, %v15563_v55  ;;  %v15569_v55 = vld [vmem:[#allocation211_spill] sm:$0xff] }
 0x559   : > { %15542 = vst [vmem:[#allocation266_spill] sm:$0xff] %v11952_v18  ;;  %v11966_v15 = vpop.permute.xlu0 %7361  ;;  %v15581_v18 = vld [vmem:[#allocation171_spill] sm:$0xff] }
 0x55a   : > { %7363 = vrot.lane.b32.xlu1 %v3498_v62, %s8796_s14  ;;  %15543 = vst [vmem:[#allocation39_spill] sm:$0xff] %v11966_v15  ;;  %v12022_v62 = vsel %vm2428_vm0, %v15557_v40, %v15556_v7  ;;  %v6081_v7 = vcombine.low %v12034_v39, %v12012_v43 }
 0x55b   : > { %7589 = vrot.lane.b32.xlu0 %v6080_v24, %s8810_s20  ;;  %v3685_v24 = vcombine.low %v12004_v36, %v11979_v0 }
 0x55c   : > { %v11988_v44 = vpop.permute.xlu1 %7139 }
 0x55d   : > { %15548 = vst [vmem:[#allocation272_spill] sm:$0xff] %v11988_v44  ;;  %v12017_v13 = vpop.permute.xlu0 %7365  ;;  %v12065_v40 = vrot.slane %v3685_v24, %v9770_v32  ;;  %v12085_v24 = vrot.slane %v3653_v4, %v9770_v32  ;;  %v12104_v4 = vsel %vm2428_vm0, %v15576_v12, %v15575_v38  ;;  %v3854_v38 = vcombine.high %v11930_v28, %v11917_v21 }
 0x55e   : > { %7367 = vrot.lane.b32.xlu1 %v5674_v6, %s8796_s14  ;;  %15555 = vst [vmem:[#allocation45_spill] sm:$0xff] %v12017_v13  ;;  %v15561_v6 = vld [vmem:[#allocation287_spill] sm:$0xff]  ;;  %s8813_s14 = smov 76   ;;  %v15607_v13 = vld [vmem:[#allocation380_spill] sm:$0xff] }
 0x55f   : > { %7601 = vrot.lane.b32.xlu0 %v3905_v5, %s8811_s2  ;;  %v12047_v60 = vsel %vm2428_vm0, %v15562_v48, %v15561_v6  ;;  %v12070_v6 = vsel %vm2428_vm0, %v15567_v9, %v15566_v53  ;;  %v15568_v48 = vld [vmem:[#allocation15_spill] sm:$0xff] }
 0x560   : > { %v12039_v16 = vpop.permute.xlu1 %7143  ;;  %v3637_v3 = vcombine.low %v12047_v60, %v12022_v62  ;;  %v12075_v42 = vsel %vm2428_vm0, %v15569_v55, %v15568_v48  ;;  %v12094_v48 = vrot.slane %v3669_v20, %v9770_v32  ;;  %v15573_v55 = vld [vmem:[#allocation405_spill] sm:$0xff] }
 0x561   : > { %15560 = vst [vmem:[#allocation247_spill] sm:$0xff] %v12039_v16  ;;  %v12060_v5 = vpop.permute.xlu0 %7377  ;;  %v5861_v53 = vcombine.low %v12075_v42, %v12054_v26  ;;  %v15577_v16 = vld [vmem:[#allocation113_spill] sm:$0xff] }
 0x562   : > { %7379 = vrot.lane.b32.xlu1 %v3499_v29, %s8797_s17  ;;  %15565 = vst [vmem:[#allocation20_spill] sm:$0xff] %v12060_v5  ;;  %v15571_v29 = vld [vmem:[#allocation219_spill] sm:$0xff]  ;;  %v12123_v12 = vrot.slane %v3637_v3, %v9770_v32  ;;  %v15586_v3 = vld [vmem:[#allocation28_spill] sm:$0xff]  ;;  %v15603_v5 = vld [vmem:[#allocation165_spill] sm:$0xff] }
 0x563   : > { %v12080_v44 = vsel %vm2428_vm0, %v15571_v29, %v15570_v52  ;;  %7605 = vrot.lane.b32.xlu0 %v6081_v7, %s8811_s2  ;;  %v15574_v52 = vld [vmem:[#allocation179_spill] sm:$0xff]  ;;  %v12140_v21 = vrot.slane %v5861_v53, %v9770_v32  ;;  %v12158_v53 = vrot.slane %v3886_v31, %v9807_v63  ;;  %v6082_v31 = vcombine.high %v12034_v39, %v12012_v43 }
 0x564   : > { %v12089_v9 = vpop.permute.xlu1 %7155  ;;  %v12099_v29 = vsel %vm2428_vm0, %v15574_v52, %v15573_v55  ;;  %v3906_v52 = vcombine.high %v11969_v47, %v11956_v56  ;;  %v3500_v47 = vcombine.high %v11997_v35, %v11982_v10  ;;  %v6062_v10 = vcombine.high %v11950_v49, %v11937_v59  ;;  %v15592_v49 = vld [vmem:[#allocation274_spill] sm:$0xff] }
 0x565   : > { %15572 = vst [vmem:[#allocation260_spill] sm:$0xff] %v12089_v9  ;;  %v12109_v9 = vsel %vm2428_vm0, %v15578_v41, %v15577_v16  ;;  %v5829_v7 = vcombine.low %v12099_v29, %v12070_v6  ;;  %v12116_v55 = vpop.permute.xlu0 %7381  ;;  %v3733_v41 = vcombine.low %v12094_v48, %v12065_v40  ;;  %v15580_v16 = vld [vmem:[#allocation397_spill] sm:$0xff] }
 0x566   : > { %v5845_v20 = vcombine.low %v12109_v9, %v12080_v44  ;;  %7383 = vrot.lane.b32.xlu1 %v5675_v11, %s8797_s17  ;;  %15579 = vst [vmem:[#allocation33_spill] sm:$0xff] %v12116_v55  ;;  %v12130_v34 = vsel %vm2428_vm0, %v15581_v18, %v15580_v16  ;;  %v15582_v11 = vld [vmem:[#allocation243_spill] sm:$0xff]  ;;  %s8814_s17 = smov 78  }
 0x567   : > { %v12135_v25 = vsel %vm2428_vm0, %v15583_v50, %v15582_v11  ;;  %v5813_v56 = vcombine.low %v12130_v34, %v12104_v4  ;;  %7617 = vrot.lane.b32.xlu0 %v3906_v52, %s8812_s6  ;;  %v15585_v18 = vld [vmem:[#allocation255_spill] sm:$0xff]  ;;  %v15587_v50 = vld [vmem:[#allocation280_spill] sm:$0xff]  ;;  %v15588_v11 = vld [vmem:[#allocation53_spill] sm:$0xff]  ;;  %v12165_v35 = vrot.slane %v5829_v7, %v9770_v32 }
 0x568   : > { %v12142_v28 = vpop.permute.xlu1 %7159  ;;  %v12150_v16 = vsel %vm2428_vm0, %v15586_v3, %v15585_v18  ;;  %v12155_v30 = vsel %vm2428_vm0, %v15588_v11, %v15587_v50  ;;  %v12168_v52 = vrot.slane %v5845_v20, %v9770_v32  ;;  %v12176_v3 = vrot.slane %v3854_v38, %v9807_v63  ;;  %v15590_v50 = vld [vmem:[#allocation268_spill] sm:$0xff]  ;;  %v15591_v11 = vld [vmem:[#allocation41_spill] sm:$0xff]  ;;  %v15593_v7 = vld [vmem:[#allocation47_spill] sm:$0xff] }
 0x569   : > { %15584 = vst [vmem:[#allocation234_spill] sm:$0xff] %v12142_v28  ;;  %v3701_v28 = vcombine.low %v12123_v12, %v12085_v24  ;;  %v12171_v18 = vpop.permute.xlu0 %7393  ;;  %v12181_v59 = vsel %vm2428_vm0, %v15591_v11, %v15590_v50  ;;  %v12186_v20 = vsel %vm2428_vm0, %v15593_v7, %v15592_v49  ;;  %v12194_v43 = vrot.slane %v5813_v56, %v9770_v32  ;;  %v15595_v11 = vld [vmem:[#allocation249_spill] sm:$0xff]  ;;  %v15596_v49 = vld [vmem:[#allocation22_spill] sm:$0xff]  ;;  %v15598_v56 = vld [vmem:[#allocation35_spill] sm:$0xff] }
 0x56a   : > { %7395 = vrot.lane.b32.xlu1 %v3500_v47, %s8798_s22  ;;  %15589 = vst [vmem:[#allocation7_spill] sm:$0xff] %v12171_v18  ;;  %v12189_v47 = vrot.slane %v3733_v41, %v9807_v63  ;;  %v5909_v39 = vcombine.low %v12168_v52, %v12140_v21  ;;  %v5676_v50 = vcombine.high %v5636_v17, %v12037_v2 }
 0x56b   : > { %7621 = vrot.lane.b32.xlu0 %v6082_v31, %s8812_s6  ;;  %v12205_v41 = vsel %vm2428_vm0, %v15596_v49, %v15595_v11  ;;  %v4061_v45 = vcombine.low %v12135_v25, %v12150_v16  ;;  %v12212_v7 = vsel %vm2428_vm0, %v15598_v56, %v15597_v27  ;;  %v3709_v2 = vrot.slane %v3701_v28, %v9807_v63  ;;  %v15600_v27 = vld [vmem:[#allocation236_spill] sm:$0xff]  ;;  %v15601_v56 = vld [vmem:[#allocation9_spill] sm:$0xff] }
 0x56c   : > { %v12198_v38 = vpop.permute.xlu1 %7171  ;;  %v12218_v17 = vrot.slane %v6062_v10, %v9807_v63  ;;  %v5877_v31 = vcombine.low %v12194_v43, %v12165_v35  ;;  %v3907_v49 = vcombine.low %v12176_v3, %v12158_v53  ;;  %v12230_v18 = vsel %vm2428_vm0, %v15601_v56, %v15600_v27  ;;  %v15602_v10 = vld [vmem:[#allocation391_spill] sm:$0xff] }
 0x56d   : > { %15594 = vst [vmem:[#allocation390_spill] sm:$0xff] %v12198_v38  ;;  %v4093_v38 = vcombine.low %v12181_v59, %v12155_v30  ;;  %v12223_v11 = vpop.permute.xlu0 %7397  ;;  %v4077_v28 = vcombine.low %v12212_v7, %v12186_v20  ;;  %v12237_v15 = vsel %vm2428_vm0, %v15603_v5, %v15602_v10  ;;  %v12243_v22 = vrot.slane %v5909_v39, %v9807_v63  ;;  %v15605_v5 = vld [vmem:[#allocation369_spill] sm:$0xff] }
 0x56e   : > { %7399 = vrot.lane.b32.xlu1 %v5676_v50, %s8798_s22  ;;  %15599 = vst [vmem:[#allocation163_spill] sm:$0xff] %v12223_v11  ;;  %v4045_v50 = vcombine.low %v12230_v18, %v12205_v41  ;;  %v6044_v11 = vrot.slane %v6030_v58, %v9807_v63  ;;  %v3765_v27 = vcombine.low %v3709_v2, %v12189_v47  ;;  %v15606_v10 = vld [vmem:[#allocation137_spill] sm:$0xff]  ;;  %v15608_v58 = vld [vmem:[#allocation151_spill] sm:$0xff]  ;;  %s8815_s22 = smov 80  }
 0x56f   : > { %7633 = vrot.lane.b32.xlu0 %v3907_v49, %s8813_s14  ;;  %v12250_v56 = vrot.slane %v4093_v38, %v9770_v32  ;;  %v12255_v57 = vsel %vm2428_vm0, %v15606_v10, %v15605_v5  ;;  %v12260_v39 = vsel %vm2428_vm0, %v15608_v58, %v15607_v13  ;;  %v12268_v49 = vrot.slane %v4061_v45, %v9770_v32  ;;  %v15613_v58 = vld [vmem:[#allocation358_spill] sm:$0xff]  ;;  %v15615_v45 = vld [vmem:[#allocation364_spill] sm:$0xff] }
 0x570   : > { %v12245_v55 = vpop.permute.xlu1 %7175  ;;  %v6269_v38 = vcombine.low %v12260_v39, %v12237_v15  ;;  %v5885_v19 = vrot.slane %v5877_v31, %v9807_v63  ;;  %v6083_v13 = vcombine.low %v6044_v11, %v12218_v17  ;;  %v12278_v10 = vrot.slane %v4077_v28, %v9770_v32  ;;  %v15618_v31 = vld [vmem:[#allocation375_spill] sm:$0xff] }
 0x571   : > { %15604 = vst [vmem:[#allocation368_spill] sm:$0xff] %v12245_v55  ;;  %v15610_v55 = vld [vmem:[#allocation158_spill] sm:$0xff]  ;;  %v12274_v5 = vpop.permute.xlu0 %7409  ;;  %v12288_v54 = vsel %vm2428_vm0, %v15616_v51, %v15615_v45  ;;  %v12304_v51 = vrot.slane %v4045_v50, %v9770_v32  ;;  %v15623_v45 = vld [vmem:[#allocation116_spill] sm:$0xff]  ;;  %v3908_v50 = vcombine.high %v12176_v3, %v12158_v53  ;;  %v15628_v3 = vld [vmem:[#allocation25_spill] sm:$0xff] }
 0x572   : > { %v12265_v33 = vsel %vm2428_vm0, %v15610_v55, %v15609_v8  ;;  %7411 = vrot.lane.b32.xlu1 %v3765_v27, %s8799_s25  ;;  %15612 = vst [vmem:[#allocation379_spill] sm:$0xff] %v12274_v5  ;;  %v15614_v8 = vld [vmem:[#allocation123_spill] sm:$0xff]  ;;  %15617 = vst [vmem:[#allocation149_spill] sm:$0xff] %v12288_v54  ;;  %v12293_v27 = vsel %vm2428_vm0, %v15619_v14, %v15618_v31  ;;  %v15622_v14 = vld [vmem:[#allocation346_spill] sm:$0xff] }
 0x573   : > { %15611 = vst [vmem:[#allocation135_spill] sm:$0xff] %v12265_v33  ;;  %v12283_v55 = vsel %vm2428_vm0, %v15614_v8, %v15613_v58  ;;  %15620 = vst [vmem:[#allocation384_spill] sm:$0xff] %v12293_v27  ;;  %v6253_v28 = vcombine.low %v12293_v27, %v12265_v33  ;;  %v5941_v58 = vcombine.low %v5885_v19, %v12243_v22  ;;  %7637 = vrot.lane.b32.xlu0 %v6083_v13, %s8813_s14  ;;  %v15627_v53 = vld [vmem:[#allocation252_spill] sm:$0xff] }
 0x574   : > { %v6237_v5 = vcombine.low %v12283_v55, %v12255_v57  ;;  %v12299_v1 = vpop.permute.xlu1 %7187  ;;  %v4141_v8 = vcombine.low %v12278_v10, %v12250_v56  ;;  %v12311_v31 = vsel %vm2428_vm0, %v15623_v45, %v15622_v14  ;;  %v4109_v33 = vcombine.low %v12304_v51, %v12268_v49 }
 0x575   : > { %15621 = vst [vmem:[#allocation156_spill] sm:$0xff] %v12299_v1  ;;  %15624 = vst [vmem:[#allocation356_spill] sm:$0xff] %v12311_v31  ;;  %v6221_v27 = vcombine.low %v12311_v31, %v12288_v54  ;;  %v12316_v1 = vrot.slane %v6269_v38, %v9770_v32  ;;  %v12319_v13 = vpop.permute.xlu0 %7413  ;;  %v3734_v14 = vcombine.high %v12094_v48, %v12065_v40 }
 0x576   : > { %7415 = vrot.lane.b32.xlu1 %v5941_v58, %s8799_s25  ;;  %15625 = vst [vmem:[#allocation121_spill] sm:$0xff] %v12319_v13  ;;  %v12328_v45 = vrot.slane %v6237_v5, %v9770_v32  ;;  %v12331_v31 = vrot.slane %v6253_v28, %v9770_v32  ;;  %v3766_v58 = vcombine.high %v3709_v2, %v12189_v47  ;;  %v15630_v28 = vld [vmem:[#allocation238_spill] sm:$0xff]  ;;  %s8816_s25 = smov 82  }
 0x577   : > { %7649 = vrot.lane.b32.xlu0 %v3908_v50, %s8814_s17  ;;  %v2451_v13 = vsel %vm2428_vm0, %v15628_v3, %v15627_v53  ;;  %v12341_v54 = vrot.slane %v4141_v8, %v9807_v63  ;;  %v3702_v40 = vcombine.high %v12123_v12, %v12085_v24  ;;  %v12346_v48 = vrot.slane %v6221_v27, %v9770_v32  ;;  %v15631_v50 = vld [vmem:[#allocation11_spill] sm:$0xff]  ;;  %v15634_v3 = vld [vmem:[#allocation12_spill] sm:$0xff] }
 0x578   : > { %v12333_v38 = vpop.permute.xlu1 %7191  ;;  %v6317_v5 = vcombine.low %v12331_v31, %v12316_v1  ;;  %v6084_v2 = vcombine.high %v6044_v11, %v12218_v17  ;;  %v12357_v8 = vsel %vm2428_vm0, %v15631_v50, %v15630_v28  ;;  %v15633_v53 = vld [vmem:[#allocation239_spill] sm:$0xff]  ;;  %v12363_v12 = vrot.slane %v4109_v33, %v9807_v63 }
 0x579   : > { %15626 = vst [vmem:[#allocation362_spill] sm:$0xff] %v12333_v38  ;;  %v12351_v47 = vpop.permute.xlu0 %7425  ;;  %15632 = vst [vmem:[#allocation373_spill] sm:$0xff] %v12357_v8  ;;  %v2435_v24 = vsel %vm2428_vm0, %v15634_v3, %v15633_v53  ;;  %v12366_v27 = vrot.slane %v3734_v14, %v9807_v63  ;;  %v5910_v17 = vcombine.high %v12168_v52, %v12140_v21  ;;  %v15636_v33 = vld [vmem:[#allocation251_spill] sm:$0xff]  ;;  %v15637_v53 = vld [vmem:[#allocation24_spill] sm:$0xff] }
 0x57a   : > { %7427 = vrot.lane.b32.xlu1 %v3766_v58, %s8800_s27  ;;  %15629 = vst [vmem:[#allocation128_spill] sm:$0xff] %v12351_v47  ;;  %v6285_v58 = vcombine.low %v12346_v48, %v12328_v45  ;;  %v5942_v28 = vcombine.high %v5885_v19, %v12243_v22  ;;  %v4046_v50 = vcombine.high %v12230_v18, %v12205_v41  ;;  %v15640_v41 = vld [vmem:[#allocation245_spill] sm:$0xff] }
 0x57b   : > { %7653 = vrot.lane.b32.xlu0 %v6084_v2, %s8814_s17  ;;  %v12381_v14 = vsel %vm2428_vm0, %v15637_v53, %v15636_v33  ;;  %v4317_v3 = vcombine.low %v2435_v24, %v2451_v13  ;;  %v4062_v38 = vcombine.high %v12135_v25, %v12150_v16  ;;  %v12386_v21 = vrot.slane %v3702_v40, %v9807_v63  ;;  %v15641_v2 = vld [vmem:[#allocation18_spill] sm:$0xff]  ;;  %v15644_v40 = vld [vmem:[#allocation19_spill] sm:$0xff] }
 0x57c   : > { %v12372_v11 = vpop.permute.xlu1 %7203  ;;  %15638 = vst [vmem:[#allocation344_spill] sm:$0xff] %v12381_v14  ;;  %v12389_v52 = vrot.slane %v6317_v5, %v9807_v63  ;;  %v5878_v19 = vcombine.high %v12194_v43, %v12165_v35  ;;  %v4173_v18 = vcombine.low %v12363_v12, %v12341_v54  ;;  %v12401_v25 = vsel %vm2428_vm0, %v15641_v2, %v15640_v41  ;;  %v15643_v16 = vld [vmem:[#allocation246_spill] sm:$0xff]  ;;  %v15723_v14 = vld [vmem:[#allocation233_spill] sm:$0xff] }
 0x57d   : > { %15635 = vst [vmem:[#allocation142_spill] sm:$0xff] %v12372_v11  ;;  %v12394_v22 = vpop.permute.xlu0 %7429  ;;  %15642 = vst [vmem:[#allocation357_spill] sm:$0xff] %v12401_v25  ;;  %v2443_v5 = vsel %vm2428_vm0, %v15644_v40, %v15643_v16  ;;  %v4318_v33 = vcombine.high %v2435_v24, %v2451_v13  ;;  %v3686_v35 = vcombine.high %v12004_v36, %v11979_v0  ;;  %v15645_v43 = vld [vmem:[#allocation258_spill] sm:$0xff] }
 0x57e   : > { %7431 = vrot.lane.b32.xlu1 %v5942_v28, %s8800_s27  ;;  %15639 = vst [vmem:[#allocation114_spill] sm:$0xff] %v12394_v22  ;;  %v15646_v28 = vld [vmem:[#allocation31_spill] sm:$0xff]  ;;  %v12412_v11 = vrot.slane %v6285_v58, %v9807_v63  ;;  %v12415_v47 = vrot.slane %v5910_v17, %v9807_v63  ;;  %v3767_v2 = vcombine.low %v12386_v21, %v12366_v27  ;;  %s8817_s27 = smov 84  }
 0x57f   : > { %v2459_v53 = vsel %vm2428_vm0, %v15646_v28, %v15645_v43  ;;  %7665 = vrot.lane.b32.xlu0 %v4173_v18, %s8815_s22  ;;  %v4060_v0 = vrot.slane %v4046_v50, %v9770_v32  ;;  %v3654_v13 = vcombine.high %v11994_v61, %v11974_v37  ;;  %v3670_v24 = vcombine.high %v12031_v23, %v12009_v46 }
 0x580   : > { %v12417_v41 = vpop.permute.xlu1 %7207  ;;  %v12430_v58 = vrot.slane %v4317_v3, %v9770_v32  ;;  %v4076_v17 = vrot.slane %v4062_v38, %v9770_v32  ;;  %v5892_v16 = vrot.slane %v5878_v19, %v9807_v63  ;;  %v6349_v50 = vcombine.low %v12412_v11, %v12389_v52  ;;  %v15649_v38 = vld [vmem:[#allocation257_spill] sm:$0xff]  ;;  %v15650_v3 = vld [vmem:[#allocation30_spill] sm:$0xff] }
 0x581   : > { %15647 = vst [vmem:[#allocation385_spill] sm:$0xff] %v12417_v41  ;;  %v12435_v18 = vpop.permute.xlu0 %7441  ;;  %v12440_v40 = vrot.slane %v4318_v33, %v9770_v32  ;;  %v4333_v37 = vcombine.low %v2443_v5, %v2459_v53  ;;  %v3638_v61 = vcombine.high %v12047_v60, %v12022_v62  ;;  %v12445_v46 = vrot.slane %v3686_v35, %v9770_v32 }
 0x582   : > { %7443 = vrot.lane.b32.xlu1 %v3767_v2, %s8801_s24  ;;  %15648 = vst [vmem:[#allocation122_spill] sm:$0xff] %v12435_v18  ;;  %v4110_v23 = vcombine.high %v12304_v51, %v12268_v49  ;;  %v12452_v19 = vsel %vm2428_vm0, %v15650_v3, %v15649_v38  ;;  %v5862_v43 = vcombine.high %v12075_v42, %v12054_v26  ;;  %v15762_v18 = vld [vmem:[#allocation338_spill] sm:$0xff] }
 0x583   : > { %15651 = vst [vmem:[#allocation309_spill] sm:$0xff] %v12452_v19  ;;  %v5943_v28 = vcombine.low %v5892_v16, %v12415_v47  ;;  %7669 = vrot.lane.b32.xlu0 %v6349_v50, %s8815_s22  ;;  %v4334_v62 = vcombine.high %v2443_v5, %v2459_v53  ;;  %v4142_v60 = vcombine.high %v12278_v10, %v12250_v56 }
 0x584   : > { %v12456_v33 = vpop.permute.xlu1 %7219  ;;  %v12463_v49 = vrot.slane %v3654_v13, %v9770_v32  ;;  %v12466_v51 = vrot.slane %v3670_v24, %v9770_v32  ;;  %v4125_v35 = vcombine.low %v4060_v0, %v4076_v17  ;;  %v5830_v26 = vcombine.high %v12099_v29, %v12070_v6 }
 0x585   : > { %15652 = vst [vmem:[#allocation80_spill] sm:$0xff] %v12456_v33  ;;  %v5846_v42 = vcombine.high %v12109_v9, %v12080_v44  ;;  %v12473_v2 = vpop.permute.xlu0 %7445  ;;  %v4174_v56 = vcombine.high %v12363_v12, %v12341_v54  ;;  %v4126_v10 = vcombine.high %v4060_v0, %v4076_v17  ;;  %v4341_v5 = vrot.slane %v4333_v37, %v9770_v32 }
 0x586   : > { %7447 = vrot.lane.b32.xlu1 %v5943_v28, %s8801_s24  ;;  %15653 = vst [vmem:[#allocation337_spill] sm:$0xff] %v12473_v2  ;;  %v12479_v53 = vrot.slane %v3638_v61, %v9770_v32  ;;  %v3749_v13 = vcombine.low %v12466_v51, %v12445_v46  ;;  %v12484_v6 = vrot.slane %v4110_v23, %v9807_v63  ;;  %s8818_s24 = smov 86   ;;  %v15768_v2 = vld [vmem:[#allocation95_spill] sm:$0xff] }
 0x587   : > { %v5814_v44 = vcombine.high %v12130_v34, %v12104_v4  ;;  %v12489_v9 = vrot.slane %v5862_v43, %v9770_v32  ;;  %v3768_v54 = vcombine.high %v12386_v21, %v12366_v27  ;;  %7681 = vrot.lane.b32.xlu0 %v4174_v56, %s8816_s25  ;;  %v4605_v12 = vcombine.low %v12401_v25, %v12452_v19  ;;  %v15714_v25 = vld [vmem:[#allocation127_spill] sm:$0xff]  ;;  %v15715_v19 = vld [vmem:[#allocation214_spill] sm:$0xff] }
 0x588   : > { %v12491_v29 = vpop.permute.xlu1 %7223  ;;  %v4348_v0 = vrot.slane %v4334_v62, %v9770_v32  ;;  %v12500_v24 = vrot.slane %v4142_v60, %v9807_v63  ;;  %v3717_v34 = vcombine.low %v12479_v53, %v12463_v49  ;;  %v6318_v4 = vcombine.high %v12331_v31, %v12316_v1 }
 0x589   : > { %15654 = vst [vmem:[#allocation108_spill] sm:$0xff] %v12491_v29  ;;  %v12507_v17 = vrot.slane %v5830_v26, %v9770_v32  ;;  %v12510_v27 = vrot.slane %v5846_v42, %v9770_v32  ;;  %v12513_v21 = vpop.permute.xlu0 %7457  ;;  %v6350_v50 = vcombine.high %v12412_v11, %v12389_v52  ;;  %v12518_v37 = vrot.slane %v4125_v35, %v9807_v63  ;;  %v15659_v26 = vld [vmem:[#allocation276_spill] sm:$0xff]  ;;  %v15660_v42 = vld [vmem:[#allocation49_spill] sm:$0xff] }
 0x58a   : > { %7459 = vrot.lane.b32.xlu1 %v3768_v54, %s8802_s28  ;;  %15655 = vst [vmem:[#allocation295_spill] sm:$0xff] %v12513_v21  ;;  %v12521_v61 = vrot.slane %v4126_v10, %v9807_v63  ;;  %v4381_v1 = vcombine.low %v12430_v58, %v4341_v5  ;;  %v12525_v31 = vrot.slane %v3749_v13, %v9807_v63  ;;  %v15662_v10 = vld [vmem:[#allocation277_spill] sm:$0xff] }
 0x58b   : > { %v6286_v23 = vcombine.high %v12346_v48, %v12328_v45  ;;  %v12530_v38 = vrot.slane %v5814_v44, %v9770_v32  ;;  %v5925_v11 = vcombine.low %v12510_v27, %v12489_v9  ;;  %v5944_v3 = vcombine.high %v5892_v16, %v12415_v47  ;;  %7685 = vrot.lane.b32.xlu0 %v6350_v50, %s8816_s25 }
 0x58c   : > { %v12534_v52 = vpop.permute.xlu1 %7235  ;;  %v12539_v43 = vrot.slane %v4605_v12, %v9770_v32  ;;  %v4382_v28 = vcombine.high %v12430_v58, %v4341_v5  ;;  %v4397_v62 = vcombine.low %v12440_v40, %v4348_v0  ;;  %v4094_v45 = vcombine.high %v12181_v59, %v12155_v30  ;;  %v15663_v5 = vld [vmem:[#allocation50_spill] sm:$0xff] }
 0x58d   : > { %15656 = vst [vmem:[#allocation66_spill] sm:$0xff] %v12534_v52  ;;  %v12546_v48 = vrot.slane %v3717_v34, %v9807_v63  ;;  %v12549_v60 = vrot.slane %v6318_v4, %v9807_v63  ;;  %v5893_v47 = vcombine.low %v12530_v38, %v12507_v17  ;;  %v12554_v16 = vpop.permute.xlu0 %7461  ;;  %v4175_v58 = vcombine.low %v12484_v6, %v12500_v24  ;;  %v15666_v34 = vld [vmem:[#allocation37_spill] sm:$0xff]  ;;  %v15679_v52 = vld [vmem:[#allocation271_spill] sm:$0xff] }
 0x58e   : > { %15657 = vst [vmem:[#allocation323_spill] sm:$0xff] %v12539_v43  ;;  %7463 = vrot.lane.b32.xlu1 %v5944_v3, %s8802_s28  ;;  %15658 = vst [vmem:[#allocation94_spill] sm:$0xff] %v12554_v16  ;;  %v12559_v35 = vrot.slane %v4381_v1, %v9807_v63  ;;  %v4398_v30 = vcombine.high %v12440_v40, %v4348_v0  ;;  %v4078_v59 = vcombine.high %v12212_v7, %v12186_v20  ;;  %v15665_v0 = vld [vmem:[#allocation264_spill] sm:$0xff]  ;;  %v15668_v1 = vld [vmem:[#allocation265_spill] sm:$0xff]  ;;  %s8819_s28 = smov 88  }
 0x58f   : > { %v12567_v56 = vsel %vm2428_vm0, %v15660_v42, %v15659_v26  ;;  %v2483_v13 = vsel %vm2428_vm0, %v15663_v5, %v15662_v10  ;;  %v12573_v44 = vrot.slane %v6286_v23, %v9807_v63  ;;  %v12576_v54 = vrot.slane %v5925_v11, %v9807_v63  ;;  %7697 = vrot.lane.b32.xlu0 %v4175_v58, %s8817_s27  ;;  %v15669_v23 = vld [vmem:[#allocation38_spill] sm:$0xff] }
 0x590   : > { %15661 = vst [vmem:[#allocation330_spill] sm:$0xff] %v12567_v56  ;;  %v12578_v12 = vpop.permute.xlu1 %7239  ;;  %v3769_v20 = vcombine.low %v12546_v48, %v12525_v31  ;;  %v12584_v7 = vrot.slane %v4382_v28, %v9807_v63  ;;  %v12587_v40 = vrot.slane %v4397_v62, %v9807_v63  ;;  %v12592_v4 = vsel %vm2428_vm0, %v15666_v34, %v15665_v0  ;;  %v15674_v0 = vld [vmem:[#allocation384_spill] sm:$0xff] }
 0x591   : > { %15664 = vst [vmem:[#allocation101_spill] sm:$0xff] %v12578_v12  ;;  %15667 = vst [vmem:[#allocation302_spill] sm:$0xff] %v12592_v4  ;;  %v4108_v50 = vrot.slane %v4094_v45, %v9770_v32  ;;  %v2467_v11 = vsel %vm2428_vm0, %v15669_v23, %v15668_v1  ;;  %v6270_v3 = vcombine.high %v12260_v39, %v12237_v15  ;;  %v12604_v62 = vpop.permute.xlu0 %7473  ;;  %v15671_v15 = vld [vmem:[#allocation285_spill] sm:$0xff]  ;;  %v15672_v39 = vld [vmem:[#allocation56_spill] sm:$0xff] }
 0x592   : > { %v12601_v28 = vrot.slane %v5893_v47, %v9807_v63  ;;  %7475 = vrot.lane.b32.xlu1 %v3769_v20, %s8803_s29  ;;  %15670 = vst [vmem:[#allocation73_spill] sm:$0xff] %v12604_v62  ;;  %v6351_v58 = vcombine.low %v12573_v44, %v12549_v60  ;;  %v12609_v26 = vrot.slane %v4398_v30, %v9807_v63  ;;  %v15673_v20 = vld [vmem:[#allocation135_spill] sm:$0xff] }
 0x593   : > { %v4092_v45 = vrot.slane %v4078_v59, %v9770_v32  ;;  %v4621_v42 = vcombine.low %v12592_v4, %v12567_v56  ;;  %v4349_v10 = vcombine.low %v2467_v11, %v2483_v13  ;;  %v2491_v47 = vsel %vm2428_vm0, %v15672_v39, %v15671_v15  ;;  %v15676_v59 = vld [vmem:[#allocation270_spill] sm:$0xff]  ;;  %v15677_v23 = vld [vmem:[#allocation43_spill] sm:$0xff]  ;;  %v15680_v15 = vld [vmem:[#allocation44_spill] sm:$0xff] }
 0x594   : > { %v6238_v5 = vcombine.high %v12283_v55, %v12255_v57  ;;  %v6254_v34 = vcombine.high %v15674_v0, %v15673_v20  ;;  %v12621_v1 = vpop.permute.xlu1 %7251  ;;  %v5945_v30 = vcombine.low %v12601_v28, %v12576_v54  ;;  %7701 = vrot.lane.b32.xlu0 %v6351_v58, %s8817_s27  ;;  %v12629_v36 = vsel %vm2428_vm0, %v15677_v23, %v15676_v59  ;;  %v15681_v20 = vld [vmem:[#allocation149_spill] sm:$0xff]  ;;  %v15682_v0 = vld [vmem:[#allocation356_spill] sm:$0xff] }
 0x595   : > { %15675 = vst [vmem:[#allocation316_spill] sm:$0xff] %v12621_v1  ;;  %15678 = vst [vmem:[#allocation87_spill] sm:$0xff] %v12629_v36  ;;  %v2475_v39 = vsel %vm2428_vm0, %v15680_v15, %v15679_v52  ;;  %v4350_v57 = vcombine.high %v2467_v11, %v2483_v13  ;;  %v4157_v55 = vcombine.low %v4092_v45, %v4108_v50  ;;  %v12640_v58 = vpop.permute.xlu0 %7477  ;;  %v15685_v13 = vld [vmem:[#allocation284_spill] sm:$0xff] }
 0x596   : > { %v4158_v33 = vcombine.high %v4092_v45, %v4108_v50  ;;  %v6222_v1 = vcombine.high %v15682_v0, %v15681_v20  ;;  %v12637_v12 = vrot.slane %v6270_v3, %v9770_v32  ;;  %7479 = vrot.lane.b32.xlu1 %v5945_v30, %s8803_s29  ;;  %15683 = vst [vmem:[#allocation288_spill] sm:$0xff] %v12640_v58  ;;  %v15686_v50 = vld [vmem:[#allocation55_spill] sm:$0xff]  ;;  %s8820_s29 = smov 90   ;;  %v15763_v58 = vld [vmem:[#allocation109_spill] sm:$0xff] }
 0x597   : > { %v4176_v59 = vcombine.high %v12484_v6, %v12500_v24  ;;  %v12645_v23 = vrot.slane %v4621_v42, %v9770_v32  ;;  %v12648_v52 = vrot.slane %v4349_v10, %v9770_v32  ;;  %v12653_v11 = vsel %vm2428_vm0, %v15686_v50, %v15685_v13 }
 0x598   : > { %15687 = vst [vmem:[#allocation186_spill] sm:$0xff] %v12653_v11  ;;  %v4365_v3 = vcombine.low %v2475_v39, %v2491_v47  ;;  %v3750_v45 = vcombine.high %v12466_v51, %v12445_v46  ;;  %v12658_v30 = vrot.slane %v6238_v5, %v9770_v32  ;;  %v12661_v6 = vrot.slane %v6254_v34, %v9770_v32  ;;  %v12663_v24 = vpop.permute.xlu1 %7255 }
 0x599   : > { %15684 = vst [vmem:[#allocation59_spill] sm:$0xff] %v12645_v23  ;;  %15688 = vst [vmem:[#allocation228_spill] sm:$0xff] %v12663_v24  ;;  %v3770_v42 = vcombine.high %v12546_v48, %v12525_v31  ;;  %7713 = vrot.lane.b32.xlu0 %v4176_v59, %s8818_s24  ;;  %v12669_v10 = vrot.slane %v4350_v57, %v9770_v32  ;;  %v12672_v15 = vrot.slane %v4157_v55, %v9807_v63  ;;  %v12685_v48 = vpop.permute.xlu0 %7489  ;;  %v15693_v55 = vld [vmem:[#allocation110_spill] sm:$0xff] }
 0x59a   : > { %v4366_v46 = vcombine.high %v2475_v39, %v2491_v47  ;;  %v3718_v51 = vcombine.high %v12479_v53, %v12463_v49  ;;  %v12677_v5 = vrot.slane %v4158_v33, %v9807_v63  ;;  %v12680_v34 = vrot.slane %v6222_v1, %v9770_v32  ;;  %15689 = vst [vmem:[#allocation413_spill] sm:$0xff] %v12685_v48  ;;  %v15690_v33 = vld [vmem:[#allocation311_spill] sm:$0xff]  ;;  %v15691_v53 = vld [vmem:[#allocation82_spill] sm:$0xff]  ;;  %v15692_v39 = vld [vmem:[#allocation341_spill] sm:$0xff] }
 0x59b   : > { %v6333_v31 = vcombine.low %v12661_v6, %v12637_v12  ;;  %7491 = vrot.lane.b32.xlu1 %v3770_v42, %s8804_s30  ;;  %v6352_v57 = vcombine.high %v12573_v44, %v12549_v60  ;;  %v4637_v47 = vcombine.low %v12629_v36, %v12653_v11  ;;  %v12692_v49 = vrot.slane %v4365_v3, %v9770_v32  ;;  %v15695_v3 = vld [vmem:[#allocation297_spill] sm:$0xff]  ;;  %v15696_v42 = vld [vmem:[#allocation68_spill] sm:$0xff] }
 0x59c   : > { %v12697_v1 = vsel %vm2428_vm0, %v15691_v53, %v15690_v33  ;;  %v12702_v20 = vsel %vm2428_vm0, %v15693_v55, %v15692_v39  ;;  %v12705_v0 = vrot.slane %v3750_v45, %v9807_v63  ;;  %v6301_v60 = vcombine.low %v12680_v34, %v12658_v30  ;;  %v12711_v59 = vpop.permute.xlu1 %7267  ;;  %v15698_v53 = vld [vmem:[#allocation96_spill] sm:$0xff] }
 0x59d   : > { %v5926_v44 = vcombine.high %v12510_v27, %v12489_v9  ;;  %15694 = vst [vmem:[#allocation196_spill] sm:$0xff] %v12711_v59  ;;  %v5946_v13 = vcombine.high %v12601_v28, %v12576_v54  ;;  %7717 = vrot.lane.b32.xlu0 %v6352_v57, %s8818_s24  ;;  %v12717_v50 = vrot.slane %v4366_v46, %v9770_v32  ;;  %v15697_v27 = vld [vmem:[#allocation325_spill] sm:$0xff]  ;;  %v15699_v28 = vld [vmem:[#allocation332_spill] sm:$0xff]  ;;  %v15700_v57 = vld [vmem:[#allocation103_spill] sm:$0xff]  ;;  %v12745_v55 = vpop.permute.xlu0 %7493 }
 0x59e   : > { %v12722_v45 = vsel %vm2428_vm0, %v15696_v42, %v15695_v3  ;;  %v12725_v33 = vrot.slane %v3718_v51, %v9807_v63  ;;  %v4177_v9 = vcombine.low %v12518_v37, %v12672_v15  ;;  %v12732_v54 = vsel %vm2428_vm0, %v15698_v53, %v15697_v27  ;;  %15701 = vst [vmem:[#allocation155_spill] sm:$0xff] %v12745_v55  ;;  %v15702_v3 = vld [vmem:[#allocation290_spill] sm:$0xff]  ;;  %v15703_v42 = vld [vmem:[#allocation61_spill] sm:$0xff]  ;;  %v15704_v53 = vld [vmem:[#allocation304_spill] sm:$0xff] }
 0x59f   : > { %v12737_v46 = vsel %vm2428_vm0, %v15700_v57, %v15699_v28  ;;  %v12740_v39 = vrot.slane %v6333_v31, %v9807_v63  ;;  %v5894_v51 = vcombine.high %v12530_v38, %v12507_v17  ;;  %7495 = vrot.lane.b32.xlu1 %v5946_v13, %s8804_s30  ;;  %v12750_v27 = vsel %vm2428_vm0, %v15703_v42, %v15702_v3  ;;  %v15705_v59 = vld [vmem:[#allocation75_spill] sm:$0xff]  ;;  %v15706_v38 = vld [vmem:[#allocation318_spill] sm:$0xff]  ;;  %v15707_v13 = vld [vmem:[#allocation89_spill] sm:$0xff]  ;;  %s8821_s30 = smov 92  }
 0x5a0   : > { %v12755_v28 = vsel %vm2428_vm0, %v15705_v59, %v15704_v53  ;;  %v3925_v31 = vcombine.low %v12722_v45, %v12697_v1  ;;  %v3957_v17 = vcombine.low %v12732_v54, %v12702_v20  ;;  %v12764_v57 = vsel %vm2428_vm0, %v15707_v13, %v15706_v38  ;;  %v12772_v42 = vpop.permute.xlu1 %7271  ;;  %v15709_v13 = vld [vmem:[#allocation242_spill] sm:$0xff]  ;;  %v15716_v36 = vld [vmem:[#allocation416_spill] sm:$0xff] }
 0x5a1   : > { %v12767_v24 = vrot.slane %v6301_v60, %v9807_v63  ;;  %v12770_v3 = vrot.slane %v5926_v44, %v9807_v63  ;;  %15708 = vst [vmem:[#allocation212_spill] sm:$0xff] %v12772_v42  ;;  %v3771_v59 = vcombine.low %v12725_v33, %v12705_v0  ;;  %7729 = vrot.lane.b32.xlu0 %v4177_v9, %s8819_s28  ;;  %v15710_v44 = vld [vmem:[#allocation230_spill] sm:$0xff] }
 0x5a2   : > { %v4413_v53 = vcombine.low %v12648_v52, %v12692_v49  ;;  %v4414_v38 = vcombine.high %v12648_v52, %v12692_v49  ;;  %v3941_v60 = vcombine.low %v12764_v57, %v12737_v46  ;;  %v12786_v29 = vsel %vm2428_vm0, %v15710_v44, %v15709_v13  ;;  %v12796_v52 = vpop.permute.xlu0 %7505  ;;  %v15712_v13 = vld [vmem:[#allocation13_spill] sm:$0xff]  ;;  %v15713_v44 = vld [vmem:[#allocation198_spill] sm:$0xff] }
 0x5a3   : > { %v4429_v42 = vcombine.low %v12669_v10, %v12717_v50  ;;  %v3909_v9 = vcombine.low %v12750_v27, %v12755_v28  ;;  %v12793_v41 = vrot.slane %v5894_v51, %v9807_v63  ;;  %7507 = vrot.lane.b32.xlu1 %v3771_v59, %s8805_s3  ;;  %15711 = vst [vmem:[#allocation414_spill] sm:$0xff] %v12796_v52  ;;  %v15717_v59 = vld [vmem:[#allocation222_spill] sm:$0xff]  ;;  %v15725_v52 = vld [vmem:[#allocation289_spill] sm:$0xff] }
 0x5a4   : > { %v6353_v49 = vcombine.low %v12767_v24, %v12740_v39  ;;  %v12801_v4 = vrot.slane %v3957_v17, %v9770_v32  ;;  %v12806_v56 = vsel %vm2428_vm0, %v15713_v44, %v15712_v13  ;;  %v12811_v51 = vsel %vm2428_vm0, %v15715_v19, %v15714_v25  ;;  %v12825_v44 = vpop.permute.xlu1 %7283  ;;  %v15760_v55 = vld [vmem:[#allocation378_spill] sm:$0xff] }
 0x5a5   : > { %v12816_v11 = vsel %vm2428_vm0, %v15717_v59, %v15716_v36  ;;  %v4430_v43 = vcombine.high %v12669_v10, %v12717_v50  ;;  %v12821_v17 = vrot.slane %v3925_v31, %v9770_v32  ;;  %v6133_v13 = vcombine.low %v12811_v51, %v12786_v29  ;;  %15718 = vst [vmem:[#allocation220_spill] sm:$0xff] %v12825_v44  ;;  %v15719_v36 = vld [vmem:[#allocation404_spill] sm:$0xff]  ;;  %v15720_v59 = vld [vmem:[#allocation182_spill] sm:$0xff] }
 0x5a6   : > { %v5947_v25 = vcombine.low %v12793_v41, %v12770_v3  ;;  %7733 = vrot.lane.b32.xlu0 %v6353_v49, %s8819_s28  ;;  %v12831_v19 = vrot.slane %v3941_v60, %v9770_v32  ;;  %v12836_v10 = vsel %vm2428_vm0, %v15720_v59, %v15719_v36  ;;  %v15721_v50 = vld [vmem:[#allocation410_spill] sm:$0xff]  ;;  %v15726_v49 = vld [vmem:[#allocation60_spill] sm:$0xff]  ;;  %v12858_v59 = vpop.permute.xlu0 %7509  ;;  %v13036_v16 = vsel %vm2428_vm0, %v15763_v58, %v15762_v18 }
 0x5a7   : > { %v15722_v31 = vld [vmem:[#allocation190_spill] sm:$0xff]  ;;  %v12851_v60 = vsel %vm2428_vm0, %v15726_v49, %v15725_v52  ;;  %v6101_v48 = vcombine.low %v12836_v10, %v12806_v56  ;;  %15728 = vst [vmem:[#allocation180_spill] sm:$0xff] %v12858_v59  ;;  %v15754_v59 = vld [vmem:[#allocation161_spill] sm:$0xff]  ;;  %v3958_v18 = vcombine.high %v12732_v54, %v12702_v20  ;;  %v15765_v58 = vld [vmem:[#allocation352_spill] sm:$0xff] }
 0x5a8   : > { %v12841_v23 = vsel %vm2428_vm0, %v15722_v31, %v15721_v50  ;;  %v15724_v44 = vld [vmem:[#allocation206_spill] sm:$0xff]  ;;  %15727 = vst [vmem:[#allocation403_spill] sm:$0xff] %v12851_v60  ;;  %7511 = vrot.lane.b32.xlu1 %v5947_v25, %s8805_s3  ;;  %v4178_v50 = vcombine.high %v12518_v37, %v12672_v15  ;;  %v4005_v52 = vcombine.low %v12831_v19, %v12801_v4  ;;  %v15730_v31 = vld [vmem:[#allocation400_spill] sm:$0xff]  ;;  %s8822_s3 = smov 94  }
 0x5a9   : > { %v12846_v8 = vsel %vm2428_vm0, %v15724_v44, %v15723_v14  ;;  %v12863_v14 = vrot.slane %v4637_v47, %v9770_v32  ;;  %v12866_v44 = vrot.slane %v3909_v9, %v9770_v32  ;;  %v15731_v49 = vld [vmem:[#allocation174_spill] sm:$0xff]  ;;  %v12876_v25 = vrot.slane %v4413_v53, %v9807_v63  ;;  %v12883_v47 = vpop.permute.xlu1 %7287 }
 0x5aa   : > { %v6117_v36 = vcombine.low %v12846_v8, %v12816_v11  ;;  %v12873_v62 = vsel %vm2428_vm0, %v15731_v49, %v15730_v31  ;;  %v12881_v15 = vrot.slane %v6133_v13, %v9770_v32  ;;  %15732 = vst [vmem:[#allocation188_spill] sm:$0xff] %v12883_v47  ;;  %v3772_v9 = vcombine.high %v12725_v33, %v12705_v0 }
 0x5ab   : > { %15729 = vst [vmem:[#allocation408_spill] sm:$0xff] %v12863_v14  ;;  %v6085_v37 = vcombine.low %v12873_v62, %v12841_v23  ;;  %7745 = vrot.lane.b32.xlu0 %v4178_v50, %s8820_s29  ;;  %v12889_v31 = vrot.slane %v4414_v38, %v9807_v63  ;;  %v12892_v53 = vrot.slane %v4429_v42, %v9807_v63  ;;  %v12908_v38 = vpop.permute.xlu0 %7521  ;;  %v15735_v42 = vld [vmem:[#allocation296_spill] sm:$0xff]  ;;  %v15736_v50 = vld [vmem:[#allocation67_spill] sm:$0xff] }
 0x5ac   : > { %v12895_v49 = vrot.slane %v4430_v43, %v9807_v63  ;;  %v3973_v13 = vcombine.low %v12866_v44, %v12821_v17  ;;  %v6334_v47 = vcombine.high %v12661_v6, %v12637_v12  ;;  %v12902_v0 = vrot.slane %v6101_v48, %v9770_v32  ;;  %7523 = vrot.lane.b32.xlu1 %v3772_v9, %s8806_s4 }
 0x5ad   : > { %15733 = vst [vmem:[#allocation162_spill] sm:$0xff] %v12892_v53  ;;  %v12905_v33 = vrot.slane %v6117_v36, %v9770_v32  ;;  %15734 = vst [vmem:[#allocation204_spill] sm:$0xff] %v12908_v38  ;;  %v6354_v43 = vcombine.high %v12767_v24, %v12740_v39  ;;  %v12915_v14 = vsel %vm2428_vm0, %v15736_v50, %v15735_v42  ;;  %v12931_v39 = vpop.permute.xlu1 %7299  ;;  %v15739_v42 = vld [vmem:[#allocation303_spill] sm:$0xff]  ;;  %v15740_v50 = vld [vmem:[#allocation74_spill] sm:$0xff] }
 0x5ae   : > { %15737 = vst [vmem:[#allocation398_spill] sm:$0xff] %v12915_v14  ;;  %v12918_v12 = vrot.slane %v4005_v52, %v9807_v63  ;;  %v4179_v6 = vcombine.low %v12521_v61, %v12677_v5  ;;  %v6302_v36 = vcombine.high %v12680_v34, %v12658_v30  ;;  %v12927_v9 = vrot.slane %v6085_v37, %v9770_v32  ;;  %v15743_v38 = vld [vmem:[#allocation81_spill] sm:$0xff]  ;;  %v15746_v34 = vld [vmem:[#allocation396_spill] sm:$0xff]  ;;  %v15770_v53 = vld [vmem:[#allocation102_spill] sm:$0xff] }
 0x5af   : > { %v6181_v24 = vcombine.low %v12905_v33, %v12881_v15  ;;  %15738 = vst [vmem:[#allocation172_spill] sm:$0xff] %v12931_v39  ;;  %v5948_v52 = vcombine.high %v12793_v41, %v12770_v3  ;;  %7749 = vrot.lane.b32.xlu0 %v6354_v43, %s8820_s29  ;;  %v12939_v48 = vsel %vm2428_vm0, %v15740_v50, %v15739_v42  ;;  %v15742_v39 = vld [vmem:[#allocation310_spill] sm:$0xff]  ;;  %v12961_v50 = vpop.permute.xlu0 %7525  ;;  %v15747_v37 = vld [vmem:[#allocation168_spill] sm:$0xff] }
 0x5b0   : > { %15741 = vst [vmem:[#allocation244_spill] sm:$0xff] %v12939_v48  ;;  %v12950_v41 = vsel %vm2428_vm0, %v15743_v38, %v15742_v39  ;;  %v12953_v3 = vrot.slane %v3973_v13, %v9807_v63  ;;  %v12956_v43 = vrot.slane %v6334_v47, %v9807_v63  ;;  %v6149_v42 = vcombine.low %v12927_v9, %v12902_v0  ;;  %v15749_v13 = vld [vmem:[#allocation372_spill] sm:$0xff] }
 0x5b1   : > { %15744 = vst [vmem:[#allocation17_spill] sm:$0xff] %v12950_v41  ;;  %7527 = vrot.lane.b32.xlu1 %v5948_v52, %s8806_s4  ;;  %15745 = vst [vmem:[#allocation256_spill] sm:$0xff] %v12961_v50  ;;  %v12966_v30 = vsel %vm2428_vm0, %v15747_v37, %v15746_v34  ;;  %v4181_v39 = vcombine.low %v12851_v60, %v12939_v48  ;;  %v12977_v52 = vrot.slane %v6302_v36, %v9807_v63  ;;  %v12982_v34 = vpop.permute.xlu1 %7303  ;;  %v15750_v38 = vld [vmem:[#allocation140_spill] sm:$0xff]  ;;  %v15751_v36 = vld [vmem:[#allocation383_spill] sm:$0xff]  ;;  %s8823_s4 = smov 96  }
 0x5b2   : > { %v12980_v50 = vrot.slane %v6181_v24, %v9807_v63  ;;  %15748 = vst [vmem:[#allocation29_spill] sm:$0xff] %v12982_v34  ;;  %v4037_v37 = vcombine.low %v12953_v3, %v12918_v12  ;;  %v4197_v47 = vcombine.low %v12915_v14, %v12950_v41  ;;  %v12992_v60 = vsel %vm2428_vm0, %v15750_v38, %v15749_v13  ;;  %v15752_v48 = vld [vmem:[#allocation154_spill] sm:$0xff]  ;;  %v15753_v34 = vld [vmem:[#allocation389_spill] sm:$0xff] }
 0x5b3   : > { %7761 = vrot.lane.b32.xlu0 %v4179_v6, %s8821_s30  ;;  %v12997_v24 = vsel %vm2428_vm0, %v15752_v48, %v15751_v36  ;;  %v13002_v21 = vsel %vm2428_vm0, %v15754_v59, %v15753_v34  ;;  %v3910_v6 = vcombine.high %v12750_v27, %v12755_v28  ;;  %v13009_v41 = vrot.slane %v6149_v42, %v9807_v63  ;;  %v13012_v38 = vpop.permute.xlu0 %7537  ;;  %v15756_v13 = vld [vmem:[#allocation361_spill] sm:$0xff]  ;;  %v15757_v34 = vld [vmem:[#allocation126_spill] sm:$0xff]  ;;  %v15758_v28 = vld [vmem:[#allocation367_spill] sm:$0xff] }
 0x5b4   : > { %v6541_v14 = vcombine.low %v12997_v24, %v12966_v30  ;;  %15755 = vst [vmem:[#allocation281_spill] sm:$0xff] %v13012_v38  ;;  %v6355_v48 = vcombine.low %v12977_v52, %v12956_v43  ;;  %v3926_v59 = vcombine.high %v12722_v45, %v12697_v1  ;;  %v13021_v27 = vsel %vm2428_vm0, %v15757_v34, %v15756_v13  ;;  %v15759_v36 = vld [vmem:[#allocation133_spill] sm:$0xff] }
 0x5b5   : > { %7539 = vrot.lane.b32.xlu1 %v4037_v37, %s8807_s18  ;;  %v13026_v42 = vsel %vm2428_vm0, %v15759_v36, %v15758_v28  ;;  %v15761_v37 = vld [vmem:[#allocation147_spill] sm:$0xff]  ;;  %v6509_v1 = vcombine.low %v13021_v27, %v12992_v60  ;;  %v13042_v13 = vpop.permute.xlu1 %7315  ;;  %v6213_v34 = vcombine.low %v13009_v41, %v12980_v50  ;;  %v13051_v28 = vrot.slane %v4197_v47, %v9770_v32 }
 0x5b6   : > { %v13031_v38 = vsel %vm2428_vm0, %v15761_v37, %v15760_v55  ;;  %15764 = vst [vmem:[#allocation54_spill] sm:$0xff] %v13042_v13  ;;  %v13048_v55 = vrot.slane %v4181_v39, %v9770_v32  ;;  %v15766_v36 = vld [vmem:[#allocation119_spill] sm:$0xff]  ;;  %v15767_v13 = vld [vmem:[#allocation324_spill] sm:$0xff]  ;;  %v13073_v20 = vrot.slane %v6541_v14, %v9770_v32  ;;  %v4006_v14 = vcombine.high %v12831_v19, %v12801_v4 }
 0x5b7   : > { %v6525_v45 = vcombine.low %v13031_v38, %v13002_v21  ;;  %7765 = vrot.lane.b32.xlu0 %v6355_v48, %s8821_s30  ;;  %v13058_v37 = vsel %vm2428_vm0, %v15766_v36, %v15765_v58  ;;  %v13063_v22 = vsel %vm2428_vm0, %v15768_v2, %v15767_v13  ;;  %v15769_v48 = vld [vmem:[#allocation331_spill] sm:$0xff]  ;;  %v13076_v54 = vpop.permute.xlu0 %7541  ;;  %v3940_v58 = vrot.slane %v3926_v59, %v9770_v32  ;;  %v15772_v36 = vld [vmem:[#allocation317_spill] sm:$0xff]  ;;  %v15773_v2 = vld [vmem:[#allocation88_spill] sm:$0xff] }
 0x5b8   : > { %v13068_v39 = vsel %vm2428_vm0, %v15770_v53, %v15769_v48  ;;  %v6493_v47 = vcombine.low %v13058_v37, %v13026_v42  ;;  %15771 = vst [vmem:[#allocation269_spill] sm:$0xff] %v13076_v54  ;;  %v13082_v13 = vsel %vm2428_vm0, %v15773_v2, %v15772_v36  ;;  %v3942_v53 = vcombine.high %v12764_v57, %v12737_v46 }
 0x5b9   : > { %7543 = vrot.lane.b32.xlu1 %v6213_v34, %s8807_s18  ;;  %v4229_v48 = vcombine.low %v13063_v22, %v13036_v16  ;;  %v13091_v34 = vrot.slane %v6509_v1, %v9770_v32  ;;  %v13094_v54 = vrot.slane %v6525_v45, %v9770_v32  ;;  %v13096_v59 = vpop.permute.xlu1 %7319  ;;  %v4038_v36 = vcombine.high %v12953_v3, %v12918_v12  ;;  %s8824_s18 = smov 98  }
 0x5ba   : > { %v15774_v46 = vcombine.high %v12521_v61, %v12677_v5  ;;  %v3924_v57 = vrot.slane %v3910_v6, %v9770_v32  ;;  %v4245_v4 = vcombine.low %v13048_v55, %v13051_v28  ;;  %v4213_v19 = vcombine.low %v13082_v13, %v13068_v39 }
 0x5bb   : > { %v3972_v1 = vrot.slane %v3958_v18, %v9770_v32  ;;  %v3974_v45 = vcombine.high %v12866_v44, %v12821_v17  ;;  %v13113_v12 = vrot.slane %v6493_v47, %v9770_v32  ;;  %v6589_v61 = vcombine.low %v13094_v54, %v13073_v20  ;;  %v13118_v5 = vpop.permute.xlu0 %7553 }
 0x5bc   : > { %7777 = vrot.lane.b32.xlu0 %v15774_v46, %s8822_s3  ;;  %v6356_v3 = vcombine.high %v12977_v52, %v12956_v43  ;;  %v3989_v6 = vcombine.low %v3924_v57, %v3940_v58  ;;  %v3956_v2 = vrot.slane %v3942_v53, %v9770_v32  ;;  %v13124_v18 = vrot.slane %v4229_v48, %v9770_v32 }
 0x5bd   : > { %7555 = vrot.lane.b32.xlu1 %v4038_v36, %s8808_s19  ;;  %v6510_v17 = vcombine.high %v13021_v27, %v12992_v60  ;;  %v13129_v44 = vrot.slane %v4006_v14, %v9807_v63  ;;  %v6557_v47 = vcombine.low %v13113_v12, %v13091_v34  ;;  %v6182_v36 = vcombine.high %v12905_v33, %v12881_v15  ;;  %v13135_v46 = vpop.permute.xlu1 %7331 }
 0x5be   : > { %15775 = vst [vmem:[#allocation42_spill] sm:$0xff] %v13135_v46  ;;  %v6214_v43 = vcombine.high %v13009_v41, %v12980_v50  ;;  %v13141_v52 = vrot.slane %v4213_v19, %v9770_v32  ;;  %v4021_v60 = vcombine.low %v3956_v2, %v3972_v1  ;;  %v4022_v27 = vcombine.high %v3956_v2, %v3972_v1 }
 0x5bf   : > { %v6494_v53 = vcombine.high %v13058_v37, %v13026_v42  ;;  %v13146_v48 = vrot.slane %v3974_v45, %v9807_v63  ;;  %v3990_v14 = vcombine.high %v3924_v57, %v3940_v58  ;;  %v13149_v15 = vrot.slane %v6589_v61, %v9807_v63  ;;  %v13154_v41 = vpop.permute.xlu0 %7557 }
 0x5c0   : > { %7781 = vrot.lane.b32.xlu0 %v6356_v3, %s8822_s3  ;;  %v6150_v33 = vcombine.high %v12927_v9, %v12902_v0  ;;  %v13157_v50 = vrot.slane %v4245_v4, %v9807_v63  ;;  %v4277_v42 = vcombine.low %v13141_v52, %v13124_v18  ;;  %v13162_v37 = vrot.slane %v6510_v17, %v9770_v32 }
 0x5c1   : > { %7559 = vrot.lane.b32.xlu1 %v6214_v43, %s8808_s19  ;;  %v13167_v57 = vrot.slane %v6557_v47, %v9807_v63  ;;  %v6542_v0 = vcombine.high %v12997_v24, %v12966_v30  ;;  %v13172_v9 = vrot.slane %v6182_v36, %v9807_v63  ;;  %v13174_v4 = vpop.permute.xlu1 %7335  ;;  %v4039_v19 = vcombine.low %v13146_v48, %v13129_v44  ;;  %s8825_s19 = smov 100  }
 0x5c2   : > { %v15776_v1 = vcombine.low %v12559_v35, %v12876_v25  ;;  %v13183_v45 = vrot.slane %v3989_v6, %v9807_v63  ;;  %v13186_v61 = vrot.slane %v4021_v60, %v9807_v63  ;;  %v13189_v30 = vrot.slane %v4022_v27, %v9807_v63 }
 0x5c3   : > { %v13192_v24 = vrot.slane %v6494_v53, %v9770_v32  ;;  %v13195_v3 = vrot.slane %v3990_v14, %v9807_v63  ;;  %v6526_v2 = vcombine.high %v13031_v38, %v13002_v21  ;;  %v13200_v17 = vrot.slane %v6150_v33, %v9807_v63  ;;  %v13203_v6 = vpop.permute.xlu0 %7569 }
 0x5c4   : > { %7793 = vrot.lane.b32.xlu0 %v15776_v1, %s8823_s4  ;;  %v6621_v47 = vcombine.low %v13167_v57, %v13149_v15  ;;  %v13208_v36 = vrot.slane %v4277_v42, %v9807_v63  ;;  %v6558_v43 = vcombine.high %v13113_v12, %v13091_v34  ;;  %v6590_v21 = vcombine.high %v13094_v54, %v13073_v20  ;;  %v15795_v54 = vld [vmem:[#allocation261_spill] sm:$0xff] }
 0x5c5   : > { %7571 = vrot.lane.b32.xlu1 %v4039_v19, %s8809_s21  ;;  %v6573_v60 = vcombine.low %v13192_v24, %v13162_v37  ;;  %v13217_v38 = vrot.slane %v6542_v0, %v9770_v32  ;;  %v6134_v27 = vcombine.high %v12811_v51, %v12786_v29  ;;  %v13221_v53 = vpop.permute.xlu1 %7347  ;;  %v6215_v14 = vcombine.low %v13200_v17, %v13172_v9 }
 0x5c6   : > { %15777 = vst [vmem:[#allocation275_spill] sm:$0xff] %v13221_v53  ;;  %v4040_v34 = vcombine.high %v13146_v48, %v13129_v44  ;;  %v4041_v12 = vcombine.low %v13183_v45, %v13186_v61  ;;  %v13239_v33 = vrot.slane %v6526_v2, %v9770_v32  ;;  %v6102_v44 = vcombine.high %v12836_v10, %v12806_v56 }
 0x5c7   : > { %v6118_v48 = vcombine.high %v12846_v8, %v12816_v11  ;;  %v13246_v42 = vpop.permute.xlu0 %7573  ;;  %v13249_v0 = vrot.slane %v6558_v43, %v9807_v63  ;;  %v13252_v19 = vrot.slane %v6573_v60, %v9807_v63  ;;  %v13255_v1 = vrot.slane %v6590_v21, %v9807_v63  ;;  %v15780_v43 = vld [vmem:[#allocation399_spill] sm:$0xff]  ;;  %v15782_v60 = vld [vmem:[#allocation254_spill] sm:$0xff]  ;;  %v15783_v21 = vld [vmem:[#allocation392_spill] sm:$0xff] }
 0x5c8   : > { %7797 = vrot.lane.b32.xlu0 %v6621_v47, %s8823_s4  ;;  %v6086_v2 = vcombine.high %v12873_v62, %v12841_v23  ;;  %v6605_v56 = vcombine.low %v13239_v33, %v13217_v38  ;;  %v13264_v11 = vrot.slane %v6134_v27, %v9770_v32  ;;  %v15779_v47 = vcombine.high %v12559_v35, %v12876_v25  ;;  %v15781_v62 = vld [vmem:[#allocation173_spill] sm:$0xff]  ;;  %v15786_v35 = vld [vmem:[#allocation226_spill] sm:$0xff] }
 0x5c9   : > { %7575 = vrot.lane.b32.xlu1 %v6215_v14, %s8809_s21  ;;  %v13266_v10 = vpop.permute.xlu1 %7351  ;;  %v13275_v23 = vsel %vm2428_vm0, %v15781_v62, %v15780_v43  ;;  %v15784_v14 = vld [vmem:[#allocation393_spill] sm:$0xff]  ;;  %v13283_v51 = vrot.slane %v6102_v44, %v9770_v32  ;;  %v13286_v8 = vrot.slane %v6118_v48, %v9770_v32  ;;  %v6622_v43 = vcombine.high %v13167_v57, %v13149_v15  ;;  %v15787_v62 = vld [vmem:[#allocation248_spill] sm:$0xff]  ;;  %s8826_s21 = smov 102  }
 0x5ca   : > { %15778 = vst [vmem:[#allocation48_spill] sm:$0xff] %v13266_v10  ;;  %v15785_v58 = vcombine.low %v15783_v21, %v15784_v14  ;;  %v15789_v21 = vld [vmem:[#allocation282_spill] sm:$0xff]  ;;  %v15790_v14 = vld [vmem:[#allocation283_spill] sm:$0xff] }
 0x5cb   : > { %v6197_v48 = vcombine.low %v13286_v8, %v13264_v11 }
 0x5cc   : > { %7809 = vrot.lane.b32.xlu0 %v15779_v47, %s8824_s18  ;;  %v8048_v27 = vsel %vm8045_vm1, %v15785_v58, %v15782_v60  ;;  %v13291_v47 = vpop.permute.xlu0 %7585  ;;  %v13296_v58 = vrot.slane %v6086_v2, %v9770_v32  ;;  %v15788_v60 = vld [vmem:[#allocation202_spill] sm:$0xff]  ;;  %v6216_v2 = vcombine.high %v13200_v17, %v13172_v9 }
 0x5cd   : > { %v8053_v25 = vsel %vm8050_vm2, %v8048_v27, %v15786_v35  ;;  %7587 = vrot.lane.b32.xlu1 %v4040_v34, %s8810_s20  ;;  %v15791_v34 = vcombine.low %v15789_v21, %v15790_v14  ;;  %v15792_v35 = vld [vmem:[#allocation46_spill] sm:$0xff]  ;;  %v13309_v57 = vpop.permute.xlu1 %7363 }
 0x5ce   : > { %v8058_v44 = vsel %vm8055_vm3, %v8053_v25, %v15787_v62  ;;  %15793 = vst [vmem:[#allocation250_spill] sm:$0xff] %v13309_v57  ;;  %v13315_v25 = vrot.slane %v6605_v56, %v9807_v63  ;;  %v15794_v62 = vld [vmem:[#allocation210_spill] sm:$0xff]  ;;  %v15798_v56 = vld [vmem:[#allocation407_spill] sm:$0xff] }
 0x5cf   : > { %v8046_v27 = vsel %vm8045_vm1, %v15791_v34, %v15788_v60  ;;  %v8063_v15 = vsel %vm8060_vm4, %v8058_v44, %v15792_v35  ;;  %v6165_v44 = vcombine.low %v13296_v58, %v13283_v51  ;;  %v15796_v60 = vld [vmem:[#allocation267_spill] sm:$0xff]  ;;  %v15797_v34 = vld [vmem:[#allocation164_spill] sm:$0xff] }
 0x5d0   : > { %7813 = vrot.lane.b32.xlu0 %v6622_v43, %s8824_s18  ;;  %v8051_v29 = vsel %vm8050_vm2, %v8046_v27, %v15794_v62  ;;  %v8068_v21 = vsel %vm8065_vm5, %v8063_v15, %v15795_v54  ;;  %v13328_v17 = vpop.permute.xlu0 %7589  ;;  %v15799_v43 = vld [vmem:[#allocation181_spill] sm:$0xff]  ;;  %v15801_v15 = vld [vmem:[#allocation150_spill] sm:$0xff] }
 0x5d1   : > { %v8056_v14 = vsel %vm8055_vm3, %v8051_v29, %v15796_v60  ;;  %v8073_v9 = vsel %vm8070_vm6, %v8068_v21, %v15797_v34  ;;  %7591 = vrot.lane.b32.xlu1 %v6216_v2, %s8810_s20  ;;  %v13333_v27 = vsel %vm2428_vm0, %v15799_v43, %v15798_v56  ;;  %v15800_v54 = vld [vmem:[#allocation273_spill] sm:$0xff]  ;;  %v13340_v29 = vrot.slane %v6197_v48, %v9807_v63  ;;  %v15802_v21 = vld [vmem:[#allocation6_spill] sm:$0xff]  ;;  %v15803_v60 = vld [vmem:[#allocation363_spill] sm:$0xff]  ;;  %v13346_v20 = vpop.permute.xlu1 %7367  ;;  %s8827_s20 = smov 104  }
 0x5d2   : > { %v8061_v35 = vsel %vm8060_vm4, %v8056_v14, %v15800_v54  ;;  %v8078_v62 = vsel %vm8075_vm7, %v8073_v9, %v15801_v15  ;;  %15804 = vst [vmem:[#allocation23_spill] sm:$0xff] %v13346_v20  ;;  %v15805_v14 = vcombine.low %v12584_v7, %v12889_v31  ;;  %v15806_v9 = vld [vmem:[#allocation34_spill] sm:$0xff]  ;;  %v6623_v54 = vcombine.low %v13249_v0, %v13255_v1  ;;  %v15808_v15 = vld [vmem:[#allocation136_spill] sm:$0xff] }
 0x5d3   : > { %v8066_v2 = vsel %vm8065_vm5, %v8061_v35, %v15802_v21  ;;  %v8083_v34 = vsel %vm8080_vm8, %v8078_v62, %v15803_v60  ;;  %v15807_v48 = vld [vmem:[#allocation374_spill] sm:$0xff]  ;;  %v13359_v35 = vrot.slane %v6165_v44, %v9807_v63  ;;  %v15809_v21 = vld [vmem:[#allocation345_spill] sm:$0xff] }
 0x5d4   : > { %7825 = vrot.lane.b32.xlu0 %v15805_v14, %s8825_s19  ;;  %v8071_v56 = vsel %vm8070_vm6, %v8066_v2, %v15806_v9  ;;  %v8088_v43 = vsel %vm8085_vm9, %v8083_v34, %v15807_v48  ;;  %v13369_v2 = vpop.permute.xlu0 %7601  ;;  %v15810_v34 = vld [vmem:[#allocation157_spill] sm:$0xff] }
 0x5d5   : > { %v8076_v62 = vsel %vm8075_vm7, %v8071_v56, %v15808_v15  ;;  %v8093_v60 = vsel %vm14813_vm10, %v8088_v43, %v15809_v21  ;;  %7603 = vrot.lane.b32.xlu1 %v4041_v12, %s8811_s2  ;;  %v15811_v9 = vld [vmem:[#allocation353_spill] sm:$0xff]  ;;  %v6624_v56 = vcombine.high %v13249_v0, %v13255_v1  ;;  %v15813_v15 = vld [vmem:[#allocation354_spill] sm:$0xff]  ;;  %v13381_v12 = vpop.permute.xlu1 %7379  ;;  %v6217_v57 = vcombine.low %v13359_v35, %v13340_v29  ;;  %v15817_v0 = vld [vmem:[#allocation143_spill] sm:$0xff] }
 0x5d6   : > { %v8081_v14 = vsel %vm8080_vm8, %v8076_v62, %v15810_v34  ;;  %v8098_v44 = vsel %vm14814_vm11, %v8093_v60, %v15811_v9  ;;  %v15812_v48 = vld [vmem:[#allocation129_spill] sm:$0xff]  ;;  %15814 = vst [vmem:[#allocation263_spill] sm:$0xff] %v13381_v12  ;;  %v15815_v62 = vld [vmem:[#allocation240_spill] sm:$0xff] }
 0x5d7   : > { %v8086_v43 = vsel %vm8085_vm9, %v8081_v14, %v15812_v48  ;;  %v8103_v21 = vsel %vm14816_vm12, %v8098_v44, %v15813_v15  ;;  %v15816_v60 = vld [vmem:[#allocation189_spill] sm:$0xff]  ;;  %v15818_v14 = vld [vmem:[#allocation106_spill] sm:$0xff]  ;;  %v15819_v44 = vld [vmem:[#allocation115_spill] sm:$0xff] }
 0x5d8   : > { %7829 = vrot.lane.b32.xlu0 %v6623_v54, %s8825_s19  ;;  %v13389_v34 = vsel %vm2428_vm0, %v15816_v60, %v15815_v62  ;;  %v8091_v1 = vsel %vm14813_vm10, %v8086_v43, %v15817_v0  ;;  %v8108_v9 = vsel %vm14815_vm13, %v8103_v21, %v15818_v14  ;;  %v15820_v15 = vld [vmem:[#allocation92_spill] sm:$0xff]  ;;  %v13400_v54 = vpop.permute.xlu0 %7605  ;;  %v15822_v0 = vld [vmem:[#allocation293_spill] sm:$0xff]  ;;  %vm14820_vm10 = vcmask 261120  }
 0x5d9   : > { %v8096_v48 = vsel %vm14814_vm11, %v8091_v1, %v15819_v44  ;;  %v8113_v12 = vsel %vm14818_vm14, %v8108_v9, %v15820_v15  ;;  %7607 = vrot.lane.b32.xlu1 %v6217_v57, %s8811_s2  ;;  %v15821_v60 = vld [vmem:[#allocation348_spill] sm:$0xff]  ;;  %v15823_v9 = vld [vmem:[#allocation335_spill] sm:$0xff]  ;;  %v15824_v44 = vld [vmem:[#allocation57_spill] sm:$0xff]  ;;  %vm14819_vm11 = vcmask 277504   ;;  %v13416_v62 = vpop.permute.xlu1 %7383  ;;  %s8828_s2 = smov 106  }
 0x5da   : > { %v8101_v43 = vsel %vm14816_vm12, %v8096_v48, %v15821_v60  ;;  %v8118_v21 = vsel %vm14817_vm15, %v8113_v12, %v15822_v0  ;;  %15825 = vst [vmem:[#allocation36_spill] sm:$0xff] %v13416_v62  ;;  %v15826_v12 = vcombine.high %v12584_v7, %v12889_v31  ;;  %v6166_v48 = vcombine.high %v13296_v58, %v13283_v51  ;;  %v15827_v60 = vld [vmem:[#allocation78_spill] sm:$0xff]  ;;  %v15828_v1 = vld [vmem:[#allocation193_spill] sm:$0xff]  ;;  %v15831_v14 = vld [vmem:[#allocation328_spill] sm:$0xff] }
 0x5db   : > { %v8106_v57 = vsel %vm14815_vm13, %v8101_v43, %v15823_v9  ;;  %v8123_v15 = vsel %vm14820_vm10, %v8118_v21, %v15824_v44  ;;  %vm14822_vm13 = vcmask 293888   ;;  %v15829_v21 = vld [vmem:[#allocation148_spill] sm:$0xff]  ;;  %v15830_v9 = vld [vmem:[#allocation197_spill] sm:$0xff]  ;;  %vm14821_vm12 = vcmask 310272  }
 0x5dc   : > { %7841 = vrot.lane.b32.xlu0 %v15826_v12, %s8826_s21  ;;  %v8111_v0 = vsel %vm14818_vm14, %v8106_v57, %v15827_v60  ;;  %v8128_v43 = vsel %vm14819_vm11, %v8123_v15, %v15828_v1  ;;  %v13431_v44 = vsel %vm2428_vm0, %v15830_v9, %v15829_v21  ;;  %v15832_v7 = vld [vmem:[#allocation185_spill] sm:$0xff]  ;;  %v15833_v51 = vcombine.high %v13183_v45, %v13186_v61  ;;  %v13441_v58 = vpop.permute.xlu0 %7617  ;;  %v15834_v57 = vld [vmem:[#allocation300_spill] sm:$0xff]  ;;  %v15835_v12 = vld [vmem:[#allocation14_spill] sm:$0xff] }
 0x5dd   : > { %v8116_v53 = vsel %vm14817_vm15, %v8111_v0, %v15831_v14  ;;  %v8133_v31 = vsel %vm14822_vm13, %v8128_v43, %v15832_v7  ;;  %v6198_v1 = vcombine.high %v13286_v8, %v13264_v11  ;;  %vm14824_vm15 = vcmask 326656   ;;  %v15836_v60 = vld [vmem:[#allocation355_spill] sm:$0xff]  ;;  %v13453_v45 = vpop.permute.xlu1 %7395  ;;  %v15839_v8 = vld [vmem:[#allocation217_spill] sm:$0xff]  ;;  %v15872_v62 = vld [vmem:[#allocation180_spill] sm:$0xff] }
 0x5de   : > { %7619 = vrot.lane.b32.xlu1 %v15833_v51, %s8812_s6  ;;  %v8121_v15 = vsel %vm14820_vm10, %v8116_v53, %v15834_v57  ;;  %v8138_v14 = vsel %vm14821_vm12, %v8133_v31, %v15835_v12  ;;  %v15837_v43 = vld [vmem:[#allocation51_spill] sm:$0xff]  ;;  %vm14823_vm14 = vcmask 343040   ;;  %15838 = vst [vmem:[#allocation237_spill] sm:$0xff] %v13453_v45  ;;  %v6218_v61 = vcombine.high %v13359_v35, %v13340_v29  ;;  %v15840_v9 = vld [vmem:[#allocation45_spill] sm:$0xff] }
 0x5df   : > { %v8126_v0 = vsel %vm14819_vm11, %v8121_v15, %v15836_v60  ;;  %v8143_v21 = vsel %vm14824_vm15, %v8138_v14, %v15837_v43  ;;  %v13459_v53 = vrot.slane %v6166_v48, %v9807_v63  ;;  %vm14826_vm11 = vcmask 359424   ;;  %v15841_v31 = vld [vmem:[#allocation415_spill] sm:$0xff]  ;;  %v15842_v51 = vld [vmem:[#allocation205_spill] sm:$0xff] }
 0x5e0   : > { %7845 = vrot.lane.b32.xlu0 %v6624_v56, %s8826_s21  ;;  %v8131_v11 = vsel %vm14822_vm13, %v8126_v0, %v15839_v8  ;;  %v8148_v7 = vsel %vm14823_vm14, %v8143_v21, %v15840_v9  ;;  %v13468_v57 = vsel %vm2428_vm0, %v15842_v51, %v15841_v31  ;;  %v15843_v15 = vld [vmem:[#allocation169_spill] sm:$0xff]  ;;  %vm14825_vm10 = vcmask 375808   ;;  %v13475_v48 = vpop.permute.xlu0 %7621  ;;  %v15845_v12 = vld [vmem:[#allocation307_spill] sm:$0xff]  ;;  %v15847_v0 = vld [vmem:[#allocation26_spill] sm:$0xff] }
 0x5e1   : > { %v8136_v29 = vsel %vm14821_vm12, %v8131_v11, %v15843_v15  ;;  %v15844_v35 = vld [vmem:[#allocation33_spill] sm:$0xff]  ;;  %v15848_v21 = vld [vmem:[#allocation163_spill] sm:$0xff]  ;;  %vm14828_vm12 = vcmask 392192   ;;  %v13487_v11 = vrot.slane %v6198_v1, %v9807_v63  ;;  %vm14827_vm13 = vcmask 408576   ;;  %v13493_v51 = vpop.permute.xlu1 %7399  ;;  %v15852_v15 = vld [vmem:[#allocation162_spill] sm:$0xff] }
 0x5e2   : > { %v8153_v56 = vsel %vm14826_vm11, %v8148_v7, %v15844_v35  ;;  %7623 = vrot.lane.b32.xlu1 %v6218_v61, %s8812_s6  ;;  %v15846_v14 = vld [vmem:[#allocation229_spill] sm:$0xff]  ;;  %v8141_v43 = vsel %vm14824_vm15, %v8136_v29, %v15847_v0  ;;  %v15849_v9 = vld [vmem:[#allocation39_spill] sm:$0xff]  ;;  %15851 = vst [vmem:[#allocation10_spill] sm:$0xff] %v13493_v51  ;;  %v15853_v29 = vcombine.low %v12587_v40, %v15852_v15  ;;  %v15854_v35 = vld [vmem:[#allocation52_spill] sm:$0xff]  ;;  %vm14830_vm15 = vcmask 441344   ;;  %s8829_s6 = smov 108  }
 0x5e3   : > { %v13480_v60 = vsel %vm2428_vm0, %v15846_v14, %v15845_v12  ;;  %v8158_v8 = vsel %vm14825_vm10, %v8153_v56, %v15848_v21  ;;  %v8146_v61 = vsel %vm14823_vm14, %v8141_v43, %v15849_v9  ;;  %v15850_v7 = vld [vmem:[#allocation121_spill] sm:$0xff]  ;;  %v15856_v12 = vld [vmem:[#allocation20_spill] sm:$0xff]  ;;  %v15857_v0 = vld [vmem:[#allocation114_spill] sm:$0xff]  ;;  %vm14829_vm14 = vcmask 424960  }
 0x5e4   : > { %v8163_v31 = vsel %vm14828_vm12, %v8158_v8, %v15850_v7  ;;  %7857 = vrot.lane.b32.xlu0 %v15853_v29, %s8827_s20  ;;  %v15855_v56 = vld [vmem:[#allocation213_spill] sm:$0xff]  ;;  %v8151_v14 = vsel %vm14826_vm11, %v8146_v61, %v15856_v12  ;;  %v15860_v7 = vld [vmem:[#allocation7_spill] sm:$0xff]  ;;  %v15862_v61 = vcombine.low %v13195_v3, %v13189_v30  ;;  %vm14831_vm11 = vcmask 474112  }
 0x5e5   : > { %v13502_v1 = vsel %vm2428_vm0, %v15855_v56, %v15854_v35  ;;  %v8168_v43 = vsel %vm14827_vm13, %v8163_v31, %v15857_v0  ;;  %v15858_v21 = vld [vmem:[#allocation21_spill] sm:$0xff]  ;;  %v8156_v29 = vsel %vm14825_vm10, %v8151_v14, %v15860_v7  ;;  %v13521_v35 = vpop.permute.xlu0 %7633  ;;  %v15863_v56 = vld [vmem:[#allocation379_spill] sm:$0xff]  ;;  %v15864_v0 = vld [vmem:[#allocation94_spill] sm:$0xff]  ;;  %vm14832_vm10 = vcmask 457728   ;;  %v13533_v7 = vpop.permute.xlu1 %7411 }
 0x5e6   : > { %v15859_v8 = vld [vmem:[#allocation221_spill] sm:$0xff]  ;;  %7635 = vrot.lane.b32.xlu1 %v15862_v61, %s8813_s14  ;;  %v6405_v31 = vcombine.low %v13502_v1, %v13480_v60  ;;  %v8161_v12 = vsel %vm14828_vm12, %v8156_v29, %v15863_v56  ;;  %15867 = vst [vmem:[#allocation394_spill] sm:$0xff] %v13533_v7  ;;  %v6219_v61 = vcombine.low %v13459_v53, %v13487_v11  ;;  %v15869_v56 = vld [vmem:[#allocation122_spill] sm:$0xff]  ;;  %vm14833_vm12 = vcmask 506880  }
 0x5e7   : > { %v13511_v9 = vsel %vm2428_vm0, %v15859_v8, %v15858_v21  ;;  %v15861_v45 = vld [vmem:[#allocation337_spill] sm:$0xff]  ;;  %v15865_v21 = vld [vmem:[#allocation128_spill] sm:$0xff]  ;;  %v15868_v29 = vcombine.low %v13252_v19, %v13315_v25 }
 0x5e8   : > { %v8173_v51 = vsel %vm14829_vm14, %v8168_v43, %v15861_v45  ;;  %v8166_v45 = vsel %vm14827_vm13, %v8161_v12, %v15865_v21  ;;  %v15866_v43 = vld [vmem:[#allocation288_spill] sm:$0xff]  ;;  %vm14834_vm13 = vcmask 490496   ;;  %v6373_v21 = vcombine.low %v13333_v27, %v13431_v44 }
 0x5e9   : > { %v8178_v14 = vsel %vm14830_vm15, %v8173_v51, %v15864_v0  ;;  %7861 = vrot.lane.b32.xlu0 %v15868_v29, %s8827_s20  ;;  %v6389_v51 = vcombine.low %v13468_v57, %v13511_v9  ;;  %v8171_v12 = vsel %vm14829_vm14, %v8166_v45, %v15869_v56  ;;  %v15870_v0 = vld [vmem:[#allocation155_spill] sm:$0xff]  ;;  %v7638_v29 = vpop.permute.xlu0 %7637  ;;  %v13555_v20 = vrot.slane %v6405_v31, %v9770_v32  ;;  %v15873_v45 = vld [vmem:[#allocation73_spill] sm:$0xff]  ;;  %v15874_v56 = vld [vmem:[#allocation256_spill] sm:$0xff]  ;;  %v13571_v10 = vpop.permute.xlu1 %7415 }
 0x5ea   : > { %v8183_v8 = vsel %vm14832_vm10, %v8178_v14, %v15866_v43  ;;  %v15871_v43 = vld [vmem:[#allocation295_spill] sm:$0xff]  ;;  %7639 = vrot.lane.b32.xlu1 %v6219_v61, %s8813_s14  ;;  %vm14836_vm14 = vcmask 523264   ;;  %s8830_s14 = smov 110  }
 0x5eb   : > { %v8188_v14 = vsel %vm14831_vm11, %v8183_v8, %v15870_v0  ;;  %v8176_v7 = vsel %vm14830_vm15, %v8171_v12, %v15871_v43  ;;  %v15875_v12 = vcombine.low %v13275_v23, %v13389_v34  ;;  %vm14835_vm15 = vcmask 539648  }
 0x5ec   : > { %v8193_v46 = vsel %vm14834_vm13, %v8188_v14, %v15872_v62  ;;  %v8181_v8 = vsel %vm14832_vm10, %v8176_v7, %v15873_v45  ;;  %v15876_v62 = vld [vmem:[#allocation413_spill] sm:$0xff]  ;;  %v13578_v7 = vrot.slane %v6389_v51, %v9770_v32  ;;  %v15879_v45 = vld [vmem:[#allocation414_spill] sm:$0xff]  ;;  %vm8215_vm10 = vcmask 572416  }
 0x5ed   : > { %v8198_v0 = vsel %vm14833_vm12, %v8193_v46, %v15874_v56  ;;  %v13565_v43 = vrot.slane %v15875_v12, %v9770_v32  ;;  %v8186_v61 = vsel %vm14831_vm11, %v8181_v8, %v15876_v62  ;;  %v15877_v14 = vld [vmem:[#allocation269_spill] sm:$0xff]  ;;  %v15878_v46 = vcombine.high %v12587_v40, %v15852_v15  ;;  %v15880_v12 = vld [vmem:[#allocation204_spill] sm:$0xff]  ;;  %v7650_v51 = vpop.permute.xlu0 %7649 }
 0x5ee   : > { %v8203_v31 = vsel %vm14836_vm14, %v8198_v0, %v15877_v14  ;;  %v8191_v56 = vsel %vm14834_vm13, %v8186_v61, %v15879_v45  ;;  %vm8210_vm11 = vcmask 556032   ;;  %v13585_v0 = vrot.slane %v6373_v21, %v9770_v32  ;;  %v15882_v61 = vld [vmem:[#allocation281_spill] sm:$0xff] }
 0x5ef   : > { %7873 = vrot.lane.b32.xlu0 %v15878_v46, %s8828_s2  ;;  %v8208_v8 = vsel %vm14835_vm15, %v8203_v31, %v13154_v41  ;;  %v8196_v62 = vsel %vm14833_vm12, %v8191_v56, %v15880_v12  ;;  %v15881_v15 = vcombine.high %v13195_v3, %v13189_v30  ;;  %v6453_v41 = vcombine.low %v13578_v7, %v13555_v20  ;;  %v13605_v30 = vpop.permute.xlu1 %7427 }
 0x5f0   : > { %v8213_v40 = vsel %vm8210_vm11, %v8208_v8, %v13246_v42  ;;  %v8201_v21 = vsel %vm14836_vm14, %v8196_v62, %v15882_v61  ;;  %vm14837_vm12 = vcmask 588800   ;;  %vm8225_vm13 = vcmask 605184   ;;  %15883 = vst [vmem:[#allocation166_spill] sm:$0xff] %v13605_v30  ;;  %v15891_v61 = vld [vmem:[#allocation139_spill] sm:$0xff] }
 0x5f1   : > { %7651 = vrot.lane.b32.xlu1 %v15881_v15, %s8814_s17  ;;  %v8218_v14 = vsel %vm8215_vm10, %v8213_v40, %v13328_v17  ;;  %v8206_v42 = vsel %vm14835_vm15, %v8201_v21, %v13118_v5  ;;  %v6220_v3 = vcombine.high %v13459_v53, %v13487_v11  ;;  %v15884_v46 = vcombine.high %v13252_v19, %v13315_v25  ;;  %v15887_v11 = vld [vmem:[#allocation167_spill] sm:$0xff] }
 0x5f2   : > { %v8223_v31 = vsel %vm14837_vm12, %v8218_v14, %v13400_v54  ;;  %v15885_v17 = vcombine.high %v13239_v33, %v13217_v38  ;;  %v8211_v5 = vsel %vm8210_vm11, %v8206_v42, %v13203_v6  ;;  %vm8230_vm15 = vcmask 621568   ;;  %v7654_v38 = vpop.permute.xlu0 %7653  ;;  %v15886_v33 = vld [vmem:[#allocation395_spill] sm:$0xff]  ;;  %v15895_v14 = vld [vmem:[#allocation160_spill] sm:$0xff] }
 0x5f3   : > { %7877 = vrot.lane.b32.xlu0 %v15884_v46, %s8828_s2  ;;  %v8228_v54 = vsel %vm8225_vm13, %v8223_v31, %v13475_v48  ;;  %v6421_v53 = vcombine.low %v13565_v43, %v13585_v0  ;;  %v8216_v19 = vsel %vm8215_vm10, %v8211_v5, %v13291_v47  ;;  %vm14838_vm14 = vcmask 637952   ;;  %v13646_v40 = vpop.permute.xlu1 %7431  ;;  %v15890_v15 = vld [vmem:[#allocation371_spill] sm:$0xff] }
 0x5f4   : > { %v13617_v45 = vrot.slane %v15885_v17, %v9807_v63  ;;  %v8233_v25 = vsel %vm8230_vm15, %v8228_v54, %v7638_v29  ;;  %v13632_v6 = vsel %vm2428_vm0, %v15887_v11, %v15886_v33  ;;  %v8221_v48 = vsel %vm14837_vm12, %v8216_v19, %v13369_v2  ;;  %v15896_v19 = vld [vmem:[#allocation360_spill] sm:$0xff]  ;;  %v15898_v33 = vld [vmem:[#allocation366_spill] sm:$0xff] }
 0x5f5   : > { %7655 = vrot.lane.b32.xlu1 %v6220_v3, %s8814_s17  ;;  %v4309_v56 = vcombine.low %v13157_v50, %v13208_v36  ;;  %v8238_v8 = vsel %vm14838_vm14, %v8233_v25, %v7654_v38  ;;  %v15888_v47 = vcombine.high %v13192_v24, %v13162_v37  ;;  %v6461_v12 = vrot.slane %v6453_v41, %v9807_v63  ;;  %v15892_v37 = vld [vmem:[#allocation382_spill] sm:$0xff]  ;;  %v15893_v24 = vld [vmem:[#allocation153_spill] sm:$0xff]  ;;  %v15899_v11 = vld [vmem:[#allocation132_spill] sm:$0xff]  ;;  %s8831_s17 = smov 112  }
 0x5f6   : > { %v8226_v62 = vsel %vm8225_vm13, %v8221_v48, %v13441_v58  ;;  %v15889_v2 = vcombine.low %v12609_v26, %v12895_v49  ;;  %vm14839_vm12 = vcmask 654336   ;;  %v13655_v21 = vsel %vm2428_vm0, %v15891_v61, %v15890_v15  ;;  %v15894_v58 = vld [vmem:[#allocation388_spill] sm:$0xff]  ;;  %v7666_v5 = vpop.permute.xlu0 %7665  ;;  %v15897_v25 = vld [vmem:[#allocation125_spill] sm:$0xff] }
 0x5f7   : > { %v6588_v29 = vrot.slane %v15888_v47, %v9807_v63  ;;  %v13660_v41 = vsel %vm2428_vm0, %v15893_v24, %v15892_v37  ;;  %v13665_v42 = vsel %vm2428_vm0, %v15895_v14, %v15894_v58  ;;  %v8231_v31 = vsel %vm8230_vm15, %v8226_v62, %v13521_v35  ;;  %v15900_v48 = vld [vmem:[#allocation377_spill] sm:$0xff]  ;;  %v15901_v47 = vld [vmem:[#allocation146_spill] sm:$0xff]  ;;  %v15904_v37 = vld [vmem:[#allocation344_spill] sm:$0xff] }
 0x5f8   : > { %7889 = vrot.lane.b32.xlu0 %v15889_v2, %s8829_s6  ;;  %v6813_v3 = vcombine.low %v13660_v41, %v13632_v6  ;;  %v6429_v46 = vrot.slane %v6421_v53, %v9807_v63  ;;  %v8236_v17 = vsel %vm14838_vm14, %v8231_v31, %v7650_v51  ;;  %v13678_v38 = vsel %vm2428_vm0, %v15897_v25, %v15896_v19  ;;  %v13695_v2 = vpop.permute.xlu1 %7443  ;;  %v15903_v61 = vld [vmem:[#allocation373_spill] sm:$0xff]  ;;  %v15906_v14 = vld [vmem:[#allocation408_spill] sm:$0xff]  ;;  %v15907_v31 = vld [vmem:[#allocation59_spill] sm:$0xff] }
 0x5f9   : > { %7667 = vrot.lane.b32.xlu1 %v4309_v56, %s8815_s22  ;;  %v6627_v54 = vcombine.low %v6588_v29, %v13617_v45  ;;  %v13683_v35 = vsel %vm2428_vm0, %v15899_v11, %v15898_v33  ;;  %v13688_v53 = vsel %vm2428_vm0, %v15901_v47, %v15900_v48  ;;  %v8241_v51 = vsel %vm14839_vm12, %v8236_v17, %v7666_v5  ;;  %v15908_v5 = vld [vmem:[#allocation350_spill] sm:$0xff]  ;;  %v15910_v47 = vld [vmem:[#allocation323_spill] sm:$0xff] }
 0x5fa   : > { %v6781_v56 = vcombine.low %v13678_v38, %v13655_v21  ;;  %v6797_v62 = vcombine.low %v13688_v53, %v13665_v42  ;;  %15902 = vst [vmem:[#allocation370_spill] sm:$0xff] %v13695_v2  ;;  %v6485_v15 = vcombine.low %v6429_v46, %v6461_v12  ;;  %v15905_v24 = vcombine.low %v15903_v61, %v15904_v37  ;;  %v15909_v19 = vld [vmem:[#allocation118_spill] sm:$0xff] }
 0x5fb   : > { %v4685_v17 = vcombine.low %v15907_v31, %v15906_v14  ;;  %v13709_v25 = vsel %vm2428_vm0, %v15909_v19, %v15908_v5  ;;  %v13714_v11 = vrot.slane %v6813_v3, %v9770_v32  ;;  %v4452_v48 = vcombine.high %v12609_v26, %v12895_v49 }
 0x5fc   : > { %7893 = vrot.lane.b32.xlu0 %v6627_v54, %s8829_s6  ;;  %v13702_v58 = vrot.slane %v15905_v24, %v9770_v32  ;;  %v6765_v33 = vcombine.low %v13709_v25, %v13683_v35  ;;  %v7670_v54 = vpop.permute.xlu0 %7669  ;;  %v4278_v2 = vcombine.high %v13141_v52, %v13124_v18  ;;  %v13725_v19 = vrot.slane %v6781_v56, %v9770_v32  ;;  %v13730_v30 = vpop.permute.xlu1 %7447 }
 0x5fd   : > { %7671 = vrot.lane.b32.xlu1 %v6485_v15, %s8815_s22  ;;  %v8243_v5 = vsel %vm14839_vm12, %v8238_v8, %v7670_v54  ;;  %v13728_v3 = vrot.slane %v6797_v62, %v9770_v32  ;;  %v4310_v15 = vcombine.high %v13157_v50, %v13208_v36  ;;  %vm14840_vm14 = vcmask 670720   ;;  %s8832_s22 = smov 114  }
 0x5fe   : > { %v4653_v24 = vcombine.low %v13702_v58, %v15910_v47  ;;  %v4693_v26 = vrot.slane %v4685_v17, %v9807_v63  ;;  %v4246_v49 = vcombine.high %v13048_v55, %v13051_v28  ;;  %v13739_v18 = vrot.slane %v6765_v33, %v9770_v32 }
 0x5ff   : > { %v6861_v52 = vcombine.low %v13728_v3, %v13714_v11  ;;  %v6628_v50 = vcombine.high %v6588_v29, %v13617_v45  ;;  %v4292_v62 = vrot.slane %v4278_v2, %v9807_v63  ;;  %v6454_v28 = vcombine.high %v13578_v7, %v13555_v20 }
 0x600   : > { %7905 = vrot.lane.b32.xlu0 %v4452_v48, %s8830_s14  ;;  %v7682_v8 = vpop.permute.xlu0 %7681  ;;  %v4661_v36 = vrot.slane %v4653_v24, %v9807_v63  ;;  %v6829_v55 = vcombine.low %v13739_v18, %v13725_v19  ;;  %v13752_v17 = vpop.permute.xlu1 %7459  ;;  %v6486_v33 = vcombine.high %v6429_v46, %v6461_v12  ;;  %v4260_v54 = vrot.slane %v4246_v49, %v9807_v63 }
 0x601   : > { %7683 = vrot.lane.b32.xlu1 %v4310_v15, %s8816_s25  ;;  %v8246_v56 = vsel %vm14840_vm14, %v8241_v51, %v7682_v8  ;;  %v6869_v45 = vrot.slane %v6861_v52, %v9807_v63  ;;  %v6422_v29 = vcombine.high %v13565_v43, %v13585_v0  ;;  %v4230_v48 = vcombine.high %v13063_v22, %v13036_v16  ;;  %v15911_v43 = vld [vmem:[#allocation17_spill] sm:$0xff]  ;;  %v15912_v0 = vld [vmem:[#allocation398_spill] sm:$0xff]  ;;  %v15913_v52 = vld [vmem:[#allocation244_spill] sm:$0xff] }
 0x602   : > { %v4717_v2 = vcombine.low %v4661_v36, %v4693_v26  ;;  %v6837_v7 = vrot.slane %v6829_v55, %v9807_v63  ;;  %v6468_v12 = vrot.slane %v6454_v28, %v9807_v63  ;;  %v4311_v24 = vcombine.low %v4260_v54, %v4292_v62  ;;  %v15914_v8 = vld [vmem:[#allocation403_spill] sm:$0xff] }
 0x603   : > { %vm14841_vm12 = vcmask 687104   ;;  %v4198_v15 = vcombine.high %v15912_v0, %v15911_v43  ;;  %v4214_v49 = vcombine.high %v13082_v13, %v13068_v39  ;;  %v6436_v22 = vrot.slane %v6422_v29, %v9807_v63 }
 0x604   : > { %7909 = vrot.lane.b32.xlu0 %v6628_v50, %s8830_s14  ;;  %v7686_v51 = vpop.permute.xlu0 %7685  ;;  %v13765_v46 = vpop.permute.xlu1 %7463  ;;  %v4182_v50 = vcombine.high %v15914_v8, %v15913_v52  ;;  %v13777_v55 = vrot.slane %v4230_v48, %v9770_v32  ;;  %v4686_v13 = vcombine.high %v15907_v31, %v15906_v14  ;;  %v4718_v48 = vcombine.high %v4661_v36, %v4693_v26 }
 0x605   : > { %7687 = vrot.lane.b32.xlu1 %v6486_v33, %s8816_s25  ;;  %v8248_v20 = vsel %vm14840_vm14, %v8243_v5, %v7686_v51  ;;  %v6893_v5 = vcombine.low %v6837_v7, %v6869_v45  ;;  %v6406_v33 = vcombine.high %v13502_v1, %v13480_v60  ;;  %v6487_v39 = vcombine.low %v6436_v22, %v6468_v12  ;;  %s8833_s25 = smov 116  }
 0x606   : > { %v13788_v29 = vrot.slane %v4198_v15, %v9770_v32  ;;  %v6390_v60 = vcombine.high %v13468_v57, %v13511_v9  ;;  %v13801_v14 = vrot.slane %v4182_v50, %v9770_v32  ;;  %v4312_v9 = vcombine.high %v4260_v54, %v4292_v62 }
 0x607   : > { %vm14842_vm14 = vcmask 703488   ;;  %v6862_v26 = vcombine.high %v13728_v3, %v13714_v11  ;;  %v6894_v62 = vcombine.high %v6837_v7, %v6869_v45  ;;  %v6830_v15 = vcombine.high %v13739_v18, %v13725_v19  ;;  %v15915_v45 = vld [vmem:[#allocation186_spill] sm:$0xff]  ;;  %v15916_v7 = vld [vmem:[#allocation87_spill] sm:$0xff] }
 0x608   : > { %7921 = vrot.lane.b32.xlu0 %v4717_v2, %s8831_s17  ;;  %v7698_v16 = vpop.permute.xlu0 %7697  ;;  %v13782_v51 = vpop.permute.xlu1 %7475  ;;  %v13791_v2 = vrot.slane %v4214_v49, %v9770_v32 }
 0x609   : > { %7699 = vrot.lane.b32.xlu1 %v4311_v24, %s8817_s27  ;;  %v8251_v28 = vsel %vm14841_vm12, %v8246_v56, %v7698_v16  ;;  %v6374_v56 = vcombine.high %v13333_v27, %v13431_v44  ;;  %v4654_v24 = vcombine.high %v13702_v58, %v15910_v47  ;;  %v6358_v27 = vcombine.high %v13275_v23, %v13389_v34 }
 0x60a   : > { %v4293_v31 = vcombine.low %v13791_v2, %v13777_v55  ;;  %v13809_v44 = vrot.slane %v6406_v33, %v9770_v32  ;;  %v13815_v58 = vrot.slane %v4686_v13, %v9807_v63  ;;  %v4261_v47 = vcombine.low %v13801_v14, %v13788_v29  ;;  %v15919_v33 = vld [vmem:[#allocation330_spill] sm:$0xff] }
 0x60b   : > { %v13822_v23 = vrot.slane %v6374_v56, %v9770_v32  ;;  %v13825_v34 = vrot.slane %v6390_v60, %v9770_v32  ;;  %v4668_v54 = vrot.slane %v4654_v24, %v9807_v63  ;;  %v13834_v11 = vrot.slane %v6358_v27, %v9770_v32 }
 0x60c   : > { %7925 = vrot.lane.b32.xlu0 %v6893_v5, %s8831_s17  ;;  %v7702_v1 = vpop.permute.xlu0 %7701  ;;  %v13811_v57 = vpop.permute.xlu1 %7479  ;;  %v6488_v16 = vcombine.high %v6436_v22, %v6468_v12  ;;  %v4638_v5 = vcombine.high %v15916_v7, %v15915_v45  ;;  %v4269_v52 = vrot.slane %v4261_v47, %v9807_v63  ;;  %v13845_v8 = vrot.slane %v6862_v26, %v9807_v63  ;;  %v15918_v12 = vld [vmem:[#allocation357_spill] sm:$0xff] }
 0x60d   : > { %7703 = vrot.lane.b32.xlu1 %v6487_v39, %s8817_s27  ;;  %v8253_v43 = vsel %vm14841_vm12, %v8248_v20, %v7702_v1  ;;  %v4301_v20 = vrot.slane %v4293_v31, %v9807_v63  ;;  %v6469_v3 = vcombine.low %v13825_v34, %v13809_v44  ;;  %v6437_v19 = vcombine.low %v13834_v11, %v13822_v23  ;;  %v15920_v39 = vld [vmem:[#allocation302_spill] sm:$0xff]  ;;  %s8834_s27 = smov 118  }
 0x60e   : > { %v4719_v50 = vcombine.low %v4668_v54, %v13815_v58  ;;  %v4622_v13 = vcombine.high %v15920_v39, %v15919_v33  ;;  %v6844_v60 = vrot.slane %v6830_v15, %v9807_v63  ;;  %vm14843_vm12 = vcmask 719872  }
 0x60f   : > { %v13858_v1 = vrot.slane %v6469_v3, %v9807_v63  ;;  %v4313_v24 = vcombine.low %v4269_v52, %v4301_v20  ;;  %v4590_v31 = vcombine.high %v15903_v61, %v15904_v37  ;;  %v13866_v27 = vrot.slane %v4638_v5, %v9770_v32 }
 0x610   : > { %7937 = vrot.lane.b32.xlu0 %v4718_v48, %s8832_s22  ;;  %v7714_v36 = vpop.permute.xlu0 %7713  ;;  %v13838_v49 = vpop.permute.xlu1 %7491  ;;  %v6895_v26 = vcombine.low %v6844_v60, %v13845_v8  ;;  %v6782_v37 = vcombine.high %v13678_v38, %v13655_v21  ;;  %v4720_v38 = vcombine.high %v4668_v54, %v13815_v58  ;;  %v4294_v45 = vcombine.high %v13791_v2, %v13777_v55 }
 0x611   : > { %7715 = vrot.lane.b32.xlu1 %v4312_v9, %s8818_s24  ;;  %v8256_v0 = vsel %vm14842_vm14, %v8251_v28, %v7714_v36  ;;  %v15917_v28 = vld [vmem:[#allocation309_spill] sm:$0xff]  ;;  %v6445_v9 = vrot.slane %v6437_v19, %v9807_v63  ;;  %v13889_v3 = vrot.slane %v4590_v31, %v9770_v32  ;;  %v4314_v19 = vcombine.high %v4269_v52, %v4301_v20  ;;  %v15927_v31 = vld [vmem:[#allocation70_spill] sm:$0xff] }
 0x612   : > { %v4606_v22 = vcombine.high %v15918_v12, %v15917_v28  ;;  %v13906_v5 = vrot.slane %v6782_v37, %v9770_v32  ;;  %v4262_v55 = vcombine.high %v13801_v14, %v13788_v29  ;;  %v6896_v20 = vcombine.high %v6844_v60, %v13845_v8  ;;  %v15922_v28 = vld [vmem:[#allocation84_spill] sm:$0xff]  ;;  %v15923_v29 = vld [vmem:[#allocation343_spill] sm:$0xff] }
 0x613   : > { %v6489_v15 = vcombine.low %v6445_v9, %v13858_v1  ;;  %v15924_v14 = vld [vmem:[#allocation112_spill] sm:$0xff]  ;;  %v13941_v39 = vrot.slane %v4294_v45, %v9807_v63  ;;  %v6490_v60 = vcombine.high %v6445_v9, %v13858_v1  ;;  %v15931_v1 = vld [vmem:[#allocation105_spill] sm:$0xff] }
 0x614   : > { %7941 = vrot.lane.b32.xlu0 %v6894_v62, %s8832_s22  ;;  %v7718_v18 = vpop.permute.xlu0 %7717  ;;  %v13860_v48 = vpop.permute.xlu1 %7495  ;;  %v13874_v36 = vrot.slane %v4606_v22, %v9770_v32  ;;  %v13877_v62 = vrot.slane %v4622_v13, %v9770_v32  ;;  %v13937_v22 = vsel %vm2428_vm0, %v15924_v14, %v15923_v29  ;;  %v6470_v13 = vcombine.high %v13825_v34, %v13809_v44  ;;  %v15930_v34 = vld [vmem:[#allocation334_spill] sm:$0xff]  ;;  %v15937_v29 = vld [vmem:[#allocation63_spill] sm:$0xff] }
 0x615   : > { %7719 = vrot.lane.b32.xlu1 %v6488_v16, %s8818_s24  ;;  %v8258_v56 = vsel %vm14842_vm14, %v8253_v43, %v7718_v18  ;;  %v6814_v43 = vcombine.high %v13660_v41, %v13632_v6  ;;  %v6798_v6 = vcombine.high %v13688_v53, %v13665_v42  ;;  %vm14844_vm14 = vcmask 736256   ;;  %s8835_s24 = smov 120  }
 0x616   : > { %v4701_v16 = vcombine.low %v13877_v62, %v13866_v27  ;;  %v4669_v53 = vcombine.low %v13889_v3, %v13874_v36  ;;  %v13969_v9 = vsel %vm2428_vm0, %v15931_v1, %v15930_v34  ;;  %v15940_v34 = vld [vmem:[#allocation259_spill] sm:$0xff]  ;;  %v15941_v1 = vld [vmem:[#allocation200_spill] sm:$0xff] }
 0x617   : > { %v13896_v21 = vrot.slane %v6814_v43, %v9770_v32 }
 0x618   : > { %7953 = vrot.lane.b32.xlu0 %v4719_v50, %s8833_s25  ;;  %v7730_v47 = vpop.permute.xlu0 %7729  ;;  %v13884_v41 = vpop.permute.xlu1 %7507  ;;  %v13915_v58 = vrot.slane %v4701_v16, %v9807_v63  ;;  %v13927_v52 = vrot.slane %v4669_v53, %v9807_v63  ;;  %v15921_v50 = vld [vmem:[#allocation313_spill] sm:$0xff]  ;;  %v6438_v16 = vcombine.high %v13834_v11, %v13822_v23  ;;  %v13996_v11 = vrot.slane %v6470_v13, %v9807_v63  ;;  %v15939_v13 = vld [vmem:[#allocation232_spill] sm:$0xff] }
 0x619   : > { %7731 = vrot.lane.b32.xlu1 %v4313_v24, %s8819_s28  ;;  %v8261_v61 = vsel %vm14843_vm12, %v8256_v0, %v7730_v47  ;;  %v6766_v0 = vcombine.high %v13709_v25, %v13683_v35  ;;  %v13909_v35 = vrot.slane %v6798_v6, %v9770_v32  ;;  %v13932_v12 = vsel %vm2428_vm0, %v15922_v28, %v15921_v50  ;;  %v15926_v24 = vld [vmem:[#allocation299_spill] sm:$0xff]  ;;  %v15936_v28 = vld [vmem:[#allocation292_spill] sm:$0xff] }
 0x61a   : > { %v13954_v43 = vsel %vm2428_vm0, %v15927_v31, %v15926_v24  ;;  %v13957_v47 = vrot.slane %v4262_v55, %v9807_v63  ;;  %v4721_v44 = vcombine.low %v13927_v52, %v13915_v58  ;;  %v15935_v55 = vld [vmem:[#allocation91_spill] sm:$0xff]  ;;  %v14006_v14 = vsel %vm2428_vm0, %v15937_v29, %v15936_v28 }
 0x61b   : > { %v13920_v2 = vrot.slane %v6766_v0, %v9770_v32  ;;  %v6877_v54 = vcombine.low %v13909_v35, %v13896_v21  ;;  %v4469_v45 = vcombine.low %v13954_v43, %v13932_v12  ;;  %v4702_v28 = vcombine.high %v13877_v62, %v13866_v27  ;;  %v15949_v27 = vld [vmem:[#allocation411_spill] sm:$0xff]  ;;  %v15950_v62 = vld [vmem:[#allocation192_spill] sm:$0xff] }
 0x61c   : > { %7957 = vrot.lane.b32.xlu0 %v6895_v26, %s8833_s25  ;;  %v7734_v42 = vpop.permute.xlu0 %7733  ;;  %v13911_v25 = vpop.permute.xlu1 %7511  ;;  %v15928_v26 = vld [vmem:[#allocation327_spill] sm:$0xff]  ;;  %v4315_v50 = vcombine.low %v13957_v47, %v13941_v39 }
 0x61d   : > { %7735 = vrot.lane.b32.xlu1 %v6489_v15, %s8819_s28  ;;  %v8263_v7 = vsel %vm14843_vm12, %v8258_v56, %v7734_v42  ;;  %v6845_v8 = vcombine.low %v13920_v2, %v13906_v5  ;;  %v13974_v15 = vrot.slane %v6877_v54, %v9807_v63  ;;  %v15932_v42 = vld [vmem:[#allocation306_spill] sm:$0xff]  ;;  %vm14845_vm12 = vcmask 752640   ;;  %s8836_s28 = smov 122  }
 0x61e   : > { %v14043_v29 = vrot.slane %v4469_v45, %v9770_v32  ;;  %v14062_v45 = vsel %vm2428_vm0, %v15950_v62, %v15949_v27  ;;  %v4722_v27 = vcombine.high %v13927_v52, %v13915_v58  ;;  %v4316_v52 = vcombine.high %v13957_v47, %v13941_v39 }
 0x61f   : > { %v13993_v23 = vrot.slane %v6845_v8, %v9807_v63  ;;  %v15938_v8 = vld [vmem:[#allocation279_spill] sm:$0xff] }
 0x620   : > { %7969 = vrot.lane.b32.xlu0 %v4720_v38, %s8834_s27  ;;  %v7746_v18 = vpop.permute.xlu0 %7745  ;;  %v13947_v56 = vpop.permute.xlu1 %7523  ;;  %v15933_v38 = vld [vmem:[#allocation77_spill] sm:$0xff] }
 0x621   : > { %7747 = vrot.lane.b32.xlu1 %v4314_v19, %s8820_s29  ;;  %v8266_v33 = vsel %vm14844_vm14, %v8261_v61, %v7746_v18  ;;  %15925 = vst [vmem:[#allocation138_spill] sm:$0xff] %v13947_v56  ;;  %v15929_v61 = vld [vmem:[#allocation98_spill] sm:$0xff]  ;;  %v13982_v53 = vsel %vm2428_vm0, %v15933_v38, %v15932_v42  ;;  %v15934_v19 = vld [vmem:[#allocation320_spill] sm:$0xff]  ;;  %v15942_v42 = vld [vmem:[#allocation141_spill] sm:$0xff]  ;;  %v6898_v47 = vcombine.high %v13993_v23, %v13974_v15 }
 0x622   : > { %v13962_v37 = vsel %vm2428_vm0, %v15929_v61, %v15928_v26  ;;  %v13989_v18 = vsel %vm2428_vm0, %v15935_v55, %v15934_v19  ;;  %v4453_v24 = vcombine.low %v14006_v14, %v13982_v53  ;;  %v6452_v26 = vrot.slane %v6438_v16, %v9807_v63  ;;  %v15943_v38 = vld [vmem:[#allocation216_spill] sm:$0xff] }
 0x623   : > { %v4501_v6 = vcombine.low %v13962_v37, %v13937_v22  ;;  %v14032_v19 = vsel %vm2428_vm0, %v15943_v38, %v15942_v42  ;;  %v15945_v55 = vld [vmem:[#allocation224_spill] sm:$0xff]  ;;  %v15947_v42 = vld [vmem:[#allocation406_spill] sm:$0xff] }
 0x624   : > { %7973 = vrot.lane.b32.xlu0 %v6896_v20, %s8834_s27  ;;  %v7750_v0 = vpop.permute.xlu0 %7749  ;;  %v13998_v20 = vpop.permute.xlu1 %7527  ;;  %v15951_v38 = vld [vmem:[#allocation134_spill] sm:$0xff]  ;;  %v14079_v62 = vrot.slane %v4453_v24, %v9770_v32  ;;  %v4716_v24 = vrot.slane %v4702_v28, %v9807_v63 }
 0x625   : > { %7751 = vrot.lane.b32.xlu1 %v6490_v60, %s8820_s29  ;;  %v8268_v54 = vsel %vm14844_vm14, %v8263_v7, %v7750_v0  ;;  %v4485_v7 = vcombine.low %v13989_v18, %v13969_v9  ;;  %v14013_v60 = vsel %vm2428_vm0, %v15939_v13, %v15938_v8  ;;  %v14018_v31 = vrot.slane %v4501_v6, %v9770_v32  ;;  %v15944_v6 = vld [vmem:[#allocation194_spill] sm:$0xff]  ;;  %s8837_s29 = smov 124  }
 0x626   : > { %v14027_v0 = vsel %vm2428_vm0, %v15941_v1, %v15940_v34  ;;  %v14037_v16 = vsel %vm2428_vm0, %v15945_v55, %v15944_v6  ;;  %v6677_v8 = vcombine.low %v14032_v19, %v14013_v60  ;;  %v6491_v34 = vcombine.low %v6452_v26, %v13996_v11  ;;  %v15952_v6 = vld [vmem:[#allocation208_spill] sm:$0xff] }
 0x627   : > { %v14052_v1 = vrot.slane %v4485_v7, %v9770_v32  ;;  %v14067_v55 = vsel %vm2428_vm0, %v15952_v6, %v15951_v38  ;;  %v15953_v6 = vld [vmem:[#allocation401_spill] sm:$0xff]  ;;  %vm14846_vm14 = vcmask 769024  }
 0x628   : > { %7985 = vrot.lane.b32.xlu0 %v4721_v44, %s8835_s24  ;;  %v7762_v61 = vpop.permute.xlu0 %7761  ;;  %v6897_v44 = vcombine.low %v13993_v23, %v13974_v15  ;;  %v14047_v13 = vpop.permute.xlu1 %7539  ;;  %v14092_v56 = vrot.slane %v6677_v8, %v9770_v32 }
 0x629   : > { %7763 = vrot.lane.b32.xlu1 %v4315_v50, %s8821_s30  ;;  %v8271_v50 = vsel %vm14845_vm12, %v8266_v33, %v7762_v61  ;;  %15946 = vst [vmem:[#allocation381_spill] sm:$0xff] %v14047_v13  ;;  %v15948_v33 = vld [vmem:[#allocation184_spill] sm:$0xff]  ;;  %v4549_v38 = vcombine.low %v14052_v1, %v14018_v31 }
 0x62a   : > { %v14057_v61 = vsel %vm2428_vm0, %v15948_v33, %v15947_v42  ;;  %v6661_v42 = vcombine.low %v14067_v55, %v14037_v16 }
 0x62b   : > { %v6645_v7 = vcombine.low %v14057_v61, %v14027_v0 }
 0x62c   : > { %7989 = vrot.lane.b32.xlu0 %v6897_v44, %s8835_s24  ;;  %v4670_v44 = vcombine.high %v13889_v3, %v13874_v36  ;;  %v7766_v33 = vpop.permute.xlu0 %7765  ;;  %v15954_v36 = vld [vmem:[#allocation176_spill] sm:$0xff]  ;;  %v14094_v58 = vpop.permute.xlu1 %7543 }
 0x62d   : > { %7767 = vrot.lane.b32.xlu1 %v6491_v34, %s8821_s30  ;;  %v14086_v3 = vsel %vm2428_vm0, %v15954_v36, %v15953_v6  ;;  %v8273_v13 = vsel %vm14845_vm12, %v8268_v54, %v7766_v33  ;;  %v4517_v54 = vcombine.low %v14079_v62, %v14043_v29  ;;  %v6878_v33 = vcombine.high %v13909_v35, %v13896_v21  ;;  %s8838_s30 = smov 126  }
 0x62e   : > { %v6629_v34 = vcombine.low %v14086_v3, %v14062_v45  ;;  %v14105_v8 = vrot.slane %v6645_v7, %v9770_v32  ;;  %v14108_v6 = vrot.slane %v6661_v42, %v9770_v32  ;;  %v4684_v28 = vrot.slane %v4670_v44, %v9807_v63 }
 0x62f   : > { %v6846_v21 = vcombine.high %v13920_v2, %v13906_v5  ;;  %v4525_v15 = vrot.slane %v4517_v54, %v9807_v63  ;;  %v6892_v23 = vrot.slane %v6878_v33, %v9807_v63  ;;  %vm8280_vm12 = vcmask 785408  }
 0x630   : > { %8001 = vrot.lane.b32.xlu0 %v4722_v27, %s8836_s28  ;;  %v7778_v39 = vpop.permute.xlu0 %7777  ;;  %v4557_v27 = vrot.slane %v4549_v38, %v9807_v63  ;;  %v14119_v35 = vrot.slane %v6629_v34, %v9770_v32  ;;  %v6725_v7 = vcombine.low %v14108_v6, %v14092_v56  ;;  %v14123_v42 = vpop.permute.xlu1 %7555  ;;  %v4723_v2 = vcombine.low %v4684_v28, %v4716_v24 }
 0x631   : > { %7779 = vrot.lane.b32.xlu1 %v4316_v52, %s8822_s3  ;;  %v8276_v36 = vsel %vm14846_vm14, %v8271_v50, %v7778_v39  ;;  %v6492_v52 = vcombine.high %v6452_v26, %v13996_v11  ;;  %v6860_v38 = vrot.slane %v6846_v21, %v9807_v63 }
 0x632   : > { %v6693_v50 = vcombine.low %v14119_v35, %v14105_v8  ;;  %v6733_v34 = vrot.slane %v6725_v7, %v9807_v63  ;;  %v4581_v26 = vcombine.low %v4525_v15, %v4557_v27 }
 0x633   : > { %v6899_v39 = vcombine.low %v6860_v38, %v6892_v23 }
 0x634   : > { %8005 = vrot.lane.b32.xlu0 %v6898_v47, %s8836_s28  ;;  %v7782_v5 = vpop.permute.xlu0 %7781  ;;  %v14135_v11 = vpop.permute.xlu1 %7559  ;;  %v6701_v54 = vrot.slane %v6693_v50, %v9807_v63 }
 0x635   : > { %7783 = vrot.lane.b32.xlu1 %v6492_v52, %s8822_s3  ;;  %v8278_v44 = vsel %vm14846_vm14, %v8273_v13, %v7782_v5  ;;  %v4724_v52 = vcombine.high %v4684_v28, %v4716_v24  ;;  %v4550_v5 = vcombine.high %v14052_v1, %v14018_v31  ;;  %vm8285_vm14 = vcmask 801792   ;;  %v15955_v31 = vld [vmem:[#allocation64_spill] sm:$0xff]  ;;  %v15956_v1 = vld [vmem:[#allocation170_spill] sm:$0xff]  ;;  %s8524_s3 = sshll.u32 %s8975_s5, 5 }
 0x636   : > { %v6757_v21 = vcombine.low %v6701_v54, %v6733_v34  ;;  %v15957_v28 = vld [vmem:[#allocation218_spill] sm:$0xff]  ;;  %s14687_s5 = scalar_lea.vmem [#allocation4], %s8524_s3 }
 0x637   : > { %v14155_v24 = vrot.slane %v4550_v5, %v9807_v63 }
 0x638   : > { %8017 = vrot.lane.b32.xlu0 %v4723_v2, %s8837_s29  ;;  %v7794_v33 = vpop.permute.xlu0 %7793  ;;  %v14141_v13 = vpop.permute.xlu1 %7571 }
 0x639   : > { %7795 = vrot.lane.b32.xlu1 %v4581_v26, %s8823_s4  ;;  %v8281_v47 = vsel %vm8280_vm12, %v8276_v36, %v7794_v33  ;;  %v4582_v26 = vcombine.high %v4525_v15, %v4557_v27  ;;  %v4518_v36 = vcombine.high %v14079_v62, %v14043_v29  ;;  %v6726_v29 = vcombine.high %v14108_v6, %v14092_v56  ;;  %v15959_v62 = vld [vmem:[#allocation225_spill] sm:$0xff] }
 0x63a   : > { %v4486_v6 = vcombine.high %v13989_v18, %v13969_v9 }
 0x63b   : > { %v14175_v5 = vrot.slane %v4518_v36, %v9807_v63 }
 0x63c   : > { %8021 = vrot.lane.b32.xlu0 %v6899_v39, %s8837_s29  ;;  %v7798_v7 = vpop.permute.xlu0 %7797  ;;  %v14148_v2 = vpop.permute.xlu1 %7575  ;;  %v6900_v39 = vcombine.high %v6860_v38, %v6892_v23 }
 0x63d   : > { %7799 = vrot.lane.b32.xlu1 %v6757_v21, %s8823_s4  ;;  %v8283_v50 = vsel %vm8280_vm12, %v8278_v44, %v7798_v7  ;;  %v15958_v44 = vcombine.low %v15956_v1, %v15957_v28  ;;  %v4454_v21 = vcombine.high %v14006_v14, %v13982_v53  ;;  %v6758_v7 = vcombine.high %v6701_v54, %v6733_v34  ;;  %v15960_v14 = vld [vmem:[#allocation209_spill] sm:$0xff]  ;;  %v15961_v54 = vld [vmem:[#allocation99_spill] sm:$0xff]  ;;  %s8530_s4 = sshll.u32 (%p16106_p7), %s8757_s10, 3 }
 0x63e   : > { %v4502_v53 = vcombine.high %v13962_v37, %v13937_v22  ;;  %v6694_v34 = vcombine.high %v14119_v35, %v14105_v8  ;;  %v15966_v37 = vld [vmem:[#allocation85_spill] sm:$0xff]  ;;  %v4583_v18 = vcombine.low %v14175_v5, %v14155_v24  ;;  %v14201_v35 = vrot.slane %v6726_v29, %v9807_v63  ;;  %v15968_v1 = vld [vmem:[#allocation351_spill] sm:$0xff] }
 0x63f   : > { %v8049_v27 = vsel %vm8045_vm1, %v15958_v44, %v15955_v31  ;;  %v15967_v31 = vld [vmem:[#allocation253_spill] sm:$0xff]  ;;  %v15969_v44 = vld [vmem:[#allocation266_spill] sm:$0xff]  ;;  %v15971_v29 = vld [vmem:[#allocation247_spill] sm:$0xff] }
 0x640   : > { %8033 = vrot.lane.b32.xlu0 %v4724_v52, %s8838_s30  ;;  %v7810_v33 = vpop.permute.xlu0 %7809  ;;  %v8054_v23 = vsel %vm8050_vm2, %v8049_v27, %v15959_v62  ;;  %v14169_v38 = vpop.permute.xlu1 %7587  ;;  %v4470_v52 = vcombine.high %v13954_v43, %v13932_v12  ;;  %v15965_v43 = vld [vmem:[#allocation201_spill] sm:$0xff] }
 0x641   : > { %7811 = vrot.lane.b32.xlu1 %v4582_v26, %s8824_s18  ;;  %v8286_v15 = vsel %vm8285_vm14, %v8281_v47, %v7810_v33  ;;  %v8059_v56 = vsel %vm8055_vm3, %v8054_v23, %v15960_v14  ;;  %v15962_v47 = vld [vmem:[#allocation339_spill] sm:$0xff]  ;;  %v15963_v26 = vld [vmem:[#allocation340_spill] sm:$0xff]  ;;  %v14210_v23 = vrot.slane %v4454_v21, %v9770_v32  ;;  %v15970_v14 = vld [vmem:[#allocation177_spill] sm:$0xff] }
 0x642   : > { %v15964_v33 = vcombine.low %v15962_v47, %v15963_v26  ;;  %v8064_v36 = vsel %vm8060_vm4, %v8059_v56, %v15965_v43  ;;  %v6708_v47 = vrot.slane %v6694_v34, %v9807_v63  ;;  %v15972_v26 = vld [vmem:[#allocation241_spill] sm:$0xff]  ;;  %v14229_v43 = vrot.slane %v4486_v6, %v9770_v32 }
 0x643   : > { %v8069_v9 = vsel %vm8065_vm5, %v8064_v36, %v15967_v31  ;;  %v15974_v36 = vld [vmem:[#allocation278_spill] sm:$0xff]  ;;  %v15976_v31 = vld [vmem:[#allocation272_spill] sm:$0xff] }
 0x644   : > { %8037 = vrot.lane.b32.xlu0 %v6900_v39, %s8838_s30  ;;  %v8047_v12 = vsel %vm8045_vm1, %v15964_v33, %v15961_v54  ;;  %v7814_v22 = vpop.permute.xlu0 %7813  ;;  %v8074_v27 = vsel %vm8070_vm6, %v8069_v9, %v15969_v44  ;;  %v14207_v62 = vpop.permute.xlu1 %7591  ;;  %vm8290_vm1 = vcmask 818176   ;;  %v14220_v54 = vrot.slane %v4470_v52, %v9770_v32 }
 0x645   : > { %7815 = vrot.lane.b32.xlu1 %v6758_v7, %s8824_s18  ;;  %v8052_v39 = vsel %vm8050_vm2, %v8047_v12, %v15966_v37  ;;  %v8288_v8 = vsel %vm8285_vm14, %v8283_v50, %v7814_v22  ;;  %v14213_v7 = vrot.slane %v4502_v53, %v9770_v32  ;;  %v8079_v56 = vsel %vm8075_vm7, %v8074_v27, %v15971_v29  ;;  %v15973_v12 = vld [vmem:[#allocation234_spill] sm:$0xff]  ;;  %v15975_v37 = vld [vmem:[#allocation368_spill] sm:$0xff]  ;;  %s8376_s18 = sadd.s32 (%p16106_p7), %s8753_s9, %s8530_s4 }
 0x646   : > { %v8057_v28 = vsel %vm8055_vm3, %v8052_v39, %v15968_v1  ;;  %v8084_v21 = vsel %vm8080_vm8, %v8079_v56, %v15973_v12  ;;  %v6678_v39 = vcombine.high %v14032_v19, %v14013_v60  ;;  %v15977_v1 = vld [vmem:[#allocation362_spill] sm:$0xff]  ;;  %vm15978_vm2 = vcmask 162816   ;;  %v15979_v27 = vld [vmem:[#allocation260_spill] sm:$0xff] }
 0x647   : > { %v8062_v50 = vsel %vm8060_vm4, %v8057_v28, %v15970_v14  ;;  %v8089_v52 = vsel %vm8085_vm9, %v8084_v21, %v15975_v37  ;;  %v6759_v6 = vcombine.low %v6708_v47, %v14201_v35  ;;  %v4565_v44 = vcombine.low %v14229_v43, %v14213_v7  ;;  %v15982_v56 = vld [vmem:[#allocation390_spill] sm:$0xff]  ;;  %v15991_v37 = vld [vmem:[#allocation228_spill] sm:$0xff] }
 0x648   : > { %v8067_v33 = vsel %vm8065_vm5, %v8062_v50, %v15972_v26  ;;  %v7826_v53 = vpop.permute.xlu0 %7825  ;;  %v14242_v28 = vpop.permute.xlu1 %7603  ;;  %vm15981_vm3 = vcmask 179200   ;;  %v4584_v60 = vcombine.high %v14175_v5, %v14155_v24  ;;  %v6646_v19 = vcombine.high %v14057_v61, %v14027_v0  ;;  %vm15986_vm5 = vmmov %vm15978_vm2  ;;  %v15987_v5 = vld [vmem:[#allocation101_spill] sm:$0xff] }
 0x649   : > { %7827 = vrot.lane.b32.xlu1 %v4583_v18, %s8825_s19  ;;  %v8072_v22 = vsel %vm8070_vm6, %v8067_v33, %v15974_v36  ;;  %v8291_v34 = vsel %vm8290_vm1, %v8286_v15, %v7826_v53  ;;  %v8094_v18 = vsel %vm15978_vm2, %v8089_v52, %v15977_v1  ;;  %v15980_v15 = vld [vmem:[#allocation385_spill] sm:$0xff]  ;;  %v6662_v29 = vcombine.high %v14067_v55, %v14037_v16  ;;  %v15983_v33 = vld [vmem:[#allocation108_spill] sm:$0xff]  ;;  %v15989_v55 = vld [vmem:[#allocation142_spill] sm:$0xff] }
 0x64a   : > { %v8077_v9 = vsel %vm8075_vm7, %v8072_v22, %v15976_v31  ;;  %v8099_v50 = vsel %vm15981_vm3, %v8094_v18, %v15980_v15  ;;  %vm15984_vm4 = vcmask 195584   ;;  %v6630_v53 = vcombine.high %v14086_v3, %v14062_v45  ;;  %v15985_v36 = vld [vmem:[#allocation156_spill] sm:$0xff]  ;;  %vm15990_vm7 = vmmov %vm15981_vm3 }
 0x64b   : > { %v8082_v14 = vsel %vm8080_vm8, %v8077_v9, %v15979_v27  ;;  %v8104_v12 = vsel %vm15984_vm4, %v8099_v50, %v15983_v33  ;;  %vm15988_vm6 = vcmask 211968   ;;  %v14270_v61 = vrot.slane %v6678_v39, %v9770_v32  ;;  %v15993_v9 = vld [vmem:[#allocation80_spill] sm:$0xff]  ;;  %vm15994_vm2 = vmmov %vm15984_vm4  ;;  %v15997_v27 = vld [vmem:[#allocation66_spill] sm:$0xff] }
 0x64c   : > { %v8087_v26 = vsel %vm8085_vm9, %v8082_v14, %v15982_v56  ;;  %v7830_v21 = vpop.permute.xlu0 %7829  ;;  %v8109_v0 = vsel %vm15988_vm6, %v8104_v12, %v15987_v5  ;;  %vm15992_vm8 = vcmask 228352   ;;  %v14276_v31 = vpop.permute.xlu1 %7607  ;;  %vm8295_vm9 = vcmask 834560   ;;  %v15995_v39 = vld [vmem:[#allocation212_spill] sm:$0xff]  ;;  %vm15998_vm4 = vmmov %vm15988_vm6 }
 0x64d   : > { %7831 = vrot.lane.b32.xlu1 %v6759_v6, %s8825_s19  ;;  %v8092_v24 = vsel %vm15986_vm5, %v8087_v26, %v15985_v36  ;;  %v8293_v16 = vsel %vm8290_vm1, %v8288_v8, %v7830_v21  ;;  %v8114_v52 = vsel %vm15992_vm8, %v8109_v0, %v15991_v37  ;;  %v4533_v45 = vcombine.low %v14210_v23, %v14220_v54  ;;  %v15999_v15 = vld [vmem:[#allocation188_spill] sm:$0xff]  ;;  %vm16002_vm6 = vmmov %vm15992_vm8  ;;  %s8531_s19 = sshll.u32 (%p16106_p7), %s8376_s18, 3 }
 0x64e   : > { %v8097_v22 = vsel %vm15990_vm7, %v8092_v24, %v15989_v55  ;;  %v14281_v3 = vrot.slane %v4565_v44, %v9807_v63  ;;  %vm15996_vm3 = vcmask 244736   ;;  %v14288_v18 = vrot.slane %v6646_v19, %v9770_v32  ;;  %v16001_v26 = vld [vmem:[#allocation316_spill] sm:$0xff]  ;;  %v16003_v19 = vld [vmem:[#allocation29_spill] sm:$0xff] }
 0x64f   : > { %v8102_v8 = vsel %vm15994_vm2, %v8097_v22, %v15993_v9  ;;  %v8119_v1 = vsel %vm15996_vm3, %v8114_v52, %v15995_v39  ;;  %v14291_v6 = vrot.slane %v6662_v29, %v9770_v32  ;;  %vm16000_vm5 = vcmask 261120   ;;  %v16005_v36 = vld [vmem:[#allocation196_spill] sm:$0xff]  ;;  %vm16006_vm8 = vmmov %vm15996_vm3  ;;  %v16017_v39 = vld [vmem:[#allocation23_spill] sm:$0xff] }
 0x650   : > { %v8107_v14 = vsel %vm15998_vm4, %v8102_v8, %v15997_v27  ;;  %v8124_v50 = vsel %vm16000_vm5, %v8119_v1, %v15999_v15  ;;  %v7842_v44 = vpop.permute.xlu0 %7841  ;;  %v14299_v56 = vrot.slane %v6630_v53, %v9770_v32  ;;  %vm16004_vm7 = vcmask 277504   ;;  %v14312_v5 = vpop.permute.xlu1 %7619  ;;  %v16008_v55 = vld [vmem:[#allocation220_spill] sm:$0xff]  ;;  %vm16009_vm3 = vmmov %vm16000_vm5  ;;  %v16019_v15 = vld [vmem:[#allocation42_spill] sm:$0xff] }
 0x651   : > { %7843 = vrot.lane.b32.xlu1 %v4584_v60, %s8826_s21  ;;  %v8112_v33 = vsel %vm16002_vm6, %v8107_v14, %v16001_v26  ;;  %v8129_v12 = vsel %vm16004_vm7, %v8124_v50, %v16003_v19  ;;  %v8296_v29 = vsel %vm8295_vm9, %v8291_v34, %v7842_v44  ;;  %v6741_v21 = vcombine.low %v14291_v6, %v14270_v61  ;;  %v16011_v52 = vld [vmem:[#allocation172_spill] sm:$0xff]  ;;  %vm16012_vm5 = vmmov %vm16004_vm7  ;;  %v16023_v19 = vld [vmem:[#allocation275_spill] sm:$0xff] }
 0x652   : > { %v8117_v24 = vsel %vm16006_vm8, %v8112_v33, %v16005_v36  ;;  %vm16007_vm2 = vcmask 293888   ;;  %v6760_v53 = vcombine.high %v6708_v47, %v14201_v35  ;;  %v4541_v0 = vrot.slane %v4533_v45, %v9807_v63  ;;  %v16013_v8 = vld [vmem:[#allocation48_spill] sm:$0xff]  ;;  %v16015_v47 = vld [vmem:[#allocation54_spill] sm:$0xff] }
 0x653   : > { %v8134_v60 = vsel %vm16007_vm2, %v8129_v12, %v13096_v59  ;;  %v8122_v22 = vsel %vm16009_vm3, %v8117_v24, %v16008_v55  ;;  %vm16010_vm4 = vcmask 310272   ;;  %v6709_v37 = vcombine.low %v14299_v56, %v14288_v18  ;;  %vm16016_vm7 = vmmov %vm16007_vm2  ;;  %v16021_v44 = vld [vmem:[#allocation36_spill] sm:$0xff]  ;;  %v16025_v36 = vld [vmem:[#allocation10_spill] sm:$0xff] }
 0x654   : > { %v8139_v34 = vsel %vm16010_vm4, %v8134_v60, %v13174_v4  ;;  %v8127_v9 = vsel %vm16012_vm5, %v8122_v22, %v16011_v52  ;;  %vm16014_vm6 = vcmask 326656   ;;  %v7846_v35 = vpop.permute.xlu0 %7845  ;;  %vm16018_vm8 = vcmask 343040   ;;  %vm16020_vm2 = vmmov %vm16010_vm4  ;;  %v14340_v33 = vpop.permute.xlu1 %7623  ;;  %v16027_v60 = vld [vmem:[#allocation250_spill] sm:$0xff]  ;;  %v16030_v22 = vld [vmem:[#allocation263_spill] sm:$0xff] }
 0x655   : > { %v8144_v59 = vsel %vm16014_vm6, %v8139_v34, %v16013_v8  ;;  %7847 = vrot.lane.b32.xlu1 %v6760_v53, %s8826_s21  ;;  %v8132_v45 = vsel %vm16016_vm7, %v8127_v9, %v16015_v47  ;;  %v4585_v4 = vcombine.low %v4541_v0, %v14281_v3  ;;  %v8298_v27 = vsel %vm8295_vm9, %v8293_v16, %v7846_v35  ;;  %vm16024_vm5 = vmmov %vm16014_vm6  ;;  %v16033_v8 = vld [vmem:[#allocation237_spill] sm:$0xff]  ;;  %v16036_v47 = vld [vmem:[#allocation291_spill] sm:$0xff] }
 0x656   : > { %v8149_v1 = vsel %vm16018_vm8, %v8144_v59, %v16017_v39  ;;  %v14334_v14 = vrot.slane %v6741_v21, %v9807_v63  ;;  %v8137_v50 = vsel %vm16020_vm2, %v8132_v45, %v16019_v15  ;;  %vm16022_vm3 = vcmask 359424   ;;  %vm16028_vm7 = vmmov %vm16018_vm8  ;;  %v16037_v45 = vld [vmem:[#allocation62_spill] sm:$0xff]  ;;  %v16042_v15 = vld [vmem:[#allocation69_spill] sm:$0xff] }
 0x657   : > { %v8154_v26 = vsel %vm16022_vm3, %v8149_v1, %v16021_v44  ;;  %vm8300_vm4 = vcmask 850944   ;;  %v8142_v12 = vsel %vm16024_vm5, %v8137_v50, %v16023_v19  ;;  %vm16026_vm6 = vcmask 375808   ;;  %vm16031_vm2 = vmmov %vm16022_vm3  ;;  %v16038_v1 = vld [vmem:[#allocation394_spill] sm:$0xff]  ;;  %v16044_v44 = vld [vmem:[#allocation76_spill] sm:$0xff] }
 0x658   : > { %v8159_v24 = vsel %vm16026_vm6, %v8154_v26, %v16025_v36  ;;  %v6717_v16 = vrot.slane %v6709_v37, %v9807_v63  ;;  %v8147_v21 = vsel %vm16028_vm7, %v8142_v12, %v16027_v60  ;;  %vm16029_vm8 = vcmask 392192   ;;  %v7858_v55 = vpop.permute.xlu0 %7857  ;;  %vm16034_vm5 = vmmov %vm16026_vm6  ;;  %v14361_v35 = vpop.permute.xlu1 %7635  ;;  %v16045_v19 = vld [vmem:[#allocation166_spill] sm:$0xff] }
 0x659   : > { %v8164_v53 = vsel %vm16029_vm8, %v8159_v24, %v13571_v10  ;;  %7859 = vrot.lane.b32.xlu1 %v4585_v4, %s8827_s20  ;;  %v8152_v34 = vsel %vm16031_vm2, %v8147_v21, %v16030_v22  ;;  %vm16032_vm3 = vcmask 408576   ;;  %v8301_v9 = vsel %vm8300_vm4, %v8296_v29, %v7858_v55  ;;  %vm16039_vm7 = vmmov %vm16029_vm8  ;;  %v16041_v4 = vld [vmem:[#allocation298_spill] sm:$0xff] }
 0x65a   : > { %v8169_v52 = vsel %vm16032_vm3, %v8164_v53, %v13646_v40  ;;  %v8157_v37 = vsel %vm16034_vm5, %v8152_v34, %v16033_v8  ;;  %vm16035_vm6 = vcmask 424960   ;;  %v6761_v10 = vcombine.low %v6717_v16, %v14334_v14  ;;  %vm16046_vm2 = vmmov %vm16032_vm3  ;;  %v16048_v60 = vld [vmem:[#allocation370_spill] sm:$0xff]  ;;  %v16055_v8 = vld [vmem:[#allocation83_spill] sm:$0xff] }
 0x65b   : > { %v8174_v59 = vsel %vm16035_vm6, %v8169_v52, %v13730_v30  ;;  %v14367_v39 = vsel %vm2428_vm0, %v16037_v45, %v16036_v47  ;;  %v8162_v40 = vsel %vm16039_vm7, %v8157_v37, %v16038_v1  ;;  %vm16040_vm8 = vcmask 441344   ;;  %v16043_v30 = vld [vmem:[#allocation305_spill] sm:$0xff]  ;;  %vm16049_vm5 = vmmov %vm16035_vm6  ;;  %v16056_v37 = vld [vmem:[#allocation342_spill] sm:$0xff] }
 0x65c   : > { %v8179_v29 = vsel %vm16040_vm8, %v8174_v59, %v13765_v46  ;;  %v14376_v50 = vsel %vm2428_vm0, %v16042_v15, %v16041_v4  ;;  %v14381_v26 = vsel %vm2428_vm0, %v16044_v44, %v16043_v30  ;;  %v8167_v12 = vsel %vm16046_vm2, %v8162_v40, %v16045_v19  ;;  %v7862_v24 = vpop.permute.xlu0 %7861  ;;  %vm16051_vm7 = vmmov %vm16040_vm8  ;;  %v7640_v34 = vpop.permute.xlu1 %7639  ;;  %v16060_v45 = vld [vmem:[#allocation138_spill] sm:$0xff]  ;;  %v16062_v15 = vld [vmem:[#allocation97_spill] sm:$0xff] }
 0x65d   : > { %vm16047_vm3 = vcmask 457728   ;;  %7863 = vrot.lane.b32.xlu1 %v6761_v10, %s8827_s20  ;;  %v4566_v46 = vcombine.high %v14229_v43, %v14213_v7  ;;  %v8172_v21 = vsel %vm16049_vm5, %v8167_v12, %v16048_v60  ;;  %vm16050_vm6 = vcmask 474112   ;;  %v16061_v4 = vld [vmem:[#allocation326_spill] sm:$0xff]  ;;  %v16066_v44 = vld [vmem:[#allocation104_spill] sm:$0xff] }
 0x65e   : > { %v8184_v36 = vsel %vm16047_vm3, %v8179_v29, %v13811_v57  ;;  %v8303_v55 = vsel %vm8300_vm4, %v8298_v27, %v7862_v24  ;;  %v8177_v22 = vsel %vm16051_vm7, %v8172_v21, %v13752_v17  ;;  %vm16052_vm8 = vcmask 490496   ;;  %v16054_v17 = vld [vmem:[#allocation312_spill] sm:$0xff]  ;;  %v16069_v21 = vld [vmem:[#allocation319_spill] sm:$0xff] }
 0x65f   : > { %v8189_v53 = vsel %vm16050_vm6, %v8184_v36, %v13860_v48  ;;  %v4586_v52 = vcombine.high %v4541_v0, %v14281_v3  ;;  %vm8305_vm2 = vcmask 867328   ;;  %v4725_v7 = vcombine.low %v14367_v39, %v14381_v26  ;;  %v16057_v3 = vld [vmem:[#allocation111_spill] sm:$0xff] }
 0x660   : > { %v8194_v57 = vsel %vm16052_vm8, %v8189_v53, %v13911_v25  ;;  %v4534_v43 = vcombine.high %v14210_v23, %v14220_v54  ;;  %v8182_v48 = vsel %vm16047_vm3, %v8177_v22, %v13782_v51  ;;  %vm16053_vm5 = vcmask 506880   ;;  %v16070_v53 = vld [vmem:[#allocation90_spill] sm:$0xff]  ;;  %v16071_v22 = vld [vmem:[#allocation321_spill] sm:$0xff] }
 0x661   : > { %v8199_v27 = vsel %vm16053_vm5, %v8194_v57, %v13998_v20  ;;  %v14411_v25 = vsel %vm2428_vm0, %v16055_v8, %v16054_v17  ;;  %v14416_v0 = vsel %vm2428_vm0, %v16057_v3, %v16056_v37  ;;  %v8187_v59 = vsel %vm16050_vm6, %v8182_v48, %v13838_v49  ;;  %7875 = vrot.lane.b32.xlu1 %v4586_v52, %s8828_s2  ;;  %v7874_v51 = vpop.permute.xlu0 %7873  ;;  %v16075_v17 = vld [vmem:[#allocation120_spill] sm:$0xff]  ;;  %v16076_v8 = vld [vmem:[#allocation199_spill] sm:$0xff] }
 0x662   : > { %vm16058_vm7 = vcmask 523264   ;;  %v14424_v20 = vrot.slane %v4566_v46, %v9807_v63  ;;  %v8192_v54 = vsel %vm16052_vm8, %v8187_v59, %v13884_v41  ;;  %vm16059_vm3 = vcmask 539648   ;;  %v16077_v37 = vld [vmem:[#allocation27_spill] sm:$0xff] }
 0x663   : > { %v8204_v23 = vsel %vm16058_vm7, %v8199_v27, %v14094_v58  ;;  %v14431_v47 = vsel %vm8305_vm2, %v8301_v9, %v7874_v51  ;;  %v6742_v49 = vcombine.high %v14291_v6, %v14270_v61  ;;  %v8197_v58 = vsel %vm16053_vm5, %v8192_v54, %v16060_v45  ;;  %v7652_v40 = vpop.permute.xlu1 %7651  ;;  %v16063_v9 = vld [vmem:[#allocation381_spill] sm:$0xff]  ;;  %vm16064_vm6 = vmmov %vm16058_vm7  ;;  %v16078_v3 = vld [vmem:[#allocation215_spill] sm:$0xff] }
 0x664   : > { %v8209_v10 = vsel %vm16059_vm3, %v8204_v23, %v14135_v11  ;;  %v6762_v29 = vcombine.high %v6717_v16, %v14334_v14  ;;  %v4548_v41 = vrot.slane %v4534_v43, %v9807_v63  ;;  %v14444_v11 = vsel %vm2428_vm0, %v16062_v15, %v16061_v4  ;;  %v16065_v6 = vld [vmem:[#allocation333_spill] sm:$0xff]  ;;  %vm16067_vm7 = vmmov %vm16059_vm3  ;;  %v16079_v23 = vld [vmem:[#allocation235_spill] sm:$0xff] }
 0x665   : > { %v8214_v1 = vsel %vm8210_vm11, %v8209_v10, %v14148_v2  ;;  %v8202_v30 = vsel %vm16064_vm6, %v8197_v58, %v16063_v9  ;;  %v14453_v2 = vsel %vm2428_vm0, %v16066_v44, %v16065_v6  ;;  %v6710_v14 = vcombine.high %v14299_v56, %v14288_v18  ;;  %v7878_v12 = vpop.permute.xlu0 %7877  ;;  %v16080_v51 = vld [vmem:[#allocation223_spill] sm:$0xff]  ;;  %v16084_v9 = vld [vmem:[#allocation32_spill] sm:$0xff] }
 0x666   : > { %v8219_v61 = vsel %vm8215_vm10, %v8214_v1, %v14207_v62  ;;  %v8207_v16 = vsel %vm16067_vm7, %v8202_v30, %v14123_v42  ;;  %vm16068_vm8 = vcmask 588800   ;;  %7879 = vrot.lane.b32.xlu1 %v6762_v29, %s8828_s2  ;;  %v4773_v62 = vcombine.low %v14444_v11, %v14416_v0  ;;  %v16082_v29 = vld [vmem:[#allocation409_spill] sm:$0xff]  ;;  %v16083_v4 = vld [vmem:[#allocation183_spill] sm:$0xff]  ;;  %s8378_s2 = scalar_lea.vmem (%p16106_p7), %s14763_s1, %s8531_s19 }
 0x667   : > { %v8224_v19 = vsel %vm16068_vm8, %v8219_v61, %v14276_v31  ;;  %v8212_v36 = vsel %vm8210_vm11, %v8207_v16, %v14141_v13  ;;  %v14469_v18 = vsel %vm8305_vm2, %v8303_v55, %v7878_v12  ;;  %v6756_v42 = vrot.slane %v6742_v49, %v9807_v63  ;;  %v7656_v46 = vpop.permute.xlu1 %7655  ;;  %vm16073_vm11 = vmmov %vm16068_vm8  ;;  %v16085_v30 = vld [vmem:[#allocation191_spill] sm:$0xff] }
 0x668   : > { %v8229_v24 = vsel %vm8225_vm13, %v8224_v19, %v14340_v33  ;;  %v8217_v31 = vsel %vm8215_vm10, %v8212_v36, %v14169_v38  ;;  %v4587_v60 = vcombine.low %v4548_v41, %v14424_v20  ;;  %v14479_v13 = vsel %vm2428_vm0, %v16070_v53, %v16069_v21  ;;  %v16072_v33 = vld [vmem:[#allocation231_spill] sm:$0xff] }
 0x669   : > { %v8234_v56 = vsel %vm8230_vm15, %v8229_v24, %v7640_v34  ;;  %v14484_v55 = vsel %vm2428_vm0, %v16072_v33, %v16071_v22  ;;  %v8222_v57 = vsel %vm16073_vm11, %v8217_v31, %v14242_v28  ;;  %vm16074_vm3 = vcmask 637952   ;;  %v16087_v6 = vld [vmem:[#allocation207_spill] sm:$0xff]  ;;  %v16089_v24 = vld [vmem:[#allocation402_spill] sm:$0xff] }
 0x66a   : > { %v8239_v38 = vsel %vm16074_vm3, %v8234_v56, %v7656_v46  ;;  %v4741_v34 = vcombine.low %v14376_v50, %v14411_v25  ;;  %v4757_v52 = vcombine.low %v14479_v13, %v14453_v2  ;;  %v6724_v43 = vrot.slane %v6710_v14, %v9807_v63  ;;  %7891 = vrot.lane.b32.xlu1 %v4587_v60, %s8829_s6  ;;  %v14497_v27 = vpop.permute.xlu0 %7889  ;;  %vm16081_vm10 = vmmov %vm16074_vm3  ;;  %v16090_v31 = vld [vmem:[#allocation175_spill] sm:$0xff] }
 0x66b   : > { %v8227_v48 = vsel %vm8225_vm13, %v8222_v57, %v14312_v5  ;;  %v14502_v28 = vsel %vm2428_vm0, %v16076_v8, %v16075_v17  ;;  %v14507_v59 = vsel %vm2428_vm0, %v16078_v3, %v16077_v37  ;;  %v14512_v54 = vsel %vm2428_vm0, %v16080_v51, %v16079_v23  ;;  %v7668_v58 = vpop.permute.xlu1 %7667 }
 0x66c   : > { %v8232_v5 = vsel %vm8230_vm15, %v8227_v48, %v14361_v35  ;;  %v4781_v10 = vrot.slane %v4773_v62, %v9770_v32  ;;  %v6949_v49 = vcombine.low %v14507_v59, %v14484_v55  ;;  %v6763_v1 = vcombine.low %v6724_v43, %v6756_v42  ;;  %v16086_v35 = vld [vmem:[#allocation178_spill] sm:$0xff] }
 0x66d   : > { %v8237_v45 = vsel %vm16081_vm10, %v8232_v5, %v7652_v40  ;;  %v14523_v15 = vsel %vm2428_vm0, %v16083_v4, %v16082_v29  ;;  %v14528_v61 = vsel %vm2428_vm0, %v16085_v30, %v16084_v9  ;;  %v14533_v44 = vsel %vm2428_vm0, %v16087_v6, %v16086_v35 }
 0x66e   : > { %vm16088_vm13 = vcmask 654336   ;;  %v4749_v40 = vrot.slane %v4741_v34, %v9770_v32  ;;  %v4765_v16 = vrot.slane %v4757_v52, %v9770_v32  ;;  %v6917_v19 = vcombine.low %v14523_v15, %v14502_v28  ;;  %7895 = vrot.lane.b32.xlu1 %v6763_v1, %s8829_s6  ;;  %v14543_v62 = vpop.permute.xlu0 %7893 }
 0x66f   : > { %v8242_v14 = vsel %vm16088_vm13, %v8237_v45, %v7668_v58  ;;  %v6933_v12 = vcombine.low %v14533_v44, %v14512_v54  ;;  %v4733_v36 = vrot.slane %v4725_v7, %v9770_v32  ;;  %v14552_v56 = vsel %vm2428_vm0, %v16090_v31, %v16089_v24  ;;  %v7672_v53 = vpop.permute.xlu1 %7671  ;;  %vm16091_vm15 = vmmov %vm16088_vm13 }
 0x670   : > { %v4821_v46 = vcombine.low %v4765_v16, %v4781_v10  ;;  %v6901_v60 = vcombine.low %v14552_v56, %v14528_v61  ;;  %v6957_v21 = vrot.slane %v6949_v49, %v9770_v32  ;;  %v4588_v22 = vcombine.high %v4548_v41, %v14424_v20 }
 0x671   : > { %v8244_v33 = vsel %vm16091_vm15, %v8239_v38, %v7672_v53  ;;  %v4789_v57 = vcombine.low %v4733_v36, %v4749_v40  ;;  %v6925_v34 = vrot.slane %v6917_v19, %v9770_v32  ;;  %v6941_v7 = vrot.slane %v6933_v12, %v9770_v32 }
 0x672   : > { %7907 = vrot.lane.b32.xlu1 %v4588_v22, %s8830_s14  ;;  %v14562_v52 = vpop.permute.xlu0 %7905  ;;  %v4829_v48 = vrot.slane %v4821_v46, %v9807_v63  ;;  %v6909_v17 = vrot.slane %v6901_v60, %v9770_v32  ;;  %v6764_v3 = vcombine.high %v6724_v43, %v6756_v42  ;;  %vm16092_vm0 = vcmask 670720  }
 0x673   : > { %v6997_v8 = vcombine.low %v6941_v7, %v6957_v21  ;;  %v7684_v37 = vpop.permute.xlu1 %7683  ;;  %v4797_v41 = vrot.slane %v4789_v57, %v9807_v63  ;;  %vm16093_vm5 = vmmov %vm16092_vm0  ;;  %vm16094_vm6 = vcmask 687104   ;;  %v4822_v9 = vcombine.high %v4765_v16, %v4781_v10 }
 0x674   : > { %v8247_v20 = vsel %vm16092_vm0, %v8242_v14, %v7684_v37  ;;  %v6965_v38 = vcombine.low %v6909_v17, %v6925_v34  ;;  %vm16095_vm7 = vmmov %vm16094_vm6  ;;  %v4790_v14 = vcombine.high %v4733_v36, %v4749_v40  ;;  %v6998_v24 = vcombine.high %v6941_v7, %v6957_v21 }
 0x675   : > { %v7005_v51 = vrot.slane %v6997_v8, %v9807_v63  ;;  %v4853_v49 = vcombine.low %v4797_v41, %v4829_v48  ;;  %v4854_v35 = vcombine.high %v4797_v41, %v4829_v48  ;;  %v4836_v12 = vrot.slane %v4822_v9, %v9807_v63 }
 0x676   : > { %7911 = vrot.lane.b32.xlu1 %v6764_v3, %s8830_s14  ;;  %v14569_v23 = vpop.permute.xlu0 %7909  ;;  %v6973_v58 = vrot.slane %v6965_v38, %v9807_v63  ;;  %vm16096_vm8 = vcmask 703488   ;;  %v4804_v53 = vrot.slane %v4790_v14, %v9807_v63  ;;  %v6966_v22 = vcombine.high %v6909_v17, %v6925_v34 }
 0x677   : > { %v7688_v5 = vpop.permute.xlu1 %7687  ;;  %v4774_v40 = vcombine.high %v14444_v11, %v14416_v0  ;;  %v7012_v16 = vrot.slane %v6998_v24, %v9807_v63  ;;  %vm16097_vm11 = vmmov %vm16096_vm8  ;;  %v4742_v57 = vcombine.high %v14376_v50, %v14411_v25  ;;  %v4758_v7 = vcombine.high %v14479_v13, %v14453_v2 }
 0x678   : > { %v8249_v45 = vsel %vm16093_vm5, %v8244_v33, %v7688_v5  ;;  %v7029_v1 = vcombine.low %v6973_v58, %v7005_v51  ;;  %v7030_v46 = vcombine.high %v6973_v58, %v7005_v51  ;;  %v4855_v33 = vcombine.low %v4804_v53, %v4836_v12 }
 0x679   : > { %v6980_v34 = vrot.slane %v6966_v22, %v9807_v63  ;;  %v4726_v0 = vcombine.high %v14367_v39, %v14381_v26  ;;  %v4788_v11 = vrot.slane %v4774_v40, %v9770_v32  ;;  %v6950_v17 = vcombine.high %v14507_v59, %v14484_v55 }
 0x67a   : > { %7923 = vrot.lane.b32.xlu1 %v4853_v49, %s8831_s17  ;;  %v14575_v42 = vpop.permute.xlu0 %7921  ;;  %vm16098_vm3 = vcmask 719872   ;;  %v4756_v25 = vrot.slane %v4742_v57, %v9770_v32  ;;  %v4772_v2 = vrot.slane %v4758_v7, %v9770_v32  ;;  %v6918_v13 = vcombine.high %v14523_v15, %v14502_v28 }
 0x67b   : > { %v7700_v43 = vpop.permute.xlu1 %7699  ;;  %v7031_v37 = vcombine.low %v6980_v34, %v7012_v16  ;;  %v6934_v3 = vcombine.high %v14533_v44, %v14512_v54  ;;  %v4740_v26 = vrot.slane %v4726_v0, %v9770_v32  ;;  %v6902_v59 = vcombine.high %v14552_v56, %v14528_v61  ;;  %vm16099_vm10 = vmmov %vm16098_vm3 }
 0x67c   : > { %v8252_v29 = vsel %vm16094_vm6, %v8247_v20, %v7700_v43  ;;  %v4837_v55 = vcombine.low %v4772_v2, %v4788_v11  ;;  %v6964_v20 = vrot.slane %v6950_v17, %v9770_v32  ;;  %v4856_v38 = vcombine.high %v4804_v53, %v4836_v12 }
 0x67d   : > { %v4805_v28 = vcombine.low %v4740_v26, %v4756_v25  ;;  %v6932_v15 = vrot.slane %v6918_v13, %v9770_v32  ;;  %v6948_v54 = vrot.slane %v6934_v3, %v9770_v32  ;;  %v6916_v49 = vrot.slane %v6902_v59, %v9770_v32 }
 0x67e   : > { %7927 = vrot.lane.b32.xlu1 %v7029_v1, %s8831_s17  ;;  %v14579_v4 = vpop.permute.xlu0 %7925  ;;  %v4845_v5 = vrot.slane %v4837_v55, %v9807_v63  ;;  %vm16100_vm13 = vcmask 736256   ;;  %vm16102_vm0 = vcmask 752640   ;;  %vm16104_vm6 = vcmask 769024  }
 0x67f   : > { %v7704_v30 = vpop.permute.xlu1 %7703  ;;  %v7013_v61 = vcombine.low %v6948_v54, %v6964_v20  ;;  %v4813_v43 = vrot.slane %v4805_v28, %v9807_v63  ;;  %v6981_v1 = vcombine.low %v6916_v49, %v6932_v15  ;;  %vm16101_vm15 = vmmov %vm16100_vm13  ;;  %v6982_v17 = vcombine.high %v6916_v49, %v6932_v15 }
 0x680   : > { %v8254_v6 = vsel %vm16095_vm7, %v8249_v45, %v7704_v30  ;;  %v7032_v45 = vcombine.high %v6980_v34, %v7012_v16  ;;  %vm16103_vm5 = vmmov %vm16102_vm0  ;;  %v4806_v16 = vcombine.high %v4740_v26, %v4756_v25  ;;  %vm8310_vm7 = vcmask 883712  }
 0x681   : > { %v7021_v9 = vrot.slane %v7013_v61, %v9807_v63  ;;  %v6989_v32 = vrot.slane %v6981_v1, %v9807_v63  ;;  %v4858_v22 = vcombine.high %v4813_v43, %v4845_v5  ;;  %v8311_v13 = vsel %vm8310_vm7, %v14431_v47, %v14497_v27 }
 0x682   : > { %7939 = vrot.lane.b32.xlu1 %v4854_v35, %s8832_s22  ;;  %v14583_v19 = vpop.permute.xlu0 %7937  ;;  %v4857_v35 = vcombine.low %v4813_v43, %v4845_v5  ;;  %v4820_v0 = vrot.slane %v4806_v16, %v9807_v63  ;;  %v8313_v27 = vsel %vm8310_vm7, %v14469_v18, %v14543_v62 }
 0x683   : > { %v7716_v31 = vpop.permute.xlu1 %7715  ;;  %v7033_v24 = vcombine.low %v6989_v32, %v7021_v9  ;;  %v7034_v7 = vcombine.high %v6989_v32, %v7021_v9 }
 0x684   : > { %v8257_v60 = vsel %vm16096_vm8, %v8252_v29, %v7716_v31  ;;  %vm8315_vm8 = vcmask 900096  }
 0x685   : > { %v8316_v26 = vsel %vm8315_vm8, %v8311_v13, %v14562_v52 }
 0x686   : > { %7943 = vrot.lane.b32.xlu1 %v7030_v46, %s8832_s22  ;;  %v14589_v10 = vpop.permute.xlu0 %7941 }
 0x687   : > { %v7720_v36 = vpop.permute.xlu1 %7719 }
 0x688   : > { %v8259_v21 = vsel %vm16097_vm11, %v8254_v6, %v7720_v36  ;;  %vm8320_vm11 = vcmask 916480  }
 0x689   : > { %v8321_v55 = vsel %vm8320_vm11, %v8316_v26, %v14575_v42 }
 0x68a   : > { %7955 = vrot.lane.b32.xlu1 %v4855_v33, %s8833_s25  ;;  %v14601_v48 = vpop.permute.xlu0 %7953 }
 0x68b   : > { %v7732_v8 = vpop.permute.xlu1 %7731 }
 0x68c   : > { %v8262_v50 = vsel %vm16098_vm3, %v8257_v60, %v7732_v8  ;;  %v4838_v60 = vcombine.high %v4772_v2, %v4788_v11  ;;  %vm16105_vm3 = vmmov %vm16104_vm6  ;;  %v6996_v2 = vrot.slane %v6982_v17, %v9807_v63 }
 0x68e   : > { %7959 = vrot.lane.b32.xlu1 %v7031_v37, %s8833_s25  ;;  %v14616_v39 = vpop.permute.xlu0 %7957  ;;  %v4852_v33 = vrot.slane %v4838_v60, %v9807_v63 }
 0x68f   : > { %v7736_v41 = vpop.permute.xlu1 %7735 }
 0x690   : > { %v8264_v51 = vsel %vm16099_vm10, %v8259_v21, %v7736_v41  ;;  %v7014_v21 = vcombine.high %v6948_v54, %v6964_v20  ;;  %vm8325_vm10 = vcmask 932864   ;;  %v8318_v41 = vsel %vm8315_vm8, %v8313_v27, %v14569_v23 }
 0x692   : > { %7971 = vrot.lane.b32.xlu1 %v4856_v38, %s8834_s27  ;;  %v14626_v44 = vpop.permute.xlu0 %7969  ;;  %v7028_v8 = vrot.slane %v7014_v21, %v9807_v63  ;;  %v8326_v63 = vsel %vm8325_vm10, %v8321_v55, %v14583_v19  ;;  %v8323_v38 = vsel %vm8320_vm11, %v8318_v41, %v14579_v4 }
 0x693   : > { %v7748_v56 = vpop.permute.xlu1 %7747 }
 0x694   : > { %v8267_v58 = vsel %vm16100_vm13, %v8262_v50, %v7748_v56  ;;  %v4859_v50 = vcombine.low %v4820_v0, %v4852_v33  ;;  %vm8330_vm13 = vcmask 949248   ;;  %v7035_v20 = vcombine.low %v6996_v2, %v7028_v8 }
 0x695   : > { %v8331_v52 = vsel %vm8330_vm13, %v8326_v63, %v14601_v48  ;;  %v8328_v48 = vsel %vm8325_vm10, %v8323_v38, %v14589_v10  ;;  %v7036_v61 = vcombine.high %v6996_v2, %v7028_v8 }
 0x696   : > { %7975 = vrot.lane.b32.xlu1 %v7032_v45, %s8834_s27  ;;  %v14633_v29 = vpop.permute.xlu0 %7973  ;;  %v8333_v23 = vsel %vm8330_vm13, %v8328_v48, %v14616_v39 }
 0x697   : > { %v7752_v30 = vpop.permute.xlu1 %7751 }
 0x698   : > { %v8269_v6 = vsel %vm16101_vm15, %v8264_v51, %v7752_v30  ;;  %vm8335_vm15 = vcmask 965632   ;;  %v4860_v51 = vcombine.high %v4820_v0, %v4852_v33 }
 0x699   : > { %v8336_v19 = vsel %vm8335_vm15, %v8331_v52, %v14626_v44  ;;  %v8338_v44 = vsel %vm8335_vm15, %v8333_v23, %v14633_v29 }
 0x69a   : > { %7987 = vrot.lane.b32.xlu1 %v4857_v35, %s8835_s24  ;;  %v7986_v14 = vpop.permute.xlu0 %7985 }
 0x69b   : > { %v7764_v12 = vpop.permute.xlu1 %7763 }
 0x69c   : > { %v8272_v31 = vsel %vm16102_vm0, %v8267_v58, %v7764_v12  ;;  %vm8340_vm0 = vcmask 982016  }
 0x69d   : > { %v8341_v18 = vsel %vm8340_vm0, %v8336_v19, %v7986_v14 }
 0x69e   : > { %7991 = vrot.lane.b32.xlu1 %v7033_v24, %s8835_s24  ;;  %v7990_v46 = vpop.permute.xlu0 %7989 }
 0x69f   : > { %v7768_v53 = vpop.permute.xlu1 %7767  ;;  %v8343_v49 = vsel %vm8340_vm0, %v8338_v44, %v7990_v46 }
 0x6a0   : > { %v8274_v40 = vsel %vm16103_vm5, %v8269_v6, %v7768_v53  ;;  %vm8345_vm5 = vcmask 998400  }
 0x6a2   : > { %8003 = vrot.lane.b32.xlu1 %v4858_v22, %s8836_s28  ;;  %v8002_v36 = vpop.permute.xlu0 %8001 }
 0x6a3   : > { %v7780_v57 = vpop.permute.xlu1 %7779  ;;  %v8346_v28 = vsel %vm8345_vm5, %v8341_v18, %v8002_v36 }
 0x6a4   : > { %v8277_v34 = vsel %vm16104_vm6, %v8272_v31, %v7780_v57  ;;  %vm8350_vm6 = vcmask 1014784  }
 0x6a6   : > { %8007 = vrot.lane.b32.xlu1 %v7034_v7, %s8836_s28  ;;  %v8006_v11 = vpop.permute.xlu0 %8005 }
 0x6a7   : > { %v7784_v37 = vpop.permute.xlu1 %7783  ;;  %v8348_v39 = vsel %vm8345_vm5, %v8343_v49, %v8006_v11 }
 0x6a8   : > { %v8279_v25 = vsel %vm16105_vm3, %v8274_v40, %v7784_v37  ;;  %vm8355_vm3 = vcmask 1031168  }
 0x6aa   : > { %8019 = vrot.lane.b32.xlu1 %v4859_v50, %s8837_s29  ;;  %v8018_v3 = vpop.permute.xlu0 %8017 }
 0x6ab   : > { %v7796_v59 = vpop.permute.xlu1 %7795  ;;  %v8351_v54 = vsel %vm8350_vm6, %v8346_v28, %v8018_v3 }
 0x6ac   : > { %v8282_v47 = vsel %vm8280_vm12, %v8277_v34, %v7796_v59 }
 0x6ae   : > { %8023 = vrot.lane.b32.xlu1 %v7035_v20, %s8837_s29  ;;  %v8022_v42 = vpop.permute.xlu0 %8021 }
 0x6af   : > { %v7800_v62 = vpop.permute.xlu1 %7799  ;;  %v8353_v45 = vsel %vm8350_vm6, %v8348_v39, %v8022_v42 }
 0x6b0   : > { %v8284_v15 = vsel %vm8280_vm12, %v8279_v25, %v7800_v62 }
 0x6b2   : > { %8035 = vrot.lane.b32.xlu1 %v4860_v51, %s8838_s30  ;;  %v8034_v4 = vpop.permute.xlu0 %8033 }
 0x6b3   : > { %v8356_v5 = vsel %vm8355_vm3, %v8351_v54, %v8034_v4  ;;  %v7812_v10 = vpop.permute.xlu1 %7811 }
 0x6b4   : > { %8360 = vst [vmem:[%s14687_s5] sm:$0xff] %v8356_v5  ;;  %v8287_v56 = vsel %vm8285_vm14, %v8282_v47, %v7812_v10 }
 0x6b6   : > { %8039 = vrot.lane.b32.xlu1 %v7036_v61, %s8838_s30  ;;  %v8038_v58 = vpop.permute.xlu0 %8037 }
 0x6b7   : > { %v8358_v43 = vsel %vm8355_vm3, %v8353_v45, %v8038_v58  ;;  %v7816_v1 = vpop.permute.xlu1 %7815 }
 0x6b8   : > { %8362 = vst [vmem:[%s14687_s5 + $0x10] sm:$0xff] %v8358_v43  ;;  %v8289_v29 = vsel %vm8285_vm14, %v8284_v15, %v7816_v1 }
 0x6bb   : > { %v7828_v9 = vpop.permute.xlu1 %7827  ;;  %v8412_v61 = vld [vmem:[%s14687_s5] sm:$0xff] (%p16106_p7) }
 0x6bc   : > { %v8292_v30 = vsel %vm8290_vm1, %v8287_v56, %v7828_v9  ;;  %8413 = vst [vmem:[%s8378_s2] sm:$0xff] (%p16106_p7), %v8412_v61 }
 0x6bf   : > { %v7832_v35 = vpop.permute.xlu1 %7831  ;;  %v8416_v56 = vld [vmem:[%s14687_s5 + $0x10] sm:$0xff] (%p16106_p7) }
 0x6c0   : > { %v8294_v6 = vsel %vm8290_vm1, %v8289_v29, %v7832_v35  ;;  %8417 = vst [vmem:[%s8378_s2 + $0x20] sm:$0xff] (%p16106_p7), %v8416_v56 }
 0x6c3   : > { %v7844_v32 = vpop.permute.xlu1 %7843 }
 0x6c4   : > { %v8297_v14 = vsel %vm8295_vm9, %v8292_v30, %v7844_v32 }
 0x6c7   : > { %v7848_v12 = vpop.permute.xlu1 %7847 }
 0x6c8   : > { %v8299_v24 = vsel %vm8295_vm9, %v8294_v6, %v7848_v12 }
 0x6cb   : > { %v7860_v31 = vpop.permute.xlu1 %7859 }
 0x6cc   : > { %v8302_v46 = vsel %vm8300_vm4, %v8297_v14, %v7860_v31 }
 0x6cf   : > { %v7864_v60 = vpop.permute.xlu1 %7863 }
 0x6d0   : > { %v8304_v53 = vsel %vm8300_vm4, %v8299_v24, %v7864_v60 }
 0x6d3   : > { %v7876_v22 = vpop.permute.xlu1 %7875 }
 0x6d4   : > { %v8307_v40 = vsel %vm8305_vm2, %v8302_v46, %v7876_v22 }
 0x6d8   : > { %v7880_v16 = vpop.permute.xlu1 %7879 }
 0x6d9   : > { %v8309_v36 = vsel %vm8305_vm2, %v8304_v53, %v7880_v16 }
 0x6dc   : > { %v7892_v33 = vpop.permute.xlu1 %7891 }
 0x6dd   : > { %v8312_v55 = vsel %vm8310_vm7, %v8307_v40, %v7892_v33 }
 0x6e0   : > { %v7896_v21 = vpop.permute.xlu1 %7895 }
 0x6e1   : > { %v8314_v27 = vsel %vm8310_vm7, %v8309_v36, %v7896_v21 }
 0x6e4   : > { %v7908_v57 = vpop.permute.xlu1 %7907 }
 0x6e5   : > { %v8317_v20 = vsel %vm8315_vm8, %v8312_v55, %v7908_v57 }
 0x6e8   : > { %v7912_v7 = vpop.permute.xlu1 %7911 }
 0x6e9   : > { %v8319_v41 = vsel %vm8315_vm8, %v8314_v27, %v7912_v7 }
 0x6ec   : > { %v7924_v34 = vpop.permute.xlu1 %7923 }
 0x6ed   : > { %v8322_v63 = vsel %vm8320_vm11, %v8317_v20, %v7924_v34 }
 0x6f0   : > { %v7928_v0 = vpop.permute.xlu1 %7927 }
 0x6f1   : > { %v8324_v38 = vsel %vm8320_vm11, %v8319_v41, %v7928_v0 }
 0x6f4   : > { %v7940_v17 = vpop.permute.xlu1 %7939 }
 0x6f5   : > { %v8327_v47 = vsel %vm8325_vm10, %v8322_v63, %v7940_v17 }
 0x6f8   : > { %v7944_v11 = vpop.permute.xlu1 %7943 }
 0x6f9   : > { %v8329_v62 = vsel %vm8325_vm10, %v8324_v38, %v7944_v11 }
 0x6fc   : > { %v7956_v8 = vpop.permute.xlu1 %7955 }
 0x6fd   : > { %v8332_v52 = vsel %vm8330_vm13, %v8327_v47, %v7956_v8 }
 0x700   : > { %v7960_v37 = vpop.permute.xlu1 %7959 }
 0x701   : > { %v8334_v48 = vsel %vm8330_vm13, %v8329_v62, %v7960_v37 }
 0x704   : > { %v7972_v50 = vpop.permute.xlu1 %7971 }
 0x705   : > { %v8337_v19 = vsel %vm8335_vm15, %v8332_v52, %v7972_v50 }
 0x708   : > { %v7976_v25 = vpop.permute.xlu1 %7975 }
 0x709   : > { %v8339_v23 = vsel %vm8335_vm15, %v8334_v48, %v7976_v25 }
 0x70c   : > { %v7988_v2 = vpop.permute.xlu1 %7987 }
 0x70d   : > { %v8342_v18 = vsel %vm8340_vm0, %v8337_v19, %v7988_v2 }
 0x710   : > { %v7992_v13 = vpop.permute.xlu1 %7991 }
 0x711   : > { %v8344_v4 = vsel %vm8340_vm0, %v8339_v23, %v7992_v13 }
 0x714   : > { %v8004_v3 = vpop.permute.xlu1 %8003 }
 0x715   : > { %v8347_v51 = vsel %vm8345_vm5, %v8342_v18, %v8004_v3 }
 0x718   : > { %v8008_v26 = vpop.permute.xlu1 %8007 }
 0x719   : > { %v8349_v44 = vsel %vm8345_vm5, %v8344_v4, %v8008_v26 }
 0x71c   : > { %v8020_v59 = vpop.permute.xlu1 %8019 }
 0x71d   : > { %v8352_v28 = vsel %vm8350_vm6, %v8347_v51, %v8020_v59 }
 0x720   : > { %v8024_v42 = vpop.permute.xlu1 %8023 }
 0x721   : > { %v8354_v5 = vsel %vm8350_vm6, %v8349_v44, %v8024_v42 }
 0x724   : > { %v8036_v15 = vpop.permute.xlu1 %8035  ;;  %8370 = sbr.rel (!%p16106_p7) target bundleno = 1843 (0x733), region = 32 }
 0x725   : > { %v8357_v54 = vsel %vm8355_vm3, %v8352_v28, %v8036_v15 }
 0x726   : > { %8361 = vst [vmem:[%s14687_s5 + $0x8] sm:$0xff] %v8357_v54 }
 0x728   : > { %v8040_v49 = vpop.permute.xlu1 %8039 }
 0x729   : > { %v8359_v10 = vsel %vm8355_vm3, %v8354_v5, %v8040_v49 }
 0x72a   : > { %8363 = vst [vmem:[%s14687_s5 + $0x18] sm:$0xff] %v8359_v10 }
 0x72d   : > { %v8414_v39 = vld [vmem:[%s14687_s5 + $0x8] sm:$0xff] }
 0x72e   : > { %8415 = vst [vmem:[%s8378_s2 + $0x10] sm:$0xff] %v8414_v39 }
 0x731   : > { %v8418_v45 = vld [vmem:[%s14687_s5 + $0x18] sm:$0xff] }
 0x732   : > { %8419 = vst [vmem:[%s8378_s2 + $0x30] sm:$0xff] %v8418_v45 }
 0x733 PF: > { %s14_s13 = sadd.s32 1, %s8769_s13   ;;  %s16107_s6 = smov %s8745_s7 }
 0x734   : > { %p11_p9 = scmp.ge.s32.totalorder %s14_s13, 6   ;;  %s16108_s7 = smov %s8749_s8 }
 0x735   : > { %s16109_s8 = smov %s8926_s26  ;;  %s16110_s9 = smov %s8761_s11 }
 0x736   : > { %s16111_s10 = smov %s8765_s12  ;;  %s16112_s11 = smov %s16115_s15 }
 0x737   : > { %s16113_s12 = smov %s16119_s16  ;;  %13 = sbr.rel (!%p11_p9) target bundleno = 5 (0x5), region = 103 }
 0x73e   :  { %8435 = vsyncpa [#allocation3], 1 }
 0x73f   :  { %8437 = vsyncpa [#allocation3 + $0x1], 1 }

</bundles_post_ra>
